<compile_context>
chip_gen: v7x
topology: tpu7x:2x2x1
jax: 0.10.0
libtpu: 0.0.40
codegen_flags: <defaults>
</compile_context>

<pallas_src>
import math
import numpy as np
import jax
import jax.numpy as jnp
from jax.experimental import pallas as pl
from jax.experimental.pallas import tpu as pltpu

# ReLUKAN hyper-parameters (PyTorch module defaults).
GRID_SIZE = 5
KAN_K = 3
R_CONST = 4.0 * GRID_SIZE * GRID_SIZE / ((KAN_K + 1) ** 2)   # 6.25
N_BASIS = GRID_SIZE + KAN_K                                   # 8

# Conv-stack geometry (flattened padded spatial layouts).
NB = 8        # images per conv-stack grid step
_WP1 = 32     # row stride of the padded 30x32 conv1 input image
_NIN = 1024   # flattened conv1 input length (30*32 padded to 1024)
_NV1 = 896    # conv1 output positions computed per image (28 rows * 32 stride)
_NM1 = 860    # pool1 lazy positions computed per image
_WP2 = 16     # row stride of the padded 16x16 conv2 input map
_NV2 = 222    # conv2 output positions computed per image
_NM2 = 205    # pool2 lazy positions computed per image
_NW2 = (NB - 1) * 256 + _NV2   # conv2 width in the wide (batch-on-lanes) layout
_NP2 = (NB - 1) * 256 + _NM2   # pool2 width in the wide layout


# --------------------------- Pallas kernels ---------------------------

def conv_stack_kernel(x_ref, w1e_ref, b1e_ref, s1_ref, w2k_ref, b2_ref, s2_ref,
                      o_ref):
    """Fused conv1+ReLU+pool1+conv2+ReLU+pool2 for NB images, all in VMEM.

    x_ref  : (NB, 1024) f32 zero-padded flat images (30x32 row-major, original
             pixel (i,j) at 32*(i+1)+(j+1)), padded to 1024 lanes.
    w1e_ref: (NB*16, 9*NB) bf16 block-expanded conv1 weight
             (w1e[b*16+c, t*NB+b] = w1[c, tap t]).
    b1e_ref: (NB*16, 1) f32 conv1 bias tiled per image.
    s1_ref : (860, 256) bf16 0/1 pool1 compaction + zero re-pad to 16x16.
    w2k_ref: (32, 144) bf16 conv2 im2col weight (col = tap*16 + cin).
    b2_ref : (32, 1)  f32.
    s2_ref : (205, 64) bf16 0/1 pool2 compaction to a 64-lane-padded 7x7 grid.
    o_ref  : (NB, 32, 64) bf16 features; per-image row-major flatten is the
             fc1 feature order (channel-major, 64 lanes per channel).
    """
    x = x_ref[...]                                            # (NB, 1024) f32

    # conv1: nine tap-shifted slices stacked on sublanes, one MXU matmul with
    # the block-expanded weight (bf16 operands, f32 accumulation).
    x1 = jnp.concatenate(
        [x[:, kh * _WP1 + kw: kh * _WP1 + kw + _NV1]
         for kh in range(3) for kw in range(3)], axis=0)       # (9*NB, 896)
    h1 = jnp.dot(w1e_ref[...], x1.astype(jnp.bfloat16),
                 preferred_element_type=jnp.float32) + b1e_ref[...]
    h1 = jnp.maximum(h1, 0.0)                                  # (NB*16, 896)

    # pool1: lazy 2x2 max, then compact + zero re-pad via the selection matmul.
    m1 = jnp.maximum(
        jnp.maximum(h1[:, 0:_NM1], h1[:, 1:1 + _NM1]),
        jnp.maximum(h1[:, _WP1:_WP1 + _NM1], h1[:, _WP1 + 1:_WP1 + 1 + _NM1]))
    p1 = jnp.dot(m1.astype(jnp.bfloat16), s1_ref[...],
                 preferred_element_type=jnp.float32)           # (NB*16, 256)
    p1 = p1.astype(jnp.bfloat16)

    # Move the batch from sublanes to 256-lane-per-image segments (tile-aligned
    # vreg moves only), so conv2 can use one batch-shared weight.
    p1w = jnp.concatenate([p1[b * 16:(b + 1) * 16, :] for b in range(NB)],
                          axis=1)                              # (16, NB*256)

    # conv2: im2col K = 9*16 = 144, one shared-weight MXU matmul for all images.
    x2 = jnp.concatenate(
        [p1w[:, kh * _WP2 + kw: kh * _WP2 + kw + _NW2]
         for kh in range(3) for kw in range(3)], axis=0)       # (144, _NW2)
    h2 = jnp.dot(w2k_ref[...], x2,
                 preferred_element_type=jnp.float32) + b2_ref[...]
    h2 = jnp.maximum(h2, 0.0)                                  # (32, _NW2)

    # pool2: lazy 2x2 max, move batch back to sublanes (aligned vreg moves),
    # then the final compaction matmul to 64-lane-padded channel blocks.
    m2 = jnp.maximum(
        jnp.maximum(h2[:, 0:_NP2], h2[:, 1:1 + _NP2]),
        jnp.maximum(h2[:, _WP2:_WP2 + _NP2], h2[:, _WP2 + 1:_WP2 + 1 + _NP2]))
    m2 = m2.astype(jnp.bfloat16)                               # (32, _NP2)
    m2r = jnp.concatenate([m2[:, b * 256: b * 256 + _NM2] for b in range(NB)],
                          axis=0)                              # (NB*32, 205)
    feats = jnp.dot(m2r, s2_ref[...],
                    preferred_element_type=jnp.float32)        # (NB*32, 64)
    feats = feats.astype(jnp.bfloat16)
    for b in range(NB):
        o_ref[b] = feats[b * 32:(b + 1) * 32, :]


def head_kernel(x_ref, w1_ref, b1_ref, plo_ref, phi_ref, wk_ref, bk_ref, o_ref):
    """Fused fc1 + ReLUKAN([128, 10], g=5, k=3) + log_softmax.

    x_ref : (BB, 2048) bf16 features (64-lane padded per channel).
    w1_ref: (2048, 128) bf16 (zero rows for the padding), b1_ref: (1, 128) f32.
    plo_ref/phi_ref: (8, 1, 128) f32 phase_low / phase_high.
    wk_ref: (1024, 10) bf16 effective KAN weight with R_CONST^2 folded in.
    bk_ref: (1, 10) f32.
    o_ref : (BB, 10) f32 log-probabilities.
    """
    # fc1: bf16 operands on the MXU, f32 accumulation.
    h = jnp.dot(x_ref[...], w1_ref[...],
                preferred_element_type=jnp.float32) + b1_ref[...]   # (BB, 128)

    # ReLUKAN basis in f32 on the VPU (R^2 folded into wk); one K=1024 matmul.
    parts = []
    for j in range(N_BASIS):
        t = jnp.maximum(h - plo_ref[j], 0.0) * jnp.maximum(phi_ref[j] - h, 0.0)
        parts.append((t * t).astype(jnp.bfloat16))
    basis = jnp.concatenate(parts, axis=1)                           # (BB, 1024)

    logits = jnp.dot(basis, wk_ref[...],
                     preferred_element_type=jnp.float32) + bk_ref[...]

    # log_softmax along dim 1 (stable).
    m = jnp.max(logits, axis=-1, keepdims=True)
    s = logits - m
    lse = jnp.log(jnp.sum(jnp.exp(s), axis=-1, keepdims=True))
    o_ref[...] = (s - lse).astype(o_ref.dtype)


# --------------------------- wrappers ---------------------------

def _conv_stack(x_flat, kp):
    Bp = x_flat.shape[0]
    return pl.pallas_call(
        conv_stack_kernel,
        out_shape=jax.ShapeDtypeStruct((Bp, 32, 64), jnp.bfloat16),
        grid=(Bp // NB,),
        in_specs=[
            pl.BlockSpec((NB, _NIN), lambda i: (i, 0)),
            pl.BlockSpec((NB * 16, 9 * NB), lambda i: (0, 0)),
            pl.BlockSpec((NB * 16, 1), lambda i: (0, 0)),
            pl.BlockSpec((_NM1, 256), lambda i: (0, 0)),
            pl.BlockSpec((32, 144), lambda i: (0, 0)),
            pl.BlockSpec((32, 1), lambda i: (0, 0)),
            pl.BlockSpec((_NM2, 64), lambda i: (0, 0)),
        ],
        out_specs=pl.BlockSpec((NB, 32, 64), lambda i: (i, 0, 0)),
        compiler_params=pltpu.CompilerParams(
            dimension_semantics=("parallel",)),
    )(x_flat, kp["W1e"], kp["b1e"], kp["S1"], kp["W2k"], kp["b2"], kp["S2"])


def _head(feats, kp):
    Bp = feats.shape[0]
    bb = next(b for b in (256, 128, 64, 32, 16, 8) if Bp % b == 0)
    return pl.pallas_call(
        head_kernel,
        out_shape=jax.ShapeDtypeStruct((Bp, 10), jnp.float32),
        grid=(Bp // bb,),
        in_specs=[
            pl.BlockSpec((bb, 2048), lambda i: (i, 0)),
            pl.BlockSpec((2048, 128), lambda i: (0, 0)),
            pl.BlockSpec((1, 128), lambda i: (0, 0)),
            pl.BlockSpec((N_BASIS, 1, 128), lambda i: (0, 0, 0)),
            pl.BlockSpec((N_BASIS, 1, 128), lambda i: (0, 0, 0)),
            pl.BlockSpec((N_BASIS * 128, 10), lambda i: (0, 0)),
            pl.BlockSpec((1, 10), lambda i: (0, 0)),
        ],
        out_specs=pl.BlockSpec((bb, 10), lambda i: (i, 0)),
        compiler_params=pltpu.CompilerParams(
            dimension_semantics=("parallel",)),
    )(feats, kp["w_fc1"], kp["b_fc1"], kp["phase_low"], kp["phase_high"],
      kp["w_kan"], kp["b_kan"])


def cnn_relukan_forward(x_nchw, kp):
    B = x_nchw.shape[0]
    Bp = ((B + NB - 1) // NB) * NB                           # multiple of NB
    x = x_nchw[:, 0, :, :]                                   # (B, 28, 28)
    x = jnp.pad(x, ((0, Bp - B), (1, 1), (1, 3)))            # (Bp, 30, 32), zeros
    x = jnp.pad(x.reshape(Bp, 30 * 32), ((0, 0), (0, _NIN - 30 * 32)))
    feats = _conv_stack(x, kp)                               # (Bp, 32, 64) bf16
    feats = feats.reshape(Bp, 32 * 64)                       # free reshape
    logp = _head(feats, kp)                                  # (Bp, 10)
    return logp[:B]


# --------------------------- parameters ---------------------------

def init_params(key):
    """Synthetic parameters in PyTorch layouts (what state_dict() would hold)."""
    ks = jax.random.split(key, 8)

    def uinit(k, shape, fan_in):
        bound = 1.0 / math.sqrt(fan_in)
        return jax.random.uniform(k, shape, jnp.float32, -bound, bound)

    base_low = jnp.arange(-KAN_K, GRID_SIZE, dtype=jnp.float32) / GRID_SIZE
    base_high = base_low + (KAN_K + 1) / GRID_SIZE
    return dict(
        w_conv1=uinit(ks[0], (16, 1, 3, 3), 1 * 9),
        b_conv1=uinit(ks[1], (16,), 1 * 9),
        w_conv2=uinit(ks[2], (32, 16, 3, 3), 16 * 9),
        b_conv2=uinit(ks[3], (32,), 16 * 9),
        w_fc1=uinit(ks[4], (128, 32 * 7 * 7), 32 * 7 * 7),   # torch Linear (out, in)
        b_fc1=uinit(ks[5], (128,), 32 * 7 * 7),
        # ReLUKAN([128,10]) equal_size_conv = Conv2d(1, 10, (g+k, 128)).
        w_kan=uinit(ks[6], (10, 1, N_BASIS, 128), N_BASIS * 128),
        b_kan=uinit(ks[7], (10,), N_BASIS * 128),
        phase_low=jnp.tile(base_low[:, None], (1, 128)),      # (8, 128)
        phase_high=jnp.tile(base_high[:, None], (1, 128)),
    )


def _pool_selectors():
    """Constant 0/1 matrices turning lazy pooled maps into compact (re-)padded maps."""
    s1 = np.zeros((_NM1, 256), np.float32)
    for hp in range(14):
        for wp in range(14):
            s1[2 * hp * _WP1 + 2 * wp, _WP2 * (hp + 1) + (wp + 1)] = 1.0
    s2 = np.zeros((_NM2, 64), np.float32)
    for hp in range(7):
        for wp in range(7):
            s2[2 * hp * _WP2 + 2 * wp, 7 * hp + wp] = 1.0
    return jnp.asarray(s1), jnp.asarray(s2)


def prepare_params(p):
    """One-time repack of torch-layout params into kernel layouts (call outside jit)."""
    s1, s2 = _pool_selectors()

    # conv1: block-expanded weight so one matmul handles NB images per step.
    w1_tap = p["w_conv1"].reshape(16, 9)                     # [cout, tap]
    eye_b = jnp.eye(NB, dtype=jnp.float32)
    w1e = jnp.einsum("ct,bd->bctd", w1_tap, eye_b).reshape(NB * 16, 9 * NB)
    b1e = jnp.tile(p["b_conv1"], NB).reshape(NB * 16, 1)

    # conv2: im2col weight (col index = tap*16 + cin), shared across images.
    w2k = jnp.transpose(p["w_conv2"], (0, 2, 3, 1)).reshape(32, 144)

    # fc1: rows reordered to the kernel feature order (channel-major, 64 lanes
    # per channel with exactly-zero rows for the 49->64 padding).
    wt = jnp.transpose(p["w_fc1"]).reshape(32, 49, 128)      # [cout, 7x7, j]
    wt = jnp.pad(wt, ((0, 0), (0, 64 - 49), (0, 0)))

    # KAN projection with R_CONST^2 folded in (row = basis*128 + feature).
    wk = jnp.transpose(p["w_kan"][:, 0], (1, 2, 0)).reshape(N_BASIS * 128, 10)
    wk = wk * (R_CONST * R_CONST)

    return dict(
        W1e=w1e.astype(jnp.bfloat16),
        b1e=b1e,
        S1=s1.astype(jnp.bfloat16),
        W2k=w2k.astype(jnp.bfloat16),
        b2=p["b_conv2"].reshape(32, 1),
        S2=s2.astype(jnp.bfloat16),
        w_fc1=wt.reshape(32 * 64, 128).astype(jnp.bfloat16),
        b_fc1=p["b_fc1"].reshape(1, 128),
        phase_low=p["phase_low"].reshape(N_BASIS, 1, 128),
        phase_high=p["phase_high"].reshape(N_BASIS, 1, 128),
        w_kan=wk.astype(jnp.bfloat16),
        b_kan=p["b_kan"].reshape(1, 10),
    )


# --------------------------- plain-XLA reference (self-check) ---------------------------

def _reference_forward(x_nchw, p):
    dn = ("NCHW", "OIHW", "NCHW")
    y = jax.lax.conv_general_dilated(x_nchw, p["w_conv1"], (1, 1),
                                     [(1, 1), (1, 1)], dimension_numbers=dn)
    y = jnp.maximum(y + p["b_conv1"][None, :, None, None], 0.0)
    y = jax.lax.reduce_window(y, -jnp.inf, jax.lax.max,
                              (1, 1, 2, 2), (1, 1, 2, 2), "VALID")
    y = jax.lax.conv_general_dilated(y, p["w_conv2"], (1, 1),
                                     [(1, 1), (1, 1)], dimension_numbers=dn)
    y = jnp.maximum(y + p["b_conv2"][None, :, None, None], 0.0)
    y = jax.lax.reduce_window(y, -jnp.inf, jax.lax.max,
                              (1, 1, 2, 2), (1, 1, 2, 2), "VALID")
    h = y.reshape(y.shape[0], -1) @ p["w_fc1"].T + p["b_fc1"]
    t = (jnp.maximum(h[:, None, :] - p["phase_low"][None], 0.0)
         * jnp.maximum(p["phase_high"][None] - h[:, None, :], 0.0) * R_CONST) ** 2
    logits = jnp.einsum("bji,cji->bc", t, p["w_kan"][:, 0]) + p["b_kan"]
    return jax.nn.log_softmax(logits, axis=1)


if __name__ == "__main__":
    key = jax.random.PRNGKey(0)
    pkey, xkey = jax.random.split(key)
    params = init_params(pkey)
    kparams = prepare_params(params)

    # fc1 expects 32*7*7 features -> 28x28 single-channel input, batch=2.
    x = jax.random.normal(xkey, (2, 1, 28, 28), dtype=jnp.float32)

    fwd = jax.jit(cnn_relukan_forward)
    out = jax.block_until_ready(fwd(x, kparams))

    assert out.shape == (2, 10)
    assert bool(jnp.all(jnp.isfinite(out)))
    # log_softmax rows must normalise.
    assert bool(jnp.allclose(jnp.sum(jnp.exp(out), axis=1), 1.0, atol=1e-3))
    # Cross-check against a plain-XLA f32 reference (tolerance covers the bf16
    # operands used on every MXU matmul; f32 accumulation throughout).
    ref = _reference_forward(x, params)
    err = float(jnp.max(jnp.abs(out - ref)))
    assert err < 0.15, err
    print("KERNEL_OK")
</pallas_src>

<mosaic_0001>
module attributes {stable_mosaic.version = 11 : i64} {
  func.func @conv_stack_kernel(%arg0: i32, %arg1: memref<8x1024xf32, #tpu.memory_space<vmem>>, %arg2: memref<128x72xbf16, #tpu.memory_space<vmem>>, %arg3: memref<128x1xf32, #tpu.memory_space<vmem>>, %arg4: memref<860x256xbf16, #tpu.memory_space<vmem>>, %arg5: memref<32x144xbf16, #tpu.memory_space<vmem>>, %arg6: memref<32x1xf32, #tpu.memory_space<vmem>>, %arg7: memref<205x64xbf16, #tpu.memory_space<vmem>>, %arg8: memref<8x32x64xbf16, #tpu.memory_space<vmem>>) attributes {dimension_semantics = [#tpu.dimension_semantics<parallel>], iteration_bounds = array<i64: 1>, scalar_prefetch = 0 : i64, scratch_operands = 0 : i64, tpu.core_type = #tpu.core_type<tc>, window_params = [{transform_indices = @transform_0, window_bounds = array<i64: 8, 1024>}, {pipeline_mode = #tpu.pipeline_mode<synchronous>, transform_indices = @transform_1, window_bounds = array<i64: 128, 72>}, {pipeline_mode = #tpu.pipeline_mode<synchronous>, transform_indices = @transform_2, window_bounds = array<i64: 128, 1>}, {pipeline_mode = #tpu.pipeline_mode<synchronous>, transform_indices = @transform_3, window_bounds = array<i64: 860, 256>}, {pipeline_mode = #tpu.pipeline_mode<synchronous>, transform_indices = @transform_4, window_bounds = array<i64: 32, 144>}, {pipeline_mode = #tpu.pipeline_mode<synchronous>, transform_indices = @transform_5, window_bounds = array<i64: 32, 1>}, {pipeline_mode = #tpu.pipeline_mode<synchronous>, transform_indices = @transform_6, window_bounds = array<i64: 205, 64>}, {transform_indices = @transform_7, window_bounds = array<i64: 8, 32, 64>}]} {
    %c0 = arith.constant 0 : index
    %c0_0 = arith.constant 0 : index
    %0 = vector.load %arg1[%c0, %c0_0] : memref<8x1024xf32, #tpu.memory_space<vmem>>, vector<8x1024xf32>
    %1 = vector.extract_strided_slice %0 {offsets = [0, 0], sizes = [8, 896], strides = [1, 1]} : vector<8x1024xf32> to vector<8x896xf32>
    %2 = vector.extract_strided_slice %0 {offsets = [0, 1], sizes = [8, 896], strides = [1, 1]} : vector<8x1024xf32> to vector<8x896xf32>
    %3 = vector.extract_strided_slice %0 {offsets = [0, 2], sizes = [8, 896], strides = [1, 1]} : vector<8x1024xf32> to vector<8x896xf32>
    %4 = vector.extract_strided_slice %0 {offsets = [0, 32], sizes = [8, 896], strides = [1, 1]} : vector<8x1024xf32> to vector<8x896xf32>
    %5 = vector.extract_strided_slice %0 {offsets = [0, 33], sizes = [8, 896], strides = [1, 1]} : vector<8x1024xf32> to vector<8x896xf32>
    %6 = vector.extract_strided_slice %0 {offsets = [0, 34], sizes = [8, 896], strides = [1, 1]} : vector<8x1024xf32> to vector<8x896xf32>
    %7 = vector.extract_strided_slice %0 {offsets = [0, 64], sizes = [8, 896], strides = [1, 1]} : vector<8x1024xf32> to vector<8x896xf32>
    %8 = vector.extract_strided_slice %0 {offsets = [0, 65], sizes = [8, 896], strides = [1, 1]} : vector<8x1024xf32> to vector<8x896xf32>
    %9 = vector.extract_strided_slice %0 {offsets = [0, 66], sizes = [8, 896], strides = [1, 1]} : vector<8x1024xf32> to vector<8x896xf32>
    %10 = tpu.concatenate %1, %2, %3, %4, %5, %6, %7, %8, %9 in 0 : vector<8x896xf32>, vector<8x896xf32>, vector<8x896xf32>, vector<8x896xf32>, vector<8x896xf32>, vector<8x896xf32>, vector<8x896xf32>, vector<8x896xf32>, vector<8x896xf32> -> vector<72x896xf32>
    %c0_1 = arith.constant 0 : index
    %c0_2 = arith.constant 0 : index
    %11 = vector.load %arg2[%c0_1, %c0_2] : memref<128x72xbf16, #tpu.memory_space<vmem>>, vector<128x72xbf16>
    %12 = arith.truncf %10 : vector<72x896xf32> to vector<72x896xbf16>
    %cst = arith.constant dense<0.000000e+00> : vector<128x896xf32>
    %13 = tpu.matmul %11, %12, %cst {dimension_numbers = #tpu.dot_dimension_numbers<[1], [0], [0], [1], [0, 0, 1, 1], [], []>} : vector<128x72xbf16>, vector<72x896xbf16>, vector<128x896xf32> -> vector<128x896xf32>
    %c0_3 = arith.constant 0 : index
    %c0_4 = arith.constant 0 : index
    %14 = vector.load %arg3[%c0_3, %c0_4] : memref<128x1xf32, #tpu.memory_space<vmem>>, vector<128x1xf32>
    %15 = vector.broadcast %14 : vector<128x1xf32> to vector<128x896xf32>
    %16 = arith.addf %13, %15 : vector<128x896xf32>
    %cst_5 = arith.constant 0.000000e+00 : f32
    %17 = vector.broadcast %cst_5 : f32 to vector<128x896xf32>
    %18 = arith.maximumf %16, %17 : vector<128x896xf32>
    %19 = vector.extract_strided_slice %18 {offsets = [0, 0], sizes = [128, 860], strides = [1, 1]} : vector<128x896xf32> to vector<128x860xf32>
    %20 = vector.extract_strided_slice %18 {offsets = [0, 1], sizes = [128, 860], strides = [1, 1]} : vector<128x896xf32> to vector<128x860xf32>
    %21 = arith.maximumf %19, %20 : vector<128x860xf32>
    %22 = vector.extract_strided_slice %18 {offsets = [0, 32], sizes = [128, 860], strides = [1, 1]} : vector<128x896xf32> to vector<128x860xf32>
    %23 = vector.extract_strided_slice %18 {offsets = [0, 33], sizes = [128, 860], strides = [1, 1]} : vector<128x896xf32> to vector<128x860xf32>
    %24 = arith.maximumf %22, %23 : vector<128x860xf32>
    %25 = arith.maximumf %21, %24 : vector<128x860xf32>
    %26 = arith.truncf %25 : vector<128x860xf32> to vector<128x860xbf16>
    %c0_6 = arith.constant 0 : index
    %c0_7 = arith.constant 0 : index
    %27 = vector.load %arg4[%c0_6, %c0_7] : memref<860x256xbf16, #tpu.memory_space<vmem>>, vector<860x256xbf16>
    %cst_8 = arith.constant dense<0.000000e+00> : vector<128x256xf32>
    %28 = tpu.matmul %26, %27, %cst_8 {dimension_numbers = #tpu.dot_dimension_numbers<[1], [0], [0], [1], [0, 0, 1, 1], [], []>} : vector<128x860xbf16>, vector<860x256xbf16>, vector<128x256xf32> -> vector<128x256xf32>
    %29 = arith.truncf %28 : vector<128x256xf32> to vector<128x256xbf16>
    %30 = vector.extract_strided_slice %29 {offsets = [0, 0], sizes = [16, 256], strides = [1, 1]} : vector<128x256xbf16> to vector<16x256xbf16>
    %31 = vector.extract_strided_slice %29 {offsets = [16, 0], sizes = [16, 256], strides = [1, 1]} : vector<128x256xbf16> to vector<16x256xbf16>
    %32 = vector.extract_strided_slice %29 {offsets = [32, 0], sizes = [16, 256], strides = [1, 1]} : vector<128x256xbf16> to vector<16x256xbf16>
    %33 = vector.extract_strided_slice %29 {offsets = [48, 0], sizes = [16, 256], strides = [1, 1]} : vector<128x256xbf16> to vector<16x256xbf16>
    %34 = vector.extract_strided_slice %29 {offsets = [64, 0], sizes = [16, 256], strides = [1, 1]} : vector<128x256xbf16> to vector<16x256xbf16>
    %35 = vector.extract_strided_slice %29 {offsets = [80, 0], sizes = [16, 256], strides = [1, 1]} : vector<128x256xbf16> to vector<16x256xbf16>
    %36 = vector.extract_strided_slice %29 {offsets = [96, 0], sizes = [16, 256], strides = [1, 1]} : vector<128x256xbf16> to vector<16x256xbf16>
    %37 = vector.extract_strided_slice %29 {offsets = [112, 0], sizes = [16, 256], strides = [1, 1]} : vector<128x256xbf16> to vector<16x256xbf16>
    %38 = tpu.concatenate %30, %31, %32, %33, %34, %35, %36, %37 in 1 : vector<16x256xbf16>, vector<16x256xbf16>, vector<16x256xbf16>, vector<16x256xbf16>, vector<16x256xbf16>, vector<16x256xbf16>, vector<16x256xbf16>, vector<16x256xbf16> -> vector<16x2048xbf16>
    %39 = vector.extract_strided_slice %38 {offsets = [0, 0], sizes = [16, 2014], strides = [1, 1]} : vector<16x2048xbf16> to vector<16x2014xbf16>
    %40 = vector.extract_strided_slice %38 {offsets = [0, 1], sizes = [16, 2014], strides = [1, 1]} : vector<16x2048xbf16> to vector<16x2014xbf16>
    %41 = vector.extract_strided_slice %38 {offsets = [0, 2], sizes = [16, 2014], strides = [1, 1]} : vector<16x2048xbf16> to vector<16x2014xbf16>
    %42 = vector.extract_strided_slice %38 {offsets = [0, 16], sizes = [16, 2014], strides = [1, 1]} : vector<16x2048xbf16> to vector<16x2014xbf16>
    %43 = vector.extract_strided_slice %38 {offsets = [0, 17], sizes = [16, 2014], strides = [1, 1]} : vector<16x2048xbf16> to vector<16x2014xbf16>
    %44 = vector.extract_strided_slice %38 {offsets = [0, 18], sizes = [16, 2014], strides = [1, 1]} : vector<16x2048xbf16> to vector<16x2014xbf16>
    %45 = vector.extract_strided_slice %38 {offsets = [0, 32], sizes = [16, 2014], strides = [1, 1]} : vector<16x2048xbf16> to vector<16x2014xbf16>
    %46 = vector.extract_strided_slice %38 {offsets = [0, 33], sizes = [16, 2014], strides = [1, 1]} : vector<16x2048xbf16> to vector<16x2014xbf16>
    %47 = vector.extract_strided_slice %38 {offsets = [0, 34], sizes = [16, 2014], strides = [1, 1]} : vector<16x2048xbf16> to vector<16x2014xbf16>
    %48 = tpu.concatenate %39, %40, %41, %42, %43, %44, %45, %46, %47 in 0 : vector<16x2014xbf16>, vector<16x2014xbf16>, vector<16x2014xbf16>, vector<16x2014xbf16>, vector<16x2014xbf16>, vector<16x2014xbf16>, vector<16x2014xbf16>, vector<16x2014xbf16>, vector<16x2014xbf16> -> vector<144x2014xbf16>
    %c0_9 = arith.constant 0 : index
    %c0_10 = arith.constant 0 : index
    %49 = vector.load %arg5[%c0_9, %c0_10] : memref<32x144xbf16, #tpu.memory_space<vmem>>, vector<32x144xbf16>
    %cst_11 = arith.constant dense<0.000000e+00> : vector<32x2014xf32>
    %50 = tpu.matmul %49, %48, %cst_11 {dimension_numbers = #tpu.dot_dimension_numbers<[1], [0], [0], [1], [0, 0, 1, 1], [], []>} : vector<32x144xbf16>, vector<144x2014xbf16>, vector<32x2014xf32> -> vector<32x2014xf32>
    %c0_12 = arith.constant 0 : index
    %c0_13 = arith.constant 0 : index
    %51 = vector.load %arg6[%c0_12, %c0_13] : memref<32x1xf32, #tpu.memory_space<vmem>>, vector<32x1xf32>
    %52 = vector.broadcast %51 : vector<32x1xf32> to vector<32x2014xf32>
    %53 = arith.addf %50, %52 : vector<32x2014xf32>
    %cst_14 = arith.constant 0.000000e+00 : f32
    %54 = vector.broadcast %cst_14 : f32 to vector<32x2014xf32>
    %55 = arith.maximumf %53, %54 : vector<32x2014xf32>
    %56 = vector.extract_strided_slice %55 {offsets = [0, 0], sizes = [32, 1997], strides = [1, 1]} : vector<32x2014xf32> to vector<32x1997xf32>
    %57 = vector.extract_strided_slice %55 {offsets = [0, 1], sizes = [32, 1997], strides = [1, 1]} : vector<32x2014xf32> to vector<32x1997xf32>
    %58 = arith.maximumf %56, %57 : vector<32x1997xf32>
    %59 = vector.extract_strided_slice %55 {offsets = [0, 16], sizes = [32, 1997], strides = [1, 1]} : vector<32x2014xf32> to vector<32x1997xf32>
    %60 = vector.extract_strided_slice %55 {offsets = [0, 17], sizes = [32, 1997], strides = [1, 1]} : vector<32x2014xf32> to vector<32x1997xf32>
    %61 = arith.maximumf %59, %60 : vector<32x1997xf32>
    %62 = arith.maximumf %58, %61 : vector<32x1997xf32>
    %63 = arith.truncf %62 : vector<32x1997xf32> to vector<32x1997xbf16>
    %64 = vector.extract_strided_slice %63 {offsets = [0, 0], sizes = [32, 205], strides = [1, 1]} : vector<32x1997xbf16> to vector<32x205xbf16>
    %65 = vector.extract_strided_slice %63 {offsets = [0, 256], sizes = [32, 205], strides = [1, 1]} : vector<32x1997xbf16> to vector<32x205xbf16>
    %66 = vector.extract_strided_slice %63 {offsets = [0, 512], sizes = [32, 205], strides = [1, 1]} : vector<32x1997xbf16> to vector<32x205xbf16>
    %67 = vector.extract_strided_slice %63 {offsets = [0, 768], sizes = [32, 205], strides = [1, 1]} : vector<32x1997xbf16> to vector<32x205xbf16>
    %68 = vector.extract_strided_slice %63 {offsets = [0, 1024], sizes = [32, 205], strides = [1, 1]} : vector<32x1997xbf16> to vector<32x205xbf16>
    %69 = vector.extract_strided_slice %63 {offsets = [0, 1280], sizes = [32, 205], strides = [1, 1]} : vector<32x1997xbf16> to vector<32x205xbf16>
    %70 = vector.extract_strided_slice %63 {offsets = [0, 1536], sizes = [32, 205], strides = [1, 1]} : vector<32x1997xbf16> to vector<32x205xbf16>
    %71 = vector.extract_strided_slice %63 {offsets = [0, 1792], sizes = [32, 205], strides = [1, 1]} : vector<32x1997xbf16> to vector<32x205xbf16>
    %72 = tpu.concatenate %64, %65, %66, %67, %68, %69, %70, %71 in 0 : vector<32x205xbf16>, vector<32x205xbf16>, vector<32x205xbf16>, vector<32x205xbf16>, vector<32x205xbf16>, vector<32x205xbf16>, vector<32x205xbf16>, vector<32x205xbf16> -> vector<256x205xbf16>
    %c0_15 = arith.constant 0 : index
    %c0_16 = arith.constant 0 : index
    %73 = vector.load %arg7[%c0_15, %c0_16] : memref<205x64xbf16, #tpu.memory_space<vmem>>, vector<205x64xbf16>
    %cst_17 = arith.constant dense<0.000000e+00> : vector<256x64xf32>
    %74 = tpu.matmul %72, %73, %cst_17 {dimension_numbers = #tpu.dot_dimension_numbers<[1], [0], [0], [1], [0, 0, 1, 1], [], []>} : vector<256x205xbf16>, vector<205x64xbf16>, vector<256x64xf32> -> vector<256x64xf32>
    %75 = arith.truncf %74 : vector<256x64xf32> to vector<256x64xbf16>
    %76 = vector.extract_strided_slice %75 {offsets = [0, 0], sizes = [32, 64], strides = [1, 1]} : vector<256x64xbf16> to vector<32x64xbf16>
    %c0_18 = arith.constant 0 : index
    %c0_19 = arith.constant 0 : index
    %c0_20 = arith.constant 0 : index
    %77 = vector.load %arg8[%c0_18, %c0_19, %c0_20] : memref<8x32x64xbf16, #tpu.memory_space<vmem>>, vector<1x32x64xbf16>
    %78 = vector.shape_cast %77 : vector<1x32x64xbf16> to vector<32x64xbf16>
    %79 = vector.shape_cast %76 : vector<32x64xbf16> to vector<1x32x64xbf16>
    tpu.vector_store %arg8[%c0_18, %c0_19, %c0_20], %79 {strides = array<i32>} : memref<8x32x64xbf16, #tpu.memory_space<vmem>>, vector<1x32x64xbf16>,
    %80 = vector.extract_strided_slice %75 {offsets = [32, 0], sizes = [32, 64], strides = [1, 1]} : vector<256x64xbf16> to vector<32x64xbf16>
    %c1 = arith.constant 1 : index
    %c0_21 = arith.constant 0 : index
    %c0_22 = arith.constant 0 : index
    %81 = vector.load %arg8[%c1, %c0_21, %c0_22] : memref<8x32x64xbf16, #tpu.memory_space<vmem>>, vector<1x32x64xbf16>
    %82 = vector.shape_cast %81 : vector<1x32x64xbf16> to vector<32x64xbf16>
    %83 = vector.shape_cast %80 : vector<32x64xbf16> to vector<1x32x64xbf16>
    tpu.vector_store %arg8[%c1, %c0_21, %c0_22], %83 {strides = array<i32>} : memref<8x32x64xbf16, #tpu.memory_space<vmem>>, vector<1x32x64xbf16>,
    %84 = vector.extract_strided_slice %75 {offsets = [64, 0], sizes = [32, 64], strides = [1, 1]} : vector<256x64xbf16> to vector<32x64xbf16>
    %c2 = arith.constant 2 : index
    %c0_23 = arith.constant 0 : index
    %c0_24 = arith.constant 0 : index
    %85 = vector.load %arg8[%c2, %c0_23, %c0_24] : memref<8x32x64xbf16, #tpu.memory_space<vmem>>, vector<1x32x64xbf16>
    %86 = vector.shape_cast %85 : vector<1x32x64xbf16> to vector<32x64xbf16>
    %87 = vector.shape_cast %84 : vector<32x64xbf16> to vector<1x32x64xbf16>
    tpu.vector_store %arg8[%c2, %c0_23, %c0_24], %87 {strides = array<i32>} : memref<8x32x64xbf16, #tpu.memory_space<vmem>>, vector<1x32x64xbf16>,
    %88 = vector.extract_strided_slice %75 {offsets = [96, 0], sizes = [32, 64], strides = [1, 1]} : vector<256x64xbf16> to vector<32x64xbf16>
    %c3 = arith.constant 3 : index
    %c0_25 = arith.constant 0 : index
    %c0_26 = arith.constant 0 : index
    %89 = vector.load %arg8[%c3, %c0_25, %c0_26] : memref<8x32x64xbf16, #tpu.memory_space<vmem>>, vector<1x32x64xbf16>
    %90 = vector.shape_cast %89 : vector<1x32x64xbf16> to vector<32x64xbf16>
    %91 = vector.shape_cast %88 : vector<32x64xbf16> to vector<1x32x64xbf16>
    tpu.vector_store %arg8[%c3, %c0_25, %c0_26], %91 {strides = array<i32>} : memref<8x32x64xbf16, #tpu.memory_space<vmem>>, vector<1x32x64xbf16>,
    %92 = vector.extract_strided_slice %75 {offsets = [128, 0], sizes = [32, 64], strides = [1, 1]} : vector<256x64xbf16> to vector<32x64xbf16>
    %c4 = arith.constant 4 : index
    %c0_27 = arith.constant 0 : index
    %c0_28 = arith.constant 0 : index
    %93 = vector.load %arg8[%c4, %c0_27, %c0_28] : memref<8x32x64xbf16, #tpu.memory_space<vmem>>, vector<1x32x64xbf16>
    %94 = vector.shape_cast %93 : vector<1x32x64xbf16> to vector<32x64xbf16>
    %95 = vector.shape_cast %92 : vector<32x64xbf16> to vector<1x32x64xbf16>
    tpu.vector_store %arg8[%c4, %c0_27, %c0_28], %95 {strides = array<i32>} : memref<8x32x64xbf16, #tpu.memory_space<vmem>>, vector<1x32x64xbf16>,
    %96 = vector.extract_strided_slice %75 {offsets = [160, 0], sizes = [32, 64], strides = [1, 1]} : vector<256x64xbf16> to vector<32x64xbf16>
    %c5 = arith.constant 5 : index
    %c0_29 = arith.constant 0 : index
    %c0_30 = arith.constant 0 : index
    %97 = vector.load %arg8[%c5, %c0_29, %c0_30] : memref<8x32x64xbf16, #tpu.memory_space<vmem>>, vector<1x32x64xbf16>
    %98 = vector.shape_cast %97 : vector<1x32x64xbf16> to vector<32x64xbf16>
    %99 = vector.shape_cast %96 : vector<32x64xbf16> to vector<1x32x64xbf16>
    tpu.vector_store %arg8[%c5, %c0_29, %c0_30], %99 {strides = array<i32>} : memref<8x32x64xbf16, #tpu.memory_space<vmem>>, vector<1x32x64xbf16>,
    %100 = vector.extract_strided_slice %75 {offsets = [192, 0], sizes = [32, 64], strides = [1, 1]} : vector<256x64xbf16> to vector<32x64xbf16>
    %c6 = arith.constant 6 : index
    %c0_31 = arith.constant 0 : index
    %c0_32 = arith.constant 0 : index
    %101 = vector.load %arg8[%c6, %c0_31, %c0_32] : memref<8x32x64xbf16, #tpu.memory_space<vmem>>, vector<1x32x64xbf16>
    %102 = vector.shape_cast %101 : vector<1x32x64xbf16> to vector<32x64xbf16>
    %103 = vector.shape_cast %100 : vector<32x64xbf16> to vector<1x32x64xbf16>
    tpu.vector_store %arg8[%c6, %c0_31, %c0_32], %103 {strides = array<i32>} : memref<8x32x64xbf16, #tpu.memory_space<vmem>>, vector<1x32x64xbf16>,
    %104 = vector.extract_strided_slice %75 {offsets = [224, 0], sizes = [32, 64], strides = [1, 1]} : vector<256x64xbf16> to vector<32x64xbf16>
    %c7 = arith.constant 7 : index
    %c0_33 = arith.constant 0 : index
    %c0_34 = arith.constant 0 : index
    %105 = vector.load %arg8[%c7, %c0_33, %c0_34] : memref<8x32x64xbf16, #tpu.memory_space<vmem>>, vector<1x32x64xbf16>
    %106 = vector.shape_cast %105 : vector<1x32x64xbf16> to vector<32x64xbf16>
    %107 = vector.shape_cast %104 : vector<32x64xbf16> to vector<1x32x64xbf16>
    tpu.vector_store %arg8[%c7, %c0_33, %c0_34], %107 {strides = array<i32>} : memref<8x32x64xbf16, #tpu.memory_space<vmem>>, vector<1x32x64xbf16>,
    return
  }
  func.func @transform_0(%arg0: i32) -> (i32, i32) {
    %c0_i32 = arith.constant 0 : i32
    %c0_i32_0 = arith.constant 0 : i32
    return %arg0, %c0_i32 : i32, i32
  }
  func.func @transform_1(%arg0: i32) -> (i32, i32) {
    %c0_i32 = arith.constant 0 : i32
    %c0_i32_0 = arith.constant 0 : i32
    %c0_i32_1 = arith.constant 0 : i32
    return %c0_i32, %c0_i32_0 : i32, i32
  }
  func.func @transform_2(%arg0: i32) -> (i32, i32) {
    %c0_i32 = arith.constant 0 : i32
    %c0_i32_0 = arith.constant 0 : i32
    %c0_i32_1 = arith.constant 0 : i32
    return %c0_i32, %c0_i32_0 : i32, i32
  }
  func.func @transform_3(%arg0: i32) -> (i32, i32) {
    %c0_i32 = arith.constant 0 : i32
    %c0_i32_0 = arith.constant 0 : i32
    %c0_i32_1 = arith.constant 0 : i32
    return %c0_i32, %c0_i32_0 : i32, i32
  }
  func.func @transform_4(%arg0: i32) -> (i32, i32) {
    %c0_i32 = arith.constant 0 : i32
    %c0_i32_0 = arith.constant 0 : i32
    %c0_i32_1 = arith.constant 0 : i32
    return %c0_i32, %c0_i32_0 : i32, i32
  }
  func.func @transform_5(%arg0: i32) -> (i32, i32) {
    %c0_i32 = arith.constant 0 : i32
    %c0_i32_0 = arith.constant 0 : i32
    %c0_i32_1 = arith.constant 0 : i32
    return %c0_i32, %c0_i32_0 : i32, i32
  }
  func.func @transform_6(%arg0: i32) -> (i32, i32) {
    %c0_i32 = arith.constant 0 : i32
    %c0_i32_0 = arith.constant 0 : i32
    %c0_i32_1 = arith.constant 0 : i32
    return %c0_i32, %c0_i32_0 : i32, i32
  }
  func.func @transform_7(%arg0: i32) -> (i32, i32, i32) {
    %c0_i32 = arith.constant 0 : i32
    %c0_i32_0 = arith.constant 0 : i32
    %c0_i32_1 = arith.constant 0 : i32
    return %arg0, %c0_i32, %c0_i32_0 : i32, i32, i32
  }
}

module attributes {stable_mosaic.version = 11 : i64} {
  func.func @head_kernel(%arg0: i32, %arg1: memref<8x2048xbf16, #tpu.memory_space<vmem>>, %arg2: memref<2048x128xbf16, #tpu.memory_space<vmem>>, %arg3: memref<1x128xf32, #tpu.memory_space<vmem>>, %arg4: memref<8x1x128xf32, #tpu.memory_space<vmem>>, %arg5: memref<8x1x128xf32, #tpu.memory_space<vmem>>, %arg6: memref<1024x10xbf16, #tpu.memory_space<vmem>>, %arg7: memref<1x10xf32, #tpu.memory_space<vmem>>, %arg8: memref<8x10xf32, #tpu.memory_space<vmem>>) attributes {dimension_semantics = [#tpu.dimension_semantics<parallel>], iteration_bounds = array<i64: 1>, scalar_prefetch = 0 : i64, scratch_operands = 0 : i64, tpu.core_type = #tpu.core_type<tc>, window_params = [{transform_indices = @transform_0, window_bounds = array<i64: 8, 2048>}, {pipeline_mode = #tpu.pipeline_mode<synchronous>, transform_indices = @transform_1, window_bounds = array<i64: 2048, 128>}, {pipeline_mode = #tpu.pipeline_mode<synchronous>, transform_indices = @transform_2, window_bounds = array<i64: 1, 128>}, {pipeline_mode = #tpu.pipeline_mode<synchronous>, transform_indices = @transform_3, window_bounds = array<i64: 8, 1, 128>}, {pipeline_mode = #tpu.pipeline_mode<synchronous>, transform_indices = @transform_4, window_bounds = array<i64: 8, 1, 128>}, {pipeline_mode = #tpu.pipeline_mode<synchronous>, transform_indices = @transform_5, window_bounds = array<i64: 1024, 10>}, {pipeline_mode = #tpu.pipeline_mode<synchronous>, transform_indices = @transform_6, window_bounds = array<i64: 1, 10>}, {transform_indices = @transform_7, window_bounds = array<i64: 8, 10>}]} {
    %c0 = arith.constant 0 : index
    %c0_0 = arith.constant 0 : index
    %0 = vector.load %arg1[%c0, %c0_0] : memref<8x2048xbf16, #tpu.memory_space<vmem>>, vector<8x2048xbf16>
    %c0_1 = arith.constant 0 : index
    %c0_2 = arith.constant 0 : index
    %1 = vector.load %arg2[%c0_1, %c0_2] : memref<2048x128xbf16, #tpu.memory_space<vmem>>, vector<2048x128xbf16>
    %cst = arith.constant dense<0.000000e+00> : vector<8x128xf32>
    %2 = tpu.matmul %0, %1, %cst {dimension_numbers = #tpu.dot_dimension_numbers<[1], [0], [0], [1], [0, 0, 1, 1], [], []>} : vector<8x2048xbf16>, vector<2048x128xbf16>, vector<8x128xf32> -> vector<8x128xf32>
    %c0_3 = arith.constant 0 : index
    %c0_4 = arith.constant 0 : index
    %3 = vector.load %arg3[%c0_3, %c0_4] : memref<1x128xf32, #tpu.memory_space<vmem>>, vector<1x128xf32>
    %4 = vector.broadcast %3 : vector<1x128xf32> to vector<8x128xf32>
    %5 = arith.addf %2, %4 : vector<8x128xf32>
    %c0_5 = arith.constant 0 : index
    %c0_6 = arith.constant 0 : index
    %c0_7 = arith.constant 0 : index
    %6 = vector.load %arg4[%c0_5, %c0_6, %c0_7] : memref<8x1x128xf32, #tpu.memory_space<vmem>>, vector<1x1x128xf32>
    %7 = vector.shape_cast %6 : vector<1x1x128xf32> to vector<1x128xf32>
    %8 = vector.broadcast %7 : vector<1x128xf32> to vector<8x128xf32>
    %9 = arith.subf %5, %8 : vector<8x128xf32>
    %cst_8 = arith.constant 0.000000e+00 : f32
    %10 = vector.broadcast %cst_8 : f32 to vector<8x128xf32>
    %11 = arith.maximumf %9, %10 : vector<8x128xf32>
    %c0_9 = arith.constant 0 : index
    %c0_10 = arith.constant 0 : index
    %c0_11 = arith.constant 0 : index
    %12 = vector.load %arg5[%c0_9, %c0_10, %c0_11] : memref<8x1x128xf32, #tpu.memory_space<vmem>>, vector<1x1x128xf32>
    %13 = vector.shape_cast %12 : vector<1x1x128xf32> to vector<1x128xf32>
    %14 = vector.broadcast %13 : vector<1x128xf32> to vector<8x128xf32>
    %15 = arith.subf %14, %5 : vector<8x128xf32>
    %cst_12 = arith.constant 0.000000e+00 : f32
    %16 = vector.broadcast %cst_12 : f32 to vector<8x128xf32>
    %17 = arith.maximumf %15, %16 : vector<8x128xf32>
    %18 = arith.mulf %11, %17 : vector<8x128xf32>
    %19 = arith.mulf %18, %18 : vector<8x128xf32>
    %20 = arith.truncf %19 : vector<8x128xf32> to vector<8x128xbf16>
    %c1 = arith.constant 1 : index
    %c0_13 = arith.constant 0 : index
    %c0_14 = arith.constant 0 : index
    %21 = vector.load %arg4[%c1, %c0_13, %c0_14] : memref<8x1x128xf32, #tpu.memory_space<vmem>>, vector<1x1x128xf32>
    %22 = vector.shape_cast %21 : vector<1x1x128xf32> to vector<1x128xf32>
    %23 = vector.broadcast %22 : vector<1x128xf32> to vector<8x128xf32>
    %24 = arith.subf %5, %23 : vector<8x128xf32>
    %cst_15 = arith.constant 0.000000e+00 : f32
    %25 = vector.broadcast %cst_15 : f32 to vector<8x128xf32>
    %26 = arith.maximumf %24, %25 : vector<8x128xf32>
    %c1_16 = arith.constant 1 : index
    %c0_17 = arith.constant 0 : index
    %c0_18 = arith.constant 0 : index
    %27 = vector.load %arg5[%c1_16, %c0_17, %c0_18] : memref<8x1x128xf32, #tpu.memory_space<vmem>>, vector<1x1x128xf32>
    %28 = vector.shape_cast %27 : vector<1x1x128xf32> to vector<1x128xf32>
    %29 = vector.broadcast %28 : vector<1x128xf32> to vector<8x128xf32>
    %30 = arith.subf %29, %5 : vector<8x128xf32>
    %cst_19 = arith.constant 0.000000e+00 : f32
    %31 = vector.broadcast %cst_19 : f32 to vector<8x128xf32>
    %32 = arith.maximumf %30, %31 : vector<8x128xf32>
    %33 = arith.mulf %26, %32 : vector<8x128xf32>
    %34 = arith.mulf %33, %33 : vector<8x128xf32>
    %35 = arith.truncf %34 : vector<8x128xf32> to vector<8x128xbf16>
    %c2 = arith.constant 2 : index
    %c0_20 = arith.constant 0 : index
    %c0_21 = arith.constant 0 : index
    %36 = vector.load %arg4[%c2, %c0_20, %c0_21] : memref<8x1x128xf32, #tpu.memory_space<vmem>>, vector<1x1x128xf32>
    %37 = vector.shape_cast %36 : vector<1x1x128xf32> to vector<1x128xf32>
    %38 = vector.broadcast %37 : vector<1x128xf32> to vector<8x128xf32>
    %39 = arith.subf %5, %38 : vector<8x128xf32>
    %cst_22 = arith.constant 0.000000e+00 : f32
    %40 = vector.broadcast %cst_22 : f32 to vector<8x128xf32>
    %41 = arith.maximumf %39, %40 : vector<8x128xf32>
    %c2_23 = arith.constant 2 : index
    %c0_24 = arith.constant 0 : index
    %c0_25 = arith.constant 0 : index
    %42 = vector.load %arg5[%c2_23, %c0_24, %c0_25] : memref<8x1x128xf32, #tpu.memory_space<vmem>>, vector<1x1x128xf32>
    %43 = vector.shape_cast %42 : vector<1x1x128xf32> to vector<1x128xf32>
    %44 = vector.broadcast %43 : vector<1x128xf32> to vector<8x128xf32>
    %45 = arith.subf %44, %5 : vector<8x128xf32>
    %cst_26 = arith.constant 0.000000e+00 : f32
    %46 = vector.broadcast %cst_26 : f32 to vector<8x128xf32>
    %47 = arith.maximumf %45, %46 : vector<8x128xf32>
    %48 = arith.mulf %41, %47 : vector<8x128xf32>
    %49 = arith.mulf %48, %48 : vector<8x128xf32>
    %50 = arith.truncf %49 : vector<8x128xf32> to vector<8x128xbf16>
    %c3 = arith.constant 3 : index
    %c0_27 = arith.constant 0 : index
    %c0_28 = arith.constant 0 : index
    %51 = vector.load %arg4[%c3, %c0_27, %c0_28] : memref<8x1x128xf32, #tpu.memory_space<vmem>>, vector<1x1x128xf32>
    %52 = vector.shape_cast %51 : vector<1x1x128xf32> to vector<1x128xf32>
    %53 = vector.broadcast %52 : vector<1x128xf32> to vector<8x128xf32>
    %54 = arith.subf %5, %53 : vector<8x128xf32>
    %cst_29 = arith.constant 0.000000e+00 : f32
    %55 = vector.broadcast %cst_29 : f32 to vector<8x128xf32>
    %56 = arith.maximumf %54, %55 : vector<8x128xf32>
    %c3_30 = arith.constant 3 : index
    %c0_31 = arith.constant 0 : index
    %c0_32 = arith.constant 0 : index
    %57 = vector.load %arg5[%c3_30, %c0_31, %c0_32] : memref<8x1x128xf32, #tpu.memory_space<vmem>>, vector<1x1x128xf32>
    %58 = vector.shape_cast %57 : vector<1x1x128xf32> to vector<1x128xf32>
    %59 = vector.broadcast %58 : vector<1x128xf32> to vector<8x128xf32>
    %60 = arith.subf %59, %5 : vector<8x128xf32>
    %cst_33 = arith.constant 0.000000e+00 : f32
    %61 = vector.broadcast %cst_33 : f32 to vector<8x128xf32>
    %62 = arith.maximumf %60, %61 : vector<8x128xf32>
    %63 = arith.mulf %56, %62 : vector<8x128xf32>
    %64 = arith.mulf %63, %63 : vector<8x128xf32>
    %65 = arith.truncf %64 : vector<8x128xf32> to vector<8x128xbf16>
    %c4 = arith.constant 4 : index
    %c0_34 = arith.constant 0 : index
    %c0_35 = arith.constant 0 : index
    %66 = vector.load %arg4[%c4, %c0_34, %c0_35] : memref<8x1x128xf32, #tpu.memory_space<vmem>>, vector<1x1x128xf32>
    %67 = vector.shape_cast %66 : vector<1x1x128xf32> to vector<1x128xf32>
    %68 = vector.broadcast %67 : vector<1x128xf32> to vector<8x128xf32>
    %69 = arith.subf %5, %68 : vector<8x128xf32>
    %cst_36 = arith.constant 0.000000e+00 : f32
    %70 = vector.broadcast %cst_36 : f32 to vector<8x128xf32>
    %71 = arith.maximumf %69, %70 : vector<8x128xf32>
    %c4_37 = arith.constant 4 : index
    %c0_38 = arith.constant 0 : index
    %c0_39 = arith.constant 0 : index
    %72 = vector.load %arg5[%c4_37, %c0_38, %c0_39] : memref<8x1x128xf32, #tpu.memory_space<vmem>>, vector<1x1x128xf32>
    %73 = vector.shape_cast %72 : vector<1x1x128xf32> to vector<1x128xf32>
    %74 = vector.broadcast %73 : vector<1x128xf32> to vector<8x128xf32>
    %75 = arith.subf %74, %5 : vector<8x128xf32>
    %cst_40 = arith.constant 0.000000e+00 : f32
    %76 = vector.broadcast %cst_40 : f32 to vector<8x128xf32>
    %77 = arith.maximumf %75, %76 : vector<8x128xf32>
    %78 = arith.mulf %71, %77 : vector<8x128xf32>
    %79 = arith.mulf %78, %78 : vector<8x128xf32>
    %80 = arith.truncf %79 : vector<8x128xf32> to vector<8x128xbf16>
    %c5 = arith.constant 5 : index
    %c0_41 = arith.constant 0 : index
    %c0_42 = arith.constant 0 : index
    %81 = vector.load %arg4[%c5, %c0_41, %c0_42] : memref<8x1x128xf32, #tpu.memory_space<vmem>>, vector<1x1x128xf32>
    %82 = vector.shape_cast %81 : vector<1x1x128xf32> to vector<1x128xf32>
    %83 = vector.broadcast %82 : vector<1x128xf32> to vector<8x128xf32>
    %84 = arith.subf %5, %83 : vector<8x128xf32>
    %cst_43 = arith.constant 0.000000e+00 : f32
    %85 = vector.broadcast %cst_43 : f32 to vector<8x128xf32>
    %86 = arith.maximumf %84, %85 : vector<8x128xf32>
    %c5_44 = arith.constant 5 : index
    %c0_45 = arith.constant 0 : index
    %c0_46 = arith.constant 0 : index
    %87 = vector.load %arg5[%c5_44, %c0_45, %c0_46] : memref<8x1x128xf32, #tpu.memory_space<vmem>>, vector<1x1x128xf32>
    %88 = vector.shape_cast %87 : vector<1x1x128xf32> to vector<1x128xf32>
    %89 = vector.broadcast %88 : vector<1x128xf32> to vector<8x128xf32>
    %90 = arith.subf %89, %5 : vector<8x128xf32>
    %cst_47 = arith.constant 0.000000e+00 : f32
    %91 = vector.broadcast %cst_47 : f32 to vector<8x128xf32>
    %92 = arith.maximumf %90, %91 : vector<8x128xf32>
    %93 = arith.mulf %86, %92 : vector<8x128xf32>
    %94 = arith.mulf %93, %93 : vector<8x128xf32>
    %95 = arith.truncf %94 : vector<8x128xf32> to vector<8x128xbf16>
    %c6 = arith.constant 6 : index
    %c0_48 = arith.constant 0 : index
    %c0_49 = arith.constant 0 : index
    %96 = vector.load %arg4[%c6, %c0_48, %c0_49] : memref<8x1x128xf32, #tpu.memory_space<vmem>>, vector<1x1x128xf32>
    %97 = vector.shape_cast %96 : vector<1x1x128xf32> to vector<1x128xf32>
    %98 = vector.broadcast %97 : vector<1x128xf32> to vector<8x128xf32>
    %99 = arith.subf %5, %98 : vector<8x128xf32>
    %cst_50 = arith.constant 0.000000e+00 : f32
    %100 = vector.broadcast %cst_50 : f32 to vector<8x128xf32>
    %101 = arith.maximumf %99, %100 : vector<8x128xf32>
    %c6_51 = arith.constant 6 : index
    %c0_52 = arith.constant 0 : index
    %c0_53 = arith.constant 0 : index
    %102 = vector.load %arg5[%c6_51, %c0_52, %c0_53] : memref<8x1x128xf32, #tpu.memory_space<vmem>>, vector<1x1x128xf32>
    %103 = vector.shape_cast %102 : vector<1x1x128xf32> to vector<1x128xf32>
    %104 = vector.broadcast %103 : vector<1x128xf32> to vector<8x128xf32>
    %105 = arith.subf %104, %5 : vector<8x128xf32>
    %cst_54 = arith.constant 0.000000e+00 : f32
    %106 = vector.broadcast %cst_54 : f32 to vector<8x128xf32>
    %107 = arith.maximumf %105, %106 : vector<8x128xf32>
    %108 = arith.mulf %101, %107 : vector<8x128xf32>
    %109 = arith.mulf %108, %108 : vector<8x128xf32>
    %110 = arith.truncf %109 : vector<8x128xf32> to vector<8x128xbf16>
    %c7 = arith.constant 7 : index
    %c0_55 = arith.constant 0 : index
    %c0_56 = arith.constant 0 : index
    %111 = vector.load %arg4[%c7, %c0_55, %c0_56] : memref<8x1x128xf32, #tpu.memory_space<vmem>>, vector<1x1x128xf32>
    %112 = vector.shape_cast %111 : vector<1x1x128xf32> to vector<1x128xf32>
    %113 = vector.broadcast %112 : vector<1x128xf32> to vector<8x128xf32>
    %114 = arith.subf %5, %113 : vector<8x128xf32>
    %cst_57 = arith.constant 0.000000e+00 : f32
    %115 = vector.broadcast %cst_57 : f32 to vector<8x128xf32>
    %116 = arith.maximumf %114, %115 : vector<8x128xf32>
    %c7_58 = arith.constant 7 : index
    %c0_59 = arith.constant 0 : index
    %c0_60 = arith.constant 0 : index
    %117 = vector.load %arg5[%c7_58, %c0_59, %c0_60] : memref<8x1x128xf32, #tpu.memory_space<vmem>>, vector<1x1x128xf32>
    %118 = vector.shape_cast %117 : vector<1x1x128xf32> to vector<1x128xf32>
    %119 = vector.broadcast %118 : vector<1x128xf32> to vector<8x128xf32>
    %120 = arith.subf %119, %5 : vector<8x128xf32>
    %cst_61 = arith.constant 0.000000e+00 : f32
    %121 = vector.broadcast %cst_61 : f32 to vector<8x128xf32>
    %122 = arith.maximumf %120, %121 : vector<8x128xf32>
    %123 = arith.mulf %116, %122 : vector<8x128xf32>
    %124 = arith.mulf %123, %123 : vector<8x128xf32>
    %125 = arith.truncf %124 : vector<8x128xf32> to vector<8x128xbf16>
    %126 = tpu.concatenate %20, %35, %50, %65, %80, %95, %110, %125 in 1 : vector<8x128xbf16>, vector<8x128xbf16>, vector<8x128xbf16>, vector<8x128xbf16>, vector<8x128xbf16>, vector<8x128xbf16>, vector<8x128xbf16>, vector<8x128xbf16> -> vector<8x1024xbf16>
    %c0_62 = arith.constant 0 : index
    %c0_63 = arith.constant 0 : index
    %127 = vector.load %arg6[%c0_62, %c0_63] : memref<1024x10xbf16, #tpu.memory_space<vmem>>, vector<1024x10xbf16>
    %cst_64 = arith.constant dense<0.000000e+00> : vector<8x10xf32>
    %128 = tpu.matmul %126, %127, %cst_64 {dimension_numbers = #tpu.dot_dimension_numbers<[1], [0], [0], [1], [0, 0, 1, 1], [], []>} : vector<8x1024xbf16>, vector<1024x10xbf16>, vector<8x10xf32> -> vector<8x10xf32>
    %c0_65 = arith.constant 0 : index
    %c0_66 = arith.constant 0 : index
    %129 = vector.load %arg7[%c0_65, %c0_66] : memref<1x10xf32, #tpu.memory_space<vmem>>, vector<1x10xf32>
    %130 = vector.broadcast %129 : vector<1x10xf32> to vector<8x10xf32>
    %131 = arith.addf %128, %130 : vector<8x10xf32>
    %cst_67 = arith.constant dense<0xFF800000> : vector<8xf32>
    %132 = vector.multi_reduction <maximumf>, %131, %cst_67 [1] : vector<8x10xf32> to vector<8xf32>
    %133 = vector.shape_cast %132 : vector<8xf32> to vector<8x1xf32>
    %134 = vector.broadcast %133 : vector<8x1xf32> to vector<8x10xf32>
    %135 = arith.subf %131, %134 : vector<8x10xf32>
    %136 = math.exp %135 : vector<8x10xf32>
    %cst_68 = arith.constant dense<0.000000e+00> : vector<8xf32>
    %137 = vector.multi_reduction <add>, %136, %cst_68 [1] : vector<8x10xf32> to vector<8xf32>
    %138 = vector.shape_cast %137 : vector<8xf32> to vector<8x1xf32>
    %139 = math.log %138 : vector<8x1xf32>
    %140 = vector.broadcast %139 : vector<8x1xf32> to vector<8x10xf32>
    %141 = arith.subf %135, %140 : vector<8x10xf32>
    %c0_69 = arith.constant 0 : index
    %c0_70 = arith.constant 0 : index
    %142 = vector.load %arg8[%c0_69, %c0_70] : memref<8x10xf32, #tpu.memory_space<vmem>>, vector<8x10xf32>
    tpu.vector_store %arg8[%c0_69, %c0_70], %141 {strides = array<i32>} : memref<8x10xf32, #tpu.memory_space<vmem>>, vector<8x10xf32>,
    return
  }
  func.func @transform_0(%arg0: i32) -> (i32, i32) {
    %c0_i32 = arith.constant 0 : i32
    %c0_i32_0 = arith.constant 0 : i32
    return %arg0, %c0_i32 : i32, i32
  }
  func.func @transform_1(%arg0: i32) -> (i32, i32) {
    %c0_i32 = arith.constant 0 : i32
    %c0_i32_0 = arith.constant 0 : i32
    %c0_i32_1 = arith.constant 0 : i32
    return %c0_i32, %c0_i32_0 : i32, i32
  }
  func.func @transform_2(%arg0: i32) -> (i32, i32) {
    %c0_i32 = arith.constant 0 : i32
    %c0_i32_0 = arith.constant 0 : i32
    %c0_i32_1 = arith.constant 0 : i32
    return %c0_i32, %c0_i32_0 : i32, i32
  }
  func.func @transform_3(%arg0: i32) -> (i32, i32, i32) {
    %c0_i32 = arith.constant 0 : i32
    %c0_i32_0 = arith.constant 0 : i32
    %c0_i32_1 = arith.constant 0 : i32
    %c0_i32_2 = arith.constant 0 : i32
    return %c0_i32, %c0_i32_0, %c0_i32_1 : i32, i32, i32
  }
  func.func @transform_4(%arg0: i32) -> (i32, i32, i32) {
    %c0_i32 = arith.constant 0 : i32
    %c0_i32_0 = arith.constant 0 : i32
    %c0_i32_1 = arith.constant 0 : i32
    %c0_i32_2 = arith.constant 0 : i32
    return %c0_i32, %c0_i32_0, %c0_i32_1 : i32, i32, i32
  }
  func.func @transform_5(%arg0: i32) -> (i32, i32) {
    %c0_i32 = arith.constant 0 : i32
    %c0_i32_0 = arith.constant 0 : i32
    %c0_i32_1 = arith.constant 0 : i32
    return %c0_i32, %c0_i32_0 : i32, i32
  }
  func.func @transform_6(%arg0: i32) -> (i32, i32) {
    %c0_i32 = arith.constant 0 : i32
    %c0_i32_0 = arith.constant 0 : i32
    %c0_i32_1 = arith.constant 0 : i32
    return %c0_i32, %c0_i32_0 : i32, i32
  }
  func.func @transform_7(%arg0: i32) -> (i32, i32) {
    %c0_i32 = arith.constant 0 : i32
    %c0_i32_0 = arith.constant 0 : i32
    return %arg0, %c0_i32 : i32, i32
  }
}

</mosaic_0001>

<bundles_post_ra>
// kernel: cnn_relukan_forward.3
= control target key start
LH: loop header
LB: loop body
LE: loop exit
PB: predicated region body
PF: predicated region fallthrough
CT: control target
= control target key end

     0   :  { %vm2303_vm0 = vcmask 80896   ;;  %s3755_s1 = inlined_call_operand.vmem [shape: bf16[2048,128], index: 1, kind: input, shape index: {}]   ;;  %s3756_s0 = inlined_call_operand.vmem [shape: bf16[8,2048], index: 0, kind: input, shape index: {}]   ;;  %s3757_s5 = inlined_call_operand.vmem [shape: bf16[1024,10], index: 5, kind: input, shape index: {}]   ;;  %s3758_s2 = inlined_call_operand.vmem [shape: f32[1,128], index: 2, kind: input, shape index: {}]   ;;  %s3759_s3 = inlined_call_operand.vmem [shape: f32[8,1,128], index: 3, kind: input, shape index: {}]   ;;  %s3760_s4 = inlined_call_operand.vmem [shape: f32[8,1,128], index: 4, kind: input, shape index: {}]   ;;  %s3761_s6 = inlined_call_operand.vmem [shape: f32[1,10], index: 6, kind: input, shape index: {}]   ;;  %s3762_s7 = inlined_call_operand.vmem [shape: f32[8,10], index: 7, kind: output, shape index: {}]  }
   0x1   :  { %v2825_v0 = vld [vmem:[%s3755_s1 + $0x40] sm:$0xff]   ;;  %v2829_v4 = vld [vmem:[%s3755_s1 + $0x48] sm:$0xff]   ;;  %v2833_v8 = vld [vmem:[%s3755_s1 + $0x50] sm:$0xff]  }
   0x2   :  { %v2826_v1 = vld [vmem:[%s3755_s1 + $0xc0] sm:$0xff]   ;;  %2561 = vmatprep.subr.bf16.mxu0 %v2825_v0  ;;  %v2830_v5 = vld [vmem:[%s3755_s1 + $0xc8] sm:$0xff]   ;;  %v2834_v9 = vld [vmem:[%s3755_s1 + $0xd0] sm:$0xff]  }
   0x3   :  { %v2827_v2 = vld [vmem:[%s3755_s1] sm:$0xff]   ;;  %2583 = vmatprep.subr.bf16.mxu1 %v2826_v1  ;;  %v2831_v6 = vld [vmem:[%s3755_s1 + $0x8] sm:$0xff]   ;;  %v2835_v10 = vld [vmem:[%s3755_s1 + $0x10] sm:$0xff]  }
   0x4   :  { %v2828_v3 = vld [vmem:[%s3755_s1 + $0x80] sm:$0xff]   ;;  %2562 = vmatpush3.bf16.msra.mxu0 %v2827_v2  ;;  %v2832_v7 = vld [vmem:[%s3755_s1 + $0x88] sm:$0xff]   ;;  %v2836_v11 = vld [vmem:[%s3755_s1 + $0x90] sm:$0xff]  }
   0x5   :  { %2584 = vmatpush3.bf16.msra.mxu1 %v2828_v3  ;;  %2563 = vmatprep.subr.bf16.mxu0 %v2829_v4  ;;  %v2837_v12 = vld [vmem:[%s3755_s1 + $0x58] sm:$0xff]   ;;  %v2841_v16 = vld [vmem:[%s3755_s1 + $0x60] sm:$0xff]   ;;  %v2845_v20 = vld [vmem:[%s3755_s1 + $0x68] sm:$0xff]  }
   0x6   :  { %2585 = vmatprep.subr.bf16.mxu1 %v2830_v5  ;;  %v2838_v13 = vld [vmem:[%s3755_s1 + $0xd8] sm:$0xff]   ;;  %v2842_v17 = vld [vmem:[%s3755_s1 + $0xe0] sm:$0xff]   ;;  %v2846_v21 = vld [vmem:[%s3755_s1 + $0xe8] sm:$0xff]  }
   0x7   :  { %v2839_v14 = vld [vmem:[%s3755_s1 + $0x18] sm:$0xff]   ;;  %v2843_v18 = vld [vmem:[%s3755_s1 + $0x20] sm:$0xff]   ;;  %v2847_v22 = vld [vmem:[%s3755_s1 + $0x28] sm:$0xff]  }
   0x8   :  { %2564 = vmatpush3.bf16.msra.mxu0 %v2831_v6  ;;  %v2840_v15 = vld [vmem:[%s3755_s1 + $0x98] sm:$0xff]   ;;  %v2844_v19 = vld [vmem:[%s3755_s1 + $0xa0] sm:$0xff]   ;;  %v2848_v23 = vld [vmem:[%s3755_s1 + $0xa8] sm:$0xff]  }
   0x9   :  { %2586 = vmatpush3.bf16.msra.mxu1 %v2832_v7  ;;  %2565 = vmatprep.subr.bf16.mxu0 %v2833_v8  ;;  %v2849_v24 = vld [vmem:[%s3755_s1 + $0x70] sm:$0xff]   ;;  %v2853_v28 = vld [vmem:[%s3755_s1 + $0x78] sm:$0xff]   ;;  %v27_v32 = vld [vmem:[%s3756_s0] sm:$0xff] }
   0xa   :  { %2587 = vmatprep.subr.bf16.mxu1 %v2834_v9  ;;  %v2850_v25 = vld [vmem:[%s3755_s1 + $0xf0] sm:$0xff]   ;;  %v2854_v29 = vld [vmem:[%s3755_s1 + $0xf8] sm:$0xff]   ;;  %v28_v33 = vld [vmem:[%s3756_s0 + $0x8] sm:$0xff]  ;;  %v2322_v34 = vcombine.low %v27_v32, %v27_v32  ;;  %v2323_v35 = vcombine.high %v27_v32, %v27_v32 }
   0xb   :  { %v2851_v26 = vld [vmem:[%s3755_s1 + $0x30] sm:$0xff]   ;;  %v2855_v30 = vld [vmem:[%s3755_s1 + $0x38] sm:$0xff]   ;;  %v2324_v36 = vcombine.low %v28_v33, %v28_v33  ;;  %v2325_v37 = vcombine.high %v28_v33, %v28_v33  ;;  %v2861_v38 = vld [vmem:[%s3755_s1 + $0x140] sm:$0xff]  }
   0xc   :  { %2566 = vmatpush3.bf16.msra.mxu0 %v2835_v10  ;;  %v2852_v27 = vld [vmem:[%s3755_s1 + $0xb0] sm:$0xff]   ;;  %v2856_v31 = vld [vmem:[%s3755_s1 + $0xb8] sm:$0xff]   ;;  %v2862_v39 = vld [vmem:[%s3755_s1 + $0x1c0] sm:$0xff]   ;;  %1154 = vmatprep.mubr.bf16.mxu0 %v2323_v35 }
   0xd   :  { %2588 = vmatpush3.bf16.msra.mxu1 %v2836_v11  ;;  %2567 = vmatprep.subr.bf16.mxu0 %v2837_v12  ;;  %v2863_v40 = vld [vmem:[%s3755_s1 + $0x100] sm:$0xff]   ;;  %v2865_v42 = vld [vmem:[%s3755_s1 + $0x148] sm:$0xff]   ;;  %v2869_v46 = vld [vmem:[%s3755_s1 + $0x150] sm:$0xff]  }
   0xe   :  { %2589 = vmatprep.subr.bf16.mxu1 %v2838_v13  ;;  %1194 = vmatprep.mubr.bf16.mxu1 %v2325_v37  ;;  %v2864_v41 = vld [vmem:[%s3755_s1 + $0x180] sm:$0xff]   ;;  %v2866_v43 = vld [vmem:[%s3755_s1 + $0x1c8] sm:$0xff]   ;;  %v2870_v47 = vld [vmem:[%s3755_s1 + $0x1d0] sm:$0xff]  }
   0xf   :  { %v2867_v44 = vld [vmem:[%s3755_s1 + $0x108] sm:$0xff]   ;;  %v2871_v48 = vld [vmem:[%s3755_s1 + $0x110] sm:$0xff]   ;;  %v2873_v50 = vld [vmem:[%s3755_s1 + $0x158] sm:$0xff]  }
  0x10   :  { %2568 = vmatpush3.bf16.msra.mxu0 %v2839_v14  ;;  %v2868_v45 = vld [vmem:[%s3755_s1 + $0x188] sm:$0xff]   ;;  %v2872_v49 = vld [vmem:[%s3755_s1 + $0x190] sm:$0xff]   ;;  %v2874_v51 = vld [vmem:[%s3755_s1 + $0x1d8] sm:$0xff]  }
  0x11   :  { %2590 = vmatpush3.bf16.msra.mxu1 %v2840_v15  ;;  %2569 = vmatprep.subr.bf16.mxu0 %v2841_v16  ;;  %v2875_v52 = vld [vmem:[%s3755_s1 + $0x118] sm:$0xff]   ;;  %v2877_v54 = vld [vmem:[%s3755_s1 + $0x160] sm:$0xff]   ;;  %v2881_v58 = vld [vmem:[%s3755_s1 + $0x168] sm:$0xff]  }
  0x12   :  { %2591 = vmatprep.subr.bf16.mxu1 %v2842_v17  ;;  %v2876_v53 = vld [vmem:[%s3755_s1 + $0x198] sm:$0xff]   ;;  %v2878_v55 = vld [vmem:[%s3755_s1 + $0x1e0] sm:$0xff]   ;;  %v2882_v59 = vld [vmem:[%s3755_s1 + $0x1e8] sm:$0xff]  }
  0x13   :  { %v2879_v56 = vld [vmem:[%s3755_s1 + $0x120] sm:$0xff]   ;;  %v2883_v60 = vld [vmem:[%s3755_s1 + $0x128] sm:$0xff]   ;;  %v2885_v62 = vld [vmem:[%s3755_s1 + $0x170] sm:$0xff]  }
  0x14   :  { %2570 = vmatpush3.bf16.msra.mxu0 %v2843_v18  ;;  %v2880_v57 = vld [vmem:[%s3755_s1 + $0x1a0] sm:$0xff]   ;;  %v2884_v61 = vld [vmem:[%s3755_s1 + $0x1a8] sm:$0xff]   ;;  %v2886_v63 = vld [vmem:[%s3755_s1 + $0x1f0] sm:$0xff]  }
  0x15   :  { %2592 = vmatpush3.bf16.msra.mxu1 %v2844_v19  ;;  %2571 = vmatprep.subr.bf16.mxu0 %v2845_v20  ;;  %v2887_v0 = vld [vmem:[%s3755_s1 + $0x130] sm:$0xff]   ;;  %v2889_v2 = vld [vmem:[%s3755_s1 + $0x178] sm:$0xff]   ;;  %v2897_v12 = vld [vmem:[%s3755_s1 + $0x240] sm:$0xff]  }
  0x16   :  { %2593 = vmatprep.subr.bf16.mxu1 %v2846_v21  ;;  %v2888_v1 = vld [vmem:[%s3755_s1 + $0x1b0] sm:$0xff]   ;;  %v2890_v3 = vld [vmem:[%s3755_s1 + $0x1f8] sm:$0xff]   ;;  %v2898_v13 = vld [vmem:[%s3755_s1 + $0x2c0] sm:$0xff]  }
  0x17   :  { %v2891_v4 = vld [vmem:[%s3755_s1 + $0x138] sm:$0xff]   ;;  %v29_v6 = vld [vmem:[%s3756_s0 + $0x10] sm:$0xff]  ;;  %v2899_v14 = vld [vmem:[%s3755_s1 + $0x200] sm:$0xff]  }
  0x18   :  { %2572 = vmatpush3.bf16.msra.mxu0 %v2847_v22  ;;  %v2892_v5 = vld [vmem:[%s3755_s1 + $0x1b8] sm:$0xff]   ;;  %v2326_v7 = vcombine.low %v29_v6, %v29_v6  ;;  %v2327_v8 = vcombine.high %v29_v6, %v29_v6  ;;  %v2900_v15 = vld [vmem:[%s3755_s1 + $0x280] sm:$0xff]   ;;  %v2901_v16 = vld [vmem:[%s3755_s1 + $0x248] sm:$0xff]  }
  0x19   :  { %2594 = vmatpush3.bf16.msra.mxu1 %v2848_v23  ;;  %2573 = vmatprep.subr.bf16.mxu0 %v2849_v24  ;;  %v30_v9 = vld [vmem:[%s3756_s0 + $0x18] sm:$0xff]  ;;  %v2902_v17 = vld [vmem:[%s3755_s1 + $0x2c8] sm:$0xff]   ;;  %v2905_v20 = vld [vmem:[%s3755_s1 + $0x250] sm:$0xff]  }
  0x1a   :  { %2595 = vmatprep.subr.bf16.mxu1 %v2850_v25  ;;  %v2328_v10 = vcombine.low %v30_v9, %v30_v9  ;;  %v2329_v11 = vcombine.high %v30_v9, %v30_v9  ;;  %v2903_v18 = vld [vmem:[%s3755_s1 + $0x208] sm:$0xff]   ;;  %v2906_v21 = vld [vmem:[%s3755_s1 + $0x2d0] sm:$0xff]   ;;  %v2909_v24 = vld [vmem:[%s3755_s1 + $0x258] sm:$0xff]  }
  0x1b   :  { %v2904_v19 = vld [vmem:[%s3755_s1 + $0x288] sm:$0xff]   ;;  %v2907_v22 = vld [vmem:[%s3755_s1 + $0x210] sm:$0xff]   ;;  %v2910_v25 = vld [vmem:[%s3755_s1 + $0x2d8] sm:$0xff]  }
  0x1c   :  { %2574 = vmatpush3.bf16.msra.mxu0 %v2851_v26  ;;  %v2908_v23 = vld [vmem:[%s3755_s1 + $0x290] sm:$0xff]   ;;  %v2911_v26 = vld [vmem:[%s3755_s1 + $0x218] sm:$0xff]   ;;  %v2917_v32 = vld [vmem:[%s3755_s1 + $0x268] sm:$0xff]  }
  0x1d   :  { %2596 = vmatpush3.bf16.msra.mxu1 %v2852_v27  ;;  %2575 = vmatprep.subr.bf16.mxu0 %v2853_v28  ;;  %v2912_v27 = vld [vmem:[%s3755_s1 + $0x298] sm:$0xff]   ;;  %v2913_v28 = vld [vmem:[%s3755_s1 + $0x260] sm:$0xff]   ;;  %v2918_v33 = vld [vmem:[%s3755_s1 + $0x2e8] sm:$0xff]  }
  0x1e   :  { %2597 = vmatprep.subr.bf16.mxu1 %v2854_v29  ;;  %v2914_v29 = vld [vmem:[%s3755_s1 + $0x2e0] sm:$0xff]   ;;  %v2920_v35 = vld [vmem:[%s3755_s1 + $0x2a8] sm:$0xff]   ;;  %v2922_v37 = vld [vmem:[%s3755_s1 + $0x2f0] sm:$0xff]  }
  0x1f   :  { %v2953_v6 = vld [vmem:[%s3755_s1 + $0x368] sm:$0xff]  }
  0x20   :  { %2576 = vmatpush3.bf16.msra.mxu0 %v2855_v30  ;;  %v2915_v30 = vld [vmem:[%s3755_s1 + $0x220] sm:$0xff]   ;;  %v2956_v9 = vld [vmem:[%s3755_s1 + $0x3a8] sm:$0xff]  }
  0x21   :  { %2598 = vmatpush3.bf16.msra.mxu1 %v2856_v31  ;;  %2605 = vmatprep.subr.bf16.mxu0 %v2861_v38  ;;  %v2916_v31 = vld [vmem:[%s3755_s1 + $0x2a0] sm:$0xff]   ;;  %v2923_v38 = vld [vmem:[%s3755_s1 + $0x230] sm:$0xff]  }
  0x22   :  { %2627 = vmatprep.subr.bf16.mxu1 %v2862_v39  ;;  %v2924_v39 = vld [vmem:[%s3755_s1 + $0x2b0] sm:$0xff]  }
  0x23   :  { %1155 = vmatmul.mubr.bf16.vlgmr.msra.gmra.mrb[0].mxu0 %v2322_v34  ;;  %v2919_v34 = vld [vmem:[%s3755_s1 + $0x228] sm:$0xff]  }
  0x24   :  { %1195 = vmatmul.mubr.bf16.vlgmr.msra.gmra.mrb[0].mxu1 %v2324_v36  ;;  %2606 = vmatpush3.bf16.msra.mxu0 %v2863_v40  ;;  %v2921_v36 = vld [vmem:[%s3755_s1 + $0x270] sm:$0xff]   ;;  %v2925_v40 = vld [vmem:[%s3755_s1 + $0x278] sm:$0xff]  }
  0x25   :  { %2628 = vmatpush3.bf16.msra.mxu1 %v2864_v41  ;;  %2607 = vmatprep.subr.bf16.mxu0 %v2865_v42  ;;  %v2926_v41 = vld [vmem:[%s3755_s1 + $0x2f8] sm:$0xff]  }
  0x26   :  { %2629 = vmatprep.subr.bf16.mxu1 %v2866_v43  ;;  %1234 = vmatprep.mubr.bf16.mxu0 %v2327_v8  ;;  %v2927_v42 = vld [vmem:[%s3755_s1 + $0x238] sm:$0xff]   ;;  %v2955_v8 = vld [vmem:[%s3755_s1 + $0x328] sm:$0xff]  }
  0x27   :  { %1274 = vmatprep.mubr.bf16.mxu1 %v2329_v11  ;;  %v2928_v43 = vld [vmem:[%s3755_s1 + $0x2b8] sm:$0xff]   ;;  %v2958_v11 = vld [vmem:[%s3755_s1 + $0x3f0] sm:$0xff]  }
  0x28   :  { %2608 = vmatpush3.bf16.msra.mxu0 %v2867_v44  ;;  %v31_v44 = vld [vmem:[%s3756_s0 + $0x20] sm:$0xff] }
  0x29   :  { %2630 = vmatpush3.bf16.msra.mxu1 %v2868_v45  ;;  %2609 = vmatprep.subr.bf16.mxu0 %v2869_v46  ;;  %v32_v45 = vld [vmem:[%s3756_s0 + $0x28] sm:$0xff]  ;;  %v2330_v46 = vcombine.low %v31_v44, %v31_v44 }
  0x2a   :  { %2631 = vmatprep.subr.bf16.mxu1 %v2870_v47  ;;  %v2331_v47 = vcombine.high %v31_v44, %v31_v44  ;;  %v2989_v44 = vld [vmem:[%s3757_s5 + $0x68] sm:$0xff]  }
  0x2c   :  { %2610 = vmatpush3.bf16.msra.mxu0 %v2871_v48  ;;  %v2332_v48 = vcombine.low %v32_v45, %v32_v45 }
  0x2d   :  { %2632 = vmatpush3.bf16.msra.mxu1 %v2872_v49  ;;  %2611 = vmatprep.subr.bf16.mxu0 %v2873_v50  ;;  %v2333_v49 = vcombine.high %v32_v45, %v32_v45  ;;  %v2933_v50 = vld [vmem:[%s3755_s1 + $0x340] sm:$0xff]   ;;  %v2990_v45 = vld [vmem:[%s3757_s5 + $0xe8] sm:$0xff]  }
  0x2e   :  { %2633 = vmatprep.subr.bf16.mxu1 %v2874_v51  ;;  %v2934_v51 = vld [vmem:[%s3755_s1 + $0x3c0] sm:$0xff]  }
  0x30   :  { %2612 = vmatpush3.bf16.msra.mxu0 %v2875_v52  ;;  %v2935_v52 = vld [vmem:[%s3755_s1 + $0x300] sm:$0xff]  }
  0x31   :  { %2634 = vmatpush3.bf16.msra.mxu1 %v2876_v53  ;;  %2613 = vmatprep.subr.bf16.mxu0 %v2877_v54  ;;  %v2936_v53 = vld [vmem:[%s3755_s1 + $0x380] sm:$0xff]   ;;  %v2937_v54 = vld [vmem:[%s3755_s1 + $0x348] sm:$0xff]  }
  0x32   :  { %2635 = vmatprep.subr.bf16.mxu1 %v2878_v55  ;;  %v2938_v55 = vld [vmem:[%s3755_s1 + $0x3c8] sm:$0xff]  }
  0x34   :  { %2614 = vmatpush3.bf16.msra.mxu0 %v2879_v56  ;;  %v2939_v56 = vld [vmem:[%s3755_s1 + $0x308] sm:$0xff]  }
  0x35   :  { %2636 = vmatpush3.bf16.msra.mxu1 %v2880_v57  ;;  %2615 = vmatprep.subr.bf16.mxu0 %v2881_v58  ;;  %v2940_v57 = vld [vmem:[%s3755_s1 + $0x388] sm:$0xff]   ;;  %v2941_v58 = vld [vmem:[%s3755_s1 + $0x350] sm:$0xff]  }
  0x36   :  { %2637 = vmatprep.subr.bf16.mxu1 %v2882_v59  ;;  %v2942_v59 = vld [vmem:[%s3755_s1 + $0x3d0] sm:$0xff]  }
  0x38   :  { %2616 = vmatpush3.bf16.msra.mxu0 %v2883_v60  ;;  %v2943_v60 = vld [vmem:[%s3755_s1 + $0x310] sm:$0xff]  }
  0x39   :  { %2638 = vmatpush3.bf16.msra.mxu1 %v2884_v61  ;;  %2617 = vmatprep.subr.bf16.mxu0 %v2885_v62  ;;  %v2944_v61 = vld [vmem:[%s3755_s1 + $0x390] sm:$0xff]   ;;  %v2945_v62 = vld [vmem:[%s3755_s1 + $0x358] sm:$0xff]  }
  0x3a   :  { %2639 = vmatprep.subr.bf16.mxu1 %v2886_v63  ;;  %v2946_v63 = vld [vmem:[%s3755_s1 + $0x3d8] sm:$0xff]  }
  0x3c   :  { %2618 = vmatpush3.bf16.msra.mxu0 %v2887_v0  ;;  %v2947_v0 = vld [vmem:[%s3755_s1 + $0x318] sm:$0xff]  }
  0x3d   :  { %2640 = vmatpush3.bf16.msra.mxu1 %v2888_v1  ;;  %2619 = vmatprep.subr.bf16.mxu0 %v2889_v2  ;;  %v2948_v1 = vld [vmem:[%s3755_s1 + $0x398] sm:$0xff]   ;;  %v2949_v2 = vld [vmem:[%s3755_s1 + $0x360] sm:$0xff]  }
  0x3e   :  { %2641 = vmatprep.subr.bf16.mxu1 %v2890_v3  ;;  %v2950_v3 = vld [vmem:[%s3755_s1 + $0x3e0] sm:$0xff]  }
  0x40   :  { %2620 = vmatpush3.bf16.msra.mxu0 %v2891_v4  ;;  %v2951_v4 = vld [vmem:[%s3755_s1 + $0x320] sm:$0xff]  }
  0x41   :  { %2642 = vmatpush3.bf16.msra.mxu1 %v2892_v5  ;;  %2649 = vmatprep.subr.bf16.mxu0 %v2897_v12  ;;  %v2952_v5 = vld [vmem:[%s3755_s1 + $0x3a0] sm:$0xff]   ;;  %v2959_v12 = vld [vmem:[%s3755_s1 + $0x330] sm:$0xff]  }
  0x42   :  { %2671 = vmatprep.subr.bf16.mxu1 %v2898_v13  ;;  %v2960_v13 = vld [vmem:[%s3755_s1 + $0x3b0] sm:$0xff]  }
  0x43   :  { %1235 = vmatmul.mubr.bf16.vlgmr.msra.gmra.mrb[4].mxu0 %v2326_v7  ;;  %v2954_v7 = vld [vmem:[%s3755_s1 + $0x3e8] sm:$0xff]  }
  0x44   :  { %1275 = vmatmul.mubr.bf16.vlgmr.msra.gmra.mrb[4].mxu1 %v2328_v10  ;;  %2650 = vmatpush3.bf16.msra.mxu0 %v2899_v14  ;;  %v2957_v10 = vld [vmem:[%s3755_s1 + $0x370] sm:$0xff]   ;;  %v2961_v14 = vld [vmem:[%s3755_s1 + $0x378] sm:$0xff]  }
  0x45   :  { %2672 = vmatpush3.bf16.msra.mxu1 %v2900_v15  ;;  %2651 = vmatprep.subr.bf16.mxu0 %v2901_v16  ;;  %v2962_v15 = vld [vmem:[%s3755_s1 + $0x3f8] sm:$0xff]  }
  0x46   :  { %2673 = vmatprep.subr.bf16.mxu1 %v2902_v17  ;;  %1314 = vmatprep.mubr.bf16.mxu0 %v2331_v47  ;;  %v2963_v16 = vld [vmem:[%s3755_s1 + $0x338] sm:$0xff]   ;;  %v2992_v47 = vld [vmem:[%s3757_s5 + $0xa8] sm:$0xff]  }
  0x47   :  { %1354 = vmatprep.mubr.bf16.mxu1 %v2333_v49  ;;  %v2964_v17 = vld [vmem:[%s3755_s1 + $0x3b8] sm:$0xff]   ;;  %v2994_v49 = vld [vmem:[%s3757_s5 + $0xf0] sm:$0xff]  }
  0x48   :  { %2652 = vmatpush3.bf16.msra.mxu0 %v2903_v18  ;;  %v33_v18 = vld [vmem:[%s3756_s0 + $0x30] sm:$0xff] }
  0x49   :  { %2674 = vmatpush3.bf16.msra.mxu1 %v2904_v19  ;;  %2653 = vmatprep.subr.bf16.mxu0 %v2905_v20  ;;  %v34_v19 = vld [vmem:[%s3756_s0 + $0x38] sm:$0xff]  ;;  %v2334_v20 = vcombine.low %v33_v18, %v33_v18 }
  0x4a   :  { %2675 = vmatprep.subr.bf16.mxu1 %v2906_v21  ;;  %v2335_v21 = vcombine.high %v33_v18, %v33_v18 }
  0x4c   :  { %2654 = vmatpush3.bf16.msra.mxu0 %v2907_v22  ;;  %v2336_v22 = vcombine.low %v34_v19, %v34_v19 }
  0x4d   :  { %2676 = vmatpush3.bf16.msra.mxu1 %v2908_v23  ;;  %2655 = vmatprep.subr.bf16.mxu0 %v2909_v24  ;;  %v2337_v23 = vcombine.high %v34_v19, %v34_v19  ;;  %v2969_v24 = vld [vmem:[%s3757_s5 + $0x40] sm:$0xff]  }
  0x4e   :  { %2677 = vmatprep.subr.bf16.mxu1 %v2910_v25  ;;  %v2970_v25 = vld [vmem:[%s3757_s5 + $0xc0] sm:$0xff]  }
  0x50   :  { %2656 = vmatpush3.bf16.msra.mxu0 %v2911_v26  ;;  %v2971_v26 = vld [vmem:[%s3757_s5] sm:$0xff]  }
  0x51   :  { %2678 = vmatpush3.bf16.msra.mxu1 %v2912_v27  ;;  %2657 = vmatprep.subr.bf16.mxu0 %v2913_v28  ;;  %v2972_v27 = vld [vmem:[%s3757_s5 + $0x80] sm:$0xff]   ;;  %v2973_v28 = vld [vmem:[%s3757_s5 + $0x48] sm:$0xff]  }
  0x52   :  { %2679 = vmatprep.subr.bf16.mxu1 %v2914_v29  ;;  %v2974_v29 = vld [vmem:[%s3757_s5 + $0xc8] sm:$0xff]  }
  0x54   :  { %2658 = vmatpush3.bf16.msra.mxu0 %v2915_v30  ;;  %v2975_v30 = vld [vmem:[%s3757_s5 + $0x8] sm:$0xff]  }
  0x55   :  { %2680 = vmatpush3.bf16.msra.mxu1 %v2916_v31  ;;  %2659 = vmatprep.subr.bf16.mxu0 %v2917_v32  ;;  %v2976_v31 = vld [vmem:[%s3757_s5 + $0x88] sm:$0xff]   ;;  %v2977_v32 = vld [vmem:[%s3757_s5 + $0x50] sm:$0xff]  }
  0x56   :  { %2681 = vmatprep.subr.bf16.mxu1 %v2918_v33  ;;  %v2978_v33 = vld [vmem:[%s3757_s5 + $0xd0] sm:$0xff]  }
  0x58   :  { %2660 = vmatpush3.bf16.msra.mxu0 %v2919_v34  ;;  %v2979_v34 = vld [vmem:[%s3757_s5 + $0x10] sm:$0xff]  }
  0x59   :  { %2682 = vmatpush3.bf16.msra.mxu1 %v2920_v35  ;;  %2661 = vmatprep.subr.bf16.mxu0 %v2921_v36  ;;  %v2980_v35 = vld [vmem:[%s3757_s5 + $0x90] sm:$0xff]   ;;  %v2981_v36 = vld [vmem:[%s3757_s5 + $0x58] sm:$0xff]  }
  0x5a   :  { %2683 = vmatprep.subr.bf16.mxu1 %v2922_v37  ;;  %v2982_v37 = vld [vmem:[%s3757_s5 + $0xd8] sm:$0xff]  }
  0x5c   :  { %2662 = vmatpush3.bf16.msra.mxu0 %v2923_v38  ;;  %v2983_v38 = vld [vmem:[%s3757_s5 + $0x18] sm:$0xff]  }
  0x5d   :  { %2684 = vmatpush3.bf16.msra.mxu1 %v2924_v39  ;;  %2663 = vmatprep.subr.bf16.mxu0 %v2925_v40  ;;  %v2984_v39 = vld [vmem:[%s3757_s5 + $0x98] sm:$0xff]   ;;  %v2985_v40 = vld [vmem:[%s3757_s5 + $0x60] sm:$0xff]  }
  0x5e   :  { %2685 = vmatprep.subr.bf16.mxu1 %v2926_v41  ;;  %v2986_v41 = vld [vmem:[%s3757_s5 + $0xe0] sm:$0xff]  }
  0x60   :  { %2664 = vmatpush3.bf16.msra.mxu0 %v2927_v42  ;;  %v2987_v42 = vld [vmem:[%s3757_s5 + $0x20] sm:$0xff]  }
  0x61   :  { %2686 = vmatpush3.bf16.msra.mxu1 %v2928_v43  ;;  %2693 = vmatprep.subr.bf16.mxu0 %v2933_v50  ;;  %v2988_v43 = vld [vmem:[%s3757_s5 + $0xa0] sm:$0xff]   ;;  %v2995_v50 = vld [vmem:[%s3757_s5 + $0x30] sm:$0xff]  }
  0x62   :  { %2715 = vmatprep.subr.bf16.mxu1 %v2934_v51  ;;  %v2996_v51 = vld [vmem:[%s3757_s5 + $0xb0] sm:$0xff]  }
  0x63   :  { %1315 = vmatmul.mubr.bf16.vlgmr.msra.gmra.mrb[8].mxu0 %v2330_v46  ;;  %v2991_v46 = vld [vmem:[%s3757_s5 + $0x28] sm:$0xff]  }
  0x64   :  { %1355 = vmatmul.mubr.bf16.vlgmr.msra.gmra.mrb[8].mxu1 %v2332_v48  ;;  %2694 = vmatpush3.bf16.msra.mxu0 %v2935_v52  ;;  %v2993_v48 = vld [vmem:[%s3757_s5 + $0x70] sm:$0xff]   ;;  %v2997_v52 = vld [vmem:[%s3757_s5 + $0x78] sm:$0xff]  }
  0x65   :  { %2716 = vmatpush3.bf16.msra.mxu1 %v2936_v53  ;;  %2695 = vmatprep.subr.bf16.mxu0 %v2937_v54  ;;  %v2998_v53 = vld [vmem:[%s3757_s5 + $0xf8] sm:$0xff]  }
  0x66   :  { %2717 = vmatprep.subr.bf16.mxu1 %v2938_v55  ;;  %1394 = vmatprep.mubr.bf16.mxu0 %v2335_v21  ;;  %v2999_v54 = vld [vmem:[%s3757_s5 + $0x38] sm:$0xff]  }
  0x67   :  { %1434 = vmatprep.mubr.bf16.mxu1 %v2337_v23  ;;  %v3000_v55 = vld [vmem:[%s3757_s5 + $0xb8] sm:$0xff]  }
  0x68   :  { %2696 = vmatpush3.bf16.msra.mxu0 %v2939_v56  ;;  %v3001_v56 = vld [vmem:[%s3757_s5 + $0x140] sm:$0xff]  }
  0x69   :  { %2718 = vmatpush3.bf16.msra.mxu1 %v2940_v57  ;;  %2697 = vmatprep.subr.bf16.mxu0 %v2941_v58  ;;  %v3002_v57 = vld [vmem:[%s3757_s5 + $0x1c0] sm:$0xff]  }
  0x6a   :  { %2719 = vmatprep.subr.bf16.mxu1 %v2942_v59  ;;  %v2321_v58 = vld [vmem:[%s3758_s2] ss:$0 sm:$0xff] }
  0x6c   :  { %2698 = vmatpush3.bf16.msra.mxu0 %v2943_v60 }
  0x6d   :  { %2720 = vmatpush3.bf16.msra.mxu1 %v2944_v61  ;;  %2699 = vmatprep.subr.bf16.mxu0 %v2945_v62 }
  0x6e   :  { %2721 = vmatprep.subr.bf16.mxu1 %v2946_v63 }
  0x70   :  { %2700 = vmatpush3.bf16.msra.mxu0 %v2947_v0 }
  0x71   :  { %2722 = vmatpush3.bf16.msra.mxu1 %v2948_v1  ;;  %2701 = vmatprep.subr.bf16.mxu0 %v2949_v2 }
  0x72   :  { %2723 = vmatprep.subr.bf16.mxu1 %v2950_v3 }
  0x74   :  { %2702 = vmatpush3.bf16.msra.mxu0 %v2951_v4 }
  0x75   :  { %2724 = vmatpush3.bf16.msra.mxu1 %v2952_v5  ;;  %2703 = vmatprep.subr.bf16.mxu0 %v2953_v6 }
  0x76   :  { %2725 = vmatprep.subr.bf16.mxu1 %v2954_v7 }
  0x78   :  { %2704 = vmatpush3.bf16.msra.mxu0 %v2955_v8 }
  0x79   :  { %2726 = vmatpush3.bf16.msra.mxu1 %v2956_v9  ;;  %2705 = vmatprep.subr.bf16.mxu0 %v2957_v10 }
  0x7a   :  { %2727 = vmatprep.subr.bf16.mxu1 %v2958_v11 }
  0x7c   :  { %2706 = vmatpush3.bf16.msra.mxu0 %v2959_v12 }
  0x7d   :  { %2728 = vmatpush3.bf16.msra.mxu1 %v2960_v13  ;;  %2707 = vmatprep.subr.bf16.mxu0 %v2961_v14 }
  0x7e   :  { %2729 = vmatprep.subr.bf16.mxu1 %v2962_v15 }
  0x80   :  { %2708 = vmatpush3.bf16.msra.mxu0 %v2963_v16 }
  0x81   :  { %2730 = vmatpush3.bf16.msra.mxu1 %v2964_v17  ;;  %2737 = vmatprep.subr.bf16.mxu0 %v2969_v24 }
  0x82   :  { %2759 = vmatprep.subr.bf16.mxu1 %v2970_v25 }
  0x83   :  { %1395 = vmatmul.mubr.bf16.vlgmr.msra.gmra.mrb[12].mxu0 %v2334_v20 }
  0x84   :  { %1435 = vmatmul.mubr.bf16.vlgmr.msra.gmra.mrb[12].mxu1 %v2336_v22  ;;  %2738 = vmatpush3.bf16.msra.mxu0 %v2971_v26 }
  0x85   :  { %2760 = vmatpush3.bf16.msra.mxu1 %v2972_v27  ;;  %2739 = vmatprep.subr.bf16.mxu0 %v2973_v28 }
  0x86   :  { %2761 = vmatprep.subr.bf16.mxu1 %v2974_v29 }
  0x88   :  { %2740 = vmatpush3.bf16.msra.mxu0 %v2975_v30 }
  0x89   :  { %2762 = vmatpush3.bf16.msra.mxu1 %v2976_v31  ;;  %2741 = vmatprep.subr.bf16.mxu0 %v2977_v32 }
  0x8a   :  { %2763 = vmatprep.subr.bf16.mxu1 %v2978_v33 }
  0x8c   :  { %2742 = vmatpush3.bf16.msra.mxu0 %v2979_v34 }
  0x8d   :  { %2764 = vmatpush3.bf16.msra.mxu1 %v2980_v35  ;;  %2743 = vmatprep.subr.bf16.mxu0 %v2981_v36 }
  0x8e   :  { %2765 = vmatprep.subr.bf16.mxu1 %v2982_v37 }
  0x90   :  { %2744 = vmatpush3.bf16.msra.mxu0 %v2983_v38 }
  0x91   :  { %2766 = vmatpush3.bf16.msra.mxu1 %v2984_v39  ;;  %2745 = vmatprep.subr.bf16.mxu0 %v2985_v40 }
  0x92   :  { %2767 = vmatprep.subr.bf16.mxu1 %v2986_v41 }
  0x94   :  { %2746 = vmatpush3.bf16.msra.mxu0 %v2987_v42  ;;  %v2469_v42 = vld [vmem:[%s3759_s3 + $0x1] ss:$0 sm:$0xff] }
  0x95   :  { %2768 = vmatpush3.bf16.msra.mxu1 %v2988_v43  ;;  %2747 = vmatprep.subr.bf16.mxu0 %v2989_v44  ;;  %v2471_v43 = vld [vmem:[%s3760_s4 + $0x1] ss:$0 sm:$0xff]  ;;  %v2477_v44 = vld [vmem:[%s3759_s3 + $0x3] ss:$0 sm:$0xff] }
  0x96   :  { %2769 = vmatprep.subr.bf16.mxu1 %v2990_v45  ;;  %v2479_v45 = vld [vmem:[%s3760_s4 + $0x3] ss:$0 sm:$0xff] }
  0x98   :  { %2748 = vmatpush3.bf16.msra.mxu0 %v2991_v46  ;;  %v2466_v46 = vld [vmem:[%s3759_s3] ss:$0 sm:$0xff] }
  0x99   :  { %2770 = vmatpush3.bf16.msra.mxu1 %v2992_v47  ;;  %2749 = vmatprep.subr.bf16.mxu0 %v2993_v48  ;;  %v2467_v48 = vld [vmem:[%s3760_s4] ss:$0 sm:$0xff] }
  0x9a   :  { %2771 = vmatprep.subr.bf16.mxu1 %v2994_v49  ;;  %v2473_v49 = vld [vmem:[%s3759_s3 + $0x2] ss:$0 sm:$0xff] }
  0x9c   :  { %2750 = vmatpush3.bf16.msra.mxu0 %v2995_v50  ;;  %v2475_v50 = vld [vmem:[%s3760_s4 + $0x2] ss:$0 sm:$0xff] }
  0x9d   :  { %2772 = vmatpush3.bf16.msra.mxu1 %v2996_v51  ;;  %2751 = vmatprep.subr.bf16.mxu0 %v2997_v52 }
  0x9e   :  { %2773 = vmatprep.subr.bf16.mxu1 %v2998_v53 }
  0xa0   :  { %2752 = vmatpush3.bf16.msra.mxu0 %v2999_v54 }
  0xa1   :  { %2774 = vmatpush3.bf16.msra.mxu1 %v3000_v55  ;;  %2781 = vmatprep.subr.bf16.mxu0 %v3001_v56 }
  0xa2   :  { %2803 = vmatprep.subr.bf16.mxu1 %v3002_v57 }
  0xf6   :  { %v2577_v59 = vpop.f32.mrb[0].mxu0 }
  0xf7   :  { %v2599_v60 = vpop.f32.mrb[0].mxu1  ;;  %v2578_v61 = vpop.f32.mrb[1].mxu0 }
  0xf8   :  { %v2600_v62 = vpop.f32.mrb[1].mxu1  ;;  %v2579_v63 = vadd.f32 %v2578_v61, %v2577_v59  ;;  %v2580_v1 = vpop.f32.mrb[2].mxu0  ;;  %v2485_v59 = vld [vmem:[%s3759_s3 + $0x5] ss:$0 sm:$0xff]  ;;  %v2493_v61 = vld [vmem:[%s3759_s3 + $0x7] ss:$0 sm:$0xff] }
  0xf9   :  { %v2601_v0 = vadd.f32 %v2600_v62, %v2599_v60  ;;  %v2602_v2 = vpop.f32.mrb[2].mxu1  ;;  %v2581_v3 = vpop.f32.mrb[3].mxu0  ;;  %v2487_v60 = vld [vmem:[%s3760_s4 + $0x5] ss:$0 sm:$0xff] }
  0xfa   :  { %v2603_v4 = vpop.f32.mrb[3].mxu1  ;;  %v1157_v5 = vadd.f32 %v2579_v63, %v2321_v58  ;;  %v2495_v2 = vld [vmem:[%s3760_s4 + $0x7] ss:$0 sm:$0xff] }
  0xfc   :  { %v1197_v6 = vadd.f32 %v2601_v0, %v1157_v5 }
 0x116   :  { %v2621_v7 = vpop.f32.mrb[4].mxu0 }
 0x117   :  { %v2643_v8 = vpop.f32.mrb[4].mxu1  ;;  %v2622_v9 = vpop.f32.mrb[5].mxu0 }
 0x118   :  { %v2644_v10 = vpop.f32.mrb[5].mxu1  ;;  %v2623_v11 = vadd.f32 %v2622_v9, %v2621_v7  ;;  %v2624_v13 = vpop.f32.mrb[6].mxu0 }
 0x119   :  { %v2645_v12 = vadd.f32 %v2644_v10, %v2643_v8  ;;  %v2646_v14 = vpop.f32.mrb[6].mxu1  ;;  %v2625_v15 = vpop.f32.mrb[7].mxu0 }
 0x11a   :  { %v2647_v16 = vpop.f32.mrb[7].mxu1  ;;  %v1237_v17 = vadd.f32 %v2623_v11, %v1197_v6 }
 0x11c   :  { %v1277_v18 = vadd.f32 %v2645_v12, %v1237_v17 }
 0x136   :  { %v2665_v19 = vpop.f32.mrb[8].mxu0 }
 0x137   :  { %v2687_v20 = vpop.f32.mrb[8].mxu1  ;;  %v2666_v21 = vpop.f32.mrb[9].mxu0 }
 0x138   :  { %v2667_v22 = vadd.f32 %v2666_v21, %v2665_v19  ;;  %v2688_v23 = vpop.f32.mrb[9].mxu1  ;;  %v2668_v24 = vpop.f32.mrb[10].mxu0 }
 0x139   :  { %v2689_v25 = vadd.f32 %v2688_v23, %v2687_v20  ;;  %v2690_v26 = vpop.f32.mrb[10].mxu1  ;;  %v2669_v27 = vpop.f32.mrb[11].mxu0 }
 0x13a   :  { %v1317_v28 = vadd.f32 %v2667_v22, %v1277_v18  ;;  %v2691_v29 = vpop.f32.mrb[11].mxu1  ;;  %v3004_v26 = vld [vmem:[%s3757_s5 + $0x180] sm:$0xff]  }
 0x13c   :  { %v1357_v30 = vadd.f32 %v2689_v25, %v1317_v28  ;;  %v3003_v25 = vld [vmem:[%s3757_s5 + $0x100] sm:$0xff]  }
 0x156   :  { %v2709_v31 = vpop.f32.mrb[12].mxu0 }
 0x157   :  { %v2731_v32 = vpop.f32.mrb[12].mxu1  ;;  %v2710_v33 = vpop.f32.mrb[13].mxu0 }
 0x158   :  { %v2711_v34 = vadd.f32 %v2710_v33, %v2709_v31  ;;  %v2732_v35 = vpop.f32.mrb[13].mxu1  ;;  %v2712_v36 = vpop.f32.mrb[14].mxu0  ;;  %v3005_v31 = vld [vmem:[%s3757_s5 + $0x148] sm:$0xff]  }
 0x159   :  { %v2733_v37 = vadd.f32 %v2732_v35, %v2731_v32  ;;  %v2734_v38 = vpop.f32.mrb[14].mxu1  ;;  %v2713_v39 = vpop.f32.mrb[15].mxu0  ;;  %v3006_v32 = vld [vmem:[%s3757_s5 + $0x1c8] sm:$0xff]  }
 0x15a   :  { %v1397_v40 = vadd.f32 %v2711_v34, %v1357_v30  ;;  %v2735_v41 = vpop.f32.mrb[15].mxu1  ;;  %v3007_v36 = vld [vmem:[%s3757_s5 + $0x108] sm:$0xff]   ;;  %v3009_v39 = vld [vmem:[%s3757_s5 + $0x150] sm:$0xff]  }
 0x15b   :  { %v3011_v41 = vld [vmem:[%s3757_s5 + $0x110] sm:$0xff]  }
 0x15c   :  { %v3605_v47 = vadd.f32 %v2733_v37, %v1397_v40  ;;  %v3008_v37 = vld [vmem:[%s3757_s5 + $0x188] sm:$0xff]   ;;  %v3010_v40 = vld [vmem:[%s3757_s5 + $0x1d0] sm:$0xff]  }
 0x15e   :  { %v1471_v51 = vsub.f32 %v3605_v47, %v2469_v42  ;;  %v1481_v52 = vsub.f32 %v2471_v43, %v3605_v47  ;;  %v1517_v53 = vsub.f32 %v3605_v47, %v2477_v44  ;;  %v1527_v54 = vsub.f32 %v2479_v45, %v3605_v47  ;;  %v3012_v42 = vld [vmem:[%s3757_s5 + $0x190] sm:$0xff]   ;;  %v3013_v43 = vld [vmem:[%s3757_s5 + $0x158] sm:$0xff]  }
 0x15f   :  { %v1449_v55 = vsub.f32 %v3605_v47, %v2466_v46  ;;  %v1458_v56 = vsub.f32 %v2467_v48, %v3605_v47  ;;  %v1494_v57 = vsub.f32 %v3605_v47, %v2473_v49  ;;  %v1504_v58 = vsub.f32 %v2475_v50, %v3605_v47  ;;  %v3014_v44 = vld [vmem:[%s3757_s5 + $0x1d8] sm:$0xff]   ;;  %v3017_v48 = vld [vmem:[%s3757_s5 + $0x160] sm:$0xff]  }
 0x160   :  { %v1472_v62 = vmax.f32 %v1471_v51, 0.0  ;;  %v1482_v63 = vmax.f32 %v1481_v52, 0.0  ;;  %v1518_v0 = vmax.f32 %v1517_v53, 0.0  ;;  %v1528_v1 = vmax.f32 %v1527_v54, 0.0  ;;  %v3015_v45 = vld [vmem:[%s3757_s5 + $0x118] sm:$0xff]   ;;  %v3018_v49 = vld [vmem:[%s3757_s5 + $0x1e0] sm:$0xff]  }
 0x161   :  { %v1450_v3 = vmax.f32 %v1449_v55, 0.0  ;;  %v1459_v4 = vmax.f32 %v1458_v56, 0.0  ;;  %v1495_v5 = vmax.f32 %v1494_v57, 0.0  ;;  %v1505_v6 = vmax.f32 %v1504_v58, 0.0  ;;  %v3016_v46 = vld [vmem:[%s3757_s5 + $0x198] sm:$0xff]   ;;  %v3019_v54 = vld [vmem:[%s3757_s5 + $0x120] sm:$0xff]  }
 0x162   :  { %v1483_v7 = vmul.f32 %v1482_v63, %v1472_v62  ;;  %v1529_v8 = vmul.f32 %v1528_v1, %v1518_v0  ;;  %v1563_v9 = vsub.f32 %v3605_v47, %v2485_v59  ;;  %v1573_v10 = vsub.f32 %v2487_v60, %v3605_v47  ;;  %v2481_v50 = vld [vmem:[%s3759_s3 + $0x4] ss:$0 sm:$0xff]  ;;  %v2489_v52 = vld [vmem:[%s3759_s3 + $0x6] ss:$0 sm:$0xff]  ;;  %v3021_v57 = vld [vmem:[%s3757_s5 + $0x168] sm:$0xff]  }
 0x163   :  { %v1460_v11 = vmul.f32 %v1459_v4, %v1450_v3  ;;  %v1506_v12 = vmul.f32 %v1505_v6, %v1495_v5  ;;  %v1609_v13 = vsub.f32 %v3605_v47, %v2493_v61  ;;  %v1619_v14 = vsub.f32 %v2495_v2, %v3605_v47  ;;  %v2483_v51 = vld [vmem:[%s3760_s4 + $0x4] ss:$0 sm:$0xff]  ;;  %v2491_v53 = vld [vmem:[%s3760_s4 + $0x6] ss:$0 sm:$0xff]  ;;  %v3022_v58 = vld [vmem:[%s3757_s5 + $0x1e8] sm:$0xff]  }
 0x164   :  { %v1484_v15 = vmul.f32 %v1483_v7, %v1483_v7  ;;  %v1530_v16 = vmul.f32 %v1529_v8, %v1529_v8  ;;  %v1564_v17 = vmax.f32 %v1563_v9, 0.0  ;;  %v1574_v18 = vmax.f32 %v1573_v10, 0.0  ;;  %v3020_v55 = vld [vmem:[%s3757_s5 + $0x1a0] sm:$0xff]   ;;  %v3023_v62 = vld [vmem:[%s3757_s5 + $0x128] sm:$0xff]   ;;  %v3025_v0 = vld [vmem:[%s3757_s5 + $0x170] sm:$0xff]  }
 0x165   :  { %v1461_v19 = vmul.f32 %v1460_v11, %v1460_v11  ;;  %v1507_v20 = vmul.f32 %v1506_v12, %v1506_v12  ;;  %v1610_v21 = vmax.f32 %v1609_v13, 0.0  ;;  %v1620_v22 = vmax.f32 %v1619_v14, 0.0  ;;  %v3024_v63 = vld [vmem:[%s3757_s5 + $0x1a8] sm:$0xff]   ;;  %v3027_v5 = vld [vmem:[%s3757_s5 + $0x130] sm:$0xff]   ;;  %v3029_v7 = vld [vmem:[%s3757_s5 + $0x178] sm:$0xff]  }
 0x166   :  { %v1485_v23 = vpack.c.bf16 %v1484_v15, %v1484_v15  ;;  %v1531_v24 = vpack.c.bf16 %v1530_v16, %v1530_v16  ;;  %v1575_v27 = vmul.f32 %v1574_v18, %v1564_v17  ;;  %v1540_v56 = vsub.f32 %v3605_v47, %v2481_v50  ;;  %v3028_v6 = vld [vmem:[%s3757_s5 + $0x1b0] sm:$0xff]   ;;  %v3030_v8 = vld [vmem:[%s3757_s5 + $0x1f8] sm:$0xff]  }
 0x167   :  { %v1462_v28 = vpack.c.bf16 %v1461_v19, %v1461_v19  ;;  %v1508_v29 = vpack.c.bf16 %v1507_v20, %v1507_v20  ;;  %v1621_v30 = vmul.f32 %v1620_v22, %v1610_v21  ;;  %v1550_v59 = vsub.f32 %v2483_v51, %v3605_v47  ;;  %v3031_v11 = vld [vmem:[%s3757_s5 + $0x138] sm:$0xff]   ;;  %v2496_v19 = vld [vmem:[%s3761_s6] ss:$0 sm:$0xff] }
 0x168   :  { %2175 = vmatprep.mubr.bf16.mxu0 %v1485_v23  ;;  %2215 = vmatprep.mubr.bf16.mxu1 %v1531_v24  ;;  %v1576_v33 = vmul.f32 %v1575_v27, %v1575_v27  ;;  %v1586_v60 = vsub.f32 %v3605_v47, %v2489_v52  ;;  %v1596_v61 = vsub.f32 %v2491_v53, %v3605_v47  ;;  %v3026_v47 = vld [vmem:[%s3757_s5 + $0x1f0] sm:$0xff]   ;;  %v1541_v1 = vmax.f32 %v1540_v56, 0.0  ;;  %v3032_v12 = vld [vmem:[%s3757_s5 + $0x1b8] sm:$0xff]  }
 0x169   :  { %2176 = vmatmul.mubr.bf16.vlgmr.msra.gmra.mrb[16].mxu0 %v1462_v28  ;;  %2216 = vmatmul.mubr.bf16.vlgmr.msra.gmra.mrb[16].mxu1 %v1508_v29  ;;  %v1622_v34 = vmul.f32 %v1621_v30, %v1621_v30  ;;  %v1551_v2 = vmax.f32 %v1550_v59, 0.0 }
 0x16a   :  { %2782 = vmatpush3.bf16.msra.mxu0 %v3003_v25  ;;  %2804 = vmatpush3.bf16.msra.mxu1 %v3004_v26  ;;  %v1577_v35 = vpack.c.bf16 %v1576_v33, %v1576_v33  ;;  %v1587_v3 = vmax.f32 %v1586_v60, 0.0  ;;  %v1597_v4 = vmax.f32 %v1596_v61, 0.0 }
 0x16b   :  { %v1623_v38 = vpack.c.bf16 %v1622_v34, %v1622_v34  ;;  %2783 = vmatprep.subr.bf16.mxu0 %v3005_v31  ;;  %2805 = vmatprep.subr.bf16.mxu1 %v3006_v32  ;;  %v1552_v9 = vmul.f32 %v1551_v2, %v1541_v1 }
 0x16c   :  { %2255 = vmatprep.mubr.bf16.mxu0 %v1577_v35  ;;  %v1598_v10 = vmul.f32 %v1597_v4, %v1587_v3 }
 0x16d   :  { %2295 = vmatprep.mubr.bf16.mxu1 %v1623_v38  ;;  %v1553_v13 = vmul.f32 %v1552_v9, %v1552_v9 }
 0x16e   :  { %2784 = vmatpush3.bf16.msra.mxu0 %v3007_v36  ;;  %2806 = vmatpush3.bf16.msra.mxu1 %v3008_v37  ;;  %v1599_v14 = vmul.f32 %v1598_v10, %v1598_v10 }
 0x16f   :  { %2785 = vmatprep.subr.bf16.mxu0 %v3009_v39  ;;  %2807 = vmatprep.subr.bf16.mxu1 %v3010_v40  ;;  %v1554_v15 = vpack.c.bf16 %v1553_v13, %v1553_v13 }
 0x170   :  { %v1600_v16 = vpack.c.bf16 %v1599_v14, %v1599_v14 }
 0x172   :  { %2786 = vmatpush3.bf16.msra.mxu0 %v3011_v41  ;;  %2808 = vmatpush3.bf16.msra.mxu1 %v3012_v42 }
 0x173   :  { %2787 = vmatprep.subr.bf16.mxu0 %v3013_v43  ;;  %2809 = vmatprep.subr.bf16.mxu1 %v3014_v44 }
 0x176   :  { %2788 = vmatpush3.bf16.msra.mxu0 %v3015_v45  ;;  %2810 = vmatpush3.bf16.msra.mxu1 %v3016_v46 }
 0x177   :  { %2789 = vmatprep.subr.bf16.mxu0 %v3017_v48  ;;  %2811 = vmatprep.subr.bf16.mxu1 %v3018_v49 }
 0x17a   :  { %2790 = vmatpush3.bf16.msra.mxu0 %v3019_v54  ;;  %2812 = vmatpush3.bf16.msra.mxu1 %v3020_v55 }
 0x17b   :  { %2791 = vmatprep.subr.bf16.mxu0 %v3021_v57  ;;  %2813 = vmatprep.subr.bf16.mxu1 %v3022_v58 }
 0x17e   :  { %2792 = vmatpush3.bf16.msra.mxu0 %v3023_v62  ;;  %2814 = vmatpush3.bf16.msra.mxu1 %v3024_v63 }
 0x17f   :  { %2793 = vmatprep.subr.bf16.mxu0 %v3025_v0  ;;  %2815 = vmatprep.subr.bf16.mxu1 %v3026_v47 }
 0x182   :  { %2794 = vmatpush3.bf16.msra.mxu0 %v3027_v5  ;;  %2816 = vmatpush3.bf16.msra.mxu1 %v3028_v6 }
 0x183   :  { %2795 = vmatprep.subr.bf16.mxu0 %v3029_v7  ;;  %2817 = vmatprep.subr.bf16.mxu1 %v3030_v8 }
 0x186   :  { %2796 = vmatpush3.bf16.msra.mxu0 %v3031_v11  ;;  %2818 = vmatpush3.bf16.msra.mxu1 %v3032_v12 }
 0x189   :  { %2256 = vmatmul.mubr.bf16.vlgmr.msra.gmra.mrb[20].mxu0 %v1554_v15  ;;  %2296 = vmatmul.mubr.bf16.vlgmr.msra.gmra.mrb[20].mxu1 %v1600_v16 }
 0x23c   :  { %v2753_v17 = vpop.f32.mrb[16].mxu0  ;;  %v2775_v18 = vpop.f32.mrb[16].mxu1 }
 0x23d   :  { %v2754_v20 = vpop.f32.mrb[17].mxu0  ;;  %v2776_v21 = vpop.f32.mrb[17].mxu1 }
 0x23e   :  { %v2755_v22 = vadd.f32 %v2754_v20, %v2753_v17  ;;  %v2777_v23 = vadd.f32 %v2776_v21, %v2775_v18  ;;  %v2756_v24 = vpop.f32.mrb[18].mxu0  ;;  %v2778_v25 = vpop.f32.mrb[18].mxu1 }
 0x23f   :  { %v2757_v26 = vpop.f32.mrb[19].mxu0  ;;  %v2779_v27 = vpop.f32.mrb[19].mxu1 }
 0x240   :  { %v2178_v28 = vadd.f32 %v2755_v22, %v2496_v19 }
 0x242   :  { %v2218_v29 = vadd.f32 %v2777_v23, %v2178_v28 }
 0x25c   :  { %v2797_v30 = vpop.f32.mrb[20].mxu0  ;;  %v2819_v31 = vpop.f32.mrb[20].mxu1 }
 0x25d   :  { %v2798_v32 = vpop.f32.mrb[21].mxu0  ;;  %v2820_v33 = vpop.f32.mrb[21].mxu1 }
 0x25e   :  { %v2799_v34 = vadd.f32 %v2798_v32, %v2797_v30  ;;  %v2821_v35 = vadd.f32 %v2820_v33, %v2819_v31  ;;  %v2800_v36 = vpop.f32.mrb[22].mxu0  ;;  %v2822_v37 = vpop.f32.mrb[22].mxu1 }
 0x25f   :  { %v2801_v38 = vpop.f32.mrb[23].mxu0  ;;  %v2823_v39 = vpop.f32.mrb[23].mxu1 }
 0x260   :  { %v2258_v40 = vadd.f32 %v2799_v34, %v2218_v29 }
 0x262   :  { %v2298_v41 = vadd.f32 %v2821_v35, %v2258_v40 }
 0x264   :  { %v2304_v42 = vsel %vm2303_vm0, %v2298_v41, -inf }
 0x265   :  { %2305 = vmax.xlane.f32.xlu0 %v2304_v42 }
 0x2f2   :  { %v2306_v43 = vpop.xlane.xlu0 %2305 }
 0x2f3   :  { %v2307_v44 = vsub.f32 %v2298_v41, %v2306_v43 }
 0x2f5   :  { %v2308_v45 = vmul.f32 1.442695, %v2307_v44 }
 0x2f7   :  { %3033 = vpow2.f32 %v2308_v45 }
 0x301   :  { %v3034_v46 = vpop.eup %3033 }
 0x302   :  { %v2310_v48 = vsel %vm2303_vm0, %v3034_v46, 0.0 }
 0x303   :  { %2311 = vadd.xlane.f32.xlu0 %v2310_v48 }
 0x390   :  { %v2312_v49 = vpop.xlane.xlu0 %2311 }
 0x391   :  { %3035 = vlog2.f32 %v2312_v49 }
 0x39b   :  { %v3036_v50 = vpop.eup %3035 }
 0x39c   :  { %v2314_v51 = vmul.f32 0.6931472, %v3036_v50 }
 0x39e   :  { %v2315_v52 = vsub.f32 %v2307_v44, %v2314_v51 }
 0x3a0   :  { %2316 = vst.msk [vmem:[%s3762_s7] sm:$0xff] %vm2303_vm0, %v2315_v52 }

// kernel: cnn_relukan_forward.2
= control target key start
LH: loop header
LB: loop body
LE: loop exit
PB: predicated region body
PF: predicated region fallthrough
CT: control target
= control target key end

     0   :  { %s7582_s28 = smov 126   ;;  %s7583_s29 = smov 127   ;;  %v13199_v6 = vmov 0   ;;  %vm59_vm0 = vcmask 1039360   ;;  %vm121_vm1 = vcmask 785408   ;;  %vm90_vm2 = vcmask 1031168   ;;  %s13191_s0 = inlined_call_operand.vmem [shape: f32[8,1024], index: 0, kind: input, shape index: {}]   ;;  %s13192_s1 = inlined_call_operand.vmem [shape: bf16[128,72], index: 1, kind: input, shape index: {}]   ;;  %s13193_s2 = inlined_call_operand.vmem [shape: f32[128,1], index: 2, kind: input, shape index: {}]   ;;  %s13194_s3 = inlined_call_operand.vmem [shape: bf16[860,256], index: 3, kind: input, shape index: {}]   ;;  %s13195_s4 = inlined_call_operand.vmem [shape: bf16[32,144], index: 4, kind: input, shape index: {}]   ;;  %s13196_s5 = inlined_call_operand.vmem [shape: f32[32,1], index: 5, kind: input, shape index: {}]   ;;  %s13197_s6 = inlined_call_operand.vmem [shape: bf16[205,64], index: 6, kind: input, shape index: {}]   ;;  %s13198_s7 = inlined_call_operand.vmem [shape: bf16[8,32,64], index: 7, kind: output, shape index: {}]  }
   0x1   :  { %v7638_v0 = vld [vmem:[%s13191_s0 + $0x8] sm:$0xff]  ;;  %v7643_v1 = vld [vmem:[%s13191_s0 + $0x10] sm:$0xff]  ;;  %v7652_v3 = vld [vmem:[%s13191_s0] sm:$0xff]  ;;  %s7584_s9 = smov 96   ;;  %s7585_s10 = smov 94   ;;  %557 = vmatprep.mubr.bf16.mxu1 %v13199_v6  ;;  %783 = vmatprep.mubr.bf16.mxu0 %v13199_v6  ;;  %vm183_vm3 = vcmask 769024  }
   0x2   :  { %v6395_v2 = vpack.i.bf16 %v7643_v1, %v7638_v0  ;;  %s7586_s11 = smov 95   ;;  %s7587_s12 = smov 63   ;;  %v7672_v4 = vld [vmem:[%s13191_s0 + $0x18] sm:$0xff]  ;;  %v7677_v5 = vld [vmem:[%s13191_s0 + $0x20] sm:$0xff]  ;;  %v6425_v7 = vpack.i.bf16 %v7638_v0, %v7652_v3  ;;  %6510 = vset.pattern.permute.xlu0 %v13199_v6  ;;  %6511 = vset.pattern.permute.xlu1 %v13199_v6  ;;  %v7703_v9 = vld [vmem:[%s13191_s0 + $0x28] sm:$0xff]  ;;  %vm152_vm4 = vcmask 777216  }
   0x3   :  { %s7588_s13 = smov 64   ;;  %s7590_s18 = smov 62   ;;  %v6435_v8 = vpack.i.bf16 %v7677_v5, %v7672_v4  ;;  %v7708_v10 = vld [vmem:[%s13191_s0 + $0x30] sm:$0xff]  ;;  %v34_v12 = vld [vmem:[%s13191_s0 + $0x38] sm:$0xff]  ;;  %v342_v13 = vld [vmem:[%s13193_s2] sm:$0xff]  ;;  %vm245_vm5 = vcmask 515072  }
   0x4   :  { %6396 = vrot.lane.b32.xlu1 %v6395_v2, %s7582_s28  ;;  %6391 = vrot.lane.b32.xlu0 %v6395_v2, %s7583_s29  ;;  %v6475_v11 = vpack.i.bf16 %v7708_v10, %v7703_v9  ;;  %v343_v14 = vld [vmem:[%s13193_s2 + $0x8] sm:$0xff]  ;;  %v344_v19 = vld [vmem:[%s13193_s2 + $0x10] sm:$0xff]  ;;  %vm214_vm6 = vcmask 523264   ;;  %vm276_vm7 = vcmask 506880   ;;  %vm503_vm8 = vcmask 1043456   ;;  %s7592_s20 = smov 111  }
   0x5   :  { %v345_v20 = vld [vmem:[%s13193_s2 + $0x18] sm:$0xff]  ;;  %v346_v31 = vld [vmem:[%s13193_s2 + $0x20] sm:$0xff]  ;;  %v347_v32 = vld [vmem:[%s13193_s2 + $0x28] sm:$0xff]  ;;  %vm478_vm9 = vcmask 588800   ;;  %vm3112_vm10 = vcmask 1045504   ;;  %vm3087_vm11 = vcmask 752640  }
   0x6   :  { %v348_v47 = vld [vmem:[%s13193_s2 + $0x30] sm:$0xff]  ;;  %v349_v48 = vld [vmem:[%s13193_s2 + $0x38] sm:$0xff]  ;;  %v350_v63 = vld [vmem:[%s13193_s2 + $0x40] sm:$0xff]  ;;  %vm4161_vm12 = vcmask 130048   ;;  %vm3763_vm13 = vcmask 916480   ;;  %vm3827_vm14 = vcmask 908288  }
   0x7   :  { %vm3891_vm15 = vcmask 900096  }
   0x8   :  { %6401 = vrot.lane.b32.xlu1 %v6395_v2, %s7584_s9  ;;  %43 = vrot.lane.b32.xlu0 %v7652_v3, %s7583_s29 }
   0xc   :  { %105 = vrot.lane.b32.xlu1 %v7652_v3, %s7584_s9  ;;  %74 = vrot.lane.b32.xlu0 %v7652_v3, %s7582_s28 }
  0x10   :  { %6411 = vrot.lane.b32.xlu1 %v6395_v2, %s7585_s10  ;;  %6406 = vrot.lane.b32.xlu0 %v6395_v2, %s7586_s11 }
  0x14   :  { %167 = vrot.lane.b32.xlu1 %v7652_v3, %s7585_s10  ;;  %136 = vrot.lane.b32.xlu0 %v7652_v3, %s7586_s11 }
  0x18   :  { %6421 = vrot.lane.b32.xlu1 %v6395_v2, %s7587_s12  ;;  %6416 = vrot.lane.b32.xlu0 %v6395_v2, %s7588_s13 }
  0x1c   :  { %229 = vrot.lane.b32.xlu1 %v7652_v3, %s7587_s12  ;;  %198 = vrot.lane.b32.xlu0 %v7652_v3, %s7588_s13 }
  0x20   :  { %264 = vrot.lane.b32.xlu1 %v7643_v1, %s7590_s18  ;;  %6426 = vrot.lane.b32.xlu0 %v6425_v7, %s7590_s18 }
  0x24   :  { %6436 = vrot.lane.b32.xlu1 %v6435_v8, %s7582_s28  ;;  %6431 = vrot.lane.b32.xlu0 %v6435_v8, %s7583_s29 }
  0x28   :  { %6446 = vrot.lane.b32.xlu1 %v6435_v8, %s7586_s11  ;;  %6441 = vrot.lane.b32.xlu0 %v6435_v8, %s7584_s9 }
  0x2c   :  { %6456 = vrot.lane.b32.xlu1 %v6435_v8, %s7588_s13  ;;  %6451 = vrot.lane.b32.xlu0 %v6435_v8, %s7585_s10 }
  0x30   :  { %6466 = vrot.lane.b32.xlu1 %v6435_v8, %s7590_s18  ;;  %6461 = vrot.lane.b32.xlu0 %v6435_v8, %s7587_s12 }
  0x34   :  { %6476 = vrot.lane.b32.xlu1 %v6475_v11, %s7582_s28  ;;  %6471 = vrot.lane.b32.xlu0 %v6475_v11, %s7583_s29 }
  0x38   :  { %6481 = vrot.lane.b32.xlu0 %v6475_v11, %s7584_s9  ;;  %6486 = vrot.lane.b32.xlu1 %v6475_v11, %s7586_s11 }
  0x3c   :  { %6491 = vrot.lane.b32.xlu0 %v6475_v11, %s7585_s10  ;;  %6496 = vrot.lane.b32.xlu1 %v6475_v11, %s7588_s13 }
  0x40   :  { %6501 = vrot.lane.b32.xlu0 %v6475_v11, %s7587_s12  ;;  %6506 = vrot.lane.b32.xlu1 %v6475_v11, %s7590_s18 }
  0x44   :  { %57 = vrot.lane.b32.xlu0 %v34_v12, %s7583_s29  ;;  %88 = vrot.lane.b32.xlu1 %v34_v12, %s7582_s28 }
  0x48   :  { %119 = vrot.lane.b32.xlu0 %v34_v12, %s7584_s9  ;;  %150 = vrot.lane.b32.xlu1 %v34_v12, %s7586_s11 }
  0x4c   :  { %181 = vrot.lane.b32.xlu0 %v34_v12, %s7585_s10  ;;  %212 = vrot.lane.b32.xlu1 %v34_v12, %s7588_s13 }
  0x50   :  { %243 = vrot.lane.b32.xlu0 %v34_v12, %s7587_s12  ;;  %274 = vrot.lane.b32.xlu1 %v34_v12, %s7590_s18 }
  0x54   :  { %360 = vperm.xlu0 %6510, %v342_v13   ;;  %365 = vperm.xlu1 %6511, %v343_v14  }
  0x58   :  { %370 = vperm.xlu1 %6511, %v344_v19   ;;  %375 = vperm.xlu0 %6510, %v345_v20  }
  0x5c   :  { %380 = vperm.xlu1 %6511, %v346_v31   ;;  %385 = vperm.xlu0 %6510, %v347_v32  }
  0x60   :  { %390 = vperm.xlu1 %6511, %v348_v47   ;;  %395 = vperm.xlu0 %6510, %v349_v48  }
  0x64   :  { %400 = vperm.xlu1 %6511, %v350_v63  }
  0x76   :  { %v7739_v15 = vpop.permute.xlu1 %6396  ;;  %v7741_v16 = vpop.permute.xlu0 %6391 }
  0x77   :  { %v6394_v17 = vunpack.i.h.bf16 %v7741_v16  ;;  %v6393_v18 = vunpack.i.l.bf16 %v7741_v16  ;;  %v6399_v21 = vunpack.i.h.bf16 %v7739_v15  ;;  %v6398_v22 = vunpack.i.l.bf16 %v7739_v15 }
  0x79   :  { %v61_v23 = vsel %vm59_vm0, %v6393_v18, %v6394_v17  ;;  %v92_v33 = vsel %vm90_vm2, %v6398_v22, %v6399_v21 }
  0x7a   :  { %v7756_v24 = vpop.permute.xlu1 %6401  ;;  %v44_v25 = vpop.permute.xlu0 %43  ;;  %v308_v26 = vpack.c.bf16 %v61_v23, %v7638_v0  ;;  %v351_v0 = vld [vmem:[%s13193_s2 + $0x48] sm:$0xff]  ;;  %v352_v23 = vld [vmem:[%s13193_s2 + $0x50] sm:$0xff] }
  0x7b   :  { %v6404_v27 = vunpack.i.h.bf16 %v7756_v24  ;;  %v6403_v28 = vunpack.i.l.bf16 %v7756_v24  ;;  %v60_v29 = vsel %vm59_vm0, %v44_v25, %v6393_v18  ;;  %405 = vperm.xlu0 %6510, %v351_v0   ;;  %v353_v25 = vld [vmem:[%s13193_s2 + $0x58] sm:$0xff]  ;;  %410 = vperm.xlu1 %6511, %v352_v23  }
  0x7c   :  { %525 = vmatprep.subr.bf16.mxu1 %v308_v26  ;;  %v307_v30 = vpack.c.bf16 %v60_v29, %v7652_v3 }
  0x7d   :  { %v123_v34 = vsel %vm121_vm1, %v6403_v28, %v6404_v27 }
  0x7e   :  { %v106_v35 = vpop.permute.xlu1 %105  ;;  %526 = vmatpush1.bf16.msra.mxu1 %v307_v30  ;;  %v75_v36 = vpop.permute.xlu0 %74  ;;  %v315_v37 = vpack.c.bf16 %v123_v34, %v92_v33 }
  0x7f   :  { %v122_v38 = vsel %vm121_vm1, %v106_v35, %v6403_v28  ;;  %v91_v39 = vsel %vm90_vm2, %v75_v36, %v6398_v22  ;;  %415 = vperm.xlu0 %6510, %v353_v25   ;;  %v354_v36 = vld [vmem:[%s13193_s2 + $0x60] sm:$0xff] }
  0x80   :  { %v314_v40 = vpack.c.bf16 %v122_v38, %v91_v39  ;;  %527 = vmatprep.subr.bf16.mxu1 %v315_v37  ;;  %v355_v37 = vld [vmem:[%s13193_s2 + $0x68] sm:$0xff]  ;;  %v7850_v39 = vld [vmem:[%s13192_s1] sm:$0xff]   ;;  %420 = vperm.xlu1 %6511, %v354_v36  }
  0x82   :  { %v7777_v41 = vpop.permute.xlu1 %6411  ;;  %528 = vmatpush1.bf16.msra.mxu1 %v314_v40  ;;  %v7779_v42 = vpop.permute.xlu0 %6406 }
  0x83   :  { %v6414_v43 = vunpack.i.h.bf16 %v7777_v41  ;;  %v6413_v44 = vunpack.i.l.bf16 %v7777_v41  ;;  %v6409_v45 = vunpack.i.h.bf16 %v7779_v42  ;;  %v6408_v46 = vunpack.i.l.bf16 %v7779_v42  ;;  %425 = vperm.xlu0 %6510, %v355_v37  }
  0x85   :  { %v154_v49 = vsel %vm152_vm4, %v6408_v46, %v6409_v45  ;;  %v185_v50 = vsel %vm183_vm3, %v6413_v44, %v6414_v43 }
  0x86   :  { %v168_v51 = vpop.permute.xlu1 %167  ;;  %v137_v52 = vpop.permute.xlu0 %136  ;;  %v322_v53 = vpack.c.bf16 %v185_v50, %v154_v49 }
  0x87   :  { %v184_v54 = vsel %vm183_vm3, %v168_v51, %v6413_v44  ;;  %v153_v55 = vsel %vm152_vm4, %v137_v52, %v6408_v46 }
  0x88   :  { %v321_v56 = vpack.c.bf16 %v184_v54, %v153_v55  ;;  %529 = vmatprep.subr.bf16.mxu1 %v322_v53 }
  0x8a   :  { %v7799_v57 = vpop.permute.xlu1 %6421  ;;  %v7801_v58 = vpop.permute.xlu0 %6416  ;;  %530 = vmatpush1.bf16.msra.mxu1 %v321_v56 }
  0x8b   :  { %v6424_v59 = vunpack.i.h.bf16 %v7799_v57  ;;  %v6423_v60 = vunpack.i.l.bf16 %v7799_v57  ;;  %v6419_v61 = vunpack.i.h.bf16 %v7801_v58  ;;  %v6418_v62 = vunpack.i.l.bf16 %v7801_v58 }
  0x8d   :  { %v216_v2 = vsel %vm214_vm6, %v6418_v62, %v6419_v61  ;;  %v247_v3 = vsel %vm245_vm5, %v6423_v60, %v6424_v59 }
  0x8e   :  { %v230_v7 = vpop.permute.xlu1 %229  ;;  %v199_v8 = vpop.permute.xlu0 %198  ;;  %v329_v11 = vpack.c.bf16 %v247_v3, %v216_v2  ;;  %v7904_v3 = vld [vmem:[%s13192_s1 + $0x8] sm:$0xff]  }
  0x8f   :  { %v246_v12 = vsel %vm245_vm5, %v230_v7, %v6423_v60  ;;  %v215_v13 = vsel %vm214_vm6, %v199_v8, %v6418_v62 }
  0x90   :  { %v328_v14 = vpack.c.bf16 %v246_v12, %v215_v13  ;;  %531 = vmatprep.subr.bf16.mxu1 %v329_v11 }
  0x92   :  { %v7821_v18 = vpop.permute.xlu1 %264  ;;  %v6427_v19 = vpop.permute.xlu0 %6426  ;;  %532 = vmatpush1.bf16.msra.mxu1 %v328_v14 }
  0x93   :  { %v6429_v20 = vunpack.i.h.bf16 %v6427_v19  ;;  %v6428_v22 = vunpack.i.l.bf16 %v6427_v19 }
  0x95   :  { %v278_v26 = vsel %vm276_vm7, %v6429_v20, %v7821_v18  ;;  %v277_v28 = vsel %vm276_vm7, %v6428_v22, %v6429_v20 }
  0x96   :  { %v7832_v29 = vpop.permute.xlu1 %6436  ;;  %v7834_v30 = vpop.permute.xlu0 %6431  ;;  %v336_v31 = vpack.c.bf16 %v278_v26, %v278_v26  ;;  %v335_v32 = vpack.c.bf16 %v277_v28, %v277_v28 }
  0x97   :  { %v6439_v33 = vunpack.i.h.bf16 %v7832_v29  ;;  %v6434_v34 = vunpack.i.h.bf16 %v7834_v30  ;;  %v6433_v35 = vunpack.i.l.bf16 %v7834_v30  ;;  %v6438_v40 = vunpack.i.l.bf16 %v7832_v29 }
  0x98   :  { %5948 = vmatprep.subr.msk.bf16.mxu1 %vm503_vm8, %v336_v31  ;;  %v505_v38 = vsel %vm503_vm8, %v335_v32, 0 }
  0x99   :  { %v62_v44 = vsel %vm59_vm0, %v6394_v17, %v6433_v35  ;;  %534 = vmatpush1.bf16.msra.mxu1 %v505_v38  ;;  %v63_v46 = vsel %vm59_vm0, %v6433_v35, %v6434_v34  ;;  %v94_v52 = vsel %vm90_vm2, %v6438_v40, %v6439_v33  ;;  %v93_v53 = vsel %vm90_vm2, %v6399_v21, %v6438_v40  ;;  %v7954_v38 = vld [vmem:[%s13192_s1 + $0x10] sm:$0xff]  }
  0x9a   :  { %v7859_v47 = vpop.permute.xlu1 %6446  ;;  %v7861_v48 = vpop.permute.xlu0 %6441  ;;  %v310_v49 = vpack.c.bf16 %v63_v46, %v7672_v4  ;;  %v309_v50 = vpack.c.bf16 %v62_v44, %v7643_v1  ;;  %v356_v1 = vld [vmem:[%s13193_s2 + $0x70] sm:$0xff]  ;;  %v357_v4 = vld [vmem:[%s13193_s2 + $0x78] sm:$0xff]  ;;  %s7593_s2 = smov 110  }
  0x9b   :  { %v6449_v16 = vunpack.i.h.bf16 %v7859_v47  ;;  %v6444_v17 = vunpack.i.h.bf16 %v7861_v48  ;;  %v6443_v51 = vunpack.i.l.bf16 %v7861_v48  ;;  %v6448_v54 = vunpack.i.l.bf16 %v7859_v47  ;;  %430 = vperm.xlu1 %6511, %v356_v1   ;;  %435 = vperm.xlu0 %6510, %v357_v4  }
  0x9c   :  { %5949 = vmatmul.mubr.msk.bf16.vlgmr.msra.gmra.mrb[0].mxu1 %vm478_vm9, %v7850_v39  ;;  %638 = vmatprep.subr.bf16.mxu1 %v310_v49 }
  0x9d   :  { %v124_v55 = vsel %vm121_vm1, %v6404_v27, %v6443_v51  ;;  %639 = vmatpush1.bf16.msra.mxu1 %v309_v50  ;;  %v125_v56 = vsel %vm121_vm1, %v6443_v51, %v6444_v17  ;;  %567 = vmatprep.mubr.bf16.mxu1 %v13199_v6  ;;  %v156_v0 = vsel %vm152_vm4, %v6448_v54, %v6449_v16 }
  0x9e   :  { %v7890_v60 = vpop.permute.xlu1 %6456  ;;  %v7892_v62 = vpop.permute.xlu0 %6451  ;;  %v317_v15 = vpack.c.bf16 %v125_v56, %v94_v52  ;;  %v316_v63 = vpack.c.bf16 %v124_v55, %v93_v53  ;;  %v155_v7 = vsel %vm152_vm4, %v6409_v45, %v6448_v54 }
  0x9f   :  { %v6459_v21 = vunpack.i.h.bf16 %v7890_v60  ;;  %v6454_v24 = vunpack.i.h.bf16 %v7892_v62  ;;  %v6453_v27 = vunpack.i.l.bf16 %v7892_v62  ;;  %v6458_v2 = vunpack.i.l.bf16 %v7890_v60 }
  0xa0   :  { %640 = vmatprep.subr.bf16.mxu1 %v317_v15 }
  0xa1   :  { %v186_v8 = vsel %vm183_vm3, %v6414_v43, %v6453_v27  ;;  %641 = vmatpush1.bf16.msra.mxu1 %v316_v63  ;;  %v187_v11 = vsel %vm183_vm3, %v6453_v27, %v6454_v24  ;;  %v218_v42 = vsel %vm214_vm6, %v6458_v2, %v6459_v21  ;;  %v217_v22 = vsel %vm214_vm6, %v6419_v61, %v6458_v2  ;;  %v8002_v2 = vld [vmem:[%s13192_s1 + $0x18] sm:$0xff]  }
  0xa2   :  { %v7915_v12 = vpop.permute.xlu1 %6466  ;;  %v7917_v13 = vpop.permute.xlu0 %6461  ;;  %v324_v14 = vpack.c.bf16 %v187_v11, %v156_v0  ;;  %v323_v19 = vpack.c.bf16 %v186_v8, %v155_v7 }
  0xa3   :  { %v6469_v45 = vunpack.i.h.bf16 %v7915_v12  ;;  %v6468_v41 = vunpack.i.l.bf16 %v7915_v12  ;;  %v6464_v43 = vunpack.i.h.bf16 %v7917_v13  ;;  %v6463_v20 = vunpack.i.l.bf16 %v7917_v13 }
  0xa4   :  { %5950 = vmatmul.mubr.msk.bf16.gmra.mrb[4].mxu1 %vm478_vm9, %v7904_v3  ;;  %642 = vmatprep.subr.bf16.mxu1 %v324_v14 }
  0xa5   :  { %v248_v23 = vsel %vm245_vm5, %v6424_v59, %v6463_v20  ;;  %643 = vmatpush1.bf16.msra.mxu1 %v323_v19  ;;  %v249_v25 = vsel %vm245_vm5, %v6463_v20, %v6464_v43  ;;  %577 = vmatprep.mubr.bf16.mxu1 %v13199_v6  ;;  %v280_v58 = vsel %vm276_vm7, %v6468_v41, %v6469_v45 }
  0xa6   :  { %v7941_v61 = vpop.permute.xlu1 %6476  ;;  %v7943_v26 = vpop.permute.xlu0 %6471  ;;  %v331_v28 = vpack.c.bf16 %v249_v25, %v218_v42  ;;  %v330_v31 = vpack.c.bf16 %v248_v23, %v217_v22  ;;  %v338_v57 = vpack.c.bf16 %v280_v58, %v280_v58  ;;  %v279_v59 = vsel %vm276_vm7, %v7821_v18, %v6468_v41 }
  0xa7   :  { %v6479_v32 = vunpack.i.h.bf16 %v7941_v61  ;;  %v6478_v35 = vunpack.i.l.bf16 %v7941_v61  ;;  %v6474_v36 = vunpack.i.h.bf16 %v7943_v26  ;;  %v6473_v37 = vunpack.i.l.bf16 %v7943_v26 }
  0xa8   :  { %644 = vmatprep.subr.bf16.mxu1 %v331_v28  ;;  %v337_v40 = vpack.c.bf16 %v279_v59, %v279_v59 }
  0xa9   :  { %645 = vmatpush1.bf16.msra.mxu1 %v330_v31  ;;  %v65_v18 = vsel %vm59_vm0, %v6473_v37, %v6474_v36  ;;  %v64_v44 = vsel %vm59_vm0, %v6434_v34, %v6473_v37  ;;  %v96_v52 = vsel %vm90_vm2, %v6478_v35, %v6479_v32  ;;  %v95_v30 = vsel %vm90_vm2, %v6439_v33, %v6478_v35 }
  0xaa   :  { %v7962_v46 = vpop.permute.xlu0 %6481  ;;  %5957 = vmatprep.subr.msk.bf16.mxu1 %vm503_vm8, %v338_v57  ;;  %v312_v49 = vpack.c.bf16 %v65_v18, %v7703_v9  ;;  %v311_v50 = vpack.c.bf16 %v64_v44, %v7677_v5  ;;  %v7967_v51 = vpop.permute.xlu1 %6486  ;;  %v511_v5 = vsel %vm503_vm8, %v337_v40, 0 }
  0xab   :  { %v6484_v34 = vunpack.i.h.bf16 %v7962_v46  ;;  %v6483_v1 = vunpack.i.l.bf16 %v7962_v46  ;;  %v6489_v4 = vunpack.i.h.bf16 %v7967_v51  ;;  %v6488_v9 = vunpack.i.l.bf16 %v7967_v51 }
  0xac   :  { %5951 = vmatmul.mubr.msk.bf16.gmra.mrb[8].mxu1 %vm478_vm9, %v7954_v38  ;;  %751 = vmatprep.subr.bf16.mxu0 %v312_v49 }
  0xad   :  { %647 = vmatpush1.bf16.msra.mxu1 %v511_v5  ;;  %752 = vmatpush1.bf16.msra.mxu0 %v311_v50  ;;  %v127_v29 = vsel %vm121_vm1, %v6483_v1, %v6484_v34  ;;  %v126_v33 = vsel %vm121_vm1, %v6444_v17, %v6483_v1  ;;  %v158_v15 = vsel %vm152_vm4, %v6488_v9, %v6489_v4  ;;  %v7398_v50 = vld [vmem:[%s13192_s1 + $0x30] sm:$0xff]  }
  0xae   :  { %v7988_v53 = vpop.permute.xlu0 %6491  ;;  %v319_v54 = vpack.c.bf16 %v127_v29, %v96_v52  ;;  %v318_v55 = vpack.c.bf16 %v126_v33, %v95_v30  ;;  %v6497_v56 = vpop.permute.xlu1 %6496  ;;  %587 = vmatprep.mubr.bf16.mxu1 %v13199_v6  ;;  %v157_v63 = vsel %vm152_vm4, %v6449_v16, %v6488_v9  ;;  %v7399_v52 = vld [vmem:[%s13192_s1 + $0x38] sm:$0xff]  }
  0xaf   :  { %v6494_v27 = vunpack.i.h.bf16 %v7988_v53  ;;  %v6493_v48 = vunpack.i.l.bf16 %v7988_v53  ;;  %v6499_v17 = vunpack.i.h.bf16 %v6497_v56  ;;  %v6498_v0 = vunpack.i.l.bf16 %v6497_v56 }
  0xb0   :  { %753 = vmatprep.subr.bf16.mxu0 %v319_v54 }
  0xb1   :  { %754 = vmatpush1.bf16.msra.mxu0 %v318_v55  ;;  %v189_v7 = vsel %vm183_vm3, %v6493_v48, %v6494_v27  ;;  %v188_v47 = vsel %vm183_vm3, %v6454_v24, %v6493_v48  ;;  %v220_v19 = vsel %vm214_vm6, %v6498_v0, %v6499_v17  ;;  %v219_v42 = vsel %vm214_vm6, %v6459_v21, %v6498_v0 }
  0xb2   :  { %v6502_v16 = vpop.permute.xlu0 %6501  ;;  %v326_v8 = vpack.c.bf16 %v189_v7, %v158_v15  ;;  %v325_v11 = vpack.c.bf16 %v188_v47, %v157_v63  ;;  %v8010_v14 = vpop.permute.xlu1 %6506 }
  0xb3   :  { %v6504_v41 = vunpack.i.h.bf16 %v6502_v16  ;;  %v6503_v20 = vunpack.i.l.bf16 %v6502_v16  ;;  %v6509_v22 = vunpack.i.h.bf16 %v8010_v14  ;;  %v6508_v23 = vunpack.i.l.bf16 %v8010_v14 }
  0xb4   :  { %5952 = vmatmul.mubr.msk.bf16.gmra.mrb[12].mxu1 %vm478_vm9, %v8002_v2  ;;  %755 = vmatprep.subr.bf16.mxu0 %v326_v8 }
  0xb5   :  { %756 = vmatpush1.bf16.msra.mxu0 %v325_v11  ;;  %v251_v62 = vsel %vm245_vm5, %v6503_v20, %v6504_v41  ;;  %v250_v24 = vsel %vm245_vm5, %v6464_v43, %v6503_v20  ;;  %597 = vmatprep.mubr.bf16.mxu1 %v13199_v6  ;;  %v282_v60 = vsel %vm276_vm7, %v6508_v23, %v6509_v22  ;;  %v8037_v43 = vld [vmem:[%s13192_s1 + $0x20] sm:$0xff]  }
  0xb6   :  { %v333_v21 = vpack.c.bf16 %v251_v62, %v220_v19  ;;  %v332_v25 = vpack.c.bf16 %v250_v24, %v219_v42  ;;  %v340_v58 = vpack.c.bf16 %v282_v60, %v282_v60  ;;  %v281_v28 = vsel %vm276_vm7, %v6469_v45, %v6508_v23  ;;  %v58_v31 = vpop.permute.xlu0 %57  ;;  %v89_v57 = vpop.permute.xlu1 %88 }
  0xb7   :  { %v339_v59 = vpack.c.bf16 %v281_v28, %v281_v28  ;;  %v66_v13 = vsel %vm59_vm0, %v6474_v36, %v58_v31  ;;  %v97_v30 = vsel %vm90_vm2, %v6479_v32, %v89_v57 }
  0xb8   :  { %757 = vmatprep.subr.bf16.mxu0 %v333_v21  ;;  %v313_v35 = vpack.c.bf16 %v66_v13, %v7708_v10  ;;  %v8050_v10 = vld [vmem:[%s13192_s1 + $0x28] sm:$0xff]  }
  0xb9   :  { %758 = vmatpush1.bf16.msra.mxu0 %v332_v25  ;;  %v517_v12 = vsel %vm503_vm8, %v339_v59, 0 }
  0xba   :  { %5966 = vmatprep.subr.msk.bf16.mxu0 %vm503_vm8, %v340_v58  ;;  %v120_v45 = vpop.permute.xlu0 %119  ;;  %6254 = vmatprep.subr.bf16.mxu1 %v313_v35  ;;  %v151_v37 = vpop.permute.xlu1 %150 }
  0xbb   :  { %v128_v1 = vsel %vm121_vm1, %v6484_v34, %v120_v45  ;;  %v159_v5 = vsel %vm152_vm4, %v6489_v4, %v151_v37 }
  0xbc   :  { %5953 = vmatmul.mubr.msk.bf16.gmra.mrb[16].mxu1 %vm478_vm9, %v8037_v43  ;;  %v320_v9 = vpack.c.bf16 %v128_v1, %v97_v30 }
  0xbd   :  { %760 = vmatpush1.bf16.msra.mxu0 %v517_v12  ;;  %607 = vmatprep.mubr.bf16.mxu1 %v13199_v6 }
  0xbe   :  { %v182_v26 = vpop.permute.xlu0 %181  ;;  %v213_v36 = vpop.permute.xlu1 %212 }
  0xbf   :  { %v221_v40 = vsel %vm214_vm6, %v6499_v17, %v213_v36  ;;  %v190_v61 = vsel %vm183_vm3, %v6494_v27, %v182_v26 }
  0xc0   :  { %5967 = vmatmul.mubr.msk.bf16.vlgmr.msra.gmra.mrb[0].mxu0 %vm478_vm9, %v7850_v39  ;;  %v327_v32 = vpack.c.bf16 %v190_v61, %v159_v5 }
  0xc1   :  { %793 = vmatprep.mubr.bf16.mxu0 %v13199_v6 }
  0xc2   :  { %v244_v18 = vpop.permute.xlu0 %243  ;;  %v275_v46 = vpop.permute.xlu1 %274 }
  0xc3   :  { %v252_v44 = vsel %vm245_vm5, %v6504_v41, %v244_v18  ;;  %v283_v51 = vsel %vm276_vm7, %v6509_v22, %v275_v46 }
  0xc4   :  { %5954 = vmatmul.mubr.msk.bf16.gmra.mrb[20].mxu1 %vm478_vm9, %v8050_v10  ;;  %v334_v49 = vpack.c.bf16 %v252_v44, %v221_v40  ;;  %v341_v34 = vpack.c.bf16 %v283_v51, %v283_v51 }
  0xc5   :  { %617 = vmatprep.mubr.bf16.mxu1 %v13199_v6 }
  0xc6   :  { %v523_v4 = vsel %vm503_vm8, %v341_v34, 0 }
  0xc8   :  { %5968 = vmatmul.mubr.msk.bf16.gmra.mrb[4].mxu0 %vm478_vm9, %v7904_v3 }
  0xc9   :  { %803 = vmatprep.mubr.bf16.mxu0 %v13199_v6 }
  0xcc   :  { %5955 = vmatmul.mubr.msk.bf16.gmra.mrb[24].mxu1 %vm478_vm9, %v7398_v50 }
  0xcd   :  { %627 = vmatprep.mubr.bf16.mxu1 %v13199_v6 }
  0xd0   :  { %5969 = vmatmul.mubr.msk.bf16.gmra.mrb[8].mxu0 %vm478_vm9, %v7954_v38 }
  0xd1   :  { %813 = vmatprep.mubr.bf16.mxu0 %v13199_v6 }
  0xd4   :  { %5956 = vmatmul.mubr.msk.bf16.gmra.mrb[28].mxu1 %vm478_vm9, %v7399_v52 }
  0xd5   :  { %670 = vmatprep.mubr.bf16.mxu1 %v13199_v6 }
  0xd8   :  { %5970 = vmatmul.mubr.msk.bf16.gmra.mrb[12].mxu0 %vm478_vm9, %v8002_v2 }
  0xd9   :  { %823 = vmatprep.mubr.bf16.mxu0 %v13199_v6 }
  0xdc   :  { %5958 = vmatmul.mubr.msk.bf16.vlgmr.msra.gmra.mrb[32].mxu1 %vm478_vm9, %v7850_v39 }
  0xdd   :  { %680 = vmatprep.mubr.bf16.mxu1 %v13199_v6  ;;  %6255 = vmatpush3.bf16.msra.mxu1 %v313_v35 }
  0xde   :  { %6256 = vmatprep.subr.bf16.mxu1 %v320_v9 }
  0xe0   :  { %5971 = vmatmul.mubr.msk.bf16.gmra.mrb[16].mxu0 %vm478_vm9, %v8037_v43 }
  0xe1   :  { %833 = vmatprep.mubr.bf16.mxu0 %v13199_v6  ;;  %6257 = vmatpush3.bf16.msra.mxu1 %v320_v9 }
  0xe2   :  { %6258 = vmatprep.subr.bf16.mxu1 %v327_v32 }
  0xe4   :  { %5959 = vmatmul.mubr.msk.bf16.gmra.mrb[36].mxu1 %vm478_vm9, %v7904_v3 }
  0xe5   :  { %690 = vmatprep.mubr.bf16.mxu1 %v13199_v6  ;;  %6259 = vmatpush3.bf16.msra.mxu1 %v327_v32 }
  0xe6   :  { %6260 = vmatprep.subr.bf16.mxu1 %v334_v49 }
  0xe8   :  { %5972 = vmatmul.mubr.msk.bf16.gmra.mrb[20].mxu0 %vm478_vm9, %v8050_v10 }
  0xe9   :  { %843 = vmatprep.mubr.bf16.mxu0 %v13199_v6  ;;  %6261 = vmatpush3.bf16.msra.mxu1 %v334_v49 }
  0xea   :  { %6376 = vmatprep.subr.msk.bf16.mxu1 %vm503_vm8, %v341_v34 }
  0xec   :  { %5960 = vmatmul.mubr.msk.bf16.gmra.mrb[40].mxu1 %vm478_vm9, %v7954_v38 }
  0xed   :  { %700 = vmatprep.mubr.bf16.mxu1 %v13199_v6  ;;  %6263 = vmatpush3.bf16.msra.mxu1 %v523_v4 }
  0xf0   :  { %5973 = vmatmul.mubr.msk.bf16.gmra.mrb[24].mxu0 %vm478_vm9, %v7398_v50 }
  0xf1   :  { %853 = vmatprep.mubr.bf16.mxu0 %v13199_v6 }
  0xf4   :  { %5961 = vmatmul.mubr.msk.bf16.gmra.mrb[44].mxu1 %vm478_vm9, %v8002_v2 }
  0xf5   :  { %710 = vmatprep.mubr.bf16.mxu1 %v13199_v6 }
  0xf8   :  { %5974 = vmatmul.mubr.msk.bf16.gmra.mrb[28].mxu0 %vm478_vm9, %v7399_v52 }
  0xfc   :  { %5962 = vmatmul.mubr.msk.bf16.gmra.mrb[48].mxu1 %vm478_vm9, %v8037_v43 }
  0xfd   :  { %720 = vmatprep.mubr.bf16.mxu1 %v13199_v6 }
 0x104   :  { %5963 = vmatmul.mubr.msk.bf16.gmra.mrb[52].mxu1 %vm478_vm9, %v8050_v10 }
 0x105   :  { %730 = vmatprep.mubr.bf16.mxu1 %v13199_v6 }
 0x10c   :  { %5964 = vmatmul.mubr.msk.bf16.gmra.mrb[56].mxu1 %vm478_vm9, %v7398_v50 }
 0x10d   :  { %740 = vmatprep.mubr.bf16.mxu1 %v13199_v6 }
 0x114   :  { %5965 = vmatmul.mubr.msk.bf16.gmra.mrb[60].mxu1 %vm478_vm9, %v7399_v52 }
 0x115   :  { %6264 = vmatprep.mubr.msk.bf16.mxu1 %vm478_vm9, %v7850_v39  ;;  %v8138_v39 = vpop.permute.xlu0 %360 }
 0x116   :  { %13607 = vst [vmem:[#allocation2_spill] sm:$0xff] %v8138_v39 }
 0x119   :  { %v8160_v17 = vpop.permute.xlu0 %375 }
 0x11a   :  { %13610 = vst [vmem:[#allocation5_spill] sm:$0xff] %v8160_v17 }
 0x11c   :  { %6265 = vmatmul.mubr.msk.bf16.vlgmr.msra.gmra.mrb[64].mxu1 %vm478_vm9, %v7904_v3  ;;  %v8140_v3 = vpop.permute.xlu1 %365 }
 0x11d   :  { %6268 = vmatprep.mubr.msk.bf16.mxu1 %vm478_vm9, %v7954_v38  ;;  %13608 = vst [vmem:[#allocation3_spill] sm:$0xff] %v8140_v3  ;;  %v8181_v41 = vpop.permute.xlu0 %385 }
 0x11e   :  { %13612 = vst [vmem:[#allocation7_spill] sm:$0xff] %v8181_v41 }
 0x120   :  { %v8154_v63 = vpop.permute.xlu1 %370 }
 0x121   :  { %13609 = vst [vmem:[#allocation4_spill] sm:$0xff] %v8154_v63  ;;  %v8202_v31 = vpop.permute.xlu0 %395 }
 0x122   :  { %13616 = vst [vmem:[#allocation11_spill] sm:$0xff] %v8202_v31 }
 0x124   :  { %6269 = vmatmul.mubr.msk.bf16.gmra.mrb[68].mxu1 %vm478_vm9, %v8002_v2  ;;  %v8175_v14 = vpop.permute.xlu1 %380 }
 0x125   :  { %6272 = vmatprep.mubr.msk.bf16.mxu1 %vm478_vm9, %v8037_v43  ;;  %13611 = vst [vmem:[#allocation6_spill] sm:$0xff] %v8175_v14 }
 0x128   :  { %v8196_v25 = vpop.permute.xlu1 %390 }
 0x129   :  { %13615 = vst [vmem:[#allocation10_spill] sm:$0xff] %v8196_v25 }
 0x12c   :  { %6273 = vmatmul.mubr.msk.bf16.gmra.mrb[72].mxu1 %vm478_vm9, %v8050_v10  ;;  %v8217_v37 = vpop.permute.xlu1 %400  ;;  %v8223_v10 = vpop.permute.xlu0 %405 }
 0x12d   :  { %6276 = vmatprep.mubr.msk.bf16.mxu1 %vm478_vm9, %v7398_v50  ;;  %13619 = vst [vmem:[#allocation14_spill] sm:$0xff] %v8217_v37  ;;  %13620 = vst [vmem:[#allocation15_spill] sm:$0xff] %v8223_v10 }
 0x134   :  { %6277 = vmatmul.mubr.msk.bf16.gmra.mrb[76].mxu1 %vm478_vm9, %v7399_v52 }
 0x16f   :  { %v559_v29 = vpop.f32.mrb[0].mxu1 }
 0x170   :  { %v8142_v33 = vpop.f32.mrb[1].mxu1  ;;  %v8145_v38 = vadd.f32 %v559_v29, %v8138_v39 }
 0x171   :  { %v563_v53 = vpop.f32.mrb[2].mxu1 }
 0x172   :  { %v8148_v54 = vadd.f32 %v563_v53, %v8140_v3  ;;  %v8150_v55 = vpop.f32.mrb[3].mxu1  ;;  %v13210_v56 = vmax.f32 %v8145_v38, 0.0 }
 0x174   :  { %v13209_v15 = vmax.f32 %v8148_v54, 0.0 }
 0x176   :  { %v6512_v27 = vpack.i.bf16 %v13209_v15, %v13210_v56 }
 0x177   :  { %v569_v48 = vpop.f32.mrb[4].mxu1 }
 0x178   :  { %v8162_v0 = vpop.f32.mrb[5].mxu1  ;;  %6513 = vrot.lane.b32.xlu0 %v6512_v27, %s7583_s29  ;;  %v8166_v2 = vadd.f32 %v569_v48, %v8154_v63 }
 0x179   :  { %v573_v7 = vpop.f32.mrb[6].mxu1 }
 0x17a   :  { %v8169_v47 = vadd.f32 %v573_v7, %v8160_v17  ;;  %v8171_v16 = vpop.f32.mrb[7].mxu1  ;;  %v13208_v8 = vmax.f32 %v8166_v2, 0.0 }
 0x17c   :  { %v13207_v11 = vmax.f32 %v8169_v47, 0.0 }
 0x17e   :  { %v6517_v19 = vpack.i.bf16 %v13207_v11, %v13208_v8  ;;  %v8301_v8 = vpop.permute.xlu0 %415 }
 0x17f   :  { %v579_v42 = vpop.f32.mrb[8].mxu1  ;;  %13630 = vst [vmem:[#allocation25_spill] sm:$0xff] %v8301_v8 }
 0x180   :  { %v8183_v20 = vpop.f32.mrb[9].mxu1  ;;  %6518 = vrot.lane.b32.xlu0 %v6517_v19, %s7583_s29  ;;  %v8187_v22 = vadd.f32 %v579_v42, %v8175_v14 }
 0x181   :  { %v583_v23 = vpop.f32.mrb[10].mxu1 }
 0x182   :  { %13613 = vst [vmem:[#allocation8_spill] sm:$0xff] %v8187_v22  ;;  %v8190_v62 = vadd.f32 %v583_v23, %v8181_v41  ;;  %v8192_v24 = vpop.f32.mrb[11].mxu1  ;;  %v13206_v60 = vmax.f32 %v8187_v22, 0.0 }
 0x184   :  { %13614 = vst [vmem:[#allocation9_spill] sm:$0xff] %v8190_v62  ;;  %v13205_v21 = vmax.f32 %v8190_v62, 0.0 }
 0x186   :  { %v6522_v58 = vpack.i.bf16 %v13205_v21, %v13206_v60  ;;  %v8299_v60 = vadd.f32 %v8150_v55, %v8140_v3 }
 0x187   :  { %v589_v28 = vpop.f32.mrb[12].mxu1 }
 0x188   :  { %v8204_v57 = vpop.f32.mrb[13].mxu1  ;;  %6523 = vrot.lane.b32.xlu0 %v6522_v58, %s7583_s29  ;;  %v8208_v59 = vadd.f32 %v589_v28, %v8196_v25 }
 0x189   :  { %v593_v13 = vpop.f32.mrb[14].mxu1 }
 0x18a   :  { %13617 = vst [vmem:[#allocation12_spill] sm:$0xff] %v8208_v59  ;;  %v8211_v43 = vadd.f32 %v593_v13, %v8202_v31  ;;  %v8213_v35 = vpop.f32.mrb[15].mxu1  ;;  %v13204_v12 = vmax.f32 %v8208_v59, 0.0 }
 0x18c   :  { %13618 = vst [vmem:[#allocation13_spill] sm:$0xff] %v8211_v43  ;;  %v13203_v45 = vmax.f32 %v8211_v43, 0.0 }
 0x18e   :  { %v6527_v26 = vpack.i.bf16 %v13203_v45, %v13204_v12  ;;  %v8293_v12 = vadd.f32 %v8142_v33, %v8138_v39 }
 0x18f   :  { %v599_v36 = vpop.f32.mrb[16].mxu1 }
 0x190   :  { %v8225_v40 = vpop.f32.mrb[17].mxu1  ;;  %6528 = vrot.lane.b32.xlu0 %v6527_v26, %s7583_s29  ;;  %v8229_v18 = vadd.f32 %v599_v36, %v8217_v37  ;;  %13628 = vst [vmem:[#allocation23_spill] sm:$0xff] %v8293_v12  ;;  %v13218_v43 = vmax.f32 %v8293_v12, 0.0 }
 0x191   :  { %v603_v44 = vpop.f32.mrb[18].mxu1 }
 0x192   :  { %13621 = vst [vmem:[#allocation16_spill] sm:$0xff] %v8229_v18  ;;  %v8232_v49 = vadd.f32 %v603_v44, %v8223_v10  ;;  %v8234_v50 = vpop.f32.mrb[19].mxu1  ;;  %v13201_v30 = vmax.f32 %v8229_v18, 0.0 }
 0x193   :  { %v8236_v52 = vpop.f32.mrb[0].mxu0 }
 0x194   :  { %13622 = vst [vmem:[#allocation17_spill] sm:$0xff] %v8232_v49  ;;  %v13202_v1 = vmax.f32 %v8232_v49, 0.0  ;;  %v8240_v9 = vpop.f32.mrb[1].mxu0 }
 0x195   :  { %v8242_v5 = vpop.f32.mrb[2].mxu0 }
 0x196   :  { %v6532_v61 = vpack.i.bf16 %v13202_v1, %v13201_v30  ;;  %v8248_v32 = vpop.f32.mrb[3].mxu0 }
 0x197   :  { %v609_v46 = vpop.f32.mrb[20].mxu1 }
 0x198   :  { %v8250_v51 = vpop.f32.mrb[21].mxu1  ;;  %6533 = vrot.lane.b32.xlu0 %v6532_v61, %s7583_s29 }
 0x199   :  { %v613_v34 = vpop.f32.mrb[22].mxu1 }
 0x19a   :  { %v8253_v4 = vpop.f32.mrb[23].mxu1  ;;  %v8307_v18 = vadd.f32 %v613_v34, %v8301_v8 }
 0x19b   :  { %v8255_v29 = vpop.f32.mrb[4].mxu0 }
 0x19c   :  { %v8257_v53 = vpop.f32.mrb[5].mxu0  ;;  %13632 = vst [vmem:[#allocation27_spill] sm:$0xff] %v8307_v18 }
 0x19d   :  { %v8259_v27 = vpop.f32.mrb[6].mxu0 }
 0x19e   :  { %v8261_v48 = vpop.f32.mrb[7].mxu0 }
 0x19f   :  { %v8263_v7 = vpop.f32.mrb[24].mxu1 }
 0x1a0   :  { %v8265_v19 = vpop.f32.mrb[25].mxu1 }
 0x1a1   :  { %v623_v42 = vpop.f32.mrb[26].mxu1 }
 0x1a2   :  { %v8267_v23 = vpop.f32.mrb[27].mxu1 }
 0x1a3   :  { %v8269_v58 = vpop.f32.mrb[8].mxu0 }
 0x1a4   :  { %v8271_v28 = vpop.f32.mrb[9].mxu0 }
 0x1a5   :  { %v8273_v13 = vpop.f32.mrb[10].mxu0 }
 0x1a6   :  { %13623 = vst [vmem:[#allocation18_spill] sm:$0xff] %v8273_v13  ;;  %v8275_v26 = vpop.f32.mrb[11].mxu0 }
 0x1a7   :  { %13624 = vst [vmem:[#allocation19_spill] sm:$0xff] %v8275_v26  ;;  %v8277_v36 = vpop.f32.mrb[28].mxu1 }
 0x1a8   :  { %v8279_v44 = vpop.f32.mrb[29].mxu1 }
 0x1a9   :  { %v8281_v61 = vpop.f32.mrb[30].mxu1 }
 0x1aa   :  { %v8283_v6 = vpop.f32.mrb[31].mxu1 }
 0x1ab   :  { %v8285_v30 = vpop.f32.mrb[12].mxu0 }
 0x1ac   :  { %13625 = vst [vmem:[#allocation20_spill] sm:$0xff] %v8285_v30  ;;  %v8287_v1 = vpop.f32.mrb[13].mxu0 }
 0x1ad   :  { %13626 = vst [vmem:[#allocation21_spill] sm:$0xff] %v8287_v1  ;;  %v8289_v45 = vpop.f32.mrb[14].mxu0 }
 0x1ae   :  { %13627 = vst [vmem:[#allocation22_spill] sm:$0xff] %v8289_v45  ;;  %v8295_v21 = vpop.f32.mrb[15].mxu0 }
 0x1af   :  { %13629 = vst [vmem:[#allocation24_spill] sm:$0xff] %v8295_v21  ;;  %v672_v11 = vpop.f32.mrb[32].mxu1  ;;  %v8313_v21 = vpop.permute.xlu1 %410 }
 0x1b0   :  { %v8304_v15 = vadd.f32 %v672_v11, %v8138_v39  ;;  %v674_v56 = vpop.f32.mrb[33].mxu1  ;;  %13634 = vst [vmem:[#allocation29_spill] sm:$0xff] %v8313_v21  ;;  %v8321_v59 = vadd.f32 %v609_v46, %v8313_v21  ;;  %v13639_v46 = vmax.f32 %v8299_v60, 0.0 }
 0x1b1   :  { %v8310_v49 = vadd.f32 %v674_v56, %v8138_v39  ;;  %v676_v33 = vpop.f32.mrb[34].mxu1 }
 0x1b2   :  { %13631 = vst [vmem:[#allocation26_spill] sm:$0xff] %v8304_v15  ;;  %v13217_v55 = vmax.f32 %v8304_v15, 0.0  ;;  %v8317_v45 = vadd.f32 %v676_v33, %v8140_v3  ;;  %v678_v1 = vpop.f32.mrb[35].mxu1  ;;  %13635 = vst [vmem:[#allocation30_spill] sm:$0xff] %v8321_v59  ;;  %v13225_v11 = vmax.f32 %v8321_v59, 0.0 }
 0x1b3   :  { %13633 = vst [vmem:[#allocation28_spill] sm:$0xff] %v8310_v49  ;;  %v13219_v34 = vmax.f32 %v8310_v49, 0.0  ;;  %v8325_v56 = vadd.f32 %v678_v1, %v8140_v3  ;;  %v8327_v30 = vpop.f32.mrb[16].mxu0 }
 0x1b4   :  { %13637 = vst [vmem:[#allocation32_spill] sm:$0xff] %v8327_v30  ;;  %v6537_v26 = vpack.i.bf16 %v13217_v55, %v13218_v43  ;;  %v13223_v33 = vmax.f32 %v8317_v45, 0.0  ;;  %v8334_v62 = vpop.f32.mrb[17].mxu0  ;;  %v8346_v30 = vadd.f32 %v8162_v0, %v8154_v63  ;;  %v8353_v43 = vadd.f32 %v8171_v16, %v8160_v17  ;;  %v8361_v0 = vpop.permute.xlu0 %425 }
 0x1b5   :  { %13636 = vst [vmem:[#allocation31_spill] sm:$0xff] %v8325_v56  ;;  %13638 = vst [vmem:[#allocation33_spill] sm:$0xff] %v8334_v62  ;;  %v6542_v13 = vpack.i.bf16 %v13639_v46, %v13219_v34  ;;  %v13222_v1 = vmax.f32 %v8325_v56, 0.0  ;;  %v8342_v22 = vpop.f32.mrb[18].mxu0  ;;  %v13643_v16 = vmax.f32 %v8307_v18, 0.0 }
 0x1b6   :  { %13640 = vst [vmem:[#allocation34_spill] sm:$0xff] %v8342_v22  ;;  %v8348_v55 = vpop.f32.mrb[19].mxu0  ;;  %6538 = vrot.lane.b32.xlu1 %v6537_v26, %s7583_s29  ;;  %13642 = vst [vmem:[#allocation36_spill] sm:$0xff] %v8353_v43  ;;  %v8371_v22 = vadd.f32 %v623_v42, %v8361_v0 }
 0x1b7   :  { %13641 = vst [vmem:[#allocation35_spill] sm:$0xff] %v8348_v55  ;;  %v6552_v46 = vpack.i.bf16 %v13222_v1, %v13223_v33  ;;  %v682_v34 = vpop.f32.mrb[36].mxu1  ;;  %6543 = vrot.lane.b32.xlu0 %v6542_v13, %s7583_s29  ;;  %v6547_v55 = vpack.i.bf16 %v13643_v16, %v13225_v11  ;;  %v8377_v33 = vpop.permute.xlu1 %420 }
 0x1b8   :  { %v8364_v49 = vadd.f32 %v682_v34, %v8154_v63  ;;  %v684_v26 = vpop.f32.mrb[37].mxu1  ;;  %13644 = vst [vmem:[#allocation37_spill] sm:$0xff] %v8371_v22  ;;  %v8387_v42 = vadd.f32 %v8263_v7, %v8377_v33 }
 0x1b9   :  { %v8374_v56 = vadd.f32 %v684_v26, %v8154_v63  ;;  %v686_v1 = vpop.f32.mrb[38].mxu1 }
 0x1ba   :  { %v13229_v34 = vmax.f32 %v8364_v49, 0.0  ;;  %v8381_v62 = vadd.f32 %v686_v1, %v8160_v17  ;;  %v688_v59 = vpop.f32.mrb[39].mxu1  ;;  %6553 = vrot.lane.b32.xlu1 %v6552_v46, %s7583_s29  ;;  %13647 = vst [vmem:[#allocation40_spill] sm:$0xff] %v8387_v42  ;;  %v13650_v1 = vmax.f32 %v8346_v30, 0.0  ;;  %v13236_v7 = vmax.f32 %v8387_v42, 0.0 }
 0x1bb   :  { %13645 = vst [vmem:[#allocation38_spill] sm:$0xff] %v8374_v56  ;;  %v13230_v26 = vmax.f32 %v8374_v56, 0.0  ;;  %v8391_v11 = vadd.f32 %v688_v59, %v8160_v17  ;;  %v8393_v13 = vpop.f32.mrb[20].mxu0  ;;  %6548 = vrot.lane.b32.xlu0 %v6547_v55, %s7583_s29  ;;  %v13652_v59 = vmax.f32 %v8353_v43, 0.0  ;;  %v8413_v55 = vadd.f32 %v8183_v20, %v8175_v14  ;;  %v8428_v20 = vpop.permute.xlu0 %435 }
 0x1bc   :  { %13646 = vst [vmem:[#allocation39_spill] sm:$0xff] %v8381_v62  ;;  %13649 = vst [vmem:[#allocation42_spill] sm:$0xff] %v8393_v13  ;;  %v6557_v46 = vpack.i.bf16 %v13229_v34, %v13650_v1  ;;  %v13233_v16 = vmax.f32 %v8381_v62, 0.0  ;;  %v8401_v18 = vpop.f32.mrb[21].mxu0  ;;  %v8420_v34 = vadd.f32 %v8192_v24, %v8181_v41  ;;  %v13656_v24 = vmax.f32 %v8371_v22, 0.0 }
 0x1bd   :  { %13648 = vst [vmem:[#allocation41_spill] sm:$0xff] %v8391_v11  ;;  %13651 = vst [vmem:[#allocation43_spill] sm:$0xff] %v8401_v18  ;;  %v6562_v15 = vpack.i.bf16 %v13652_v59, %v13230_v26  ;;  %v13232_v13 = vmax.f32 %v8391_v11, 0.0  ;;  %v8409_v12 = vpop.f32.mrb[22].mxu0  ;;  %v8445_v11 = vpop.permute.xlu1 %430 }
 0x1be   :  { %13653 = vst [vmem:[#allocation44_spill] sm:$0xff] %v8409_v12  ;;  %v8415_v1 = vpop.f32.mrb[23].mxu0  ;;  %6558 = vrot.lane.b32.xlu1 %v6557_v46, %s7583_s29  ;;  %13655 = vst [vmem:[#allocation46_spill] sm:$0xff] %v8428_v20  ;;  %v8439_v12 = vadd.f32 %v8281_v61, %v8428_v20  ;;  %v8455_v61 = vadd.f32 %v8277_v36, %v8445_v11  ;;  %v8492_v36 = vadd.f32 %v8242_v5, %v8140_v3 }
 0x1bf   :  { %13654 = vst [vmem:[#allocation45_spill] sm:$0xff] %v8415_v1  ;;  %v6572_v59 = vpack.i.bf16 %v13232_v13, %v13233_v16  ;;  %v692_v26 = vpop.f32.mrb[40].mxu1  ;;  %6563 = vrot.lane.b32.xlu0 %v6562_v15, %s7583_s29  ;;  %v6567_v1 = vpack.i.bf16 %v13656_v24, %v13236_v7  ;;  %13659 = vst [vmem:[#allocation49_spill] sm:$0xff] %v8445_v11  ;;  %v8509_v5 = vadd.f32 %v8236_v52, %v8138_v39 }
 0x1c0   :  { %v8431_v56 = vadd.f32 %v692_v26, %v8175_v14  ;;  %v694_v46 = vpop.f32.mrb[41].mxu1  ;;  %13657 = vst [vmem:[#allocation47_spill] sm:$0xff] %v8439_v12  ;;  %13660 = vst [vmem:[#allocation50_spill] sm:$0xff] %v8455_v61 }
 0x1c1   :  { %v8442_v13 = vadd.f32 %v694_v46, %v8175_v14  ;;  %v696_v16 = vpop.f32.mrb[42].mxu1  ;;  %13666 = vst [vmem:[#allocation54_spill] sm:$0xff] %v8492_v36  ;;  %13668 = vst [vmem:[#allocation56_spill] sm:$0xff] %v8509_v5 }
 0x1c2   :  { %v13240_v26 = vmax.f32 %v8431_v56, 0.0  ;;  %v8449_v18 = vadd.f32 %v696_v16, %v8181_v41  ;;  %v698_v42 = vpop.f32.mrb[43].mxu1  ;;  %6573 = vrot.lane.b32.xlu1 %v6572_v59, %s7583_s29  ;;  %v13663_v16 = vmax.f32 %v8413_v55, 0.0 }
 0x1c3   :  { %13658 = vst [vmem:[#allocation48_spill] sm:$0xff] %v8442_v13  ;;  %v13241_v46 = vmax.f32 %v8442_v13, 0.0  ;;  %v8459_v7 = vadd.f32 %v698_v42, %v8181_v41  ;;  %v8461_v15 = vpop.f32.mrb[24].mxu0  ;;  %6568 = vrot.lane.b32.xlu0 %v6567_v1, %s7583_s29  ;;  %v13664_v42 = vmax.f32 %v8420_v34, 0.0  ;;  %v8481_v1 = vadd.f32 %v8204_v57, %v8196_v25 }
 0x1c4   :  { %13662 = vst [vmem:[#allocation52_spill] sm:$0xff] %v8461_v15  ;;  %v6577_v59 = vpack.i.bf16 %v13240_v26, %v13663_v16  ;;  %v13245_v24 = vmax.f32 %v8449_v18, 0.0  ;;  %v8469_v22 = vpop.f32.mrb[25].mxu0  ;;  %v8485_v16 = vadd.f32 %v8213_v35, %v8202_v31 }
 0x1c5   :  { %13661 = vst [vmem:[#allocation51_spill] sm:$0xff] %v8459_v7  ;;  %v6582_v62 = vpack.i.bf16 %v13664_v42, %v13241_v46  ;;  %v13244_v15 = vmax.f32 %v8459_v7, 0.0  ;;  %v8477_v43 = vpop.f32.mrb[26].mxu0  ;;  %v8496_v42 = vadd.f32 %v8248_v32, %v8140_v3  ;;  %v13249_v46 = vmax.f32 %v8455_v61, 0.0 }
 0x1c6   :  { %v8487_v26 = vpop.f32.mrb[27].mxu0  ;;  %6578 = vrot.lane.b32.xlu1 %v6577_v59, %s7583_s29  ;;  %v8513_v32 = vadd.f32 %v8240_v9, %v8138_v39  ;;  %v13670_v7 = vmax.f32 %v8439_v12, 0.0 }
 0x1c7   :  { %13665 = vst [vmem:[#allocation53_spill] sm:$0xff] %v8487_v26  ;;  %13667 = vst [vmem:[#allocation55_spill] sm:$0xff] %v8496_v42  ;;  %v6592_v57 = vpack.i.bf16 %v13244_v15, %v13245_v24  ;;  %v702_v35 = vpop.f32.mrb[44].mxu1  ;;  %6583 = vrot.lane.b32.xlu0 %v6582_v62, %s7583_s29  ;;  %v13680_v9 = vmax.f32 %v8496_v42, 0.0 }
 0x1c8   :  { %v8505_v59 = vadd.f32 %v702_v35, %v8196_v25  ;;  %v704_v13 = vpop.f32.mrb[45].mxu1  ;;  %13669 = vst [vmem:[#allocation57_spill] sm:$0xff] %v8513_v32  ;;  %v6587_v15 = vpack.i.bf16 %v13670_v7, %v13249_v46  ;;  %v13251_v35 = vmax.f32 %v8481_v1, 0.0  ;;  %v8538_v46 = vadd.f32 %v8257_v53, %v8154_v63 }
 0x1c9   :  { %v8520_v24 = vadd.f32 %v704_v13, %v8196_v25  ;;  %v706_v62 = vpop.f32.mrb[46].mxu1  ;;  %v8534_v13 = vadd.f32 %v8255_v29, %v8154_v63  ;;  %v13676_v29 = vmax.f32 %v8485_v16, 0.0  ;;  %v13682_v63 = vmax.f32 %v8509_v5, 0.0 }
 0x1ca   :  { %v13250_v3 = vmax.f32 %v8505_v59, 0.0  ;;  %v708_v26 = vpop.f32.mrb[47].mxu1  ;;  %6593 = vrot.lane.b32.xlu1 %v6592_v57, %s7583_s29  ;;  %13674 = vst [vmem:[#allocation61_spill] sm:$0xff] %v8538_v46 }
 0x1cb   :  { %13671 = vst [vmem:[#allocation58_spill] sm:$0xff] %v8520_v24  ;;  %v13252_v12 = vmax.f32 %v8520_v24, 0.0  ;;  %v8529_v7 = vpop.f32.mrb[28].mxu0  ;;  %6588 = vrot.lane.b32.xlu0 %v6587_v15, %s7583_s29  ;;  %13673 = vst [vmem:[#allocation60_spill] sm:$0xff] %v8534_v13  ;;  %v8569_v24 = vadd.f32 %v706_v62, %v8202_v31 }
 0x1cc   :  { %13672 = vst [vmem:[#allocation59_spill] sm:$0xff] %v8529_v7  ;;  %v6597_v57 = vpack.i.bf16 %v13250_v3, %v13251_v35  ;;  %v8544_v39 = vpop.f32.mrb[29].mxu0  ;;  %v8559_v3 = vadd.f32 %v8234_v50, %v8223_v10  ;;  %v13679_v35 = vmax.f32 %v8492_v36, 0.0  ;;  %v13683_v36 = vmax.f32 %v8513_v32, 0.0 }
 0x1cd   :  { %13675 = vst [vmem:[#allocation62_spill] sm:$0xff] %v8544_v39  ;;  %v6602_v15 = vpack.i.bf16 %v13676_v29, %v13252_v12  ;;  %v8552_v7 = vpop.f32.mrb[30].mxu0 }
 0x1ce   :  { %13677 = vst [vmem:[#allocation63_spill] sm:$0xff] %v8552_v7  ;;  %v8554_v53 = vpop.f32.mrb[31].mxu0  ;;  %6598 = vrot.lane.b32.xlu1 %v6597_v57, %s7583_s29  ;;  %v6612_v52 = vpack.i.bf16 %v13680_v9, %v13679_v35  ;;  %v8572_v57 = vadd.f32 %v708_v26, %v8202_v31  ;;  %v6607_v42 = vpack.i.bf16 %v13683_v36, %v13682_v63  ;;  %v13687_v63 = vmax.f32 %v8534_v13, 0.0 }
 0x1cf   :  { %13678 = vst [vmem:[#allocation64_spill] sm:$0xff] %v8554_v53  ;;  %v712_v39 = vpop.f32.mrb[48].mxu1  ;;  %6603 = vrot.lane.b32.xlu0 %v6602_v15, %s7583_s29  ;;  %v8580_v35 = vadd.f32 %v8259_v27, %v8160_v17  ;;  %v8584_v9 = vadd.f32 %v8261_v48, %v8160_v17  ;;  %v13688_v27 = vmax.f32 %v8538_v46, 0.0  ;;  %v13262_v48 = vmax.f32 %v8569_v24, 0.0 }
 0x1d0   :  { %13681 = vst [vmem:[#allocation65_spill] sm:$0xff] %v8572_v57  ;;  %v714_v50 = vpop.f32.mrb[49].mxu1  ;;  %v8600_v32 = vadd.f32 %v712_v39, %v8217_v37  ;;  %v8610_v46 = vadd.f32 %v8225_v40, %v8217_v37 }
 0x1d1   :  { %13684 = vst [vmem:[#allocation66_spill] sm:$0xff] %v8580_v35  ;;  %13685 = vst [vmem:[#allocation67_spill] sm:$0xff] %v8584_v9  ;;  %v8587_v62 = vadd.f32 %v714_v50, %v8217_v37  ;;  %v716_v15 = vpop.f32.mrb[50].mxu1  ;;  %v6617_v36 = vpack.i.bf16 %v13688_v27, %v13687_v63  ;;  %v13261_v50 = vmax.f32 %v8572_v57, 0.0  ;;  %v13264_v12 = vmax.f32 %v8584_v9, 0.0 }
 0x1d2   :  { %v718_v26 = vpop.f32.mrb[51].mxu1  ;;  %6613 = vrot.lane.b32.xlu1 %v6612_v52, %s7583_s29  ;;  %v13265_v52 = vmax.f32 %v8580_v35, 0.0  ;;  %v8615_v63 = vadd.f32 %v8253_v4, %v8301_v8 }
 0x1d3   :  { %13686 = vst [vmem:[#allocation68_spill] sm:$0xff] %v8587_v62  ;;  %v13260_v29 = vmax.f32 %v8587_v62, 0.0  ;;  %6608 = vrot.lane.b32.xlu0 %v6607_v42, %s7583_s29  ;;  %v13689_v42 = vmax.f32 %v8559_v3, 0.0  ;;  %v6622_v27 = vpack.i.bf16 %v13261_v50, %v13262_v48  ;;  %v8627_v40 = vadd.f32 %v718_v26, %v8223_v10 }
 0x1d4   :  { %v6637_v4 = vpack.i.bf16 %v13264_v12, %v13265_v52  ;;  %v8639_v50 = vadd.f32 %v8271_v28, %v8175_v14  ;;  %v13269_v26 = vmax.f32 %v8610_v46, 0.0 }
 0x1d5   :  { %v6632_v5 = vpack.i.bf16 %v13689_v42, %v13260_v29  ;;  %v8624_v29 = vadd.f32 %v716_v15, %v8223_v10  ;;  %13690 = vst [vmem:[#allocation69_spill] sm:$0xff] %v8627_v40  ;;  %v13272_v52 = vmax.f32 %v8627_v40, 0.0 }
 0x1d6   :  { %6618 = vrot.lane.b32.xlu1 %v6617_v36, %s7583_s29  ;;  %13692 = vst [vmem:[#allocation71_spill] sm:$0xff] %v8639_v50  ;;  %v13274_v9 = vmax.f32 %v8639_v50, 0.0 }
 0x1d7   :  { %v722_v39 = vpop.f32.mrb[52].mxu1  ;;  %6633 = vrot.lane.b32.xlu0 %v6632_v5, %s7583_s29  ;;  %v8635_v5 = vadd.f32 %v8269_v58, %v8175_v14  ;;  %v13694_v58 = vmax.f32 %v8600_v32, 0.0  ;;  %v8666_v14 = vadd.f32 %v8250_v51, %v8313_v21 }
 0x1d8   :  { %v724_v36 = vpop.f32.mrb[53].mxu1  ;;  %v8656_v62 = vadd.f32 %v722_v39, %v8313_v21 }
 0x1d9   :  { %13691 = vst [vmem:[#allocation70_spill] sm:$0xff] %v8635_v5  ;;  %v8642_v15 = vadd.f32 %v724_v36, %v8313_v21  ;;  %v726_v48 = vpop.f32.mrb[54].mxu1  ;;  %v6627_v28 = vpack.i.bf16 %v13694_v58, %v13269_v26  ;;  %v13273_v36 = vmax.f32 %v8624_v29, 0.0  ;;  %v8671_v58 = vadd.f32 %v8267_v23, %v8361_v0 }
 0x1da   :  { %v728_v42 = vpop.f32.mrb[55].mxu1  ;;  %6623 = vrot.lane.b32.xlu1 %v6622_v27, %s7583_s29  ;;  %v13275_v27 = vmax.f32 %v8635_v5, 0.0  ;;  %v8757_v5 = vadd.f32 %v8279_v44, %v8445_v11 }
 0x1db   :  { %13693 = vst [vmem:[#allocation72_spill] sm:$0xff] %v8642_v15  ;;  %v13270_v12 = vmax.f32 %v8642_v15, 0.0  ;;  %6638 = vrot.lane.b32.xlu0 %v6637_v4, %s7583_s29  ;;  %v13695_v4 = vmax.f32 %v8615_v63, 0.0  ;;  %v6642_v26 = vpack.i.bf16 %v13272_v52, %v13273_v36  ;;  %v8683_v51 = vadd.f32 %v728_v42, %v8301_v8 }
 0x1dc   :  { %v6657_v23 = vpack.i.bf16 %v13274_v9, %v13275_v27  ;;  %v13278_v52 = vmax.f32 %v8666_v14, 0.0  ;;  %13702 = vst [vmem:[#allocation79_spill] sm:$0xff] %v8757_v5  ;;  %v13297_v44 = vmax.f32 %v8757_v5, 0.0 }
 0x1dd   :  { %v6652_v57 = vpack.i.bf16 %v13695_v4, %v13270_v12  ;;  %v13277_v4 = vmax.f32 %v8656_v62, 0.0  ;;  %v8680_v12 = vadd.f32 %v726_v48, %v8301_v8  ;;  %13696 = vst [vmem:[#allocation73_spill] sm:$0xff] %v8683_v51  ;;  %v13280_v48 = vmax.f32 %v8671_v58, 0.0 }
 0x1de   :  { %6628 = vrot.lane.b32.xlu1 %v6627_v28, %s7583_s29  ;;  %v13283_v27 = vmax.f32 %v8683_v51, 0.0 }
 0x1df   :  { %v732_v39 = vpop.f32.mrb[56].mxu1  ;;  %6653 = vrot.lane.b32.xlu0 %v6652_v57, %s7583_s29  ;;  %v6647_v9 = vpack.i.bf16 %v13277_v4, %v13278_v52  ;;  %v8717_v4 = vadd.f32 %v8283_v6, %v8428_v20 }
 0x1e0   :  { %v734_v28 = vpop.f32.mrb[57].mxu1  ;;  %v8704_v50 = vadd.f32 %v732_v39, %v8377_v33 }
 0x1e1   :  { %v8690_v57 = vadd.f32 %v734_v28, %v8377_v33  ;;  %v736_v15 = vpop.f32.mrb[58].mxu1  ;;  %v13284_v28 = vmax.f32 %v8680_v12, 0.0  ;;  %13698 = vst [vmem:[#allocation75_spill] sm:$0xff] %v8717_v4 }
 0x1e2   :  { %v738_v36 = vpop.f32.mrb[59].mxu1  ;;  %6643 = vrot.lane.b32.xlu1 %v6642_v26, %s7583_s29 }
 0x1e3   :  { %13697 = vst [vmem:[#allocation74_spill] sm:$0xff] %v8690_v57  ;;  %v13279_v42 = vmax.f32 %v8690_v57, 0.0  ;;  %6658 = vrot.lane.b32.xlu0 %v6657_v23, %s7583_s29  ;;  %v8712_v23 = vadd.f32 %v8265_v19, %v8377_v33  ;;  %v6662_v39 = vpack.i.bf16 %v13283_v27, %v13284_v28  ;;  %v8729_v19 = vadd.f32 %v738_v36, %v8361_v0 }
 0x1e4   :  { %v13291_v27 = vmax.f32 %v8717_v4, 0.0 }
 0x1e5   :  { %v6672_v26 = vpack.i.bf16 %v13280_v48, %v13279_v42  ;;  %v13288_v42 = vmax.f32 %v8704_v50, 0.0  ;;  %v8726_v48 = vadd.f32 %v736_v15, %v8361_v0  ;;  %13699 = vst [vmem:[#allocation76_spill] sm:$0xff] %v8729_v19  ;;  %v13292_v28 = vmax.f32 %v8729_v19, 0.0  ;;  %v7400_v19 = vld [vmem:[%s13194_s3] ss:$8 sps:$4 sm:$0xff]  }
 0x1e6   :  { %6648 = vrot.lane.b32.xlu1 %v6647_v9, %s7583_s29 }
 0x1e7   :  { %v742_v52 = vpop.f32.mrb[60].mxu1  ;;  %6673 = vrot.lane.b32.xlu0 %v6672_v26, %s7583_s29  ;;  %v13289_v26 = vmax.f32 %v8712_v23, 0.0 }
 0x1e8   :  { %v744_v9 = vpop.f32.mrb[61].mxu1  ;;  %v8749_v51 = vadd.f32 %v742_v52, %v8445_v11 }
 0x1e9   :  { %v8732_v6 = vadd.f32 %v744_v9, %v8445_v11  ;;  %v8734_v57 = vpop.f32.mrb[62].mxu1  ;;  %v6667_v36 = vpack.i.bf16 %v13288_v42, %v13289_v26  ;;  %v13293_v9 = vmax.f32 %v8726_v48, 0.0  ;;  %v7430_v11 = vld [vmem:[%s13194_s3 + $0xa0] ss:$8 sps:$4 sm:$0xff]  }
 0x1ea   :  { %v8737_v40 = vpop.f32.mrb[63].mxu1  ;;  %6663 = vrot.lane.b32.xlu1 %v6662_v39, %s7583_s29  ;;  %13701 = vst [vmem:[#allocation78_spill] sm:$0xff] %v8749_v51  ;;  %v13296_v42 = vmax.f32 %v8749_v51, 0.0  ;;  %v13723_v51 = vmax.f32 %v8145_v38, 0.0 }
 0x1eb   :  { %13700 = vst [vmem:[#allocation77_spill] sm:$0xff] %v8732_v6  ;;  %v13290_v15 = vmax.f32 %v8732_v6, 0.0  ;;  %v6677_v52 = vpack.i.bf16 %v13292_v28, %v13293_v9 }
 0x1ed   :  { %v6687_v39 = vpack.i.bf16 %v13291_v27, %v13290_v15 }
 0x1ee   :  { %6668 = vrot.lane.b32.xlu1 %v6667_v36, %s7583_s29  ;;  %v6682_v36 = vpack.i.bf16 %v13296_v42, %v13297_v44  ;;  %v7402_v42 = vld [vmem:[%s13194_s3 + $0x4] ss:$8 sps:$4 sm:$0xff]  }
 0x1ef   :  { %v8760_v35 = vpop.f32.mrb[64].mxu1  ;;  %6688 = vrot.lane.b32.xlu0 %v6687_v39, %s7583_s29  ;;  %3119 = vmatprep.subr.bf16.mxu0 %v7402_v42  ;;  %v7408_v42 = vld [vmem:[%s13194_s3 + $0x24] ss:$8 sps:$4 sm:$0xff]  }
 0x1f0   :  { %13703 = vst [vmem:[#allocation80_spill] sm:$0xff] %v8760_v35  ;;  %v8768_v26 = vpop.f32.mrb[65].mxu1  ;;  %3120 = vmatpush1.bf16.msra.mxu0 %v7400_v19  ;;  %v7409_v19 = vld [vmem:[%s13194_s3 + $0x30] ss:$8 sps:$4 sm:$0xff]  }
 0x1f1   :  { %13704 = vst [vmem:[#allocation81_spill] sm:$0xff] %v8768_v26  ;;  %v8770_v15 = vpop.f32.mrb[66].mxu1 }
 0x1f2   :  { %13705 = vst [vmem:[#allocation82_spill] sm:$0xff] %v8770_v15  ;;  %v8773_v27 = vpop.f32.mrb[67].mxu1  ;;  %6678 = vrot.lane.b32.xlu1 %v6677_v52, %s7583_s29 }
 0x1f3   :  { %13706 = vst [vmem:[#allocation83_spill] sm:$0xff] %v8773_v27 }
 0x1f6   :  { %6683 = vrot.lane.b32.xlu1 %v6682_v36, %s7583_s29 }
 0x1f7   :  { %v8781_v39 = vpop.f32.mrb[68].mxu1 }
 0x1f8   :  { %13707 = vst [vmem:[#allocation84_spill] sm:$0xff] %v8781_v39  ;;  %v8783_v28 = vpop.f32.mrb[69].mxu1  ;;  %v7405_v39 = vld [vmem:[%s13194_s3 + $0x14] ss:$8 sps:$4 sm:$0xff]  }
 0x1f9   :  { %13708 = vst [vmem:[#allocation85_spill] sm:$0xff] %v8783_v28  ;;  %v8785_v9 = vpop.f32.mrb[70].mxu1  ;;  %3121 = vmatprep.subr.bf16.mxu0 %v7405_v39  ;;  %v7411_v39 = vld [vmem:[%s13194_s3 + $0x34] ss:$8 sps:$4 sm:$0xff]  }
 0x1fa   :  { %13709 = vst [vmem:[#allocation86_spill] sm:$0xff] %v8785_v9  ;;  %v8787_v6 = vpop.f32.mrb[71].mxu1  ;;  %v7403_v9 = vld [vmem:[%s13194_s3 + $0x10] ss:$8 sps:$4 sm:$0xff]  }
 0x1fb   :  { %13710 = vst [vmem:[#allocation87_spill] sm:$0xff] %v8787_v6  ;;  %3122 = vmatpush1.bf16.msra.mxu0 %v7403_v9  ;;  %v7414_v9 = vld [vmem:[%s13194_s3 + $0x44] ss:$8 sps:$4 sm:$0xff]  }
 0x1fc   :  { %3123 = vmatprep.subr.bf16.mxu0 %v7408_v42  ;;  %v7412_v42 = vld [vmem:[%s13194_s3 + $0x40] ss:$8 sps:$4 sm:$0xff]  }
 0x1ff   :  { %v8792_v52 = vpop.f32.mrb[72].mxu1 }
 0x200   :  { %13711 = vst [vmem:[#allocation88_spill] sm:$0xff] %v8792_v52  ;;  %v8797_v44 = vpop.f32.mrb[73].mxu1  ;;  %v7406_v52 = vld [vmem:[%s13194_s3 + $0x20] ss:$8 sps:$4 sm:$0xff]  }
 0x201   :  { %13712 = vst [vmem:[#allocation89_spill] sm:$0xff] %v8797_v44  ;;  %v8799_v36 = vpop.f32.mrb[74].mxu1  ;;  %3124 = vmatpush1.bf16.msra.mxu0 %v7406_v52  ;;  %v7420_v52 = vld [vmem:[%s13194_s3 + $0x64] ss:$8 sps:$4 sm:$0xff]  }
 0x202   :  { %13713 = vst [vmem:[#allocation90_spill] sm:$0xff] %v8799_v36  ;;  %v8807_v28 = vpop.f32.mrb[75].mxu1  ;;  %3125 = vmatprep.subr.bf16.mxu0 %v7411_v39  ;;  %v6514_v39 = vpop.permute.xlu0 %6513 }
 0x203   :  { %13714 = vst [vmem:[#allocation91_spill] sm:$0xff] %v8807_v28  ;;  %v6516_v35 = vunpack.i.h.bf16 %v6514_v39 }
 0x205   :  { %3126 = vmatpush1.bf16.msra.mxu0 %v7409_v19  ;;  %v7418_v19 = vld [vmem:[%s13194_s3 + $0x60] ss:$8 sps:$4 sm:$0xff]  }
 0x206   :  { %3127 = vmatprep.subr.bf16.mxu0 %v7414_v9  ;;  %v7423_v9 = vld [vmem:[%s13194_s3 + $0x74] ss:$8 sps:$4 sm:$0xff]  }
 0x207   :  { %v8815_v36 = vpop.f32.mrb[76].mxu1 }
 0x208   :  { %13715 = vst [vmem:[#allocation92_spill] sm:$0xff] %v8815_v36  ;;  %v8817_v44 = vpop.f32.mrb[77].mxu1  ;;  %v7417_v36 = vld [vmem:[%s13194_s3 + $0x54] ss:$8 sps:$4 sm:$0xff]  }
 0x209   :  { %13716 = vst [vmem:[#allocation93_spill] sm:$0xff] %v8817_v44  ;;  %v8819_v6 = vpop.f32.mrb[78].mxu1  ;;  %3128 = vmatpush1.bf16.msra.mxu0 %v7412_v42  ;;  %v7421_v44 = vld [vmem:[%s13194_s3 + $0x70] ss:$8 sps:$4 sm:$0xff]   ;;  %v7424_v42 = vld [vmem:[%s13194_s3 + $0x80] ss:$8 sps:$4 sm:$0xff]  }
 0x20a   :  { %13717 = vst [vmem:[#allocation94_spill] sm:$0xff] %v8819_v6  ;;  %v8827_v28 = vpop.f32.mrb[79].mxu1  ;;  %v7415_v6 = vld [vmem:[%s13194_s3 + $0x50] ss:$8 sps:$4 sm:$0xff]   ;;  %3129 = vmatprep.subr.bf16.mxu0 %v7417_v36  ;;  %v7426_v36 = vld [vmem:[%s13194_s3 + $0x84] ss:$8 sps:$4 sm:$0xff]  }
 0x20b   :  { %13718 = vst [vmem:[#allocation95_spill] sm:$0xff] %v8827_v28  ;;  %v6519_v28 = vpop.permute.xlu0 %6518 }
 0x20d   :  { %3130 = vmatpush1.bf16.msra.mxu0 %v7415_v6 }
 0x20e   :  { %3131 = vmatprep.subr.bf16.mxu0 %v7420_v52  ;;  %v7427_v52 = vld [vmem:[%s13194_s3 + $0x90] ss:$8 sps:$4 sm:$0xff]  }
 0x20f   :  { %v8859_v26 = vpop.permute.xlu0 %6523 }
 0x211   :  { %3132 = vmatpush1.bf16.msra.mxu0 %v7418_v19  ;;  %v7429_v19 = vld [vmem:[%s13194_s3 + $0x94] ss:$8 sps:$4 sm:$0xff]  }
 0x212   :  { %3133 = vmatprep.subr.bf16.mxu0 %v7423_v9 }
 0x213   :  { %v8861_v6 = vpop.permute.xlu0 %6528 }
 0x215   :  { %3134 = vmatpush1.bf16.msra.mxu0 %v7421_v44  ;;  %v7432_v44 = vld [vmem:[%s13194_s3 + $0xa4] ss:$8 sps:$4 sm:$0xff]  }
 0x216   :  { %3135 = vmatprep.subr.bf16.mxu0 %v7426_v36  ;;  %v6515_v36 = vunpack.i.l.bf16 %v6514_v39 }
 0x217   :  { %v8869_v9 = vpop.permute.xlu0 %6533 }
 0x219   :  { %3136 = vmatpush1.bf16.msra.mxu0 %v7424_v42 }
 0x21a   :  { %3137 = vmatprep.subr.bf16.mxu0 %v7429_v19  ;;  %v8889_v19 = vadd.f32 %v8737_v40, %v8428_v20  ;;  %v7435_v40 = vld [vmem:[%s13194_s3 + $0xb4] ss:$8 sps:$4 sm:$0xff]  }
 0x21c   :  { %13721 = vst [vmem:[#allocation98_spill] sm:$0xff] %v8889_v19 }
 0x21d   :  { %3138 = vmatpush1.bf16.msra.mxu0 %v7427_v52  ;;  %v8885_v52 = vadd.f32 %v8734_v57, %v8428_v20  ;;  %v7433_v57 = vld [vmem:[%s13194_s3 + $0xb0] ss:$8 sps:$4 sm:$0xff]  }
 0x21e   :  { %3139 = vmatprep.subr.bf16.mxu0 %v7432_v44 }
 0x21f   :  { %13720 = vst [vmem:[#allocation97_spill] sm:$0xff] %v8885_v52 }
 0x221   :  { %3140 = vmatpush1.bf16.msra.mxu0 %v7430_v11  ;;  %v13725_v11 = vmax.f32 %v8148_v54, 0.0  ;;  %v7438_v54 = vld [vmem:[%s13194_s3 + $0xc4] ss:$8 sps:$4 sm:$0xff]  }
 0x222   :  { %3141 = vmatprep.subr.bf16.mxu0 %v7435_v40 }
 0x225   :  { %3142 = vmatpush1.bf16.msra.mxu0 %v7433_v57  ;;  %v7436_v57 = vld [vmem:[%s13194_s3 + $0xc0] ss:$8 sps:$4 sm:$0xff]  }
 0x226   :  { %3143 = vmatprep.subr.bf16.mxu0 %v7438_v54 }
 0x228   :  { %v8871_v27 = vpop.permute.xlu1 %6538 }
 0x229   :  { %v13305_v42 = vunpack.i.l.bf16 %v8871_v27  ;;  %v8877_v4 = vpop.permute.xlu0 %6543  ;;  %3144 = vmatpush1.bf16.msra.mxu0 %v7436_v57  ;;  %v7441_v57 = vld [vmem:[%s13194_s3 + $0xd4] ss:$8 sps:$4 sm:$0xff]  }
 0x22a   :  { %13719 = vst [vmem:[#allocation96_spill] sm:$0xff] %v8877_v4  ;;  %v6546_v13 = vunpack.i.h.bf16 %v8877_v4  ;;  %3145 = vmatprep.subr.bf16.mxu0 %v7441_v57 }
 0x22b   :  { %v1409_v15 = vsel %vm59_vm0, %v6515_v36, %v13305_v42 }
 0x22c   :  { %v8894_v17 = vpop.permute.xlu1 %6553  ;;  %v1415_v39 = vsel %vm59_vm0, %v6516_v35, %v6546_v13  ;;  %v8899_v44 = vmax.f32 %v13723_v51, %v1409_v15  ;;  %v13312_v35 = vmax.f32 %v8885_v52, 0.0  ;;  %v6521_v15 = vunpack.i.h.bf16 %v6519_v28 }
 0x22d   :  { %13722 = vst [vmem:[#allocation99_spill] sm:$0xff] %v8894_v17  ;;  %v8907_v5 = vpop.permute.xlu0 %6548  ;;  %v8911_v36 = vmax.f32 %v13725_v11, %v1415_v39  ;;  %v6555_v42 = vunpack.i.l.bf16 %v8894_v17  ;;  %v6520_v39 = vunpack.i.l.bf16 %v6519_v28  ;;  %v13730_v28 = vmax.f32 %v8166_v2, 0.0 }
 0x22e   :  { %13724 = vst [vmem:[#allocation100_spill] sm:$0xff] %v8899_v44  ;;  %v13733_v2 = vmax.f32 %v8169_v47, 0.0 }
 0x22f   :  { %13726 = vst [vmem:[#allocation101_spill] sm:$0xff] %v8911_v36  ;;  %v6692_v51 = vpack.i.bf16 %v8911_v36, %v8899_v44  ;;  %v13728_v44 = vmax.f32 %v8889_v19, 0.0  ;;  %v1416_v54 = vsel %vm59_vm0, %v6546_v13, %v6555_v42  ;;  %v13732_v19 = vunpack.i.h.bf16 %v8894_v17 }
 0x230   :  { %v8919_v53 = vpop.permute.xlu1 %6558  ;;  %v6541_v13 = vunpack.i.h.bf16 %v8871_v27 }
 0x231   :  { %v13314_v40 = vunpack.i.l.bf16 %v8919_v53  ;;  %v8925_v11 = vpop.permute.xlu0 %6563  ;;  %6693 = vrot.lane.b32.xlu1 %v6692_v51, %s7584_s9  ;;  %v6697_v36 = vpack.i.bf16 %v13728_v44, %v13312_v35  ;;  %v1417_v44 = vsel %vm59_vm0, %v6555_v42, %v13732_v19  ;;  %v13318_v42 = vunpack.i.l.bf16 %v8877_v4 }
 0x232   :  { %13727 = vst [vmem:[#allocation102_spill] sm:$0xff] %v8925_v11  ;;  %v13313_v38 = vunpack.i.h.bf16 %v8925_v11 }
 0x233   :  { %v1421_v7 = vsel %vm59_vm0, %v6520_v39, %v13314_v40  ;;  %v7439_v39 = vld [vmem:[%s13194_s3 + $0xd0] ss:$8 sps:$4 sm:$0xff]  }
 0x234   :  { %v8939_v20 = vpop.permute.xlu1 %6573  ;;  %v1427_v51 = vsel %vm59_vm0, %v6521_v15, %v13313_v38  ;;  %v8946_v61 = vmax.f32 %v13730_v28, %v1421_v7  ;;  %v13735_v15 = vmax.f32 %v8299_v60, 0.0  ;;  %v13737_v38 = vmax.f32 %v8317_v45, 0.0  ;;  %3146 = vmatpush1.bf16.msra.mxu0 %v7439_v39  ;;  %v7442_v60 = vld [vmem:[%s13194_s3 + $0xe0] ss:$8 sps:$4 sm:$0xff]  }
 0x235   :  { %13729 = vst [vmem:[#allocation103_spill] sm:$0xff] %v8939_v20  ;;  %v8958_v35 = vpop.permute.xlu0 %6568  ;;  %6698 = vrot.lane.b32.xlu1 %v6697_v36, %s7583_s29  ;;  %v8963_v7 = vmax.f32 %v13733_v2, %v1427_v51  ;;  %v7444_v36 = vld [vmem:[%s13194_s3 + $0xe4] ss:$8 sps:$4 sm:$0xff]   ;;  %v6525_v51 = vunpack.i.l.bf16 %v8859_v26  ;;  %v6526_v45 = vunpack.i.h.bf16 %v8859_v26  ;;  %v13739_v39 = vunpack.i.l.bf16 %v8871_v27  ;;  %v7447_v27 = vld [vmem:[%s13194_s3 + $0xf4] ss:$8 sps:$4 sm:$0xff]  }
 0x236   :  { %13731 = vst [vmem:[#allocation104_spill] sm:$0xff] %v8946_v61  ;;  %v8971_v28 = vmax.f32 %v13735_v15, %v1416_v54  ;;  %v8975_v40 = vmax.f32 %v13737_v38, %v1417_v44  ;;  %3147 = vmatprep.subr.bf16.mxu0 %v7444_v36  ;;  %v1411_v15 = vsel %vm59_vm0, %v6541_v13, %v13318_v42 }
 0x237   :  { %13734 = vst [vmem:[#allocation105_spill] sm:$0xff] %v8963_v7  ;;  %v6702_v19 = vpack.i.bf16 %v8963_v7, %v8946_v61 }
 0x238   :  { %13736 = vst [vmem:[#allocation106_spill] sm:$0xff] %v8971_v28  ;;  %13738 = vst [vmem:[#allocation107_spill] sm:$0xff] %v8975_v40  ;;  %v8977_v47 = vpop.permute.xlu1 %6578  ;;  %v6722_v54 = vpack.i.bf16 %v8975_v40, %v8971_v28  ;;  %3148 = vmatpush1.bf16.msra.mxu0 %v7442_v60  ;;  %v13740_v40 = vld [vmem:[#allocation8_spill] sm:$0xff]  ;;  %v13745_v60 = vld [vmem:[#allocation9_spill] sm:$0xff] }
 0x239   :  { %v13319_v57 = vunpack.i.l.bf16 %v8977_v47  ;;  %v8984_v2 = vpop.permute.xlu0 %6583  ;;  %6703 = vrot.lane.b32.xlu0 %v6702_v19, %s7584_s9  ;;  %v1410_v19 = vsel %vm59_vm0, %v13739_v39, %v6541_v13  ;;  %v13741_v7 = vmax.f32 %v13740_v40, 0.0  ;;  %v13746_v42 = vmax.f32 %v13745_v60, 0.0  ;;  %v7445_v40 = vld [vmem:[%s13194_s3 + $0xf0] ss:$8 sps:$4 sm:$0xff]   ;;  %v13753_v28 = vld [vmem:[#allocation26_spill] sm:$0xff]  ;;  %3149 = vmatprep.subr.bf16.mxu0 %v7447_v27 }
 0x23a   :  { %v13320_v38 = vunpack.i.h.bf16 %v8984_v2  ;;  %v13754_v4 = vmax.f32 %v13753_v28, 0.0  ;;  %v6531_v27 = vunpack.i.h.bf16 %v8861_v6 }
 0x23b   :  { %v1433_v44 = vsel %vm59_vm0, %v6525_v51, %v13319_v57  ;;  %v13743_v51 = vld [vmem:[#allocation18_spill] sm:$0xff] }
 0x23c   :  { %v9003_v26 = vpop.permute.xlu1 %6593  ;;  %v1439_v36 = vsel %vm59_vm0, %v6526_v45, %v13320_v38  ;;  %v9010_v61 = vmax.f32 %v13741_v7, %v1433_v44  ;;  %v9017_v39 = vadd.f32 %v13743_v51, %v8181_v41  ;;  %v13748_v7 = vld [vmem:[#allocation19_spill] sm:$0xff]  ;;  %v9039_v52 = vmax.f32 %v13754_v4, %v1411_v15  ;;  %3150 = vmatpush1.bf16.msra.mxu0 %v7445_v40  ;;  %v13760_v40 = vld [vmem:[#allocation20_spill] sm:$0xff] }
 0x23d   :  { %v9019_v13 = vpop.permute.xlu0 %6588  ;;  %6723 = vrot.lane.b32.xlu0 %v6722_v54, %s7584_s9  ;;  %v9024_v57 = vmax.f32 %v13746_v42, %v1439_v36  ;;  %v9031_v45 = vadd.f32 %v13748_v7, %v8181_v41  ;;  %v13750_v44 = vld [vmem:[#allocation23_spill] sm:$0xff]  ;;  %v6561_v42 = vunpack.i.h.bf16 %v8919_v53  ;;  %v6575_v36 = vunpack.i.l.bf16 %v8939_v20 }
 0x23e   :  { %13742 = vst [vmem:[#allocation8_spill] sm:$0xff] %v9010_v61  ;;  %13744 = vst [vmem:[#allocation18_spill] sm:$0xff] %v9017_v39  ;;  %v13751_v38 = vmax.f32 %v13750_v44, 0.0  ;;  %v6530_v4 = vunpack.i.l.bf16 %v8861_v6  ;;  %v13756_v54 = vunpack.i.l.bf16 %v8919_v53  ;;  %v9074_v41 = vadd.f32 %v13760_v40, %v8196_v25  ;;  %v13769_v40 = vld [vmem:[#allocation22_spill] sm:$0xff] }
 0x23f   :  { %13747 = vst [vmem:[#allocation9_spill] sm:$0xff] %v9024_v57  ;;  %13749 = vst [vmem:[#allocation19_spill] sm:$0xff] %v9031_v45  ;;  %v6707_v60 = vpack.i.bf16 %v9024_v57, %v9010_v61  ;;  %v13757_v57 = vunpack.i.l.bf16 %v8925_v11  ;;  %v13758_v61 = vunpack.i.h.bf16 %v8925_v11  ;;  %v13761_v53 = vunpack.i.h.bf16 %v8939_v20 }
 0x240   :  { %v9035_v51 = vmax.f32 %v13751_v38, %v1410_v19  ;;  %13755 = vst [vmem:[#allocation26_spill] sm:$0xff] %v9039_v52  ;;  %v9047_v44 = vpop.permute.xlu1 %6598  ;;  %v1422_v38 = vsel %vm59_vm0, %v13756_v54, %v6561_v42  ;;  %v9094_v11 = vadd.f32 %v13769_v40, %v8202_v31  ;;  %v13778_v40 = vmax.f32 %v8346_v30, 0.0 }
 0x241   :  { %v9052_v19 = vpop.permute.xlu0 %6603  ;;  %6708 = vrot.lane.b32.xlu1 %v6707_v60, %s7584_s9  ;;  %v1423_v28 = vsel %vm59_vm0, %v6561_v42, %v13757_v57  ;;  %v1428_v60 = vsel %vm59_vm0, %v13758_v61, %v6575_v36  ;;  %v13759_v15 = vunpack.i.l.bf16 %v9047_v44  ;;  %v1429_v54 = vsel %vm59_vm0, %v6575_v36, %v13761_v53  ;;  %v13770_v36 = vld [vmem:[#allocation24_spill] sm:$0xff] }
 0x242   :  { %13752 = vst [vmem:[#allocation23_spill] sm:$0xff] %v9035_v51  ;;  %v6712_v7 = vpack.i.bf16 %v9039_v52, %v9035_v51  ;;  %v13762_v52 = vld [vmem:[#allocation12_spill] sm:$0xff]  ;;  %v13765_v57 = vunpack.i.h.bf16 %v9052_v19  ;;  %v9098_v53 = vadd.f32 %v13770_v36, %v8202_v31  ;;  %v13779_v36 = vmax.f32 %v8364_v49, 0.0 }
 0x243   :  { %v1445_v6 = vsel %vm59_vm0, %v6530_v4, %v13759_v15  ;;  %v13763_v51 = vmax.f32 %v13762_v52, 0.0  ;;  %v13767_v4 = vld [vmem:[#allocation21_spill] sm:$0xff]  ;;  %v6595_v49 = vunpack.i.l.bf16 %v9003_v26 }
 0x244   :  { %v1451_v61 = vsel %vm59_vm0, %v6531_v27, %v13765_v57  ;;  %v9086_v42 = vpop.permute.xlu1 %6613  ;;  %v9090_v15 = vadd.f32 %v13767_v4, %v8196_v25  ;;  %13771 = vst [vmem:[#allocation22_spill] sm:$0xff] %v9098_v53  ;;  %v13772_v52 = vld [vmem:[#allocation13_spill] sm:$0xff]  ;;  %v13776_v27 = vmax.f32 %v9017_v39, 0.0  ;;  %v13777_v57 = vmax.f32 %v9031_v45, 0.0 }
 0x245   :  { %v9081_v17 = vmax.f32 %v13763_v51, %v1445_v6  ;;  %13766 = vst [vmem:[#allocation12_spill] sm:$0xff] %v9086_v42  ;;  %v13773_v51 = vmax.f32 %v13772_v52, 0.0  ;;  %v9104_v20 = vpop.permute.xlu0 %6608  ;;  %6713 = vrot.lane.b32.xlu1 %v6712_v7, %s7584_s9  ;;  %v9113_v25 = vmax.f32 %v13778_v40, %v1422_v38  ;;  %v9117_v31 = vmax.f32 %v13779_v36, %v1423_v28  ;;  %v13781_v52 = vld [vmem:[#allocation36_spill] sm:$0xff] }
 0x246   :  { %13768 = vst [vmem:[#allocation21_spill] sm:$0xff] %v9090_v15  ;;  %13775 = vst [vmem:[#allocation13_spill] sm:$0xff] %v9104_v20  ;;  %v6717_v4 = vpack.i.bf16 %v13777_v57, %v13776_v27  ;;  %v13783_v20 = vld [vmem:[#allocation39_spill] sm:$0xff]  ;;  %v6581_v39 = vunpack.i.h.bf16 %v8977_v47  ;;  %v13337_v27 = vunpack.i.l.bf16 %v8984_v2  ;;  %v13344_v38 = vunpack.i.h.bf16 %v9003_v26 }
 0x247   :  { %13764 = vst [vmem:[#allocation20_spill] sm:$0xff] %v9081_v17  ;;  %v9102_v6 = vmax.f32 %v13773_v51, %v1451_v61  ;;  %13780 = vst [vmem:[#allocation108_spill] sm:$0xff] %v9117_v31  ;;  %v13782_v61 = vmax.f32 %v13781_v52, 0.0  ;;  %v13784_v42 = vmax.f32 %v13783_v20, 0.0  ;;  %v13342_v57 = vmax.f32 %v9090_v15, 0.0 }
 0x248   :  { %v9133_v28 = vpop.permute.xlu1 %6618  ;;  %v13787_v40 = vunpack.i.l.bf16 %v8977_v47  ;;  %v1435_v52 = vsel %vm59_vm0, %v6581_v39, %v13337_v27  ;;  %v13788_v20 = vunpack.i.h.bf16 %v8984_v2  ;;  %v1441_v47 = vsel %vm59_vm0, %v6595_v49, %v13344_v38 }
 0x249   :  { %13774 = vst [vmem:[#allocation24_spill] sm:$0xff] %v9102_v6  ;;  %v9121_v51 = vmax.f32 %v13782_v61, %v1428_v60  ;;  %v9125_v7 = vmax.f32 %v13784_v42, %v1429_v54  ;;  %v6727_v30 = vpack.i.bf16 %v9102_v6, %v9081_v17  ;;  %13786 = vst [vmem:[#allocation39_spill] sm:$0xff] %v9133_v28  ;;  %v13343_v60 = vmax.f32 %v9074_v41, 0.0  ;;  %v9139_v42 = vpop.permute.xlu0 %6633  ;;  %v13808_v17 = vld [vmem:[#allocation16_spill] sm:$0xff] }
 0x24a   :  { %6718 = vrot.lane.b32.xlu1 %v6717_v4, %s7583_s29  ;;  %v1434_v36 = vsel %vm59_vm0, %v13787_v40, %v6581_v39  ;;  %v6732_v61 = vpack.i.bf16 %v9117_v31, %v9113_v25  ;;  %v13789_v40 = vmax.f32 %v9094_v11, 0.0  ;;  %v13790_v27 = vmax.f32 %v9098_v53, 0.0 }
 0x24b   :  { %13785 = vst [vmem:[#allocation36_spill] sm:$0xff] %v9125_v7  ;;  %6728 = vrot.lane.b32.xlu0 %v6727_v30, %s7584_s9  ;;  %v6737_v54 = vpack.i.bf16 %v9125_v7, %v9121_v51  ;;  %v1440_v30 = vsel %vm59_vm0, %v13788_v20, %v6595_v49  ;;  %v6742_v39 = vpack.i.bf16 %v13342_v57, %v13343_v60  ;;  %v13791_v7 = vld [vmem:[#allocation32_spill] sm:$0xff]  ;;  %v13793_v49 = vld [vmem:[#allocation33_spill] sm:$0xff]  ;;  %v6536_v60 = vunpack.i.h.bf16 %v8869_v9 }
 0x24c   :  { %v9159_v4 = vpop.permute.xlu1 %6623  ;;  %v6747_v45 = vpack.i.bf16 %v13790_v27, %v13789_v40  ;;  %v9171_v31 = vadd.f32 %v13791_v7, %v8217_v37  ;;  %v9180_v57 = vadd.f32 %v13793_v49, %v8217_v37  ;;  %v13795_v27 = vmax.f32 %v8413_v55, 0.0 }
 0x24d   :  { %v9174_v6 = vpop.permute.xlu0 %6638  ;;  %v13796_v7 = vmax.f32 %v8431_v56, 0.0  ;;  %v13798_v20 = vmax.f32 %v8420_v34, 0.0  ;;  %v6601_v49 = vunpack.i.h.bf16 %v9047_v44  ;;  %v13350_v53 = vunpack.i.l.bf16 %v9052_v19 }
 0x24e   :  { %13792 = vst [vmem:[#allocation32_spill] sm:$0xff] %v9174_v6  ;;  %6738 = vrot.lane.b32.xlu1 %v6737_v54, %s7584_s9  ;;  %13794 = vst [vmem:[#allocation33_spill] sm:$0xff] %v9180_v57  ;;  %v9185_v40 = vmax.f32 %v13795_v27, %v1434_v36  ;;  %v13799_v54 = vmax.f32 %v8449_v18, 0.0  ;;  %v6625_v36 = vunpack.i.l.bf16 %v9159_v4  ;;  %v6535_v56 = vunpack.i.l.bf16 %v8869_v9 }
 0x24f   :  { %6733 = vrot.lane.b32.xlu0 %v6732_v61, %s7584_s9  ;;  %v9189_v38 = vmax.f32 %v13796_v7, %v1435_v52  ;;  %v9193_v15 = vmax.f32 %v13798_v20, %v1440_v30  ;;  %v13801_v52 = vunpack.i.h.bf16 %v9139_v42  ;;  %v13802_v9 = vunpack.i.l.bf16 %v9047_v44 }
 0x250   :  { %v9197_v61 = vmax.f32 %v13799_v54, %v1441_v47  ;;  %v6629_v27 = vpop.permute.xlu1 %6628  ;;  %v13806_v55 = vunpack.i.h.bf16 %v9052_v19  ;;  %v13807_v44 = vunpack.i.h.bf16 %v9159_v4  ;;  %v13809_v37 = vmax.f32 %v13808_v17, 0.0 }
 0x251   :  { %13797 = vst [vmem:[#allocation109_spill] sm:$0xff] %v9189_v38  ;;  %v1463_v34 = vsel %vm59_vm0, %v6536_v60, %v13801_v52  ;;  %v6630_v30 = vunpack.i.l.bf16 %v6629_v27  ;;  %v9211_v20 = vpop.permute.xlu0 %6653  ;;  %v6752_v7 = vpack.i.bf16 %v9189_v38, %v9185_v40  ;;  %v1446_v54 = vsel %vm59_vm0, %v13802_v9, %v6601_v49  ;;  %v13803_v52 = vld [vmem:[#allocation17_spill] sm:$0xff] }
 0x252   :  { %13800 = vst [vmem:[#allocation110_spill] sm:$0xff] %v9197_v61  ;;  %6743 = vrot.lane.b32.xlu1 %v6742_v39, %s7583_s29  ;;  %v1447_v60 = vsel %vm59_vm0, %v6601_v49, %v13350_v53  ;;  %v6762_v39 = vpack.i.bf16 %v9197_v61, %v9193_v15  ;;  %v13804_v47 = vmax.f32 %v13803_v52, 0.0  ;;  %v1452_v38 = vsel %vm59_vm0, %v13806_v55, %v6625_v36  ;;  %v13812_v53 = vld [vmem:[#allocation34_spill] sm:$0xff] }
 0x253   :  { %6748 = vrot.lane.b32.xlu0 %v6747_v45, %s7583_s29  ;;  %v1457_v45 = vsel %vm59_vm0, %v6535_v56, %v6630_v30  ;;  %v1453_v9 = vsel %vm59_vm0, %v6625_v36, %v13807_v44  ;;  %v9242_v61 = vadd.f32 %v13812_v53, %v8223_v10  ;;  %v6656_v55 = vunpack.i.h.bf16 %v9211_v20 }
 0x254   :  { %v9226_v18 = vmax.f32 %v13804_v47, %v1463_v34  ;;  %v9236_v49 = vmax.f32 %v13809_v37, %v1457_v45  ;;  %v9238_v56 = vpop.permute.xlu1 %6643  ;;  %v13813_v34 = vld [vmem:[#allocation35_spill] sm:$0xff]  ;;  %v13815_v17 = vmax.f32 %v9171_v31, 0.0  ;;  %v13816_v37 = vmax.f32 %v9180_v57, 0.0 }
 0x255   :  { %13811 = vst [vmem:[#allocation111_spill] sm:$0xff] %v9238_v56  ;;  %v9246_v47 = vadd.f32 %v13813_v34, %v8223_v10  ;;  %v13817_v45 = vmax.f32 %v8481_v1, 0.0  ;;  %v13818_v53 = vmax.f32 %v8505_v59, 0.0  ;;  %v13821_v57 = vmax.f32 %v8569_v24, 0.0 }
 0x256   :  { %13805 = vst [vmem:[#allocation17_spill] sm:$0xff] %v9226_v18  ;;  %13810 = vst [vmem:[#allocation16_spill] sm:$0xff] %v9236_v49  ;;  %6753 = vrot.lane.b32.xlu1 %v6752_v7, %s7584_s9  ;;  %v6767_v36 = vpack.i.bf16 %v13816_v37, %v13815_v17  ;;  %v6757_v34 = vpack.i.bf16 %v9226_v18, %v9236_v49  ;;  %v13820_v7 = vmax.f32 %v8485_v16, 0.0  ;;  %v6631_v1 = vunpack.i.h.bf16 %v6629_v27 }
 0x257   :  { %13814 = vst [vmem:[#allocation34_spill] sm:$0xff] %v9246_v47  ;;  %6763 = vrot.lane.b32.xlu0 %v6762_v39, %s7584_s9  ;;  %v9257_v52 = vmax.f32 %v13817_v45, %v1446_v54  ;;  %v9261_v44 = vmax.f32 %v13818_v53, %v1447_v60  ;;  %v6551_v39 = vunpack.i.h.bf16 %v8907_v5  ;;  %v9272_v17 = vmax.f32 %v13821_v57, %v1453_v9 }
 0x258   :  { %v9268_v10 = vmax.f32 %v13820_v7, %v1452_v38  ;;  %v13360_v54 = vunpack.i.h.bf16 %v9238_v56  ;;  %v6645_v59 = vunpack.i.l.bf16 %v9238_v56  ;;  %v6649_v60 = vpop.permute.xlu1 %6648  ;;  %v6550_v37 = vunpack.i.l.bf16 %v8907_v5  ;;  %v13823_v38 = vld [vmem:[#allocation42_spill] sm:$0xff]  ;;  %v9324_v56 = vpop.permute.xlu0 %6658 }
 0x259   :  { %13819 = vst [vmem:[#allocation35_spill] sm:$0xff] %v9261_v44  ;;  %13822 = vst [vmem:[#allocation112_spill] sm:$0xff] %v9272_v17  ;;  %v13357_v45 = vunpack.i.l.bf16 %v9139_v42  ;;  %v1475_v53 = vsel %vm59_vm0, %v6551_v39, %v6656_v55  ;;  %v6650_v18 = vunpack.i.l.bf16 %v6649_v60  ;;  %v9285_v57 = vadd.f32 %v13823_v38, %v8313_v21  ;;  %v13824_v39 = vld [vmem:[#allocation27_spill] sm:$0xff] }
 0x25a   :  { %6758 = vrot.lane.b32.xlu1 %v6757_v34, %s7584_s9  ;;  %v6772_v5 = vpack.i.bf16 %v9261_v44, %v9257_v52  ;;  %v1458_v27 = vsel %vm59_vm0, %v6630_v30, %v6631_v1  ;;  %v6777_v34 = vpack.i.bf16 %v9272_v17, %v9268_v10  ;;  %v13825_v7 = vmax.f32 %v13824_v39, 0.0  ;;  %v13827_v44 = vld [vmem:[#allocation30_spill] sm:$0xff] }
 0x25b   :  { %6768 = vrot.lane.b32.xlu0 %v6767_v36, %s7583_s29  ;;  %v1459_v9 = vsel %vm59_vm0, %v6631_v1, %v13357_v45  ;;  %v1469_v36 = vsel %vm59_vm0, %v6550_v37, %v6650_v18  ;;  %v13826_v38 = vunpack.i.h.bf16 %v9139_v42  ;;  %v1465_v30 = vsel %vm59_vm0, %v6645_v59, %v13360_v54  ;;  %v13829_v45 = vld [vmem:[#allocation43_spill] sm:$0xff]  ;;  %13834 = vst [vmem:[#allocation30_spill] sm:$0xff] %v9324_v56 }
 0x25c   :  { %v9298_v16 = vmax.f32 %v13825_v7, %v1475_v53  ;;  %v13828_v49 = vmax.f32 %v13827_v44, 0.0  ;;  %v9310_v37 = vpop.permute.xlu1 %6663  ;;  %v9314_v17 = vadd.f32 %v13829_v45, %v8313_v21  ;;  %v13831_v53 = vld [vmem:[#allocation44_spill] sm:$0xff]  ;;  %v13832_v7 = vld [vmem:[#allocation45_spill] sm:$0xff]  ;;  %v13836_v44 = vmax.f32 %v9246_v47, 0.0 }
 0x25d   :  { %v1464_v24 = vsel %vm59_vm0, %v13826_v38, %v6645_v59  ;;  %v9318_v39 = vadd.f32 %v13831_v53, %v8301_v8  ;;  %v9322_v38 = vadd.f32 %v13832_v7, %v8301_v8  ;;  %v13837_v45 = vmax.f32 %v8610_v46, 0.0  ;;  %v13905_v47 = vld [vmem:[#allocation80_spill] sm:$0xff] }
 0x25e   :  { %v9308_v1 = vmax.f32 %v13828_v49, %v1469_v36  ;;  %13830 = vst [vmem:[#allocation42_spill] sm:$0xff] %v9314_v17  ;;  %6778 = vrot.lane.b32.xlu1 %v6777_v34, %s7584_s9  ;;  %v13835_v49 = vmax.f32 %v9242_v61, 0.0  ;;  %v13838_v7 = vmax.f32 %v8600_v32, 0.0  ;;  %v13841_v34 = vmax.f32 %v8624_v29, 0.0 }
 0x25f   :  { %13833 = vst [vmem:[#allocation27_spill] sm:$0xff] %v9322_v38  ;;  %6773 = vrot.lane.b32.xlu0 %v6772_v5, %s7584_s9  ;;  %v9334_v36 = vmax.f32 %v13837_v45, %v1458_v27  ;;  %v13840_v5 = vmax.f32 %v8559_v3, 0.0  ;;  %v13369_v46 = vunpack.i.h.bf16 %v9310_v37  ;;  %v6665_v27 = vunpack.i.l.bf16 %v9310_v37 }
 0x260   :  { %v6782_v59 = vpack.i.bf16 %v13836_v44, %v13835_v49  ;;  %v6787_v53 = vpack.i.bf16 %v9298_v16, %v9308_v1  ;;  %v9340_v54 = vmax.f32 %v13838_v7, %v1459_v9  ;;  %v9348_v21 = vmax.f32 %v13841_v34, %v1465_v30  ;;  %v6669_v44 = vpop.permute.xlu1 %6668 }
 0x261   :  { %v9344_v8 = vmax.f32 %v13840_v5, %v1464_v24  ;;  %v6651_v49 = vunpack.i.h.bf16 %v6649_v60  ;;  %v13367_v45 = vmax.f32 %v9285_v57, 0.0  ;;  %v13366_v32 = vmax.f32 %v9314_v17, 0.0  ;;  %v9360_v24 = vpop.permute.xlu0 %6673 }
 0x262   :  { %13839 = vst [vmem:[#allocation43_spill] sm:$0xff] %v9340_v54  ;;  %13842 = vst [vmem:[#allocation44_spill] sm:$0xff] %v9348_v21  ;;  %v13368_v9 = vmax.f32 %v9318_v39, 0.0  ;;  %6783 = vrot.lane.b32.xlu1 %v6782_v59, %s7583_s29  ;;  %v13365_v29 = vunpack.i.l.bf16 %v9211_v20  ;;  %v6792_v7 = vpack.i.bf16 %v9340_v54, %v9334_v36  ;;  %v1477_v59 = vsel %vm59_vm0, %v6665_v27, %v13369_v46 }
 0x263   :  { %6788 = vrot.lane.b32.xlu0 %v6787_v53, %s7584_s9  ;;  %v1470_v60 = vsel %vm59_vm0, %v6650_v18, %v6651_v49  ;;  %v6802_v30 = vpack.i.bf16 %v9348_v21, %v9344_v8  ;;  %v1476_v53 = vsel %vm59_vm0, %v6656_v55, %v6665_v27  ;;  %v6670_v34 = vunpack.i.l.bf16 %v6669_v44 }
 0x264   :  { %v1471_v5 = vsel %vm59_vm0, %v6651_v49, %v13365_v29  ;;  %v9373_v18 = vpop.permute.xlu1 %6678  ;;  %v6797_v3 = vpack.i.bf16 %v13366_v32, %v13367_v45  ;;  %v13843_v21 = vmax.f32 %v9322_v38, 0.0  ;;  %v13844_v49 = vld [vmem:[#allocation52_spill] sm:$0xff]  ;;  %v9391_v27 = vadd.f32 %v8469_v22, %v8377_v33 }
 0x265   :  { %v9385_v55 = vadd.f32 %v13844_v49, %v8377_v33  ;;  %v6570_v29 = vunpack.i.l.bf16 %v8958_v35  ;;  %v13846_v32 = vmax.f32 %v8666_v14, 0.0  ;;  %v6671_v17 = vunpack.i.h.bf16 %v6669_v44 }
 0x266   :  { %v6807_v54 = vpack.i.bf16 %v13843_v21, %v13368_v9  ;;  %6793 = vrot.lane.b32.xlu1 %v6792_v7, %s7584_s9  ;;  %13845 = vst [vmem:[#allocation45_spill] sm:$0xff] %v9391_v27  ;;  %v6676_v21 = vunpack.i.h.bf16 %v9360_v24  ;;  %v13847_v9 = vmax.f32 %v8656_v62, 0.0  ;;  %v13850_v7 = vmax.f32 %v8680_v12, 0.0  ;;  %v13857_v12 = vld [vmem:[#allocation37_spill] sm:$0xff] }
 0x267   :  { %6803 = vrot.lane.b32.xlu0 %v6802_v30, %s7584_s9  ;;  %v9396_v45 = vmax.f32 %v13846_v32, %v1470_v60  ;;  %v13849_v30 = vmax.f32 %v8615_v63, 0.0  ;;  %v6571_v38 = vunpack.i.h.bf16 %v8958_v35  ;;  %v1481_v14 = vsel %vm59_vm0, %v6570_v29, %v6670_v34  ;;  %v13852_v29 = vld [vmem:[#allocation40_spill] sm:$0xff] }
 0x268   :  { %v9401_v49 = vmax.f32 %v13847_v9, %v1471_v5  ;;  %v9409_v22 = vmax.f32 %v13850_v7, %v1477_v59  ;;  %v13373_v32 = vunpack.i.h.bf16 %v9373_v18  ;;  %v6680_v60 = vunpack.i.l.bf16 %v9373_v18  ;;  %v6684_v62 = vpop.permute.xlu1 %6683  ;;  %v9426_v59 = vpop.permute.xlu0 %6688 }
 0x269   :  { %v9405_v46 = vmax.f32 %v13849_v30, %v1476_v53  ;;  %v13374_v9 = vunpack.i.l.bf16 %v9360_v24  ;;  %v1487_v44 = vsel %vm59_vm0, %v6571_v38, %v6676_v21  ;;  %v1482_v35 = vsel %vm59_vm0, %v6670_v34, %v6671_v17  ;;  %13854 = vst [vmem:[#allocation40_spill] sm:$0xff] %v9426_v59 }
 0x26a   :  { %13848 = vst [vmem:[#allocation52_spill] sm:$0xff] %v9401_v49  ;;  %13851 = vst [vmem:[#allocation113_spill] sm:$0xff] %v9409_v22  ;;  %6798 = vrot.lane.b32.xlu1 %v6797_v3, %s7583_s29  ;;  %v13853_v5 = vmax.f32 %v13852_v29, 0.0  ;;  %v1488_v38 = vsel %vm59_vm0, %v6676_v21, %v6680_v60  ;;  %v1489_v34 = vsel %vm59_vm0, %v6680_v60, %v13373_v32  ;;  %v6685_v7 = vunpack.i.l.bf16 %v6684_v62  ;;  %v13855_v29 = vld [vmem:[#allocation53_spill] sm:$0xff] }
 0x26b   :  { %6808 = vrot.lane.b32.xlu0 %v6807_v54, %s7583_s29  ;;  %v6812_v54 = vpack.i.bf16 %v9401_v49, %v9396_v45  ;;  %v6817_v3 = vpack.i.bf16 %v9409_v22, %v9405_v46  ;;  %v1483_v30 = vsel %vm59_vm0, %v6671_v17, %v13374_v9  ;;  %v13858_v63 = vmax.f32 %v13857_v12, 0.0 }
 0x26c   :  { %v9424_v53 = vmax.f32 %v13853_v5, %v1481_v14  ;;  %v9441_v14 = vadd.f32 %v8477_v43, %v8361_v0  ;;  %v9445_v5 = vadd.f32 %v13855_v29, %v8361_v0  ;;  %v13859_v17 = vmax.f32 %v9385_v55, 0.0 }
 0x26d   :  { %v9449_v22 = vmax.f32 %v13858_v63, %v1487_v44  ;;  %v13860_v21 = vmax.f32 %v9391_v27, 0.0  ;;  %v6590_v43 = vunpack.i.l.bf16 %v9019_v13  ;;  %v13861_v32 = vmax.f32 %v8712_v23, 0.0 }
 0x26e   :  { %13856 = vst [vmem:[#allocation53_spill] sm:$0xff] %v9445_v5  ;;  %6818 = vrot.lane.b32.xlu1 %v6817_v3, %s7584_s9  ;;  %v13379_v29 = vunpack.i.h.bf16 %v9426_v59  ;;  %v13862_v63 = vmax.f32 %v8704_v50, 0.0  ;;  %v13864_v44 = vmax.f32 %v8671_v58, 0.0  ;;  %v13865_v3 = vmax.f32 %v8726_v48, 0.0 }
 0x26f   :  { %6813 = vrot.lane.b32.xlu0 %v6812_v54, %s7584_s9  ;;  %v6827_v60 = vpack.i.bf16 %v13860_v21, %v13859_v17  ;;  %v9460_v9 = vmax.f32 %v13861_v32, %v1482_v35  ;;  %v6822_v17 = vpack.i.bf16 %v9449_v22, %v9424_v53  ;;  %v6591_v23 = vunpack.i.h.bf16 %v9019_v13 }
 0x270   :  { %v9465_v12 = vmax.f32 %v13862_v63, %v1483_v30  ;;  %v9469_v54 = vmax.f32 %v13864_v44, %v1488_v38  ;;  %v9473_v27 = vmax.f32 %v13865_v3, %v1489_v34  ;;  %v6686_v32 = vunpack.i.h.bf16 %v6684_v62  ;;  %v13867_v38 = vld [vmem:[#allocation50_spill] sm:$0xff]  ;;  %v13870_v44 = vld [vmem:[#allocation47_spill] sm:$0xff] }
 0x271   :  { %v1493_v35 = vsel %vm59_vm0, %v6590_v43, %v6685_v7  ;;  %v13378_v50 = vmax.f32 %v9441_v14, 0.0  ;;  %v13377_v58 = vmax.f32 %v9445_v5, 0.0  ;;  %v13376_v48 = vunpack.i.l.bf16 %v9426_v59 }
 0x272   :  { %13863 = vst [vmem:[#allocation37_spill] sm:$0xff] %v9465_v12  ;;  %13866 = vst [vmem:[#allocation114_spill] sm:$0xff] %v9473_v27  ;;  %6823 = vrot.lane.b32.xlu1 %v6822_v17, %s7584_s9  ;;  %v1499_v30 = vsel %vm59_vm0, %v6591_v23, %v13379_v29  ;;  %v13868_v34 = vmax.f32 %v13867_v38, 0.0  ;;  %v6842_v62 = vpack.i.bf16 %v9473_v27, %v9469_v54  ;;  %v13871_v3 = vmax.f32 %v13870_v44, 0.0  ;;  %v13874_v38 = vld [vmem:[#allocation63_spill] sm:$0xff] }
 0x273   :  { %6828 = vrot.lane.b32.xlu0 %v6827_v60, %s7583_s29  ;;  %v6832_v21 = vpack.i.bf16 %v9465_v12, %v9460_v9  ;;  %v7450_v60 = vld [vmem:[%s13194_s3 + $0x104] ss:$8 sps:$4 sm:$0xff]   ;;  %v1494_v43 = vsel %vm59_vm0, %v6685_v7, %v6686_v32  ;;  %v1495_v63 = vsel %vm59_vm0, %v6686_v32, %v13376_v48  ;;  %v6837_v23 = vpack.i.bf16 %v13377_v58, %v13378_v50  ;;  %v13875_v32 = vld [vmem:[#allocation64_spill] sm:$0xff] }
 0x274   :  { %v9489_v13 = vmax.f32 %v13868_v34, %v1493_v35  ;;  %v9504_v17 = vmax.f32 %v13871_v3, %v1499_v30  ;;  %v13873_v35 = vld [vmem:[#allocation46_spill] sm:$0xff]  ;;  %3232 = vmatprep.subr.bf16.mxu0 %v7450_v60  ;;  %v13877_v30 = vld [vmem:[#allocation79_spill] sm:$0xff]  ;;  %v13883_v50 = vld [vmem:[#allocation12_spill] sm:$0xff]  ;;  %v13894_v49 = vunpack.i.h.bf16 %v9133_v28 }
 0x275   :  { %v9514_v7 = vadd.f32 %v13874_v38, %v13873_v35  ;;  %v9518_v34 = vadd.f32 %v13875_v32, %v13873_v35  ;;  %v13878_v44 = vmax.f32 %v13877_v30, 0.0  ;;  %v13384_v29 = vunpack.i.h.bf16 %v13883_v50 }
 0x276   :  { %13869 = vst [vmem:[#allocation50_spill] sm:$0xff] %v9489_v13  ;;  %13872 = vst [vmem:[#allocation47_spill] sm:$0xff] %v9504_v17  ;;  %6833 = vrot.lane.b32.xlu1 %v6832_v21, %s7584_s9  ;;  %v6847_v58 = vpack.i.bf16 %v9504_v17, %v9489_v13  ;;  %v6615_v38 = vunpack.i.l.bf16 %v13883_v50  ;;  %v13933_v17 = vld [vmem:[#allocation2_spill] sm:$0xff] }
 0x277   :  { %6843 = vrot.lane.b32.xlu0 %v6842_v62, %s7584_s9  ;;  %13876 = vst [vmem:[#allocation63_spill] sm:$0xff] %v9518_v34  ;;  %v9522_v3 = vmax.f32 %v13878_v44, %v1494_v43  ;;  %v13880_v62 = vld [vmem:[#allocation78_spill] sm:$0xff]  ;;  %v13388_v60 = vmax.f32 %v9514_v7, 0.0  ;;  %v13387_v43 = vmax.f32 %v9518_v34, 0.0  ;;  %v13895_v34 = vld [vmem:[#allocation5_spill] sm:$0xff] }
 0x278   :  { %v13881_v21 = vmax.f32 %v13880_v62, 0.0  ;;  %v1419_v62 = vsel %vm59_vm0, %v6615_v38, %v13384_v29 }
 0x279   :  { %13879 = vst [vmem:[#allocation64_spill] sm:$0xff] %v9522_v3 }
 0x27a   :  { %v9526_v48 = vmax.f32 %v13881_v21, %v1495_v63  ;;  %6838 = vrot.lane.b32.xlu1 %v6837_v23, %s7583_s29  ;;  %v13884_v63 = vld [vmem:[#allocation99_spill] sm:$0xff]  ;;  %v6867_v23 = vpack.i.bf16 %v13387_v43, %v13388_v60  ;;  %v13896_v43 = vld [vmem:[#allocation82_spill] sm:$0xff] }
 0x27b   :  { %6848 = vrot.lane.b32.xlu0 %v6847_v58, %s7584_s9  ;;  %v13885_v30 = vunpack.i.h.bf16 %v13884_v63  ;;  %v6620_v58 = vunpack.i.l.bf16 %v9133_v28  ;;  %v9568_v60 = vadd.f32 %v13896_v43, %v13895_v34 }
 0x27c   :  { %13882 = vst [vmem:[#allocation79_spill] sm:$0xff] %v9526_v48  ;;  %v6852_v32 = vpack.i.bf16 %v9526_v48, %v9522_v3  ;;  %v13886_v48 = vld [vmem:[#allocation31_spill] sm:$0xff] }
 0x27d   :  { %v1418_v44 = vsel %vm59_vm0, %v13885_v30, %v6615_v38  ;;  %v13887_v27 = vmax.f32 %v13886_v48, 0.0  ;;  %v13889_v30 = vld [vmem:[#allocation54_spill] sm:$0xff]  ;;  %13897 = vst [vmem:[#allocation31_spill] sm:$0xff] %v9568_v60  ;;  %v13392_v34 = vmax.f32 %v9568_v60, 0.0  ;;  %v13917_v60 = vld [vmem:[#allocation97_spill] sm:$0xff] }
 0x27e   :  { %v13890_v12 = vmax.f32 %v13889_v30, 0.0  ;;  %v13892_v38 = vld [vmem:[#allocation102_spill] sm:$0xff]  ;;  %v13918_v50 = vmax.f32 %v13917_v60, 0.0 }
 0x27f   :  { %6853 = vrot.lane.b32.xlu0 %v6852_v32, %s7584_s9  ;;  %v9553_v63 = vmax.f32 %v13887_v27, %v1418_v44  ;;  %v13893_v29 = vunpack.i.l.bf16 %v13892_v38  ;;  %v1425_v32 = vsel %vm59_vm0, %v6620_v58, %v13894_v49  ;;  %v13898_v27 = vld [vmem:[#allocation38_spill] sm:$0xff]  ;;  %v13904_v38 = vld [vmem:[#allocation4_spill] sm:$0xff] }
 0x280   :  { %v9557_v5 = vmax.f32 %v13890_v12, %v1419_v62  ;;  %v13899_v48 = vmax.f32 %v13898_v27, 0.0  ;;  %v13901_v12 = vld [vmem:[#allocation60_spill] sm:$0xff]  ;;  %v9582_v49 = vadd.f32 %v13905_v47, %v13904_v38 }
 0x281   :  { %13888 = vst [vmem:[#allocation78_spill] sm:$0xff] %v9553_v63  ;;  %v1424_v21 = vsel %vm59_vm0, %v13893_v29, %v6620_v58  ;;  %v13902_v62 = vmax.f32 %v13901_v12, 0.0  ;;  %v13908_v12 = vld [vmem:[#allocation59_spill] sm:$0xff] }
 0x282   :  { %13891 = vst [vmem:[#allocation99_spill] sm:$0xff] %v9557_v5  ;;  %v9572_v44 = vmax.f32 %v13899_v48, %v1424_v21  ;;  %v6877_v29 = vpack.i.bf16 %v9557_v5, %v9553_v63  ;;  %13906 = vst [vmem:[#allocation5_spill] sm:$0xff] %v9582_v49  ;;  %v13391_v21 = vmax.f32 %v9582_v49, 0.0  ;;  %v13907_v48 = vld [vmem:[#allocation49_spill] sm:$0xff] }
 0x283   :  { %6868 = vrot.lane.b32.xlu0 %v6867_v23, %s7583_s29  ;;  %v9576_v30 = vmax.f32 %v13902_v62, %v1425_v32  ;;  %v9601_v62 = vadd.f32 %v13908_v12, %v13907_v48 }
 0x284   :  { %13900 = vst [vmem:[#allocation54_spill] sm:$0xff] %v9572_v44  ;;  %v6897_v58 = vpack.i.bf16 %v13392_v34, %v13391_v21 }
 0x285   :  { %13903 = vst [vmem:[#allocation102_spill] sm:$0xff] %v9576_v30  ;;  %v6887_v43 = vpack.i.bf16 %v9576_v30, %v9572_v44  ;;  %13909 = vst [vmem:[#allocation82_spill] sm:$0xff] %v9601_v62  ;;  %v13914_v44 = vld [vmem:[#allocation75_spill] sm:$0xff]  ;;  %v13410_v30 = vmax.f32 %v9601_v62, 0.0 }
 0x286   :  { %v13915_v49 = vmax.f32 %v13914_v44, 0.0 }
 0x287   :  { %6878 = vrot.lane.b32.xlu0 %v6877_v29, %s7584_s9  ;;  %v13910_v29 = vld [vmem:[#allocation62_spill] sm:$0xff] }
 0x288   :  { %v9605_v38 = vadd.f32 %v13910_v29, %v13907_v48 }
 0x28a   :  { %13911 = vst [vmem:[#allocation38_spill] sm:$0xff] %v9605_v38  ;;  %v13409_v63 = vmax.f32 %v9605_v38, 0.0 }
 0x28b   :  { %6888 = vrot.lane.b32.xlu0 %v6887_v43, %s7584_s9  ;;  %v13912_v43 = vld [vmem:[#allocation13_spill] sm:$0xff] }
 0x28c   :  { %v6610_v21 = vunpack.i.l.bf16 %v13912_v43  ;;  %v13922_v44 = vunpack.i.h.bf16 %v13912_v43  ;;  %v6862_v60 = vpack.i.bf16 %v13409_v63, %v13410_v30  ;;  %v13939_v63 = vld [vmem:[#allocation41_spill] sm:$0xff] }
 0x28d   :  { %v13940_v30 = vmax.f32 %v13939_v63, 0.0 }
 0x28f   :  { %6898 = vrot.lane.b32.xlu0 %v6897_v58, %s7583_s29  ;;  %v13913_v58 = vunpack.i.h.bf16 %v9426_v59  ;;  %v13920_v59 = vld [vmem:[#allocation96_spill] sm:$0xff] }
 0x290   :  { %v13921_v48 = vunpack.i.l.bf16 %v13920_v59 }
 0x2a3   :  { %v6694_v47 = vpop.permute.xlu1 %6693 }
 0x2a4   :  { %v6695_v13 = vunpack.i.l.bf16 %v6694_v47 }
 0x2a7   :  { %v9595_v23 = vpop.permute.xlu1 %6698 }
 0x2a8   :  { %v13402_v32 = vunpack.i.h.bf16 %v9595_v23  ;;  %v6700_v27 = vunpack.i.l.bf16 %v9595_v23 }
 0x2aa   :  { %v1500_v34 = vsel %vm59_vm0, %v13913_v58, %v6700_v27  ;;  %v1501_v5 = vsel %vm59_vm0, %v6700_v27, %v13402_v32  ;;  %v1412_v27 = vsel %vm59_vm0, %v13921_v48, %v6610_v21  ;;  %v13924_v32 = vld [vmem:[#allocation83_spill] sm:$0xff]  ;;  %v13926_v48 = vld [vmem:[#allocation28_spill] sm:$0xff] }
 0x2ab   :  { %v9617_v12 = vmax.f32 %v13915_v49, %v1500_v34  ;;  %v9621_v29 = vmax.f32 %v13918_v50, %v1501_v5  ;;  %v9623_v28 = vpop.permute.xlu0 %6703  ;;  %v1413_v49 = vsel %vm59_vm0, %v6610_v21, %v13922_v44  ;;  %v6640_v50 = vunpack.i.l.bf16 %v9174_v6  ;;  %v13923_v34 = vld [vmem:[#allocation3_spill] sm:$0xff]  ;;  %v13929_v21 = vld [vmem:[#allocation56_spill] sm:$0xff] }
 0x2ac   :  { %v9644_v59 = vadd.f32 %v13924_v32, %v13923_v34  ;;  %v13930_v44 = vmax.f32 %v13929_v21, 0.0  ;;  %v13936_v32 = vld [vmem:[#allocation103_spill] sm:$0xff] }
 0x2ad   :  { %13916 = vst [vmem:[#allocation60_spill] sm:$0xff] %v9617_v12  ;;  %13919 = vst [vmem:[#allocation4_spill] sm:$0xff] %v9621_v29  ;;  %v6857_v58 = vpack.i.bf16 %v9621_v29, %v9617_v12  ;;  %v13927_v29 = vmax.f32 %v13926_v48, 0.0  ;;  %v13934_v12 = vld [vmem:[#allocation81_spill] sm:$0xff]  ;;  %v13937_v34 = vunpack.i.h.bf16 %v13936_v32  ;;  %v6696_v32 = vunpack.i.h.bf16 %v6694_v47  ;;  %v13949_v47 = vld [vmem:[#allocation7_spill] sm:$0xff] }
 0x2ae   :  { %13925 = vst [vmem:[#allocation80_spill] sm:$0xff] %v9644_v59  ;;  %v9658_v62 = vadd.f32 %v13934_v12, %v13933_v17 }
 0x2af   :  { %6858 = vrot.lane.b32.xlu1 %v6857_v58, %s7584_s9  ;;  %v9648_v43 = vmax.f32 %v13927_v29, %v1412_v27  ;;  %v9652_v58 = vmax.f32 %v13930_v44, %v1413_v49  ;;  %v9654_v5 = vpop.permute.xlu0 %6723  ;;  %v1430_v48 = vsel %vm59_vm0, %v13937_v34, %v6640_v50  ;;  %v13938_v29 = vunpack.i.h.bf16 %v9174_v6 }
 0x2b0   :  { %13932 = vst [vmem:[#allocation75_spill] sm:$0xff] %v9654_v5  ;;  %13935 = vst [vmem:[#allocation97_spill] sm:$0xff] %v9658_v62  ;;  %v6725_v21 = vunpack.i.l.bf16 %v9654_v5  ;;  %v9679_v6 = vmax.f32 %v13940_v30, %v1430_v48  ;;  %v13946_v34 = vunpack.i.h.bf16 %v9654_v5  ;;  %v13947_v30 = vmax.f32 %v9658_v62, 0.0  ;;  %v13955_v62 = vld [vmem:[#allocation101_spill] sm:$0xff] }
 0x2b1   :  { %13928 = vst [vmem:[#allocation59_spill] sm:$0xff] %v9648_v43  ;;  %13931 = vst [vmem:[#allocation62_spill] sm:$0xff] %v9652_v58  ;;  %v1431_v27 = vsel %vm59_vm0, %v6640_v50, %v13938_v29  ;;  %v6872_v17 = vpack.i.bf16 %v9652_v58, %v9648_v43  ;;  %v13942_v50 = vld [vmem:[#allocation66_spill] sm:$0xff]  ;;  %v13948_v48 = vmax.f32 %v9644_v59, 0.0  ;;  %v13953_v58 = vunpack.i.h.bf16 %v9324_v56 }
 0x2b2   :  { %13941 = vst [vmem:[#allocation96_spill] sm:$0xff] %v9679_v6  ;;  %v13943_v29 = vmax.f32 %v13942_v50, 0.0  ;;  %v2071_v12 = vsel %vm121_vm1, %v6696_v32, %v6725_v21  ;;  %v2072_v63 = vsel %vm121_vm1, %v6725_v21, %v13946_v34  ;;  %v13950_v50 = vld [vmem:[#allocation87_spill] sm:$0xff] }
 0x2b3   :  { %v9660_v38 = vpop.permute.xlu1 %6708  ;;  %6863 = vrot.lane.b32.xlu1 %v6862_v60, %s7583_s29  ;;  %v6660_v60 = vunpack.i.l.bf16 %v9324_v56  ;;  %v13959_v56 = vld [vmem:[#allocation106_spill] sm:$0xff] }
 0x2b4   :  { %v9683_v49 = vmax.f32 %v13943_v29, %v1431_v27  ;;  %v6882_v27 = vpack.i.bf16 %v13948_v48, %v13947_v30  ;;  %v9700_v29 = vadd.f32 %v13950_v50, %v13949_v47  ;;  %v2280_v30 = vmax.f32 %v13955_v62, %v2071_v12  ;;  %v13956_v48 = vld [vmem:[#allocation100_spill] sm:$0xff] }
 0x2b5   :  { %v1437_v3 = vsel %vm59_vm0, %v6660_v60, %v13953_v58  ;;  %v2281_v58 = vmax.f32 %v13959_v56, %v2072_v63  ;;  %v13963_v12 = vld [vmem:[#allocation48_spill] sm:$0xff] }
 0x2b6   :  { %13944 = vst [vmem:[#allocation3_spill] sm:$0xff] %v9683_v49  ;;  %13951 = vst [vmem:[#allocation28_spill] sm:$0xff] %v9700_v29 }
 0x2b7   :  { %v9685_v44 = vpop.permute.xlu1 %6713  ;;  %6873 = vrot.lane.b32.xlu1 %v6872_v17, %s7584_s9  ;;  %v13952_v17 = vunpack.i.l.bf16 %v8984_v2  ;;  %v13958_v2 = vld [vmem:[#allocation23_spill] sm:$0xff] }
 0x2b8   :  { %13945 = vst [vmem:[#allocation83_spill] sm:$0xff] %v9685_v44  ;;  %v6715_v43 = vunpack.i.l.bf16 %v9685_v44  ;;  %v13954_v21 = vunpack.i.h.bf16 %v9685_v44 }
 0x2b9   :  { %v1436_v32 = vsel %vm59_vm0, %v13952_v17, %v6660_v60  ;;  %v13960_v60 = vld [vmem:[#allocation6_spill] sm:$0xff] }
 0x2ba   :  { %v2065_v5 = vsel %vm121_vm1, %v6695_v13, %v6715_v43  ;;  %v2066_v34 = vsel %vm121_vm1, %v6715_v43, %v13954_v21  ;;  %v13961_v13 = vld [vmem:[#allocation85_spill] sm:$0xff]  ;;  %v13964_v21 = vmax.f32 %v13963_v12, 0.0  ;;  %v13971_v12 = vunpack.i.h.bf16 %v9003_v26 }
 0x2bb   :  { %v2273_v59 = vmax.f32 %v13956_v48, %v2065_v5  ;;  %6883 = vrot.lane.b32.xlu1 %v6882_v27, %s7583_s29  ;;  %v2274_v17 = vmax.f32 %v13958_v2, %v2066_v34  ;;  %v9723_v35 = vadd.f32 %v13961_v13, %v13960_v60  ;;  %v6892_v5 = vpack.i.bf16 %v9683_v49, %v9679_v6  ;;  %v13966_v27 = vld [vmem:[#allocation70_spill] sm:$0xff]  ;;  %v13970_v13 = vld [vmem:[#allocation84_spill] sm:$0xff] }
 0x2bc   :  { %v9716_v50 = vpop.permute.xlu1 %6718  ;;  %v9731_v48 = vmax.f32 %v13964_v21, %v1436_v32  ;;  %v13967_v44 = vmax.f32 %v13966_v27, 0.0  ;;  %v7448_v2 = vld [vmem:[%s13194_s3 + $0x100] ss:$8 sps:$4 sm:$0xff]  }
 0x2bd   :  { %v9714_v47 = vpop.permute.xlu0 %6728  ;;  %13957 = vst [vmem:[#allocation56_spill] sm:$0xff] %v9716_v50  ;;  %13962 = vst [vmem:[#allocation2_spill] sm:$0xff] %v9723_v35  ;;  %v6720_v62 = vunpack.i.l.bf16 %v9716_v50  ;;  %v2385_v56 = vpack.c.bf16 %v2280_v30, %v2273_v59  ;;  %v2386_v63 = vpack.c.bf16 %v2281_v58, %v2274_v17  ;;  %v13969_v60 = vld [vmem:[#allocation10_spill] sm:$0xff]  ;;  %v13972_v21 = vunpack.i.h.bf16 %v9716_v50  ;;  %v7453_v59 = vld [vmem:[%s13194_s3 + $0x114] ss:$8 sps:$4 sm:$0xff]  }
 0x2be   :  { %13965 = vst [vmem:[#allocation81_spill] sm:$0xff] %v9731_v48  ;;  %v9735_v34 = vmax.f32 %v13967_v44, %v1437_v3  ;;  %v9742_v43 = vadd.f32 %v13970_v13, %v13969_v60  ;;  %v6706_v44 = vunpack.i.h.bf16 %v9623_v28  ;;  %v6705_v30 = vunpack.i.l.bf16 %v9623_v28  ;;  %v13973_v17 = vld [vmem:[#allocation51_spill] sm:$0xff]  ;;  %v13976_v60 = vld [vmem:[#allocation18_spill] sm:$0xff] }
 0x2bf   :  { %v1442_v32 = vsel %vm59_vm0, %v13971_v12, %v6720_v62  ;;  %v1443_v3 = vsel %vm59_vm0, %v6720_v62, %v13972_v21  ;;  %v13974_v58 = vmax.f32 %v13973_v17, 0.0  ;;  %v13977_v26 = vmax.f32 %v13976_v60, 0.0  ;;  %3151 = vmatprep.mubr.bf16.mxu0 %v2386_v63  ;;  %6893 = vrot.lane.b32.xlu1 %v6892_v5, %s7584_s9 }
 0x2c0   :  { %13968 = vst [vmem:[#allocation103_spill] sm:$0xff] %v9735_v34  ;;  %v9766_v49 = vpop.permute.xlu1 %6738  ;;  %3152 = vmatmul.mubr.bf16.vlgmr.msra.gmra.mrb[32].mxu0 %v2385_v56  ;;  %v6902_v5 = vpack.i.bf16 %v9735_v34, %v9731_v48  ;;  %v13982_v34 = vmax.f32 %v9700_v29, 0.0 }
 0x2c1   :  { %v9758_v27 = vmax.f32 %v13974_v58, %v1442_v32  ;;  %v9762_v13 = vmax.f32 %v13977_v26, %v1443_v3  ;;  %v9764_v12 = vpop.permute.xlu0 %6733  ;;  %v13429_v28 = vunpack.i.h.bf16 %v9766_v49  ;;  %v6740_v32 = vunpack.i.l.bf16 %v9766_v49  ;;  %v13979_v3 = vld [vmem:[#allocation11_spill] sm:$0xff]  ;;  %v13980_v58 = vld [vmem:[#allocation86_spill] sm:$0xff]  ;;  %3233 = vmatpush1.bf16.msra.mxu0 %v7448_v2  ;;  %v7451_v26 = vld [vmem:[%s13194_s3 + $0x110] ss:$8 sps:$4 sm:$0xff]  }
 0x2c2   :  { %v13426_v62 = vunpack.i.h.bf16 %v9764_v12  ;;  %v6735_v21 = vunpack.i.l.bf16 %v9764_v12  ;;  %v9776_v60 = vadd.f32 %v13980_v58, %v13979_v3  ;;  %3234 = vmatprep.subr.bf16.mxu0 %v7453_v59  ;;  %v7456_v2 = vld [vmem:[%s13194_s3 + $0x124] ss:$8 sps:$4 sm:$0xff]  }
 0x2c3   :  { %13975 = vst [vmem:[#allocation41_spill] sm:$0xff] %v9758_v27  ;;  %13978 = vst [vmem:[#allocation66_spill] sm:$0xff] %v9762_v13  ;;  %v6907_v63 = vpack.i.bf16 %v9762_v13, %v9758_v27  ;;  %v2084_v3 = vsel %vm121_vm1, %v6740_v32, %v13429_v28  ;;  %v2083_v17 = vsel %vm121_vm1, %v6706_v44, %v6740_v32  ;;  %v13981_v13 = vmax.f32 %v9723_v35, 0.0  ;;  %v13983_v35 = vld [vmem:[#allocation104_spill] sm:$0xff] }
 0x2c4   :  { %v2078_v56 = vsel %vm121_vm1, %v6735_v21, %v13426_v62  ;;  %v2077_v58 = vsel %vm121_vm1, %v6705_v30, %v6735_v21  ;;  %v6711_v62 = vunpack.i.h.bf16 %v9660_v38  ;;  %v9803_v48 = vpop.permute.xlu1 %6743  ;;  %6903 = vrot.lane.b32.xlu1 %v6902_v5, %s7584_s9  ;;  %v2295_v44 = vmax.f32 %v9121_v51, %v2084_v3 }
 0x2c5   :  { %v6912_v50 = vpack.i.bf16 %v13982_v34, %v13981_v13  ;;  %v9801_v27 = vpop.permute.xlu0 %6748  ;;  %6908 = vrot.lane.b32.xlu0 %v6907_v63, %s7584_s9  ;;  %v2288_v59 = vmax.f32 %v9113_v25, %v2078_v56  ;;  %v13433_v34 = vunpack.i.h.bf16 %v9803_v48  ;;  %v6745_v13 = vunpack.i.l.bf16 %v9803_v48  ;;  %v13984_v63 = vld [vmem:[#allocation105_spill] sm:$0xff]  ;;  %3235 = vmatpush1.bf16.msra.mxu0 %v7451_v26  ;;  %v7454_v25 = vld [vmem:[%s13194_s3 + $0x120] ss:$8 sps:$4 sm:$0xff]  }
 0x2c6   :  { %v13434_v30 = vunpack.i.h.bf16 %v9801_v27  ;;  %v6750_v21 = vunpack.i.l.bf16 %v9801_v27  ;;  %v6710_v32 = vunpack.i.l.bf16 %v9660_v38  ;;  %v2287_v29 = vmax.f32 %v13983_v35, %v2077_v58  ;;  %3236 = vmatprep.subr.bf16.mxu0 %v7456_v2 }
 0x2c7   :  { %v2393_v28 = vpack.c.bf16 %v2295_v44, %v2288_v59  ;;  %v2294_v6 = vmax.f32 %v13984_v63, %v2083_v17  ;;  %v13985_v51 = vunpack.i.h.bf16 %v9159_v4  ;;  %v13986_v38 = vunpack.i.l.bf16 %v9052_v19  ;;  %v7459_v17 = vld [vmem:[%s13194_s3 + $0x134] ss:$8 sps:$4 sm:$0xff]   ;;  %v13991_v19 = vld [vmem:[#allocation58_spill] sm:$0xff] }
 0x2c8   :  { %v1455_v56 = vsel %vm59_vm0, %v6750_v21, %v13434_v30  ;;  %v1449_v35 = vsel %vm59_vm0, %v6745_v13, %v13433_v34  ;;  %v13987_v4 = vld [vmem:[#allocation65_spill] sm:$0xff]  ;;  %v13989_v59 = vmax.f32 %v9094_v11, 0.0  ;;  %6913 = vrot.lane.b32.xlu1 %v6912_v50, %s7583_s29  ;;  %v13996_v30 = vld [vmem:[#allocation15_spill] sm:$0xff] }
 0x2c9   :  { %v1454_v5 = vsel %vm59_vm0, %v13985_v51, %v6750_v21  ;;  %v1448_v3 = vsel %vm59_vm0, %v13986_v38, %v6745_v13  ;;  %v13988_v26 = vmax.f32 %v13987_v4, 0.0  ;;  %v13992_v21 = vmax.f32 %v13991_v19, 0.0  ;;  %v9850_v2 = vpop.permute.xlu0 %6763  ;;  %v9852_v38 = vpop.permute.xlu1 %6753  ;;  %3161 = vmatprep.mubr.bf16.mxu0 %v2393_v28  ;;  %3237 = vmatpush1.bf16.msra.mxu0 %v7454_v25  ;;  %v7457_v50 = vld [vmem:[%s13194_s3 + $0x130] ss:$8 sps:$4 sm:$0xff]   ;;  %v7462_v25 = vld [vmem:[%s13194_s3 + $0x144] ss:$8 sps:$4 sm:$0xff]  }
 0x2ca   :  { %v9840_v44 = vmax.f32 %v13989_v59, %v1455_v56  ;;  %v13993_v51 = vmax.f32 %v9074_v41, 0.0  ;;  %v6765_v11 = vunpack.i.l.bf16 %v9850_v2  ;;  %v13436_v56 = vunpack.i.h.bf16 %v9852_v38  ;;  %3238 = vmatprep.subr.bf16.mxu0 %v7459_v17 }
 0x2cb   :  { %v9836_v58 = vmax.f32 %v13988_v26, %v1454_v5  ;;  %v9844_v63 = vmax.f32 %v13992_v21, %v1448_v3  ;;  %v13435_v5 = vunpack.i.h.bf16 %v9850_v2  ;;  %v6755_v4 = vunpack.i.l.bf16 %v9852_v38 }
 0x2cc   :  { %13990 = vst [vmem:[#allocation7_spill] sm:$0xff] %v9840_v44  ;;  %v9848_v13 = vmax.f32 %v13993_v51, %v1449_v35  ;;  %v13438_v3 = vmax.f32 %v9776_v60, 0.0  ;;  %v2392_v41 = vpack.c.bf16 %v2294_v6, %v2287_v29  ;;  %v2095_v29 = vsel %vm121_vm1, %v6711_v62, %v6765_v11 }
 0x2cd   :  { %v6922_v26 = vpack.i.bf16 %v9840_v44, %v9836_v58  ;;  %v2090_v59 = vsel %vm121_vm1, %v6755_v4, %v13436_v56  ;;  %v2096_v28 = vsel %vm121_vm1, %v6765_v11, %v13435_v5  ;;  %v2089_v6 = vsel %vm121_vm1, %v6710_v32, %v6755_v4  ;;  %v9879_v21 = vpop.permute.xlu0 %6768  ;;  %v9881_v51 = vpop.permute.xlu1 %6758  ;;  %v13995_v4 = vld [vmem:[#allocation8_spill] sm:$0xff]  ;;  %v13997_v5 = vld [vmem:[#allocation91_spill] sm:$0xff]  ;;  %3239 = vmatpush1.bf16.msra.mxu0 %v7457_v50 }
 0x2ce   :  { %13994 = vst [vmem:[#allocation87_spill] sm:$0xff] %v9848_v13  ;;  %v6917_v35 = vpack.i.bf16 %v9848_v13, %v9844_v63  ;;  %v13437_v19 = vmax.f32 %v9742_v43, 0.0  ;;  %3162 = vmatmul.mubr.bf16.gmra.mrb[36].mxu0 %v2392_v41  ;;  %v2302_v34 = vmax.f32 %v9185_v40, %v2090_v59  ;;  %v2309_v32 = vmax.f32 %v9193_v15, %v2096_v28  ;;  %v13998_v59 = vld [vmem:[#allocation9_spill] sm:$0xff]  ;;  %v7460_v28 = vld [vmem:[%s13194_s3 + $0x140] ss:$8 sps:$4 sm:$0xff]   ;;  %v14002_v50 = vld [vmem:[#allocation68_spill] sm:$0xff] }
 0x2cf   :  { %v2301_v62 = vmax.f32 %v13995_v4, %v2089_v6  ;;  %v13439_v17 = vunpack.i.h.bf16 %v9879_v21  ;;  %v6770_v11 = vunpack.i.l.bf16 %v9879_v21  ;;  %6923 = vrot.lane.b32.xlu1 %v6922_v26, %s7584_s9  ;;  %v2308_v15 = vmax.f32 %v13998_v59, %v2095_v29  ;;  %v13999_v6 = vld [vmem:[#allocation14_spill] sm:$0xff]  ;;  %v14000_v4 = vld [vmem:[#allocation89_spill] sm:$0xff]  ;;  %3240 = vmatprep.subr.bf16.mxu0 %v7462_v25 }
 0x2d0   :  { %6918 = vrot.lane.b32.xlu0 %v6917_v35, %s7584_s9  ;;  %v6927_v41 = vpack.i.bf16 %v13438_v3, %v13437_v19  ;;  %v9896_v35 = vadd.f32 %v13997_v5, %v13996_v30  ;;  %v2400_v40 = vpack.c.bf16 %v2309_v32, %v2302_v34  ;;  %v9904_v26 = vadd.f32 %v14000_v4, %v13999_v6  ;;  %v7465_v34 = vld [vmem:[%s13194_s3 + $0x154] ss:$8 sps:$4 sm:$0xff]  }
 0x2d1   :  { %v6731_v56 = vunpack.i.h.bf16 %v9714_v47  ;;  %v14001_v19 = vunpack.i.l.bf16 %v9139_v42  ;;  %v1461_v30 = vsel %vm59_vm0, %v6770_v11, %v13439_v17  ;;  %v6730_v5 = vunpack.i.l.bf16 %v9714_v47  ;;  %v9927_v6 = vpop.permute.xlu1 %6778  ;;  %3241 = vmatpush1.bf16.msra.mxu0 %v7460_v28  ;;  %v7468_v28 = vld [vmem:[%s13194_s3 + $0x164] ss:$8 sps:$4 sm:$0xff]  }
 0x2d2   :  { %v14003_v29 = vmax.f32 %v14002_v50, 0.0  ;;  %v14005_v59 = vmax.f32 %v9171_v31, 0.0  ;;  %3171 = vmatprep.mubr.bf16.mxu0 %v2400_v40  ;;  %v2399_v25 = vpack.c.bf16 %v2308_v15, %v2301_v62  ;;  %v13440_v4 = vunpack.i.h.bf16 %v9927_v6  ;;  %3242 = vmatprep.subr.bf16.mxu0 %v7465_v34 }
 0x2d3   :  { %v1460_v3 = vsel %vm59_vm0, %v14001_v19, %v6770_v11  ;;  %v9925_v19 = vpop.permute.xlu0 %6773  ;;  %v13445_v31 = vmax.f32 %v9896_v35, 0.0 }
 0x2d4   :  { %v9919_v32 = vmax.f32 %v14003_v29, %v1460_v3  ;;  %v9923_v42 = vmax.f32 %v14005_v59, %v1461_v30  ;;  %6928 = vrot.lane.b32.xlu0 %v6927_v41, %s7583_s29  ;;  %v13441_v11 = vunpack.i.h.bf16 %v9925_v19  ;;  %v6775_v47 = vunpack.i.l.bf16 %v9925_v19  ;;  %v7463_v41 = vld [vmem:[%s13194_s3 + $0x150] ss:$8 sps:$4 sm:$0xff]  }
 0x2d5   :  { %v6780_v3 = vunpack.i.l.bf16 %v9927_v6  ;;  %v13444_v29 = vmax.f32 %v9904_v26, 0.0  ;;  %v9954_v17 = vpop.permute.xlu1 %6783  ;;  %3243 = vmatpush1.bf16.msra.mxu0 %v7463_v41  ;;  %v14011_v41 = vld [vmem:[#allocation69_spill] sm:$0xff] }
 0x2d6   :  { %14004 = vst [vmem:[#allocation101_spill] sm:$0xff] %v9919_v32  ;;  %14006 = vst [vmem:[#allocation100_spill] sm:$0xff] %v9923_v42  ;;  %v6932_v30 = vpack.i.bf16 %v9923_v42, %v9919_v32  ;;  %v2102_v62 = vsel %vm121_vm1, %v6775_v47, %v13441_v11  ;;  %v2101_v15 = vsel %vm121_vm1, %v6730_v5, %v6775_v47  ;;  %3172 = vmatmul.mubr.bf16.gmra.mrb[40].mxu0 %v2399_v25  ;;  %v14007_v47 = vld [vmem:[#allocation20_spill] sm:$0xff] }
 0x2d7   :  { %v2108_v40 = vsel %vm121_vm1, %v6780_v3, %v13440_v4  ;;  %v2107_v50 = vsel %vm121_vm1, %v6731_v56, %v6780_v3  ;;  %v9952_v59 = vpop.permute.xlu0 %6788  ;;  %v2316_v4 = vmax.f32 %v9257_v52, %v2102_v62  ;;  %v2315_v56 = vmax.f32 %v14007_v47, %v2101_v15  ;;  %v14008_v42 = vld [vmem:[#allocation24_spill] sm:$0xff]  ;;  %v7466_v52 = vld [vmem:[%s13194_s3 + $0x160] ss:$8 sps:$4 sm:$0xff]   ;;  %3244 = vmatprep.subr.bf16.mxu0 %v7468_v28 }
 0x2d8   :  { %6933 = vrot.lane.b32.xlu1 %v6932_v30, %s7584_s9  ;;  %v2323_v5 = vmax.f32 %v9268_v10, %v2108_v40  ;;  %v13446_v34 = vunpack.i.h.bf16 %v9954_v17  ;;  %v6785_v3 = vunpack.i.l.bf16 %v9954_v17  ;;  %v6942_v25 = vpack.i.bf16 %v13445_v31, %v13444_v29  ;;  %v14009_v30 = vld [vmem:[#allocation111_spill] sm:$0xff]  ;;  %v14020_v31 = vld [vmem:[#allocation90_spill] sm:$0xff] }
 0x2d9   :  { %v2322_v44 = vmax.f32 %v14008_v42, %v2107_v50  ;;  %v6761_v10 = vunpack.i.h.bf16 %v9881_v51  ;;  %v14010_v62 = vunpack.i.h.bf16 %v14009_v30  ;;  %v7471_v42 = vld [vmem:[%s13194_s3 + $0x174] ss:$8 sps:$4 sm:$0xff]   ;;  %v14012_v50 = vmax.f32 %v14011_v41, 0.0  ;;  %v9991_v29 = vpop.permute.xlu1 %6793  ;;  %3245 = vmatpush1.bf16.msra.mxu0 %v7466_v52  ;;  %v7474_v52 = vld [vmem:[%s13194_s3 + $0x184] ss:$8 sps:$4 sm:$0xff]  }
 0x2da   :  { %v2407_v11 = vpack.c.bf16 %v2323_v5, %v2316_v4  ;;  %v1467_v15 = vsel %vm59_vm0, %v6785_v3, %v13446_v34  ;;  %v6760_v4 = vunpack.i.l.bf16 %v9881_v51  ;;  %v14014_v47 = vmax.f32 %v9242_v61, 0.0  ;;  %v14018_v61 = vld [vmem:[#allocation88_spill] sm:$0xff]  ;;  %3246 = vmatprep.subr.bf16.mxu0 %v7471_v42 }
 0x2db   :  { %v1466_v40 = vsel %vm59_vm0, %v14010_v62, %v6785_v3  ;;  %v9989_v62 = vpop.permute.xlu0 %6803  ;;  %v2406_v28 = vpack.c.bf16 %v2322_v44, %v2315_v56  ;;  %v13448_v41 = vunpack.i.h.bf16 %v9991_v29  ;;  %v7469_v44 = vld [vmem:[%s13194_s3 + $0x170] ss:$8 sps:$4 sm:$0xff]  }
 0x2dc   :  { %v9983_v5 = vmax.f32 %v14012_v50, %v1466_v40  ;;  %v9987_v30 = vmax.f32 %v14014_v47, %v1467_v15  ;;  %14016 = vst [vmem:[#allocation6_spill] sm:$0xff] %v9989_v62  ;;  %6943 = vrot.lane.b32.xlu1 %v6942_v25, %s7583_s29  ;;  %3181 = vmatprep.mubr.bf16.mxu0 %v2407_v11  ;;  %v13450_v3 = vunpack.i.h.bf16 %v9989_v62  ;;  %v6805_v51 = vunpack.i.l.bf16 %v9989_v62  ;;  %v14017_v50 = vld [vmem:[#allocation29_spill] sm:$0xff] }
 0x2dd   :  { %v6795_v40 = vunpack.i.l.bf16 %v9991_v29  ;;  %v10000_v15 = vadd.f32 %v14018_v61, %v14017_v50  ;;  %v14019_v61 = vld [vmem:[#allocation25_spill] sm:$0xff]  ;;  %v10025_v13 = vpop.permute.xlu1 %6798  ;;  %3247 = vmatpush1.bf16.msra.mxu0 %v7469_v44 }
 0x2de   :  { %14013 = vst [vmem:[#allocation23_spill] sm:$0xff] %v9983_v5  ;;  %14015 = vst [vmem:[#allocation106_spill] sm:$0xff] %v9987_v30  ;;  %v6937_v47 = vpack.i.bf16 %v9987_v30, %v9983_v5  ;;  %v2120_v56 = vsel %vm121_vm1, %v6805_v51, %v13450_v3  ;;  %v2119_v50 = vsel %vm121_vm1, %v6761_v10, %v6805_v51  ;;  %v6791_v30 = vunpack.i.h.bf16 %v9952_v59  ;;  %v14021_v3 = vld [vmem:[#allocation16_spill] sm:$0xff]  ;;  %v14022_v62 = vld [vmem:[#allocation17_spill] sm:$0xff] }
 0x2df   :  { %v2114_v11 = vsel %vm121_vm1, %v6795_v40, %v13448_v41  ;;  %v2113_v25 = vsel %vm121_vm1, %v6760_v4, %v6795_v40  ;;  %v10020_v34 = vadd.f32 %v14020_v31, %v14019_v61  ;;  %3182 = vmatmul.mubr.bf16.gmra.mrb[44].mxu0 %v2406_v28  ;;  %v10023_v41 = vpop.permute.xlu0 %6808  ;;  %v2337_v42 = vmax.f32 %v9344_v8, %v2120_v56  ;;  %v7472_v8 = vld [vmem:[%s13194_s3 + $0x180] ss:$8 sps:$4 sm:$0xff]  }
 0x2e0   :  { %6938 = vrot.lane.b32.xlu0 %v6937_v47, %s7584_s9  ;;  %v2330_v10 = vmax.f32 %v9334_v36, %v2114_v11  ;;  %v13455_v4 = vunpack.i.h.bf16 %v10023_v41  ;;  %v6810_v51 = vunpack.i.l.bf16 %v10023_v41  ;;  %v13454_v31 = vunpack.i.h.bf16 %v10025_v13  ;;  %3248 = vmatprep.subr.bf16.mxu0 %v7474_v52 }
 0x2e1   :  { %v6800_v40 = vunpack.i.l.bf16 %v10025_v13  ;;  %v6790_v28 = vunpack.i.l.bf16 %v9952_v59  ;;  %v2329_v5 = vmax.f32 %v14021_v3, %v2113_v25  ;;  %v2336_v32 = vmax.f32 %v14022_v62, %v2119_v50  ;;  %v7477_v3 = vld [vmem:[%s13194_s3 + $0x194] ss:$8 sps:$4 sm:$0xff]   ;;  %3249 = vmatpush1.bf16.msra.mxu0 %v7472_v8  ;;  %v7480_v8 = vld [vmem:[%s13194_s3 + $0x1a4] ss:$8 sps:$4 sm:$0xff]  }
 0x2e2   :  { %v2414_v61 = vpack.c.bf16 %v2337_v42, %v2330_v10  ;;  %v14023_v36 = vunpack.i.h.bf16 %v9310_v37  ;;  %v1479_v11 = vsel %vm59_vm0, %v6810_v51, %v13455_v4  ;;  %v14024_v59 = vunpack.i.l.bf16 %v9211_v20  ;;  %v14025_v37 = vld [vmem:[#allocation73_spill] sm:$0xff]  ;;  %v14029_v20 = vld [vmem:[#allocation72_spill] sm:$0xff]  ;;  %3250 = vmatprep.subr.bf16.mxu0 %v7477_v3 }
 0x2e3   :  { %v1473_v62 = vsel %vm59_vm0, %v6800_v40, %v13454_v31  ;;  %v14026_v44 = vmax.f32 %v14025_v37, 0.0  ;;  %v14027_v50 = vmax.f32 %v9318_v39, 0.0  ;;  %v14030_v42 = vmax.f32 %v14029_v20, 0.0  ;;  %v10071_v52 = vpop.permute.xlu0 %6813 }
 0x2e4   :  { %v1478_v47 = vsel %vm59_vm0, %v14023_v36, %v6810_v51  ;;  %v1472_v56 = vsel %vm59_vm0, %v14024_v59, %v6800_v40  ;;  %v14031_v36 = vmax.f32 %v9285_v57, 0.0  ;;  %v10073_v59 = vpop.permute.xlu1 %6818  ;;  %3191 = vmatprep.mubr.bf16.mxu0 %v2414_v61  ;;  %v6815_v37 = vunpack.i.l.bf16 %v10071_v52  ;;  %v7475_v61 = vld [vmem:[%s13194_s3 + $0x190] ss:$8 sps:$4 sm:$0xff]  }
 0x2e5   :  { %v10057_v25 = vmax.f32 %v14026_v44, %v1478_v47  ;;  %v10061_v10 = vmax.f32 %v14027_v50, %v1479_v11  ;;  %v10065_v51 = vmax.f32 %v14030_v42, %v1472_v56  ;;  %v13467_v47 = vunpack.i.h.bf16 %v10071_v52  ;;  %3251 = vmatpush1.bf16.msra.mxu0 %v7475_v61 }
 0x2e6   :  { %v10069_v40 = vmax.f32 %v14031_v36, %v1473_v62  ;;  %v13456_v39 = vunpack.i.h.bf16 %v10073_v59  ;;  %v6820_v11 = vunpack.i.l.bf16 %v10073_v59  ;;  %v13466_v56 = vmax.f32 %v10020_v34, 0.0  ;;  %3252 = vmatprep.subr.bf16.mxu0 %v7480_v8 }
 0x2e7   :  { %14028 = vst [vmem:[#allocation85_spill] sm:$0xff] %v10061_v10  ;;  %v2413_v44 = vpack.c.bf16 %v2336_v32, %v2329_v5  ;;  %v6952_v62 = vpack.i.bf16 %v10061_v10, %v10057_v25  ;;  %v2126_v50 = vsel %vm121_vm1, %v6815_v37, %v13467_v47  ;;  %v2125_v32 = vsel %vm121_vm1, %v6790_v28, %v6815_v37  ;;  %v10099_v36 = vpop.permute.xlu0 %6828  ;;  %v14079_v10 = vld [vmem:[#allocation26_spill] sm:$0xff] }
 0x2e8   :  { %14032 = vst [vmem:[#allocation48_spill] sm:$0xff] %v10069_v40  ;;  %v6947_v57 = vpack.i.bf16 %v10069_v40, %v10065_v51  ;;  %v2132_v20 = vsel %vm121_vm1, %v6820_v11, %v13456_v39  ;;  %v2131_v5 = vsel %vm121_vm1, %v6791_v30, %v6820_v11  ;;  %v13465_v42 = vmax.f32 %v10000_v15, 0.0  ;;  %v6824_v31 = vpop.permute.xlu1 %6823  ;;  %v14033_v11 = vld [vmem:[#allocation95_spill] sm:$0xff] }
 0x2e9   :  { %3192 = vmatmul.mubr.bf16.gmra.mrb[48].mxu0 %v2413_v44  ;;  %v2344_v4 = vmax.f32 %v9396_v45, %v2126_v50  ;;  %v2351_v39 = vmax.f32 %v9405_v46, %v2132_v20  ;;  %v2343_v28 = vmax.f32 %v9308_v1, %v2125_v32  ;;  %v13457_v30 = vunpack.i.h.bf16 %v10099_v36  ;;  %6953 = vrot.lane.b32.xlu1 %v6952_v62, %s7584_s9  ;;  %v7478_v1 = vld [vmem:[%s13194_s3 + $0x1a0] ss:$8 sps:$4 sm:$0xff]  }
 0x2ea   :  { %6948 = vrot.lane.b32.xlu0 %v6947_v57, %s7584_s9  ;;  %v6830_v3 = vunpack.i.l.bf16 %v10099_v36  ;;  %v6957_v37 = vpack.i.bf16 %v13466_v56, %v13465_v42  ;;  %v10114_v44 = vadd.f32 %v14033_v11, %v8361_v0  ;;  %v2350_v46 = vmax.f32 %v9298_v16, %v2131_v5  ;;  %v14034_v57 = vld [vmem:[#allocation93_spill] sm:$0xff]  ;;  %3253 = vmatpush1.bf16.msra.mxu0 %v7478_v1  ;;  %v7486_v1 = vld [vmem:[%s13194_s3 + $0x1c4] ss:$8 sps:$4 sm:$0xff]   ;;  %v14060_v42 = vld [vmem:[#allocation60_spill] sm:$0xff] }
 0x2eb   :  { %v2421_v45 = vpack.c.bf16 %v2351_v39, %v2344_v4  ;;  %v10122_v62 = vadd.f32 %v14034_v57, %v8377_v33  ;;  %v14035_v50 = vunpack.i.l.bf16 %v9360_v24  ;;  %v6826_v4 = vunpack.i.h.bf16 %v6824_v31  ;;  %v7483_v16 = vld [vmem:[%s13194_s3 + $0x1b4] ss:$8 sps:$4 sm:$0xff]   ;;  %v14036_v39 = vld [vmem:[#allocation74_spill] sm:$0xff]  ;;  %v10141_v11 = vpop.permute.xlu0 %6843 }
 0x2ec   :  { %v1485_v0 = vsel %vm59_vm0, %v6830_v3, %v13457_v30  ;;  %v14037_v61 = vmax.f32 %v14036_v39, 0.0  ;;  %v14038_v33 = vmax.f32 %v9385_v55, 0.0  ;;  %v6825_v24 = vunpack.i.l.bf16 %v6824_v31  ;;  %v10143_v57 = vpop.permute.xlu1 %6833  ;;  %3254 = vmatprep.subr.bf16.mxu0 %v7483_v16 }
 0x2ed   :  { %v1484_v20 = vsel %vm59_vm0, %v14035_v50, %v6830_v3  ;;  %3201 = vmatprep.mubr.bf16.mxu0 %v2421_v45  ;;  %v2420_v8 = vpack.c.bf16 %v2350_v46, %v2343_v28  ;;  %v13458_v3 = vunpack.i.h.bf16 %v10141_v11  ;;  %v6845_v50 = vunpack.i.l.bf16 %v10141_v11 }
 0x2ee   :  { %v10135_v32 = vmax.f32 %v14037_v61, %v1484_v20  ;;  %v10139_v5 = vmax.f32 %v14038_v33, %v1485_v0  ;;  %6958 = vrot.lane.b32.xlu0 %v6957_v37, %s7583_s29  ;;  %v13459_v20 = vunpack.i.h.bf16 %v10143_v57  ;;  %v6835_v39 = vunpack.i.l.bf16 %v10143_v57  ;;  %v7481_v37 = vld [vmem:[%s13194_s3 + $0x1b0] ss:$8 sps:$4 sm:$0xff]  }
 0x2ef   :  { %v13463_v55 = vmax.f32 %v10114_v44, 0.0  ;;  %v2144_v45 = vsel %vm121_vm1, %v6845_v50, %v13458_v3  ;;  %v2143_v0 = vsel %vm121_vm1, %v6826_v4, %v6845_v50  ;;  %v13462_v61 = vmax.f32 %v10122_v62, 0.0  ;;  %v10168_v33 = vpop.permute.xlu0 %6848  ;;  %3255 = vmatpush1.bf16.msra.mxu0 %v7481_v37 }
 0x2f0   :  { %14039 = vst [vmem:[#allocation70_spill] sm:$0xff] %v10139_v5  ;;  %v6962_v31 = vpack.i.bf16 %v10139_v5, %v10135_v32  ;;  %v2138_v28 = vsel %vm121_vm1, %v6835_v39, %v13459_v20  ;;  %v2137_v46 = vsel %vm121_vm1, %v6825_v24, %v6835_v39  ;;  %v10170_v30 = vpop.permute.xlu1 %6838  ;;  %v2365_v24 = vmax.f32 %v9469_v54, %v2144_v45 }
 0x2f1   :  { %3202 = vmatmul.mubr.bf16.gmra.mrb[52].mxu0 %v2420_v8  ;;  %v2358_v3 = vmax.f32 %v9460_v9, %v2138_v28  ;;  %v2357_v4 = vmax.f32 %v9424_v53, %v2137_v46  ;;  %v13464_v16 = vunpack.i.h.bf16 %v10170_v30  ;;  %v6840_v50 = vunpack.i.l.bf16 %v10170_v30  ;;  %v7484_v9 = vld [vmem:[%s13194_s3 + $0x1c0] ss:$8 sps:$4 sm:$0xff]   ;;  %3256 = vmatprep.subr.bf16.mxu0 %v7486_v1  ;;  %v14041_v28 = vld [vmem:[#allocation76_spill] sm:$0xff] }
 0x2f2   :  { %6963 = vrot.lane.b32.xlu1 %v6962_v31, %s7584_s9  ;;  %v6972_v8 = vpack.i.bf16 %v13463_v55, %v13462_v61  ;;  %v2364_v20 = vmax.f32 %v9449_v22, %v2143_v0  ;;  %v14040_v54 = vunpack.i.h.bf16 %v9373_v18  ;;  %v14042_v22 = vmax.f32 %v14041_v28, 0.0  ;;  %v14065_v61 = vld [vmem:[#allocation40_spill] sm:$0xff] }
 0x2f3   :  { %v2428_v39 = vpack.c.bf16 %v2365_v24, %v2358_v3  ;;  %v1491_v31 = vsel %vm59_vm0, %v6840_v50, %v13464_v16  ;;  %v7489_v3 = vld [vmem:[%s13194_s3 + $0x1d4] ss:$8 sps:$4 sm:$0xff]   ;;  %v14043_v45 = vmax.f32 %v9441_v14, 0.0  ;;  %v10203_v18 = vpop.permute.xlu0 %6853  ;;  %3257 = vmatpush1.bf16.msra.mxu0 %v7484_v9  ;;  %v7487_v24 = vld [vmem:[%s13194_s3 + $0x1d0] ss:$8 sps:$4 sm:$0xff]  }
 0x2f4   :  { %v1490_v53 = vsel %vm59_vm0, %v14040_v54, %v6840_v50  ;;  %v2427_v0 = vpack.c.bf16 %v2364_v20, %v2357_v4  ;;  %3258 = vmatprep.subr.bf16.mxu0 %v7489_v3  ;;  %v7492_v14 = vld [vmem:[%s13194_s3 + $0x1e4] ss:$8 sps:$4 sm:$0xff]  }
 0x2f5   :  { %v10197_v37 = vmax.f32 %v14042_v22, %v1490_v53  ;;  %v10201_v46 = vmax.f32 %v14043_v45, %v1491_v31  ;;  %3211 = vmatprep.mubr.bf16.mxu0 %v2428_v39  ;;  %v14046_v39 = vunpack.i.h.bf16 %v9595_v23  ;;  %v7495_v53 = vld [vmem:[%s13194_s3 + $0x1f4] ss:$8 sps:$4 sm:$0xff]   ;;  %v14047_v31 = vld [vmem:[#allocation98_spill] sm:$0xff]  ;;  %v14050_v22 = vmax.f32 %v9514_v7, 0.0 }
 0x2f6   :  { %6973 = vrot.lane.b32.xlu1 %v6972_v8, %s7583_s29  ;;  %v7490_v8 = vld [vmem:[%s13194_s3 + $0x1e0] ss:$8 sps:$4 sm:$0xff]   ;;  %v14048_v3 = vmax.f32 %v14047_v31, 0.0 }
 0x2f7   :  { %14044 = vst [vmem:[#allocation10_spill] sm:$0xff] %v10201_v46  ;;  %v6967_v1 = vpack.i.bf16 %v10201_v46, %v10197_v37  ;;  %v10214_v50 = vpop.permute.xlu0 %6868  ;;  %3259 = vmatpush1.bf16.msra.mxu0 %v7487_v24  ;;  %v13461_v24 = vunpack.i.h.bf16 %v10203_v18  ;;  %v14066_v46 = vunpack.i.l.bf16 %v14065_v61 }
 0x2f8   :  { %14045 = vst [vmem:[#allocation84_spill] sm:$0xff] %v10214_v50  ;;  %v13460_v20 = vunpack.i.h.bf16 %v10214_v50  ;;  %v6870_v4 = vunpack.i.l.bf16 %v10214_v50  ;;  %3260 = vmatprep.subr.bf16.mxu0 %v7492_v14  ;;  %v6855_v14 = vunpack.i.l.bf16 %v10203_v18 }
 0x2f9   :  { %3212 = vmatmul.mubr.bf16.gmra.mrb[56].mxu0 %v2427_v0  ;;  %6968 = vrot.lane.b32.xlu0 %v6967_v1, %s7584_s9  ;;  %v7493_v0 = vld [vmem:[%s13194_s3 + $0x1f0] ss:$8 sps:$4 sm:$0xff]   ;;  %v7498_v1 = vld [vmem:[%s13194_s3 + $0x204] ss:$8 sps:$4 sm:$0xff]  }
 0x2fa   :  { %v1502_v9 = vsel %vm59_vm0, %v14046_v39, %v6870_v4  ;;  %v1503_v54 = vsel %vm59_vm0, %v6870_v4, %v13460_v20  ;;  %v6850_v4 = vunpack.i.l.bf16 %v10168_v33  ;;  %v2150_v39 = vsel %vm121_vm1, %v6855_v14, %v13461_v24  ;;  %v14057_v20 = vld [vmem:[#allocation64_spill] sm:$0xff] }
 0x2fb   :  { %v10233_v28 = vmax.f32 %v14048_v3, %v1502_v9  ;;  %v10237_v45 = vmax.f32 %v14050_v22, %v1503_v54  ;;  %3261 = vmatpush1.bf16.msra.mxu0 %v7490_v8  ;;  %v10248_v7 = vpop.permute.xlu0 %6878  ;;  %v6851_v54 = vunpack.i.h.bf16 %v10168_v33  ;;  %v14054_v22 = vld [vmem:[#allocation46_spill] sm:$0xff]  ;;  %v2372_v24 = vmax.f32 %v14057_v20, %v2150_v39  ;;  %v14062_v39 = vld [vmem:[#allocation49_spill] sm:$0xff] }
 0x2fc   :  { %3262 = vmatprep.subr.bf16.mxu0 %v7495_v53  ;;  %14052 = vst [vmem:[#allocation11_spill] sm:$0xff] %v10248_v7  ;;  %v2149_v9 = vsel %vm121_vm1, %v6850_v4, %v6855_v14  ;;  %v14058_v4 = vld [vmem:[#allocation50_spill] sm:$0xff]  ;;  %v6880_v55 = vunpack.i.l.bf16 %v10248_v7  ;;  %v14075_v61 = vunpack.i.h.bf16 %v10248_v7 }
 0x2fd   :  { %14049 = vst [vmem:[#allocation51_spill] sm:$0xff] %v10233_v28  ;;  %14051 = vst [vmem:[#allocation18_spill] sm:$0xff] %v10237_v45  ;;  %v6982_v23 = vpack.i.bf16 %v10237_v45, %v10233_v28  ;;  %v2371_v33 = vmax.f32 %v14058_v4, %v2149_v9 }
 0x2ff   :  { %6983 = vrot.lane.b32.xlu1 %v6982_v23, %s7584_s9  ;;  %3263 = vmatpush1.bf16.msra.mxu0 %v7493_v0  ;;  %v10260_v53 = vpop.permute.xlu0 %6888  ;;  %v14055_v23 = vld [vmem:[#allocation94_spill] sm:$0xff] }
 0x300   :  { %3345 = vmatprep.subr.bf16.mxu0 %v7498_v1  ;;  %14053 = vst [vmem:[#allocation86_spill] sm:$0xff] %v10260_v53  ;;  %v10266_v0 = vadd.f32 %v14055_v23, %v14054_v22  ;;  %v14061_v22 = vld [vmem:[#allocation47_spill] sm:$0xff] }
 0x302   :  { %14056 = vst [vmem:[#allocation104_spill] sm:$0xff] %v10266_v0 }
 0x303   :  { %v6899_v4 = vpop.permute.xlu0 %6898 }
 0x321   :  { %v10253_v8 = vpop.permute.xlu1 %6858 }
 0x322   :  { %v13468_v31 = vunpack.i.h.bf16 %v10253_v8  ;;  %v6860_v3 = vunpack.i.l.bf16 %v10253_v8 }
 0x324   :  { %v2156_v1 = vsel %vm121_vm1, %v6860_v3, %v13468_v31  ;;  %v2155_v14 = vsel %vm121_vm1, %v6851_v54, %v6860_v3  ;;  %v14063_v54 = vld [vmem:[#allocation92_spill] sm:$0xff] }
 0x325   :  { %v10276_v16 = vpop.permute.xlu1 %6863  ;;  %v2379_v56 = vmax.f32 %v14060_v42, %v2156_v1  ;;  %v2378_v23 = vmax.f32 %v14061_v22, %v2155_v14  ;;  %v10284_v3 = vadd.f32 %v14063_v54, %v14062_v39  ;;  %v14067_v1 = vld [vmem:[#allocation75_spill] sm:$0xff] }
 0x326   :  { %14059 = vst [vmem:[#allocation105_spill] sm:$0xff] %v10276_v16  ;;  %v13472_v47 = vunpack.i.h.bf16 %v10276_v16  ;;  %v6865_v31 = vunpack.i.l.bf16 %v10276_v16  ;;  %v14068_v14 = vunpack.i.h.bf16 %v14067_v1  ;;  %v6890_v1 = vunpack.i.l.bf16 %v10260_v53 }
 0x327   :  { %v2435_v45 = vpack.c.bf16 %v2379_v56, %v2372_v24  ;;  %v2434_v20 = vpack.c.bf16 %v2378_v23, %v2371_v33  ;;  %14064 = vst [vmem:[#allocation65_spill] sm:$0xff] %v10284_v3  ;;  %v14069_v24 = vld [vmem:[#allocation77_spill] sm:$0xff]  ;;  %v14071_v23 = vld [vmem:[#allocation82_spill] sm:$0xff] }
 0x328   :  { %v1496_v5 = vsel %vm59_vm0, %v14066_v46, %v6865_v31  ;;  %v1497_v42 = vsel %vm59_vm0, %v6865_v31, %v13472_v47  ;;  %v2073_v56 = vsel %vm121_vm1, %v14068_v14, %v6880_v55  ;;  %v14070_v33 = vmax.f32 %v14069_v24, 0.0  ;;  %v14078_v47 = vld [vmem:[#allocation107_spill] sm:$0xff] }
 0x329   :  { %v14072_v39 = vmax.f32 %v14071_v23, 0.0  ;;  %v10304_v9 = vpop.permute.xlu1 %6873  ;;  %3221 = vmatprep.mubr.bf16.mxu0 %v2435_v45  ;;  %v2074_v46 = vsel %vm121_vm1, %v6880_v55, %v14075_v61  ;;  %v6901_v24 = vunpack.i.h.bf16 %v6899_v4  ;;  %v13481_v45 = vmax.f32 %v10284_v3, 0.0  ;;  %v14076_v23 = vld [vmem:[#allocation83_spill] sm:$0xff] }
 0x32a   :  { %v10298_v22 = vmax.f32 %v14070_v33, %v1496_v5  ;;  %14074 = vst [vmem:[#allocation8_spill] sm:$0xff] %v10304_v9  ;;  %v13480_v14 = vunpack.i.h.bf16 %v10304_v9  ;;  %v6875_v5 = vunpack.i.l.bf16 %v10304_v9  ;;  %3222 = vmatmul.mubr.bf16.gmra.mrb[60].mxu0 %v2434_v20  ;;  %v6900_v33 = vunpack.i.l.bf16 %v6899_v4  ;;  %v14080_v4 = vld [vmem:[#allocation59_spill] sm:$0xff] }
 0x32b   :  { %v10302_v54 = vmax.f32 %v14072_v39, %v1497_v42  ;;  %v14077_v39 = vunpack.i.h.bf16 %v14076_v23  ;;  %v2282_v31 = vmax.f32 %v14078_v47, %v2073_v56  ;;  %v14082_v23 = vmax.f32 %v10266_v0, 0.0  ;;  %v14084_v56 = vld [vmem:[#allocation32_spill] sm:$0xff]  ;;  %v14094_v0 = vld [vmem:[#allocation97_spill] sm:$0xff] }
 0x32c   :  { %v2068_v61 = vsel %vm121_vm1, %v6875_v5, %v13480_v14 }
 0x32d   :  { %14073 = vst [vmem:[#allocation58_spill] sm:$0xff] %v10302_v54  ;;  %v6977_v42 = vpack.i.bf16 %v10302_v54, %v10298_v22  ;;  %v2067_v55 = vsel %vm121_vm1, %v14077_v39, %v6875_v5  ;;  %v6884_v20 = vpop.permute.xlu1 %6883  ;;  %v2276_v7 = vmax.f32 %v14080_v4, %v2068_v61  ;;  %v14081_v54 = vld [vmem:[#allocation78_spill] sm:$0xff]  ;;  %v6987_v39 = vpack.i.bf16 %v14082_v23, %v13481_v45  ;;  %v14088_v23 = vld [vmem:[#allocation12_spill] sm:$0xff] }
 0x32e   :  { %v2275_v40 = vmax.f32 %v14079_v10, %v2067_v55  ;;  %v2283_v16 = vmax.f32 %v14081_v54, %v2074_v46  ;;  %v6886_v50 = vunpack.i.h.bf16 %v6884_v20  ;;  %v6885_v9 = vunpack.i.l.bf16 %v6884_v20  ;;  %v7496_v4 = vld [vmem:[%s13194_s3 + $0x200] ss:$8 sps:$4 sm:$0xff]  }
 0x32f   :  { %6978 = vrot.lane.b32.xlu0 %v6977_v42, %s7584_s9  ;;  %v14083_v5 = vunpack.i.h.bf16 %v10260_v53  ;;  %v14085_v10 = vunpack.i.h.bf16 %v14084_v56  ;;  %v14086_v42 = vld [vmem:[#allocation39_spill] sm:$0xff]  ;;  %v14089_v20 = vunpack.i.h.bf16 %v14088_v23  ;;  %v14090_v53 = vld [vmem:[#allocation80_spill] sm:$0xff]  ;;  %v14092_v56 = vld [vmem:[#allocation13_spill] sm:$0xff] }
 0x330   :  { %v14087_v14 = vunpack.i.h.bf16 %v14086_v42  ;;  %v2387_v54 = vpack.c.bf16 %v2282_v31, %v2275_v40  ;;  %v2388_v46 = vpack.c.bf16 %v2283_v16, %v2276_v7  ;;  %v7501_v16 = vld [vmem:[%s13194_s3 + $0x214] ss:$8 sps:$4 sm:$0xff]   ;;  %v14096_v7 = vld [vmem:[#allocation55_spill] sm:$0xff] }
 0x331   :  { %v2080_v47 = vsel %vm121_vm1, %v6890_v1, %v14083_v5  ;;  %v1432_v55 = vsel %vm59_vm0, %v14085_v10, %v6901_v24  ;;  %v1420_v45 = vsel %vm59_vm0, %v14089_v20, %v6886_v50  ;;  %v14091_v5 = vmax.f32 %v14090_v53, 0.0  ;;  %v14098_v20 = vld [vmem:[#allocation57_spill] sm:$0xff] }
 0x332   :  { %v1426_v61 = vsel %vm59_vm0, %v14087_v14, %v6900_v33  ;;  %v14093_v10 = vunpack.i.h.bf16 %v14092_v56  ;;  %v14095_v14 = vmax.f32 %v14094_v0, 0.0  ;;  %v14097_v31 = vmax.f32 %v14096_v7, 0.0  ;;  %3264 = vmatprep.mubr.bf16.mxu0 %v2388_v46  ;;  %v14102_v56 = vld [vmem:[#allocation31_spill] sm:$0xff]  ;;  %v14104_v7 = vld [vmem:[#allocation5_spill] sm:$0xff] }
 0x333   :  { %v10348_v3 = vmax.f32 %v14091_v5, %v6886_v50  ;;  %v14099_v53 = vmax.f32 %v14098_v20, 0.0  ;;  %v10368_v5 = vpop.permute.xlu1 %6893  ;;  %6988 = vrot.lane.b32.xlu0 %v6987_v39, %s7583_s29  ;;  %v14101_v0 = vunpack.i.h.bf16 %v9764_v12  ;;  %3265 = vmatmul.mubr.bf16.vlgmr.msra.gmra.mrb[32].mxu0 %v2387_v54  ;;  %v14109_v12 = vld [vmem:[#allocation61_spill] sm:$0xff]  ;;  %v14112_v54 = vld [vmem:[#allocation54_spill] sm:$0xff] }
 0x334   :  { %v1414_v42 = vsel %vm59_vm0, %v14093_v10, %v6885_v9  ;;  %v10355_v40 = vmax.f32 %v14095_v14, %v6885_v9  ;;  %v10362_v23 = vmax.f32 %v14097_v31, %v1420_v45  ;;  %14100 = vst [vmem:[#allocation15_spill] sm:$0xff] %v10368_v5  ;;  %v14103_v10 = vmax.f32 %v14102_v56, 0.0  ;;  %3346 = vmatpush1.bf16.msra.mxu0 %v7496_v4 }
 0x335   :  { %v10366_v50 = vmax.f32 %v14099_v53, %v1414_v42  ;;  %v2079_v9 = vsel %vm121_vm1, %v14101_v0, %v6890_v1  ;;  %v14105_v45 = vmax.f32 %v14104_v7, 0.0  ;;  %v13486_v42 = vunpack.i.h.bf16 %v10368_v5  ;;  %v14106_v53 = vld [vmem:[#allocation67_spill] sm:$0xff]  ;;  %v7499_v0 = vld [vmem:[%s13194_s3 + $0x210] ss:$8 sps:$4 sm:$0xff]   ;;  %3347 = vmatprep.subr.bf16.mxu0 %v7501_v16 }
 0x336   :  { %v10376_v14 = vmax.f32 %v14103_v10, %v6901_v24  ;;  %v6895_v20 = vunpack.i.l.bf16 %v10368_v5  ;;  %v14107_v39 = vmax.f32 %v14106_v53, 0.0  ;;  %v14110_v28 = vmax.f32 %v14109_v12, 0.0  ;;  %v7504_v10 = vld [vmem:[%s13194_s3 + $0x224] ss:$8 sps:$4 sm:$0xff]  }
 0x337   :  { %v10380_v31 = vmax.f32 %v14105_v45, %v6900_v33  ;;  %v6992_v24 = vpack.i.bf16 %v10355_v40, %v10366_v50  ;;  %v6997_v33 = vpack.i.bf16 %v10348_v3, %v10362_v23  ;;  %v2290_v56 = vmax.f32 %v14112_v54, %v2080_v47  ;;  %v10409_v4 = vpop.permute.xlu0 %6908  ;;  %v10411_v7 = vpop.permute.xlu1 %6903  ;;  %v14116_v45 = vld [vmem:[#allocation96_spill] sm:$0xff]  ;;  %v14128_v5 = vld [vmem:[#allocation30_spill] sm:$0xff] }
 0x338   :  { %v10386_v46 = vmax.f32 %v14107_v39, %v1432_v55  ;;  %v10390_v1 = vmax.f32 %v14110_v28, %v1426_v61  ;;  %v2086_v55 = vsel %vm121_vm1, %v6895_v20, %v13486_v42  ;;  %v14113_v28 = vunpack.i.h.bf16 %v9766_v49  ;;  %14114 = vst [vmem:[#allocation14_spill] sm:$0xff] %v10409_v4  ;;  %14115 = vst [vmem:[#allocation89_spill] sm:$0xff] %v10411_v7  ;;  %v14117_v47 = vld [vmem:[#allocation108_spill] sm:$0xff] }
 0x339   :  { %6993 = vrot.lane.b32.xlu1 %v6992_v24, %s7584_s9  ;;  %6998 = vrot.lane.b32.xlu0 %v6997_v33, %s7584_s9  ;;  %v2297_v53 = vmax.f32 %v14116_v45, %v2086_v55  ;;  %v2289_v39 = vmax.f32 %v14117_v47, %v2079_v9  ;;  %v14118_v49 = vld [vmem:[#allocation36_spill] sm:$0xff]  ;;  %v13487_v16 = vunpack.i.h.bf16 %v10409_v4  ;;  %v13488_v54 = vunpack.i.h.bf16 %v10411_v7 }
 0x33a   :  { %14108 = vst [vmem:[#allocation91_spill] sm:$0xff] %v10386_v46  ;;  %14111 = vst [vmem:[#allocation9_spill] sm:$0xff] %v10390_v1  ;;  %v2085_v61 = vsel %vm121_vm1, %v14113_v28, %v6895_v20  ;;  %v6910_v20 = vunpack.i.l.bf16 %v10409_v4  ;;  %v6905_v28 = vunpack.i.l.bf16 %v10411_v7  ;;  %v7002_v42 = vpack.i.bf16 %v10380_v31, %v10390_v1  ;;  %3348 = vmatpush1.bf16.msra.mxu0 %v7499_v0  ;;  %v14120_v0 = vld [vmem:[#allocation81_spill] sm:$0xff] }
 0x33b   :  { %v2296_v12 = vmax.f32 %v14118_v49, %v2085_v61  ;;  %v7007_v24 = vpack.i.bf16 %v10376_v14, %v10386_v46  ;;  %v2395_v33 = vpack.c.bf16 %v2297_v53, %v2290_v56  ;;  %v14119_v45 = vunpack.i.h.bf16 %v9852_v38  ;;  %v7502_v49 = vld [vmem:[%s13194_s3 + $0x220] ss:$8 sps:$4 sm:$0xff]   ;;  %3349 = vmatprep.subr.bf16.mxu0 %v7504_v10  ;;  %v6914_v56 = vpop.permute.xlu1 %6913  ;;  %v7507_v38 = vld [vmem:[%s13194_s3 + $0x234] ss:$8 sps:$4 sm:$0xff]  }
 0x33c   :  { %v2092_v9 = vsel %vm121_vm1, %v6905_v28, %v13488_v54  ;;  %v2098_v61 = vsel %vm121_vm1, %v6910_v20, %v13487_v16  ;;  %v6916_v16 = vunpack.i.h.bf16 %v6914_v56  ;;  %v14129_v46 = vunpack.i.h.bf16 %v14128_v5 }
 0x33d   :  { %v2394_v55 = vpack.c.bf16 %v2296_v12, %v2289_v39  ;;  %v2091_v47 = vsel %vm121_vm1, %v14119_v45, %v6905_v28  ;;  %7003 = vrot.lane.b32.xlu1 %v7002_v42, %s7584_s9  ;;  %7008 = vrot.lane.b32.xlu0 %v7007_v24, %s7584_s9  ;;  %v2304_v53 = vmax.f32 %v14120_v0, %v2092_v9  ;;  %v14121_v39 = vld [vmem:[#allocation41_spill] sm:$0xff]  ;;  %v6915_v28 = vunpack.i.l.bf16 %v6914_v56  ;;  %v14124_v24 = vld [vmem:[#allocation56_spill] sm:$0xff]  ;;  %v14130_v56 = vld [vmem:[#allocation2_spill] sm:$0xff] }
 0x33e   :  { %v2311_v12 = vmax.f32 %v14121_v39, %v2098_v61  ;;  %3274 = vmatprep.mubr.bf16.mxu0 %v2395_v33  ;;  %v14122_v45 = vunpack.i.h.bf16 %v9850_v2  ;;  %v14123_v42 = vld [vmem:[#allocation109_spill] sm:$0xff]  ;;  %v14125_v7 = vunpack.i.h.bf16 %v14124_v24  ;;  %v14126_v61 = vld [vmem:[#allocation28_spill] sm:$0xff]  ;;  %v14131_v2 = vmax.f32 %v14130_v56, 0.0  ;;  %3350 = vmatpush1.bf16.msra.mxu0 %v7502_v49  ;;  %v7510_v24 = vld [vmem:[%s13194_s3 + $0x244] ss:$8 sps:$4 sm:$0xff]  }
 0x33f   :  { %3275 = vmatmul.mubr.bf16.gmra.mrb[36].mxu0 %v2394_v55  ;;  %v2303_v4 = vmax.f32 %v14123_v42, %v2091_v47  ;;  %v14127_v0 = vmax.f32 %v14126_v61, 0.0  ;;  %v1438_v33 = vsel %vm59_vm0, %v14129_v46, %v6915_v28  ;;  %v14132_v55 = vld [vmem:[#allocation19_spill] sm:$0xff]  ;;  %v14136_v46 = vld [vmem:[#allocation110_spill] sm:$0xff]  ;;  %3351 = vmatprep.subr.bf16.mxu0 %v7507_v38 }
 0x340   :  { %v2097_v10 = vsel %vm121_vm1, %v14122_v45, %v6910_v20  ;;  %v2402_v54 = vpack.c.bf16 %v2311_v12, %v2304_v53  ;;  %v1444_v9 = vsel %vm59_vm0, %v14125_v7, %v6916_v16  ;;  %v10461_v1 = vmax.f32 %v14131_v2, %v6915_v28  ;;  %v7505_v20 = vld [vmem:[%s13194_s3 + $0x230] ss:$8 sps:$4 sm:$0xff]   ;;  %v14134_v53 = vld [vmem:[#allocation71_spill] sm:$0xff] }
 0x341   :  { %v10454_v39 = vmax.f32 %v14127_v0, %v6916_v16  ;;  %v14133_v47 = vmax.f32 %v14132_v55, 0.0  ;;  %v14135_v16 = vmax.f32 %v14134_v53, 0.0  ;;  %v2310_v45 = vmax.f32 %v14136_v46, %v2097_v10  ;;  %v10479_v42 = vpop.permute.xlu1 %6923  ;;  %v7508_v56 = vld [vmem:[%s13194_s3 + $0x240] ss:$8 sps:$4 sm:$0xff]  }
 0x342   :  { %v10474_v5 = vpop.permute.xlu0 %6918  ;;  %3284 = vmatprep.mubr.bf16.mxu0 %v2402_v54  ;;  %v6925_v61 = vunpack.i.l.bf16 %v10479_v42  ;;  %v14137_v0 = vunpack.i.h.bf16 %v9925_v19  ;;  %3352 = vmatpush1.bf16.msra.mxu0 %v7505_v20  ;;  %v7513_v19 = vld [vmem:[%s13194_s3 + $0x254] ss:$8 sps:$4 sm:$0xff]  }
 0x343   :  { %v10468_v7 = vmax.f32 %v14133_v47, %v1444_v9  ;;  %v10472_v12 = vmax.f32 %v14135_v16, %v1438_v33  ;;  %v6921_v49 = vunpack.i.h.bf16 %v10474_v5  ;;  %v6920_v28 = vunpack.i.l.bf16 %v10474_v5  ;;  %3353 = vmatprep.subr.bf16.mxu0 %v7510_v24  ;;  %v7511_v24 = vld [vmem:[%s13194_s3 + $0x250] ss:$8 sps:$4 sm:$0xff]  }
 0x344   :  { %v6926_v9 = vunpack.i.h.bf16 %v10479_v42  ;;  %v2401_v55 = vpack.c.bf16 %v2310_v45, %v2303_v4  ;;  %v14139_v4 = vld [vmem:[#allocation35_spill] sm:$0xff] }
 0x345   :  { %v7012_v54 = vpack.i.bf16 %v10461_v1, %v10472_v12  ;;  %v7017_v38 = vpack.i.bf16 %v10454_v39, %v10468_v7  ;;  %v2104_v10 = vsel %vm121_vm1, %v6920_v28, %v6921_v49  ;;  %v2103_v33 = vsel %vm121_vm1, %v14137_v0, %v6920_v28 }
 0x346   :  { %v6929_v2 = vpop.permute.xlu0 %6928  ;;  %v2110_v47 = vsel %vm121_vm1, %v6925_v61, %v6926_v9  ;;  %v2318_v53 = vmax.f32 %v9844_v63, %v2104_v10  ;;  %v14138_v28 = vunpack.i.h.bf16 %v9927_v6  ;;  %v2317_v45 = vmax.f32 %v14139_v4, %v2103_v33  ;;  %3354 = vmatpush1.bf16.msra.mxu0 %v7508_v56  ;;  %v14148_v4 = vld [vmem:[#allocation112_spill] sm:$0xff]  ;;  %v7516_v56 = vld [vmem:[%s13194_s3 + $0x264] ss:$8 sps:$4 sm:$0xff]  }
 0x347   :  { %7013 = vrot.lane.b32.xlu1 %v7012_v54, %s7584_s9  ;;  %7018 = vrot.lane.b32.xlu0 %v7017_v38, %s7584_s9  ;;  %v6931_v20 = vunpack.i.h.bf16 %v6929_v2  ;;  %v6930_v16 = vunpack.i.l.bf16 %v6929_v2  ;;  %v2325_v46 = vmax.f32 %v9836_v58, %v2110_v47  ;;  %v14140_v38 = vunpack.i.h.bf16 %v9801_v27  ;;  %v14144_v27 = vld [vmem:[#allocation22_spill] sm:$0xff] }
 0x348   :  { %v2109_v54 = vsel %vm121_vm1, %v14138_v28, %v6925_v61  ;;  %3285 = vmatmul.mubr.bf16.gmra.mrb[40].mxu0 %v2401_v55  ;;  %v14141_v10 = vmax.f32 %v9776_v60, 0.0  ;;  %v14142_v2 = vunpack.i.h.bf16 %v9803_v48  ;;  %v14143_v6 = vmax.f32 %v9742_v43, 0.0  ;;  %v14146_v60 = vld [vmem:[#allocation21_spill] sm:$0xff]  ;;  %3355 = vmatprep.subr.bf16.mxu0 %v7513_v19 }
 0x349   :  { %v1456_v63 = vsel %vm59_vm0, %v14140_v38, %v6931_v20  ;;  %v14145_v61 = vmax.f32 %v14144_v27, 0.0  ;;  %v14147_v55 = vmax.f32 %v14146_v60, 0.0  ;;  %v2409_v28 = vpack.c.bf16 %v2325_v46, %v2318_v53 }
 0x34a   :  { %v10518_v0 = vmax.f32 %v14141_v10, %v6931_v20  ;;  %v1450_v58 = vsel %vm59_vm0, %v14142_v2, %v6930_v16  ;;  %v10525_v47 = vmax.f32 %v14143_v6, %v6930_v16  ;;  %v10538_v48 = vpop.permute.xlu1 %6933  ;;  %v2324_v43 = vmax.f32 %v14148_v4, %v2109_v54  ;;  %3356 = vmatpush1.bf16.msra.mxu0 %v7511_v24  ;;  %v7519_v10 = vld [vmem:[%s13194_s3 + $0x274] ss:$8 sps:$4 sm:$0xff]   ;;  %v7517_v4 = vld [vmem:[%s13194_s3 + $0x270] ss:$8 sps:$4 sm:$0xff]  }
 0x34b   :  { %v10532_v33 = vmax.f32 %v14145_v61, %v1456_v63  ;;  %v10536_v20 = vmax.f32 %v14147_v55, %v1450_v58  ;;  %3294 = vmatprep.mubr.bf16.mxu0 %v2409_v28  ;;  %v7514_v63 = vld [vmem:[%s13194_s3 + $0x260] ss:$8 sps:$4 sm:$0xff]   ;;  %v6936_v53 = vunpack.i.h.bf16 %v10538_v48  ;;  %v6935_v19 = vunpack.i.l.bf16 %v10538_v48  ;;  %3357 = vmatprep.subr.bf16.mxu0 %v7516_v56 }
 0x34c   :  { %v2408_v54 = vpack.c.bf16 %v2324_v43, %v2317_v45  ;;  %v14149_v6 = vunpack.i.h.bf16 %v9954_v17  ;;  %v14150_v27 = vmax.f32 %v9896_v35, 0.0  ;;  %v14151_v60 = vunpack.i.h.bf16 %v9879_v21  ;;  %v14153_v17 = vld [vmem:[#allocation34_spill] sm:$0xff]  ;;  %v14155_v35 = vld [vmem:[#allocation33_spill] sm:$0xff] }
 0x34d   :  { %v7022_v16 = vpack.i.bf16 %v10525_v47, %v10536_v20  ;;  %v7027_v38 = vpack.i.bf16 %v10518_v0, %v10532_v33  ;;  %v14152_v55 = vmax.f32 %v9904_v26, 0.0  ;;  %v14154_v43 = vmax.f32 %v14153_v17, 0.0  ;;  %v14161_v17 = vld [vmem:[#allocation23_spill] sm:$0xff] }
 0x34e   :  { %v6944_v46 = vpop.permute.xlu1 %6943  ;;  %3358 = vmatpush1.bf16.msra.mxu0 %v7514_v63  ;;  %v2116_v26 = vsel %vm121_vm1, %v6935_v19, %v6936_v53 }
 0x34f   :  { %7023 = vrot.lane.b32.xlu1 %v7022_v16, %s7584_s9  ;;  %7028 = vrot.lane.b32.xlu0 %v7027_v38, %s7584_s9  ;;  %v6946_v2 = vunpack.i.h.bf16 %v6944_v46  ;;  %v6945_v58 = vunpack.i.l.bf16 %v6944_v46  ;;  %v14156_v16 = vmax.f32 %v14155_v35, 0.0  ;;  %v14162_v35 = vld [vmem:[#allocation43_spill] sm:$0xff] }
 0x350   :  { %3295 = vmatmul.mubr.bf16.gmra.mrb[44].mxu0 %v2408_v54  ;;  %3359 = vmatprep.subr.bf16.mxu0 %v7519_v10  ;;  %v14157_v54 = vunpack.i.h.bf16 %v9991_v29 }
 0x351   :  { %v1468_v24 = vsel %vm59_vm0, %v14149_v6, %v6946_v2  ;;  %v10563_v61 = vmax.f32 %v14150_v27, %v6946_v2  ;;  %v1462_v45 = vsel %vm59_vm0, %v14151_v60, %v6945_v58  ;;  %v10570_v28 = vmax.f32 %v14152_v55, %v6945_v58  ;;  %v7522_v58 = vld [vmem:[%s13194_s3 + $0x284] ss:$8 sps:$4 sm:$0xff]   ;;  %v14158_v27 = vld [vmem:[#allocation101_spill] sm:$0xff]  ;;  %v7520_v55 = vld [vmem:[%s13194_s3 + $0x280] ss:$8 sps:$4 sm:$0xff]  }
 0x352   :  { %v10577_v56 = vmax.f32 %v14154_v43, %v1468_v24  ;;  %v10581_v38 = vmax.f32 %v14156_v16, %v1462_v45  ;;  %v10583_v21 = vpop.permute.xlu0 %6938  ;;  %v2115_v2 = vsel %vm121_vm1, %v14157_v54, %v6935_v19  ;;  %v2332_v60 = vmax.f32 %v14158_v27, %v2116_v26  ;;  %v14159_v45 = vld [vmem:[#allocation6_spill] sm:$0xff]  ;;  %3360 = vmatpush1.bf16.msra.mxu0 %v7517_v4  ;;  %v14163_v54 = vld [vmem:[#allocation44_spill] sm:$0xff] }
 0x353   :  { %v13494_v63 = vunpack.i.h.bf16 %v10583_v21  ;;  %v6940_v46 = vunpack.i.l.bf16 %v10583_v21  ;;  %v14160_v29 = vunpack.i.h.bf16 %v14159_v45  ;;  %v2331_v16 = vmax.f32 %v14162_v35, %v2115_v2  ;;  %v7525_v26 = vld [vmem:[%s13194_s3 + $0x294] ss:$8 sps:$4 sm:$0xff]   ;;  %3361 = vmatprep.subr.bf16.mxu0 %v7522_v58  ;;  %v7528_v2 = vld [vmem:[%s13194_s3 + $0x2a4] ss:$8 sps:$4 sm:$0xff]  }
 0x354   :  { %v7032_v6 = vpack.i.bf16 %v10570_v28, %v10581_v38  ;;  %v7037_v24 = vpack.i.bf16 %v10563_v61, %v10577_v56 }
 0x355   :  { %v2122_v10 = vsel %vm121_vm1, %v6940_v46, %v13494_v63  ;;  %v2121_v19 = vsel %vm121_vm1, %v14160_v29, %v6940_v46  ;;  %v14164_v29 = vunpack.i.h.bf16 %v10071_v52 }
 0x356   :  { %7033 = vrot.lane.b32.xlu1 %v7032_v6, %s7584_s9  ;;  %7038 = vrot.lane.b32.xlu0 %v7037_v24, %s7584_s9  ;;  %v2339_v43 = vmax.f32 %v14161_v17, %v2122_v10  ;;  %v2338_v63 = vmax.f32 %v14163_v54, %v2121_v19  ;;  %v7523_v6 = vld [vmem:[%s13194_s3 + $0x290] ss:$8 sps:$4 sm:$0xff]  }
 0x357   :  { %3362 = vmatpush1.bf16.msra.mxu0 %v7520_v55  ;;  %v7526_v55 = vld [vmem:[%s13194_s3 + $0x2a0] ss:$8 sps:$4 sm:$0xff]  }
 0x358   :  { %v2416_v4 = vpack.c.bf16 %v2339_v43, %v2332_v60  ;;  %v2415_v46 = vpack.c.bf16 %v2338_v63, %v2331_v16  ;;  %3363 = vmatprep.subr.bf16.mxu0 %v7525_v26  ;;  %v14165_v16 = vunpack.i.h.bf16 %v10073_v59  ;;  %v14166_v26 = vld [vmem:[#allocation52_spill] sm:$0xff]  ;;  %v14169_v59 = vmax.f32 %v10020_v34, 0.0 }
 0x35a   :  { %3304 = vmatprep.mubr.bf16.mxu0 %v2416_v4  ;;  %v7531_v4 = vld [vmem:[%s13194_s3 + $0x2b4] ss:$8 sps:$4 sm:$0xff]  }
 0x35b   :  { %v10628_v58 = vpop.permute.xlu1 %6953  ;;  %3305 = vmatmul.mubr.bf16.gmra.mrb[48].mxu0 %v2415_v46 }
 0x35c   :  { %v10621_v27 = vpop.permute.xlu0 %6948  ;;  %v13496_v63 = vunpack.i.h.bf16 %v10628_v58  ;;  %v6955_v60 = vunpack.i.l.bf16 %v10628_v58  ;;  %3364 = vmatpush1.bf16.msra.mxu0 %v7523_v6 }
 0x35d   :  { %v13495_v24 = vunpack.i.h.bf16 %v10621_v27  ;;  %v6950_v10 = vunpack.i.l.bf16 %v10621_v27  ;;  %3365 = vmatprep.subr.bf16.mxu0 %v7528_v2  ;;  %v14170_v2 = vunpack.i.h.bf16 %v10025_v13  ;;  %v7529_v13 = vld [vmem:[%s13194_s3 + $0x2b0] ss:$8 sps:$4 sm:$0xff]  }
 0x35e   :  { %v2134_v43 = vsel %vm121_vm1, %v6955_v60, %v13496_v63  ;;  %v2133_v54 = vsel %vm121_vm1, %v14165_v16, %v6955_v60  ;;  %v14168_v63 = vunpack.i.h.bf16 %v10023_v41  ;;  %v14174_v41 = vld [vmem:[#allocation42_spill] sm:$0xff] }
 0x35f   :  { %v2128_v45 = vsel %vm121_vm1, %v6950_v10, %v13495_v24  ;;  %v2127_v19 = vsel %vm121_vm1, %v14164_v29, %v6950_v10  ;;  %v2353_v10 = vmax.f32 %v10057_v25, %v2134_v43  ;;  %v14167_v29 = vld [vmem:[#allocation113_spill] sm:$0xff]  ;;  %v14172_v25 = vld [vmem:[#allocation27_spill] sm:$0xff] }
 0x360   :  { %v6959_v17 = vpop.permute.xlu0 %6958  ;;  %v2346_v35 = vmax.f32 %v10065_v51, %v2128_v45  ;;  %v2345_v52 = vmax.f32 %v14166_v26, %v2127_v19  ;;  %v2352_v24 = vmax.f32 %v14167_v29, %v2133_v54  ;;  %v14171_v19 = vmax.f32 %v10000_v15, 0.0  ;;  %3366 = vmatpush1.bf16.msra.mxu0 %v7526_v55  ;;  %v7532_v29 = vld [vmem:[%s13194_s3 + $0x2c0] ss:$8 sps:$4 sm:$0xff]  }
 0x361   :  { %v6961_v46 = vunpack.i.h.bf16 %v6959_v17  ;;  %v6960_v6 = vunpack.i.l.bf16 %v6959_v17  ;;  %v14173_v17 = vmax.f32 %v14172_v25, 0.0  ;;  %v14175_v54 = vmax.f32 %v14174_v41, 0.0  ;;  %3367 = vmatprep.subr.bf16.mxu0 %v7531_v4 }
 0x362   :  { %v2423_v26 = vpack.c.bf16 %v2353_v10, %v2346_v35  ;;  %v14178_v25 = vunpack.i.h.bf16 %v10099_v36  ;;  %v14179_v41 = vmax.f32 %v10122_v62, 0.0 }
 0x363   :  { %v1480_v51 = vsel %vm59_vm0, %v14168_v63, %v6961_v46  ;;  %v10659_v60 = vmax.f32 %v14169_v59, %v6961_v46  ;;  %v1474_v45 = vsel %vm59_vm0, %v14170_v2, %v6960_v6  ;;  %v10666_v16 = vmax.f32 %v14171_v19, %v6960_v6  ;;  %v7534_v6 = vld [vmem:[%s13194_s3 + $0x2c4] ss:$8 sps:$4 sm:$0xff]  }
 0x364   :  { %v10670_v43 = vmax.f32 %v14173_v17, %v1480_v51  ;;  %v10674_v63 = vmax.f32 %v14175_v54, %v1474_v45  ;;  %v10676_v34 = vpop.permute.xlu1 %6963  ;;  %v2422_v46 = vpack.c.bf16 %v2352_v24, %v2345_v52  ;;  %3314 = vmatprep.mubr.bf16.mxu0 %v2423_v26  ;;  %3368 = vmatpush1.bf16.msra.mxu0 %v7529_v13  ;;  %v7537_v51 = vld [vmem:[%s13194_s3 + $0x2d4] ss:$8 sps:$4 sm:$0xff]   ;;  %v14176_v59 = vunpack.i.h.bf16 %v10170_v30 }
 0x365   :  { %v13500_v35 = vunpack.i.h.bf16 %v10676_v34  ;;  %v6965_v24 = vunpack.i.l.bf16 %v10676_v34  ;;  %3369 = vmatprep.subr.bf16.mxu0 %v7534_v6  ;;  %v14177_v45 = vmax.f32 %v10114_v44, 0.0  ;;  %v14180_v26 = vld [vmem:[#allocation53_spill] sm:$0xff] }
 0x366   :  { %v7042_v15 = vpack.i.bf16 %v10666_v16, %v10674_v63  ;;  %v7047_v55 = vpack.i.bf16 %v10659_v60, %v10670_v43  ;;  %3315 = vmatmul.mubr.bf16.gmra.mrb[52].mxu0 %v2422_v46  ;;  %v14181_v46 = vmax.f32 %v14180_v26, 0.0  ;;  %v14187_v26 = vld [vmem:[#allocation114_spill] sm:$0xff] }
 0x367   :  { %v2140_v36 = vsel %vm121_vm1, %v6965_v24, %v13500_v35 }
 0x368   :  { %v6974_v52 = vpop.permute.xlu1 %6973  ;;  %7043 = vrot.lane.b32.xlu1 %v7042_v15, %s7584_s9  ;;  %7048 = vrot.lane.b32.xlu0 %v7047_v55, %s7584_s9  ;;  %v14182_v15 = vld [vmem:[#allocation45_spill] sm:$0xff] }
 0x369   :  { %v6976_v4 = vunpack.i.h.bf16 %v6974_v52  ;;  %v6975_v10 = vunpack.i.l.bf16 %v6974_v52  ;;  %v14183_v30 = vmax.f32 %v14182_v15, 0.0  ;;  %v14184_v52 = vunpack.i.h.bf16 %v10143_v57  ;;  %3370 = vmatpush1.bf16.msra.mxu0 %v7532_v29 }
 0x36a   :  { %3371 = vmatprep.subr.bf16.mxu0 %v7537_v51  ;;  %v14185_v29 = vunpack.i.h.bf16 %v10141_v11  ;;  %v7543_v11 = vld [vmem:[%s13194_s3 + $0x2f4] ss:$8 sps:$4 sm:$0xff]  }
 0x36b   :  { %v1492_v2 = vsel %vm59_vm0, %v14176_v59, %v6976_v4  ;;  %v10703_v19 = vmax.f32 %v14177_v45, %v6976_v4  ;;  %v1486_v17 = vsel %vm59_vm0, %v14178_v25, %v6975_v10  ;;  %v10710_v54 = vmax.f32 %v14179_v41, %v6975_v10  ;;  %v10720_v6 = vpop.permute.xlu0 %6968  ;;  %v7535_v10 = vld [vmem:[%s13194_s3 + $0x2d0] ss:$8 sps:$4 sm:$0xff]   ;;  %v7540_v45 = vld [vmem:[%s13194_s3 + $0x2e4] ss:$8 sps:$4 sm:$0xff]  }
 0x36c   :  { %v10714_v13 = vmax.f32 %v14181_v46, %v1492_v2  ;;  %v10718_v55 = vmax.f32 %v14183_v30, %v1486_v17  ;;  %v13499_v44 = vunpack.i.h.bf16 %v10720_v6  ;;  %v6970_v62 = vunpack.i.l.bf16 %v10720_v6  ;;  %v14186_v17 = vld [vmem:[#allocation37_spill] sm:$0xff] }
 0x36d   :  { %v2139_v4 = vsel %vm121_vm1, %v14184_v52, %v6965_v24  ;;  %v2360_v24 = vmax.f32 %v10135_v32, %v2140_v36  ;;  %3372 = vmatpush1.bf16.msra.mxu0 %v7535_v10  ;;  %v7538_v32 = vld [vmem:[%s13194_s3 + $0x2e0] ss:$8 sps:$4 sm:$0xff]   ;;  %v7546_v36 = vld [vmem:[%s13194_s3 + $0x304] ss:$8 sps:$4 sm:$0xff]  }
 0x36e   :  { %v7052_v59 = vpack.i.bf16 %v10710_v54, %v10718_v55  ;;  %v7057_v2 = vpack.i.bf16 %v10703_v19, %v10714_v13  ;;  %v2146_v57 = vsel %vm121_vm1, %v6970_v62, %v13499_v44  ;;  %v2145_v25 = vsel %vm121_vm1, %v14185_v29, %v6970_v62  ;;  %3373 = vmatprep.subr.bf16.mxu0 %v7540_v45 }
 0x36f   :  { %v2367_v51 = vmax.f32 %v10197_v37, %v2146_v57  ;;  %v2359_v41 = vmax.f32 %v14186_v17, %v2139_v4  ;;  %v2366_v46 = vmax.f32 %v14187_v26, %v2145_v25  ;;  %v7541_v37 = vld [vmem:[%s13194_s3 + $0x2f0] ss:$8 sps:$4 sm:$0xff]   ;;  %v14188_v57 = vunpack.i.h.bf16 %v10253_v8  ;;  %v14190_v26 = vld [vmem:[#allocation51_spill] sm:$0xff] }
 0x370   :  { %7053 = vrot.lane.b32.xlu1 %v7052_v59, %s7584_s9  ;;  %7058 = vrot.lane.b32.xlu0 %v7057_v2, %s7584_s9  ;;  %v14189_v25 = vunpack.i.h.bf16 %v10203_v18  ;;  %v14195_v18 = vld [vmem:[#allocation104_spill] sm:$0xff] }
 0x371   :  { %v2430_v15 = vpack.c.bf16 %v2367_v51, %v2360_v24  ;;  %v2429_v30 = vpack.c.bf16 %v2366_v46, %v2359_v41  ;;  %3374 = vmatpush1.bf16.msra.mxu0 %v7538_v32  ;;  %v10764_v62 = vpop.permute.xlu1 %6983  ;;  %v14192_v32 = vld [vmem:[#allocation4_spill] sm:$0xff]  ;;  %v14196_v44 = vmax.f32 %v14195_v18, 0.0 }
 0x372   :  { %3375 = vmatprep.subr.bf16.mxu0 %v7543_v11  ;;  %v13497_v52 = vunpack.i.h.bf16 %v10764_v62  ;;  %v6985_v4 = vunpack.i.l.bf16 %v10764_v62 }
 0x373   :  { %3324 = vmatprep.mubr.bf16.mxu0 %v2430_v15  ;;  %v14191_v15 = vld [vmem:[#allocation79_spill] sm:$0xff] }
 0x374   :  { %3325 = vmatmul.mubr.bf16.gmra.mrb[56].mxu0 %v2429_v30  ;;  %v2158_v45 = vsel %vm121_vm1, %v6985_v4, %v13497_v52  ;;  %v2157_v24 = vsel %vm121_vm1, %v14188_v57, %v6985_v4  ;;  %v14193_v57 = vld [vmem:[#allocation84_spill] sm:$0xff] }
 0x375   :  { %3376 = vmatpush1.bf16.msra.mxu0 %v7541_v37  ;;  %v2381_v46 = vmax.f32 %v14190_v26, %v2158_v45  ;;  %v2380_v11 = vmax.f32 %v14192_v32, %v2157_v24  ;;  %v14194_v52 = vunpack.i.h.bf16 %v14193_v57  ;;  %v14201_v24 = vld [vmem:[#allocation63_spill] sm:$0xff] }
 0x376   :  { %3458 = vmatprep.subr.bf16.mxu0 %v7546_v36 }
 0x3a1   :  { %v10768_v10 = vpop.permute.xlu0 %6978 }
 0x3a2   :  { %v13498_v59 = vunpack.i.h.bf16 %v10768_v10  ;;  %v6980_v2 = vunpack.i.l.bf16 %v10768_v10 }
 0x3a4   :  { %v2152_v29 = vsel %vm121_vm1, %v6980_v2, %v13498_v59  ;;  %v2151_v51 = vsel %vm121_vm1, %v14189_v25, %v6980_v2  ;;  %v14197_v25 = vld [vmem:[#allocation105_spill] sm:$0xff] }
 0x3a5   :  { %v6989_v17 = vpop.permute.xlu0 %6988  ;;  %v2374_v41 = vmax.f32 %v10298_v22, %v2152_v29  ;;  %v2373_v30 = vmax.f32 %v14191_v15, %v2151_v51  ;;  %v14198_v22 = vunpack.i.h.bf16 %v14197_v25  ;;  %v14199_v29 = vld [vmem:[#allocation65_spill] sm:$0xff]  ;;  %v14205_v25 = vld [vmem:[#allocation8_spill] sm:$0xff] }
 0x3a6   :  { %v6991_v8 = vunpack.i.h.bf16 %v6989_v17  ;;  %v6990_v37 = vunpack.i.l.bf16 %v6989_v17  ;;  %v14200_v51 = vmax.f32 %v14199_v29, 0.0  ;;  %v14202_v17 = vmax.f32 %v14201_v24, 0.0  ;;  %v14207_v29 = vld [vmem:[#allocation11_spill] sm:$0xff]  ;;  %v14209_v24 = vld [vmem:[#allocation62_spill] sm:$0xff] }
 0x3a7   :  { %v2437_v36 = vpack.c.bf16 %v2381_v46, %v2374_v41  ;;  %v2436_v4 = vpack.c.bf16 %v2380_v11, %v2373_v30  ;;  %v14203_v46 = vld [vmem:[#allocation38_spill] sm:$0xff] }
 0x3a8   :  { %v1504_v59 = vsel %vm59_vm0, %v14194_v52, %v6991_v8  ;;  %v10793_v2 = vmax.f32 %v14196_v44, %v6991_v8  ;;  %v1498_v45 = vsel %vm59_vm0, %v14198_v22, %v6990_v37  ;;  %v10800_v26 = vmax.f32 %v14200_v51, %v6990_v37 }
 0x3a9   :  { %v10804_v41 = vmax.f32 %v14202_v17, %v1504_v59  ;;  %v14204_v15 = vmax.f32 %v14203_v46, 0.0  ;;  %3334 = vmatprep.mubr.bf16.mxu0 %v2437_v36  ;;  %v14206_v22 = vunpack.i.h.bf16 %v14205_v25  ;;  %v14208_v51 = vunpack.i.h.bf16 %v14207_v29  ;;  %v14210_v46 = vld [vmem:[#allocation99_spill] sm:$0xff] }
 0x3aa   :  { %3335 = vmatmul.mubr.bf16.gmra.mrb[60].mxu0 %v2436_v4 }
 0x3ab   :  { %v10808_v30 = vmax.f32 %v14204_v15, %v1498_v45  ;;  %v6994_v52 = vpop.permute.xlu1 %6993  ;;  %v6999_v32 = vpop.permute.xlu0 %6998  ;;  %v7067_v37 = vpack.i.bf16 %v10793_v2, %v10804_v41 }
 0x3ac   :  { %v6996_v44 = vunpack.i.h.bf16 %v6994_v52  ;;  %v6995_v11 = vunpack.i.l.bf16 %v6994_v52  ;;  %v7001_v8 = vunpack.i.h.bf16 %v6999_v32  ;;  %v7000_v57 = vunpack.i.l.bf16 %v6999_v32 }
 0x3ad   :  { %v7062_v18 = vpack.i.bf16 %v10800_v26, %v10808_v30  ;;  %7068 = vrot.lane.b32.xlu0 %v7067_v37, %s7584_s9 }
 0x3ae   :  { %v10815_v59 = vmax.f32 %v10355_v40, %v6996_v44  ;;  %v2069_v45 = vsel %vm121_vm1, %v14206_v22, %v6995_v11  ;;  %v10821_v36 = vmax.f32 %v10348_v3, %v7001_v8  ;;  %v2075_v4 = vsel %vm121_vm1, %v14208_v51, %v7000_v57  ;;  %v14212_v3 = vld [vmem:[#allocation91_spill] sm:$0xff] }
 0x3af   :  { %v2277_v17 = vmax.f32 %v14209_v24, %v2069_v45  ;;  %v2284_v15 = vmax.f32 %v14210_v46, %v2075_v4  ;;  %v7004_v52 = vpop.permute.xlu1 %7003  ;;  %v7009_v32 = vpop.permute.xlu0 %7008  ;;  %7063 = vrot.lane.b32.xlu1 %v7062_v18, %s7584_s9  ;;  %v2070_v40 = vsel %vm121_vm1, %v6995_v11, %v6996_v44  ;;  %v2076_v51 = vsel %vm121_vm1, %v7000_v57, %v7001_v8  ;;  %v14211_v46 = vld [vmem:[#allocation9_spill] sm:$0xff]  ;;  %v14213_v57 = vld [vmem:[#allocation86_spill] sm:$0xff] }
 0x3b0   :  { %v7006_v25 = vunpack.i.h.bf16 %v7004_v52  ;;  %v7005_v22 = vunpack.i.l.bf16 %v7004_v52  ;;  %v7011_v29 = vunpack.i.h.bf16 %v7009_v32  ;;  %v7010_v35 = vunpack.i.l.bf16 %v7009_v32 }
 0x3b1   :  { %v2278_v45 = vmax.f32 %v10366_v50, %v2070_v40  ;;  %v2285_v18 = vmax.f32 %v10362_v23, %v2076_v51  ;;  %v2389_v11 = vpack.c.bf16 %v2284_v15, %v2277_v17  ;;  %v7544_v50 = vld [vmem:[%s13194_s3 + $0x300] ss:$8 sps:$4 sm:$0xff]   ;;  %v14214_v17 = vunpack.i.h.bf16 %v14213_v57 }
 0x3b2   :  { %v10836_v4 = vmax.f32 %v10380_v31, %v7006_v25  ;;  %v10839_v37 = vmax.f32 %v10376_v14, %v7011_v29  ;;  %v2082_v44 = vsel %vm121_vm1, %v7005_v22, %v7006_v25  ;;  %v2088_v24 = vsel %vm121_vm1, %v7010_v35, %v7011_v29  ;;  %v7549_v14 = vld [vmem:[%s13194_s3 + $0x314] ss:$8 sps:$4 sm:$0xff]   ;;  %v14215_v40 = vld [vmem:[#allocation15_spill] sm:$0xff] }
 0x3b3   :  { %v2292_v52 = vmax.f32 %v14211_v46, %v2082_v44  ;;  %v2390_v32 = vpack.c.bf16 %v2285_v18, %v2278_v45  ;;  %v2299_v8 = vmax.f32 %v14212_v3, %v2088_v24  ;;  %v2081_v15 = vsel %vm121_vm1, %v14214_v17, %v7005_v22  ;;  %v7547_v46 = vld [vmem:[%s13194_s3 + $0x310] ss:$8 sps:$4 sm:$0xff]   ;;  %v14218_v22 = vld [vmem:[#allocation3_spill] sm:$0xff] }
 0x3b4   :  { %v2398_v23 = vpack.c.bf16 %v10839_v37, %v10836_v4  ;;  %v14216_v25 = vunpack.i.h.bf16 %v14215_v40 }
 0x3b5   :  { %3377 = vmatprep.mubr.bf16.mxu0 %v2390_v32  ;;  %v2397_v31 = vpack.c.bf16 %v2299_v8, %v2292_v52  ;;  %v14217_v52 = vld [vmem:[#allocation102_spill] sm:$0xff] }
 0x3b6   :  { %v2087_v3 = vsel %vm121_vm1, %v14216_v25, %v7010_v35  ;;  %3378 = vmatmul.mubr.bf16.vlgmr.msra.gmra.mrb[32].mxu0 %v2389_v11  ;;  %v2291_v32 = vmax.f32 %v14217_v52, %v2081_v15  ;;  %v7552_v35 = vld [vmem:[%s13194_s3 + $0x324] ss:$8 sps:$4 sm:$0xff]  }
 0x3b7   :  { %3387 = vmatprep.mubr.bf16.mxu0 %v2397_v31  ;;  %3459 = vmatpush1.bf16.msra.mxu0 %v7544_v50  ;;  %v2298_v8 = vmax.f32 %v14218_v22, %v2087_v3  ;;  %v14219_v3 = vld [vmem:[#allocation89_spill] sm:$0xff] }
 0x3b8   :  { %3460 = vmatprep.subr.bf16.mxu0 %v7549_v14  ;;  %v7550_v14 = vld [vmem:[%s13194_s3 + $0x320] ss:$8 sps:$4 sm:$0xff]  }
 0x3b9   :  { %v7014_v29 = vpop.permute.xlu1 %7013  ;;  %v7019_v51 = vpop.permute.xlu0 %7018  ;;  %v2396_v40 = vpack.c.bf16 %v2298_v8, %v2291_v32 }
 0x3ba   :  { %v7016_v45 = vunpack.i.h.bf16 %v7014_v29  ;;  %v7015_v18 = vunpack.i.l.bf16 %v7014_v29  ;;  %v7021_v44 = vunpack.i.h.bf16 %v7019_v51  ;;  %v7020_v24 = vunpack.i.l.bf16 %v7019_v51 }
 0x3bb   :  { %3461 = vmatpush1.bf16.msra.mxu0 %v7547_v46  ;;  %v14220_v29 = vunpack.i.h.bf16 %v14219_v3 }
 0x3bc   :  { %v10869_v11 = vmax.f32 %v10461_v1, %v7016_v45  ;;  %v10872_v57 = vmax.f32 %v10454_v39, %v7021_v44  ;;  %v2094_v50 = vsel %vm121_vm1, %v7015_v18, %v7016_v45  ;;  %v2100_v31 = vsel %vm121_vm1, %v7020_v24, %v7021_v44  ;;  %3462 = vmatprep.subr.bf16.mxu0 %v7552_v35  ;;  %v7555_v39 = vld [vmem:[%s13194_s3 + $0x334] ss:$8 sps:$4 sm:$0xff]   ;;  %v7553_v35 = vld [vmem:[%s13194_s3 + $0x330] ss:$8 sps:$4 sm:$0xff]  }
 0x3bd   :  { %v2306_v17 = vmax.f32 %v10472_v12, %v2094_v50  ;;  %v2313_v15 = vmax.f32 %v10468_v7, %v2100_v31  ;;  %v2093_v12 = vsel %vm121_vm1, %v14220_v29, %v7015_v18  ;;  %v14221_v7 = vld [vmem:[#allocation14_spill] sm:$0xff]  ;;  %v14223_v50 = vld [vmem:[#allocation103_spill] sm:$0xff] }
 0x3be   :  { %v2405_v1 = vpack.c.bf16 %v10872_v57, %v10869_v11  ;;  %v14222_v51 = vunpack.i.h.bf16 %v14221_v7  ;;  %3388 = vmatmul.mubr.bf16.gmra.mrb[36].mxu0 %v2396_v40  ;;  %v2305_v31 = vmax.f32 %v14223_v50, %v2093_v12  ;;  %v14224_v18 = vld [vmem:[#allocation66_spill] sm:$0xff]  ;;  %v14225_v50 = vld [vmem:[#allocation87_spill] sm:$0xff] }
 0x3bf   :  { %v2404_v25 = vpack.c.bf16 %v2313_v15, %v2306_v17  ;;  %3463 = vmatpush1.bf16.msra.mxu0 %v7550_v14 }
 0x3c0   :  { %v2099_v45 = vsel %vm121_vm1, %v14222_v51, %v7020_v24  ;;  %3464 = vmatprep.subr.bf16.mxu0 %v7555_v39  ;;  %v7558_v24 = vld [vmem:[%s13194_s3 + $0x344] ss:$8 sps:$4 sm:$0xff]   ;;  %v7556_v39 = vld [vmem:[%s13194_s3 + $0x340] ss:$8 sps:$4 sm:$0xff]  }
 0x3c1   :  { %v7024_v44 = vpop.permute.xlu1 %7023  ;;  %v7029_v46 = vpop.permute.xlu0 %7028  ;;  %3397 = vmatprep.mubr.bf16.mxu0 %v2404_v25  ;;  %v2312_v17 = vmax.f32 %v14224_v18, %v2099_v45  ;;  %v14226_v18 = vld [vmem:[#allocation7_spill] sm:$0xff] }
 0x3c2   :  { %v7026_v52 = vunpack.i.h.bf16 %v7024_v44  ;;  %v7025_v22 = vunpack.i.l.bf16 %v7024_v44  ;;  %v7031_v32 = vunpack.i.h.bf16 %v7029_v46  ;;  %v7030_v8 = vunpack.i.l.bf16 %v7029_v46 }
 0x3c3   :  { %3465 = vmatpush1.bf16.msra.mxu0 %v7553_v35  ;;  %v2403_v12 = vpack.c.bf16 %v2312_v17, %v2305_v31 }
 0x3c4   :  { %v10901_v15 = vmax.f32 %v10525_v47, %v7026_v52  ;;  %v10904_v40 = vmax.f32 %v10518_v0, %v7031_v32  ;;  %v2106_v14 = vsel %vm121_vm1, %v7025_v22, %v7026_v52  ;;  %v2112_v25 = vsel %vm121_vm1, %v7030_v8, %v7031_v32  ;;  %3466 = vmatprep.subr.bf16.mxu0 %v7558_v24  ;;  %v7559_v0 = vld [vmem:[%s13194_s3 + $0x354] ss:$8 sps:$4 sm:$0x3f]  }
 0x3c5   :  { %v2320_v3 = vmax.f32 %v10536_v20, %v2106_v14  ;;  %v2327_v29 = vmax.f32 %v10532_v33, %v2112_v25  ;;  %v7561_v20 = vld [vmem:[%s13194_s3 + $0x350] ss:$8 sps:$4 sm:$0x3f]   ;;  %v2105_v33 = vsel %vm121_vm1, %v6921_v49, %v7025_v22  ;;  %v2111_v51 = vsel %vm121_vm1, %v6926_v9, %v7030_v8  ;;  %s7591_s3 = smov 112  }
 0x3c6   :  { %v2412_v47 = vpack.c.bf16 %v10904_v40, %v10901_v15  ;;  %3398 = vmatmul.mubr.bf16.gmra.mrb[40].mxu0 %v2403_v12  ;;  %v2319_v31 = vmax.f32 %v14225_v50, %v2105_v33  ;;  %v2326_v5 = vmax.f32 %v14226_v18, %v2111_v51  ;;  %v3114_v49 = vsel %vm3112_vm10, %v7561_v20, 0  ;;  %v14230_v12 = vld [vmem:[#allocation106_spill] sm:$0xff] }
 0x3c7   :  { %v2411_v7 = vpack.c.bf16 %v2327_v29, %v2320_v3  ;;  %3467 = vmatpush1.bf16.msra.mxu0 %v7556_v39  ;;  %v14227_v29 = vmov 0   ;;  %v14231_v50 = vunpack.i.h.bf16 %v10621_v27  ;;  %v14232_v18 = vunpack.i.h.bf16 %v10628_v58 }
 0x3c8   :  { %v7034_v45 = vpop.permute.xlu1 %7033  ;;  %v7039_v44 = vpop.permute.xlu0 %7038  ;;  %6091 = vmatprep.subr.msk.bf16.mxu0 %vm3112_vm10, %v7559_v0  ;;  %v2410_v25 = vpack.c.bf16 %v2326_v5, %v2319_v31  ;;  %v14233_v5 = vld [vmem:[#allocation48_spill] sm:$0xff] }
 0x3c9   :  { %v7036_v46 = vunpack.i.h.bf16 %v7034_v45  ;;  %v7035_v52 = vunpack.i.l.bf16 %v7034_v45  ;;  %v7041_v32 = vunpack.i.h.bf16 %v7039_v44  ;;  %v7040_v35 = vunpack.i.l.bf16 %v7039_v44  ;;  %3407 = vmatprep.mubr.bf16.mxu0 %v2411_v7 }
 0x3cb   :  { %v10932_v42 = vmax.f32 %v10570_v28, %v7036_v46  ;;  %v10935_v9 = vmax.f32 %v10563_v61, %v7041_v32  ;;  %v2118_v22 = vsel %vm121_vm1, %v7035_v52, %v7036_v46  ;;  %v2124_v8 = vsel %vm121_vm1, %v7040_v35, %v7041_v32  ;;  %3469 = vmatpush1.bf16.msra.mxu0 %v3114_v49 }
 0x3cc   :  { %v2334_v17 = vmax.f32 %v10581_v38, %v2118_v22  ;;  %v2341_v24 = vmax.f32 %v10577_v56, %v2124_v8  ;;  %5607 = vmatprep.subr.bf16.mxu0 %v14227_v29  ;;  %v2117_v61 = vsel %vm121_vm1, %v6936_v53, %v7035_v52  ;;  %v14228_v28 = vunpack.i.h.bf16 %v10583_v21  ;;  %v14229_v38 = vld [vmem:[#allocation100_spill] sm:$0xff] }
 0x3cd   :  { %v2419_v14 = vpack.c.bf16 %v10935_v9, %v10932_v42  ;;  %v2333_v56 = vmax.f32 %v14229_v38, %v2117_v61 }
 0x3ce   :  { %v2418_v3 = vpack.c.bf16 %v2341_v24, %v2334_v17  ;;  %v2123_v39 = vsel %vm121_vm1, %v14228_v28, %v7040_v35  ;;  %3408 = vmatmul.mubr.bf16.gmra.mrb[44].mxu0 %v2410_v25 }
 0x3cf   :  { %v2340_v7 = vmax.f32 %v14230_v12, %v2123_v39 }
 0x3d0   :  { %3417 = vmatprep.mubr.bf16.mxu0 %v2418_v3 }
 0x3d1   :  { %v2417_v0 = vpack.c.bf16 %v2340_v7, %v2333_v56  ;;  %v14235_v7 = vunpack.i.h.bf16 %v10676_v34 }
 0x3d6   :  { %3418 = vmatmul.mubr.bf16.gmra.mrb[48].mxu0 %v2417_v0 }
 0x3da   :  { %v7044_v20 = vpop.permute.xlu1 %7043  ;;  %v7049_v33 = vpop.permute.xlu0 %7048 }
 0x3db   :  { %v7046_v51 = vunpack.i.h.bf16 %v7044_v20  ;;  %v7045_v45 = vunpack.i.l.bf16 %v7044_v20  ;;  %v7051_v44 = vunpack.i.h.bf16 %v7049_v33  ;;  %v7050_v48 = vunpack.i.l.bf16 %v7049_v33 }
 0x3dc   :  { %v14236_v20 = vunpack.i.h.bf16 %v10720_v6 }
 0x3dd   :  { %v10953_v53 = vmax.f32 %v10666_v16, %v7046_v51  ;;  %v10956_v21 = vmax.f32 %v10659_v60, %v7051_v44  ;;  %v2130_v46 = vsel %vm121_vm1, %v7045_v45, %v7046_v51  ;;  %v2136_v52 = vsel %vm121_vm1, %v7050_v48, %v7051_v44  ;;  %v14234_v60 = vld [vmem:[#allocation85_spill] sm:$0xff]  ;;  %v14237_v51 = vld [vmem:[#allocation70_spill] sm:$0xff] }
 0x3de   :  { %v2348_v32 = vmax.f32 %v10674_v63, %v2130_v46  ;;  %v2355_v35 = vmax.f32 %v10670_v43, %v2136_v52  ;;  %v2129_v31 = vsel %vm121_vm1, %v14231_v50, %v7045_v45  ;;  %v2135_v16 = vsel %vm121_vm1, %v14232_v18, %v7050_v48  ;;  %v14238_v45 = vld [vmem:[#allocation10_spill] sm:$0xff] }
 0x3df   :  { %v2347_v49 = vmax.f32 %v14233_v5, %v2129_v31  ;;  %v2354_v22 = vmax.f32 %v14234_v60, %v2135_v16  ;;  %v2426_v8 = vpack.c.bf16 %v10956_v21, %v10953_v53  ;;  %v14239_v16 = vunpack.i.h.bf16 %v10768_v10 }
 0x3e0   :  { %v2425_v17 = vpack.c.bf16 %v2355_v35, %v2348_v32  ;;  %v14243_v10 = vpack.c.bf16 %v10821_v36, %v10815_v59 }
 0x3e1   :  { %v2424_v24 = vpack.c.bf16 %v2354_v22, %v2347_v49  ;;  %v14240_v49 = vunpack.i.h.bf16 %v10764_v62  ;;  %v14241_v22 = vld [vmem:[#allocation58_spill] sm:$0xff] }
 0x3e2   :  { %v7054_v63 = vpop.permute.xlu1 %7053  ;;  %v7059_v25 = vpop.permute.xlu0 %7058  ;;  %3427 = vmatprep.mubr.bf16.mxu0 %v2425_v17  ;;  %v14242_v17 = vld [vmem:[#allocation18_spill] sm:$0xff] }
 0x3e3   :  { %v7056_v43 = vunpack.i.h.bf16 %v7054_v63  ;;  %v7055_v27 = vunpack.i.l.bf16 %v7054_v63  ;;  %v7061_v3 = vunpack.i.h.bf16 %v7059_v25  ;;  %v7060_v61 = vunpack.i.l.bf16 %v7059_v25  ;;  %3428 = vmatmul.mubr.bf16.gmra.mrb[52].mxu0 %v2424_v24 }
 0x3e5   :  { %v2363_v58 = vmax.f32 %v10710_v54, %v7056_v43  ;;  %v2370_v28 = vmax.f32 %v10703_v19, %v7061_v3  ;;  %v2142_v39 = vsel %vm121_vm1, %v7055_v27, %v7056_v43  ;;  %v2148_v38 = vsel %vm121_vm1, %v7060_v61, %v7061_v3 }
 0x3e6   :  { %v2362_v56 = vmax.f32 %v10718_v55, %v2142_v39  ;;  %v2369_v12 = vmax.f32 %v10714_v13, %v2148_v38  ;;  %v2141_v0 = vsel %vm121_vm1, %v14235_v7, %v7055_v27  ;;  %v2147_v33 = vsel %vm121_vm1, %v14236_v20, %v7060_v61 }
 0x3e7   :  { %v2361_v54 = vmax.f32 %v14237_v51, %v2141_v0  ;;  %v2368_v19 = vmax.f32 %v14238_v45, %v2147_v33  ;;  %v2433_v44 = vpack.c.bf16 %v2370_v28, %v2363_v58  ;;  %v11074_v33 = vld [vmem:[%s13195_s4 + $0x4] ss:$8 sps:$4 sm:$0xff]  }
 0x3e8   :  { %v2432_v48 = vpack.c.bf16 %v2369_v12, %v2362_v56  ;;  %6104 = vmatprep.mubr.msk.bf16.mxu1 %vm4161_vm12, %v11074_v33 }
 0x3e9   :  { %v2431_v53 = vpack.c.bf16 %v2368_v19, %v2361_v54 }
 0x3ea   :  { %3437 = vmatprep.mubr.bf16.mxu0 %v2432_v48 }
 0x3eb   :  { %3438 = vmatmul.mubr.bf16.gmra.mrb[56].mxu0 %v2431_v53 }
 0x41f   :  { %v7069_v55 = vpop.permute.xlu0 %7068 }
 0x420   :  { %v7071_v13 = vunpack.i.h.bf16 %v7069_v55  ;;  %v7070_v46 = vunpack.i.l.bf16 %v7069_v55 }
 0x421   :  { %v7064_v21 = vpop.permute.xlu1 %7063 }
 0x422   :  { %v7066_v34 = vunpack.i.h.bf16 %v7064_v21  ;;  %v7065_v52 = vunpack.i.l.bf16 %v7064_v21  ;;  %v2384_v32 = vmax.f32 %v10793_v2, %v7071_v13  ;;  %v2160_v50 = vsel %vm121_vm1, %v7070_v46, %v7071_v13 }
 0x423   :  { %v2383_v18 = vmax.f32 %v10804_v41, %v2160_v50  ;;  %v2159_v60 = vsel %vm121_vm1, %v14240_v49, %v7070_v46 }
 0x424   :  { %v2377_v6 = vmax.f32 %v10800_v26, %v7066_v34  ;;  %v2154_v35 = vsel %vm121_vm1, %v7065_v52, %v7066_v34  ;;  %v2153_v5 = vsel %vm121_vm1, %v14239_v16, %v7065_v52  ;;  %v2382_v26 = vmax.f32 %v14242_v17, %v2159_v60 }
 0x425   :  { %v2376_v31 = vmax.f32 %v10808_v30, %v2154_v35  ;;  %v2375_v2 = vmax.f32 %v14241_v22, %v2153_v5 }
 0x426   :  { %v2440_v24 = vpack.c.bf16 %v2384_v32, %v2377_v6 }
 0x427   :  { %v2439_v63 = vpack.c.bf16 %v2383_v18, %v2376_v31  ;;  %v2438_v25 = vpack.c.bf16 %v2382_v26, %v2375_v2 }
 0x429   :  { %3447 = vmatprep.mubr.bf16.mxu0 %v2439_v63 }
 0x42a   :  { %3448 = vmatmul.mubr.bf16.gmra.mrb[60].mxu0 %v2438_v25 }
 0x42b   :  { %3490 = vmatprep.mubr.bf16.mxu0 %v14227_v29 }
 0x432   :  { %6092 = vmatmul.mubr.msk.bf16.vlgmr.msra.gmra.mrb[32].mxu0 %vm3087_vm11, %v14243_v10 }
 0x433   :  { %3500 = vmatprep.mubr.bf16.mxu0 %v14227_v29 }
 0x43a   :  { %6093 = vmatmul.mubr.msk.bf16.gmra.mrb[36].mxu0 %vm3087_vm11, %v2398_v23 }
 0x43b   :  { %3510 = vmatprep.mubr.bf16.mxu0 %v14227_v29 }
 0x442   :  { %6094 = vmatmul.mubr.msk.bf16.gmra.mrb[40].mxu0 %vm3087_vm11, %v2405_v1 }
 0x443   :  { %3520 = vmatprep.mubr.bf16.mxu0 %v14227_v29 }
 0x44a   :  { %6095 = vmatmul.mubr.msk.bf16.gmra.mrb[44].mxu0 %vm3087_vm11, %v2412_v47 }
 0x44b   :  { %3530 = vmatprep.mubr.bf16.mxu0 %v14227_v29 }
 0x452   :  { %6096 = vmatmul.mubr.msk.bf16.gmra.mrb[48].mxu0 %vm3087_vm11, %v2419_v14 }
 0x453   :  { %3540 = vmatprep.mubr.bf16.mxu0 %v14227_v29 }
 0x45a   :  { %6097 = vmatmul.mubr.msk.bf16.gmra.mrb[52].mxu0 %vm3087_vm11, %v2426_v8 }
 0x45b   :  { %3550 = vmatprep.mubr.bf16.mxu0 %v14227_v29 }
 0x462   :  { %6098 = vmatmul.mubr.msk.bf16.gmra.mrb[56].mxu0 %vm3087_vm11, %v2433_v44 }
 0x463   :  { %3560 = vmatprep.mubr.bf16.mxu0 %v14227_v29 }
 0x46a   :  { %6099 = vmatmul.mubr.msk.bf16.gmra.mrb[60].mxu0 %vm3087_vm11, %v2440_v24 }
 0x505   :  { %v3492_v62 = vpop.f32.mrb[32].mxu0 }
 0x506   :  { %v3494_v41 = vpop.f32.mrb[33].mxu0 }
 0x507   :  { %v3496_v30 = vpop.f32.mrb[34].mxu0 }
 0x508   :  { %v11023_v59 = vpack.c.bf16 %v3496_v30, %v3492_v62  ;;  %v3498_v36 = vpop.f32.mrb[35].mxu0 }
 0x509   :  { %v3572_v4 = vpack.c.bf16 %v3498_v36, %v3494_v41 }
 0x50a   :  { %3667 = vrot.lane.b32.xlu0 %v11023_v59, %s7582_s28  ;;  %3603 = vrot.lane.b32.xlu1 %v11023_v59, %s7583_s29 }
 0x50b   :  { %4168 = vmatprep.subr.bf16.mxu1 %v3572_v4 }
 0x50c   :  { %4169 = vmatpush1.bf16.msra.mxu1 %v11023_v59 }
 0x50d   :  { %v3502_v37 = vpop.f32.mrb[36].mxu0 }
 0x50e   :  { %3731 = vrot.lane.b32.xlu1 %v11023_v59, %s7591_s3  ;;  %3669 = vrot.lane.b32.xlu0 %v3572_v4, %s7582_s28  ;;  %v3504_v23 = vpop.f32.mrb[37].mxu0 }
 0x50f   :  { %v3506_v11 = vpop.f32.mrb[38].mxu0 }
 0x510   :  { %v11033_v57 = vpack.c.bf16 %v3506_v11, %v3502_v37  ;;  %v3508_v1 = vpop.f32.mrb[39].mxu0 }
 0x511   :  { %v11035_v15 = vpack.c.bf16 %v3508_v1, %v3504_v23 }
 0x512   :  { %3797 = vrot.lane.b32.xlu0 %v3572_v4, %s7592_s20  ;;  %3605 = vrot.lane.b32.xlu1 %v3572_v4, %s7583_s29 }
 0x515   :  { %v3512_v40 = vpop.f32.mrb[40].mxu0 }
 0x516   :  { %3733 = vrot.lane.b32.xlu1 %v3572_v4, %s7591_s3  ;;  %3607 = vrot.lane.b32.xlu0 %v11033_v57, %s7583_s29  ;;  %v3514_v47 = vpop.f32.mrb[41].mxu0 }
 0x517   :  { %v3516_v42 = vpop.f32.mrb[42].mxu0 }
 0x518   :  { %v11042_v9 = vpack.c.bf16 %v3516_v42, %v3512_v40  ;;  %v3518_v14 = vpop.f32.mrb[43].mxu0 }
 0x519   :  { %v11044_v8 = vpack.c.bf16 %v3518_v14, %v3514_v47 }
 0x51a   :  { %3861 = vrot.lane.b32.xlu1 %v3572_v4, %s7593_s2  ;;  %3795 = vrot.lane.b32.xlu0 %v11023_v59, %s7592_s20 }
 0x51d   :  { %v3522_v43 = vpop.f32.mrb[44].mxu0 }
 0x51e   :  { %3671 = vrot.lane.b32.xlu1 %v11033_v57, %s7582_s28  ;;  %3735 = vrot.lane.b32.xlu0 %v11033_v57, %s7591_s3  ;;  %v3524_v27 = vpop.f32.mrb[45].mxu0 }
 0x51f   :  { %v3526_v3 = vpop.f32.mrb[46].mxu0 }
 0x520   :  { %v11053_v61 = vpack.c.bf16 %v3526_v3, %v3522_v43  ;;  %v3528_v58 = vpop.f32.mrb[47].mxu0 }
 0x521   :  { %v11055_v28 = vpack.c.bf16 %v3528_v58, %v3524_v27 }
 0x522   :  { %3859 = vrot.lane.b32.xlu1 %v11023_v59, %s7593_s2  ;;  %3925 = vrot.lane.b32.xlu0 %v3572_v4, %s7584_s9 }
 0x525   :  { %v3532_v39 = vpop.f32.mrb[48].mxu0 }
 0x526   :  { %3799 = vrot.lane.b32.xlu1 %v11033_v57, %s7592_s20  ;;  %3863 = vrot.lane.b32.xlu0 %v11033_v57, %s7593_s2  ;;  %v3534_v38 = vpop.f32.mrb[49].mxu0 }
 0x527   :  { %v3536_v56 = vpop.f32.mrb[50].mxu0 }
 0x528   :  { %v11064_v12 = vpack.c.bf16 %v3536_v56, %v3532_v39  ;;  %v3538_v7 = vpop.f32.mrb[51].mxu0 }
 0x529   :  { %v11066_v0 = vpack.c.bf16 %v3538_v7, %v3534_v38 }
 0x52a   :  { %3989 = vrot.lane.b32.xlu1 %v3572_v4, %s7586_s11  ;;  %3923 = vrot.lane.b32.xlu0 %v11023_v59, %s7584_s9 }
 0x52d   :  { %v3542_v20 = vpop.f32.mrb[52].mxu0 }
 0x52e   :  { %3927 = vrot.lane.b32.xlu1 %v11033_v57, %s7584_s9  ;;  %3991 = vrot.lane.b32.xlu0 %v11033_v57, %s7586_s11  ;;  %v3544_v51 = vpop.f32.mrb[53].mxu0 }
 0x52f   :  { %v3546_v54 = vpop.f32.mrb[54].mxu0 }
 0x530   :  { %v11082_v45 = vpack.c.bf16 %v3546_v54, %v3542_v20  ;;  %v3548_v19 = vpop.f32.mrb[55].mxu0 }
 0x531   :  { %v11084_v44 = vpack.c.bf16 %v3548_v19, %v3544_v51 }
 0x532   :  { %3987 = vrot.lane.b32.xlu1 %v11023_v59, %s7586_s11  ;;  %4053 = vrot.lane.b32.xlu0 %v3572_v4, %s7585_s10 }
 0x535   :  { %v3552_v48 = vpop.f32.mrb[56].mxu0 }
 0x536   :  { %4055 = vrot.lane.b32.xlu1 %v11033_v57, %s7585_s10  ;;  %4051 = vrot.lane.b32.xlu0 %v11023_v59, %s7585_s10  ;;  %v3554_v53 = vpop.f32.mrb[57].mxu0 }
 0x537   :  { %v3556_v55 = vpop.f32.mrb[58].mxu0 }
 0x538   :  { %v11093_v21 = vpack.c.bf16 %v3556_v55, %v3552_v48  ;;  %v3558_v13 = vpop.f32.mrb[59].mxu0  ;;  %v11258_v48 = vld [vmem:[%s13195_s4] ss:$8 sps:$4 sm:$0xff]  }
 0x539   :  { %v11095_v46 = vpack.c.bf16 %v3558_v13, %v3554_v53  ;;  %v11268_v13 = vld [vmem:[%s13195_s4 + $0x14] ss:$8 sps:$4 sm:$0xff]  }
 0x53a   :  { %3609 = vrot.lane.b32.xlu1 %v11035_v15, %s7583_s29  ;;  %3611 = vrot.lane.b32.xlu0 %v11042_v9, %s7583_s29 }
 0x53d   :  { %v3562_v34 = vpop.f32.mrb[60].mxu0 }
 0x53e   :  { %3673 = vrot.lane.b32.xlu1 %v11035_v15, %s7582_s28  ;;  %3675 = vrot.lane.b32.xlu0 %v11042_v9, %s7582_s28  ;;  %v3564_v52 = vpop.f32.mrb[61].mxu0 }
 0x53f   :  { %v3566_v32 = vpop.f32.mrb[62].mxu0 }
 0x540   :  { %v11105_v6 = vpack.c.bf16 %v3566_v32, %v3562_v34  ;;  %v3568_v35 = vpop.f32.mrb[63].mxu0 }
 0x541   :  { %v11107_v50 = vpack.c.bf16 %v3568_v35, %v3564_v52 }
 0x542   :  { %3737 = vrot.lane.b32.xlu1 %v11035_v15, %s7591_s3  ;;  %3739 = vrot.lane.b32.xlu0 %v11042_v9, %s7591_s3 }
 0x546   :  { %3801 = vrot.lane.b32.xlu1 %v11035_v15, %s7592_s20  ;;  %3803 = vrot.lane.b32.xlu0 %v11042_v9, %s7592_s20 }
 0x54a   :  { %3865 = vrot.lane.b32.xlu1 %v11035_v15, %s7593_s2  ;;  %3867 = vrot.lane.b32.xlu0 %v11042_v9, %s7593_s2 }
 0x54e   :  { %3929 = vrot.lane.b32.xlu1 %v11035_v15, %s7584_s9  ;;  %3931 = vrot.lane.b32.xlu0 %v11042_v9, %s7584_s9 }
 0x552   :  { %3993 = vrot.lane.b32.xlu1 %v11035_v15, %s7586_s11  ;;  %3995 = vrot.lane.b32.xlu0 %v11042_v9, %s7586_s11 }
 0x556   :  { %4057 = vrot.lane.b32.xlu1 %v11035_v15, %s7585_s10  ;;  %4059 = vrot.lane.b32.xlu0 %v11042_v9, %s7585_s10 }
 0x55a   :  { %3613 = vrot.lane.b32.xlu1 %v11044_v8, %s7583_s29  ;;  %3615 = vrot.lane.b32.xlu0 %v11053_v61, %s7583_s29 }
 0x55e   :  { %3677 = vrot.lane.b32.xlu1 %v11044_v8, %s7582_s28  ;;  %3679 = vrot.lane.b32.xlu0 %v11053_v61, %s7582_s28 }
 0x562   :  { %3741 = vrot.lane.b32.xlu1 %v11044_v8, %s7591_s3  ;;  %3743 = vrot.lane.b32.xlu0 %v11053_v61, %s7591_s3 }
 0x566   :  { %3805 = vrot.lane.b32.xlu1 %v11044_v8, %s7592_s20  ;;  %3807 = vrot.lane.b32.xlu0 %v11053_v61, %s7592_s20 }
 0x56a   :  { %3869 = vrot.lane.b32.xlu1 %v11044_v8, %s7593_s2  ;;  %3871 = vrot.lane.b32.xlu0 %v11053_v61, %s7593_s2 }
 0x56e   :  { %3933 = vrot.lane.b32.xlu1 %v11044_v8, %s7584_s9  ;;  %3935 = vrot.lane.b32.xlu0 %v11053_v61, %s7584_s9 }
 0x572   :  { %3997 = vrot.lane.b32.xlu1 %v11044_v8, %s7586_s11  ;;  %3999 = vrot.lane.b32.xlu0 %v11053_v61, %s7586_s11 }
 0x576   :  { %4061 = vrot.lane.b32.xlu1 %v11044_v8, %s7585_s10  ;;  %4063 = vrot.lane.b32.xlu0 %v11053_v61, %s7585_s10 }
 0x57a   :  { %3617 = vrot.lane.b32.xlu1 %v11055_v28, %s7583_s29  ;;  %3619 = vrot.lane.b32.xlu0 %v11064_v12, %s7583_s29 }
 0x57c   :  { %v3668_v31 = vpop.permute.xlu0 %3667  ;;  %v3604_v18 = vpop.permute.xlu1 %3603 }
 0x57e   :  { %3681 = vrot.lane.b32.xlu1 %v11055_v28, %s7582_s28  ;;  %3683 = vrot.lane.b32.xlu0 %v11064_v12, %s7582_s28 }
 0x580   :  { %v3732_v16 = vpop.permute.xlu1 %3731  ;;  %v3670_v5 = vpop.permute.xlu0 %3669 }
 0x581   :  { %v3700_v41 = vsel %vm90_vm2, %v3668_v31, %v3670_v5 }
 0x582   :  { %3745 = vrot.lane.b32.xlu1 %v11055_v28, %s7591_s3  ;;  %3747 = vrot.lane.b32.xlu0 %v11064_v12, %s7591_s3 }
 0x584   :  { %v3798_v49 = vpop.permute.xlu0 %3797  ;;  %v3606_v60 = vpop.permute.xlu1 %3605 }
 0x585   :  { %v3636_v26 = vsel %vm59_vm0, %v3604_v18, %v3606_v60 }
 0x586   :  { %3809 = vrot.lane.b32.xlu1 %v11055_v28, %s7592_s20  ;;  %3811 = vrot.lane.b32.xlu0 %v11064_v12, %s7592_s20 }
 0x588   :  { %v3734_v22 = vpop.permute.xlu1 %3733  ;;  %v11181_v2 = vpop.permute.xlu0 %3607 }
 0x589   :  { %v3637_v17 = vsel %vm59_vm0, %v3606_v60, %v11181_v2  ;;  %v3764_v4 = vsel %vm3763_vm13, %v3732_v16, %v3734_v22 }
 0x58a   :  { %4170 = vmatprep.subr.bf16.mxu1 %v3637_v17  ;;  %3873 = vrot.lane.b32.xlu1 %v11055_v28, %s7593_s2 }
 0x58b   :  { %3875 = vrot.lane.b32.xlu0 %v11064_v12, %s7593_s2  ;;  %4171 = vmatpush1.bf16.msra.mxu1 %v3636_v26 }
 0x58c   :  { %v3862_v24 = vpop.permute.xlu1 %3861  ;;  %v3796_v63 = vpop.permute.xlu0 %3795 }
 0x58d   :  { %v3828_v1 = vsel %vm3827_vm14, %v3796_v63, %v3798_v49 }
 0x58e   :  { %3937 = vrot.lane.b32.xlu1 %v11055_v28, %s7584_s9 }
 0x58f   :  { %3939 = vrot.lane.b32.xlu0 %v11064_v12, %s7584_s9 }
 0x590   :  { %v11194_v25 = vpop.permute.xlu1 %3671  ;;  %v11196_v10 = vpop.permute.xlu0 %3735 }
 0x591   :  { %v3701_v62 = vsel %vm90_vm2, %v3670_v5, %v11194_v25  ;;  %v3765_v30 = vsel %vm3763_vm13, %v3734_v22, %v11196_v10 }
 0x592   :  { %4172 = vmatprep.subr.bf16.mxu1 %v3701_v62  ;;  %4001 = vrot.lane.b32.xlu1 %v11055_v28, %s7586_s11 }
 0x593   :  { %4003 = vrot.lane.b32.xlu0 %v11064_v12, %s7586_s11  ;;  %4173 = vmatpush1.bf16.msra.mxu1 %v3700_v41 }
 0x594   :  { %v3860_v59 = vpop.permute.xlu1 %3859  ;;  %4174 = vmatprep.subr.bf16.mxu1 %v3765_v30  ;;  %v3926_v36 = vpop.permute.xlu0 %3925 }
 0x595   :  { %v3892_v14 = vsel %vm3891_vm15, %v3860_v59, %v3862_v24 }
 0x596   :  { %4065 = vrot.lane.b32.xlu1 %v11055_v28, %s7585_s10 }
 0x597   :  { %4067 = vrot.lane.b32.xlu0 %v11064_v12, %s7585_s10  ;;  %4175 = vmatpush1.bf16.msra.mxu1 %v3764_v4 }
 0x598   :  { %v11212_v37 = vpop.permute.xlu1 %3799  ;;  %v11214_v23 = vpop.permute.xlu0 %3863 }
 0x599   :  { %v3829_v11 = vsel %vm3827_vm14, %v3798_v49, %v11212_v37  ;;  %v3893_v40 = vsel %vm3891_vm15, %v3862_v24, %v11214_v23 }
 0x59a   :  { %4176 = vmatprep.subr.bf16.mxu1 %v3829_v11  ;;  %3621 = vrot.lane.b32.xlu1 %v11066_v0, %s7583_s29 }
 0x59b   :  { %3623 = vrot.lane.b32.xlu0 %v11082_v45, %s7583_s29  ;;  %4177 = vmatpush1.bf16.msra.mxu1 %v3828_v1 }
 0x59c   :  { %v3990_v47 = vpop.permute.xlu1 %3989  ;;  %4178 = vmatprep.subr.bf16.mxu1 %v3893_v40  ;;  %v3924_v42 = vpop.permute.xlu0 %3923 }
 0x59d   :  { %v3956_v58 = vsel %vm121_vm1, %v3924_v42, %v3926_v36 }
 0x59e   :  { %3685 = vrot.lane.b32.xlu1 %v11066_v0, %s7582_s28 }
 0x59f   :  { %3687 = vrot.lane.b32.xlu0 %v11082_v45, %s7582_s28  ;;  %4179 = vmatpush1.bf16.msra.mxu1 %v3892_v14 }
 0x5a0   :  { %v11230_v43 = vpop.permute.xlu1 %3927  ;;  %v11232_v27 = vpop.permute.xlu0 %3991 }
 0x5a1   :  { %v3957_v3 = vsel %vm121_vm1, %v3926_v36, %v11230_v43  ;;  %v4021_v39 = vsel %vm152_vm4, %v3990_v47, %v11232_v27 }
 0x5a2   :  { %4180 = vmatprep.subr.bf16.mxu1 %v3957_v3  ;;  %3749 = vrot.lane.b32.xlu1 %v11066_v0, %s7591_s3 }
 0x5a3   :  { %3751 = vrot.lane.b32.xlu0 %v11082_v45, %s7591_s3  ;;  %4181 = vmatpush1.bf16.msra.mxu1 %v3956_v58 }
 0x5a4   :  { %v3988_v38 = vpop.permute.xlu1 %3987  ;;  %4182 = vmatprep.subr.bf16.mxu1 %v4021_v39  ;;  %v4054_v56 = vpop.permute.xlu0 %4053 }
 0x5a5   :  { %v4020_v7 = vsel %vm152_vm4, %v3988_v38, %v3990_v47 }
 0x5a6   :  { %3813 = vrot.lane.b32.xlu1 %v11066_v0, %s7592_s20 }
 0x5a7   :  { %3815 = vrot.lane.b32.xlu0 %v11082_v45, %s7592_s20  ;;  %4183 = vmatpush1.bf16.msra.mxu1 %v4020_v7 }
 0x5a8   :  { %v11248_v20 = vpop.permute.xlu1 %4055  ;;  %v4052_v51 = vpop.permute.xlu0 %4051 }
 0x5a9   :  { %v4084_v54 = vsel %vm183_vm3, %v4052_v51, %v4054_v56  ;;  %v4085_v19 = vsel %vm183_vm3, %v4054_v56, %v11248_v20 }
 0x5aa   :  { %4184 = vmatprep.subr.bf16.mxu1 %v4085_v19  ;;  %3877 = vrot.lane.b32.xlu1 %v11066_v0, %s7593_s2 }
 0x5ab   :  { %3879 = vrot.lane.b32.xlu0 %v11082_v45, %s7593_s2  ;;  %4185 = vmatpush1.bf16.msra.mxu1 %v4084_v54 }
 0x5ac   :  { %v3610_v53 = vpop.permute.xlu1 %3609  ;;  %4221 = vmatprep.subr.bf16.mxu1 %v11035_v15  ;;  %v11263_v55 = vpop.permute.xlu0 %3611 }
 0x5ad   :  { %v3639_v15 = vsel %vm59_vm0, %v3610_v53, %v11263_v55  ;;  %v3638_v32 = vsel %vm59_vm0, %v11181_v2, %v3610_v53 }
 0x5ae   :  { %4201 = vmatmul.mubr.bf16.vlgmr.msra.gmra.mrb[80].mxu1 %v11258_v48  ;;  %3941 = vrot.lane.b32.xlu1 %v11066_v0, %s7584_s9 }
 0x5af   :  { %3943 = vrot.lane.b32.xlu0 %v11082_v45, %s7584_s9  ;;  %4222 = vmatpush1.bf16.msra.mxu1 %v11033_v57  ;;  %v11289_v57 = vld [vmem:[%s13195_s4 + $0x10] ss:$8 sps:$4 sm:$0xff]  }
 0x5b0   :  { %v3674_v34 = vpop.permute.xlu1 %3673  ;;  %4223 = vmatprep.subr.bf16.mxu1 %v3639_v15  ;;  %v11278_v52 = vpop.permute.xlu0 %3675  ;;  %6105 = vmatprep.mubr.msk.bf16.mxu1 %vm4161_vm12, %v11268_v13 }
 0x5b1   :  { %v3703_v35 = vsel %vm90_vm2, %v3674_v34, %v11278_v52  ;;  %v3702_v16 = vsel %vm90_vm2, %v11194_v25, %v3674_v34 }
 0x5b2   :  { %4005 = vrot.lane.b32.xlu1 %v11066_v0, %s7586_s11 }
 0x5b3   :  { %4007 = vrot.lane.b32.xlu0 %v11082_v45, %s7586_s11  ;;  %4224 = vmatpush1.bf16.msra.mxu1 %v3638_v32 }
 0x5b4   :  { %v3738_v31 = vpop.permute.xlu1 %3737  ;;  %4225 = vmatprep.subr.bf16.mxu1 %v3703_v35  ;;  %v11295_v18 = vpop.permute.xlu0 %3739 }
 0x5b5   :  { %v3767_v5 = vsel %vm3763_vm13, %v3738_v31, %v11295_v18  ;;  %v3766_v22 = vsel %vm3763_vm13, %v11196_v10, %v3738_v31 }
 0x5b6   :  { %4069 = vrot.lane.b32.xlu1 %v11066_v0, %s7585_s10  ;;  %4211 = vmatmul.mubr.bf16.gmra.mrb[84].mxu1 %v11289_v57 }
 0x5b7   :  { %4071 = vrot.lane.b32.xlu0 %v11082_v45, %s7585_s10  ;;  %4226 = vmatpush1.bf16.msra.mxu1 %v3702_v16 }
 0x5b8   :  { %v3802_v49 = vpop.permute.xlu1 %3801  ;;  %4227 = vmatprep.subr.bf16.mxu1 %v3767_v5  ;;  %v11306_v60 = vpop.permute.xlu0 %3803  ;;  %6106 = vmatprep.mubr.msk.bf16.mxu1 %vm4161_vm12, %v11074_v33 }
 0x5b9   :  { %v3831_v2 = vsel %vm3827_vm14, %v3802_v49, %v11306_v60  ;;  %v3830_v24 = vsel %vm3827_vm14, %v11212_v37, %v3802_v49 }
 0x5ba   :  { %3625 = vrot.lane.b32.xlu1 %v11084_v44, %s7583_s29 }
 0x5bb   :  { %3627 = vrot.lane.b32.xlu0 %v11093_v21, %s7583_s29  ;;  %4228 = vmatpush1.bf16.msra.mxu1 %v3766_v22 }
 0x5bc   :  { %v3866_v17 = vpop.permute.xlu1 %3865  ;;  %4229 = vmatprep.subr.bf16.mxu1 %v3831_v2  ;;  %v11318_v26 = vpop.permute.xlu0 %3867 }
 0x5bd   :  { %v3895_v63 = vsel %vm3891_vm15, %v3866_v17, %v11318_v26  ;;  %v3894_v62 = vsel %vm3891_vm15, %v11214_v23, %v3866_v17 }
 0x5be   :  { %3689 = vrot.lane.b32.xlu1 %v11084_v44, %s7582_s28 }
 0x5bf   :  { %3691 = vrot.lane.b32.xlu0 %v11093_v21, %s7582_s28  ;;  %4230 = vmatpush1.bf16.msra.mxu1 %v3830_v24 }
 0x5c0   :  { %v3930_v25 = vpop.permute.xlu1 %3929  ;;  %4231 = vmatprep.subr.bf16.mxu1 %v3895_v63  ;;  %v11328_v10 = vpop.permute.xlu0 %3931 }
 0x5c1   :  { %v3959_v41 = vsel %vm121_vm1, %v3930_v25, %v11328_v10  ;;  %v3958_v36 = vsel %vm121_vm1, %v11230_v43, %v3930_v25 }
 0x5c2   :  { %3753 = vrot.lane.b32.xlu1 %v11084_v44, %s7591_s3 }
 0x5c3   :  { %3755 = vrot.lane.b32.xlu0 %v11093_v21, %s7591_s3  ;;  %4232 = vmatpush1.bf16.msra.mxu1 %v3894_v62 }
 0x5c4   :  { %v3994_v30 = vpop.permute.xlu1 %3993  ;;  %4233 = vmatprep.subr.bf16.mxu1 %v3959_v41  ;;  %v11338_v59 = vpop.permute.xlu0 %3995 }
 0x5c5   :  { %v4023_v4 = vsel %vm152_vm4, %v3994_v30, %v11338_v59  ;;  %v4022_v11 = vsel %vm152_vm4, %v11232_v27, %v3994_v30 }
 0x5c6   :  { %3817 = vrot.lane.b32.xlu1 %v11084_v44, %s7592_s20 }
 0x5c7   :  { %3819 = vrot.lane.b32.xlu0 %v11093_v21, %s7592_s20  ;;  %4234 = vmatpush1.bf16.msra.mxu1 %v3958_v36 }
 0x5c8   :  { %v4058_v37 = vpop.permute.xlu1 %4057  ;;  %4235 = vmatprep.subr.bf16.mxu1 %v4023_v4  ;;  %v11348_v23 = vpop.permute.xlu0 %4059 }
 0x5c9   :  { %v4087_v1 = vsel %vm183_vm3, %v4058_v37, %v11348_v23  ;;  %v4086_v42 = vsel %vm183_vm3, %v11248_v20, %v4058_v37 }
 0x5ca   :  { %3881 = vrot.lane.b32.xlu1 %v11084_v44, %s7593_s2 }
 0x5cb   :  { %3883 = vrot.lane.b32.xlu0 %v11093_v21, %s7593_s2  ;;  %4236 = vmatpush1.bf16.msra.mxu1 %v4022_v11 }
 0x5cc   :  { %4237 = vmatprep.subr.bf16.mxu1 %v4087_v1  ;;  %v3614_v40 = vpop.permute.xlu1 %3613  ;;  %v11358_v47 = vpop.permute.xlu0 %3615 }
 0x5cd   :  { %v3641_v27 = vsel %vm59_vm0, %v3614_v40, %v11358_v47 }
 0x5ce   :  { %3945 = vrot.lane.b32.xlu1 %v11084_v44, %s7584_s9 }
 0x5cf   :  { %3947 = vrot.lane.b32.xlu0 %v11093_v21, %s7584_s9  ;;  %4238 = vmatpush1.bf16.msra.mxu1 %v4086_v42 }
 0x5d0   :  { %v3678_v14 = vpop.permute.xlu1 %3677  ;;  %4274 = vmatprep.subr.bf16.mxu1 %v11044_v8  ;;  %v11367_v43 = vpop.permute.xlu0 %3679  ;;  %v3640_v8 = vsel %vm59_vm0, %v11263_v55, %v3614_v40 }
 0x5d1   :  { %v3704_v56 = vsel %vm90_vm2, %v11278_v52, %v3678_v14 }
 0x5d2   :  { %4254 = vmatmul.mubr.bf16.vlgmr.msra.gmra.mrb[88].mxu1 %v11258_v48  ;;  %4009 = vrot.lane.b32.xlu1 %v11084_v44, %s7586_s11 }
 0x5d3   :  { %4011 = vrot.lane.b32.xlu0 %v11093_v21, %s7586_s11  ;;  %4275 = vmatpush1.bf16.msra.mxu1 %v11042_v9  ;;  %v3705_v9 = vsel %vm90_vm2, %v3678_v14, %v11367_v43 }
 0x5d4   :  { %v3742_v3 = vpop.permute.xlu1 %3741  ;;  %4276 = vmatprep.subr.bf16.mxu1 %v3641_v27  ;;  %v11377_v58 = vpop.permute.xlu0 %3743  ;;  %6107 = vmatprep.mubr.msk.bf16.mxu1 %vm4161_vm12, %v11268_v13  ;;  %v4119_v27 = vld [vmem:[%s13196_s5] sm:$0xff] }
 0x5d5   :  { %v3769_v7 = vsel %vm3763_vm13, %v3742_v3, %v11377_v58  ;;  %v3768_v54 = vsel %vm3763_vm13, %v11295_v18, %v3742_v3 }
 0x5d6   :  { %4073 = vrot.lane.b32.xlu1 %v11084_v44, %s7585_s10 }
 0x5d7   :  { %4075 = vrot.lane.b32.xlu0 %v11093_v21, %s7585_s10  ;;  %4277 = vmatpush1.bf16.msra.mxu1 %v3640_v8 }
 0x5d8   :  { %v3806_v39 = vpop.permute.xlu1 %3805  ;;  %4278 = vmatprep.subr.bf16.mxu1 %v3705_v9  ;;  %v11389_v38 = vpop.permute.xlu0 %3807 }
 0x5d9   :  { %v3833_v19 = vsel %vm3827_vm14, %v3806_v39, %v11389_v38  ;;  %v3832_v15 = vsel %vm3827_vm14, %v11306_v60, %v3806_v39 }
 0x5da   :  { %4264 = vmatmul.mubr.bf16.gmra.mrb[92].mxu1 %v11289_v57  ;;  %3629 = vrot.lane.b32.xlu1 %v11095_v46, %s7583_s29 }
 0x5db   :  { %3631 = vrot.lane.b32.xlu0 %v11105_v6, %s7583_s29  ;;  %4279 = vmatpush1.bf16.msra.mxu1 %v3704_v56 }
 0x5dc   :  { %v3870_v20 = vpop.permute.xlu1 %3869  ;;  %4280 = vmatprep.subr.bf16.mxu1 %v3769_v7  ;;  %v11400_v51 = vpop.permute.xlu0 %3871  ;;  %6108 = vmatprep.mubr.msk.bf16.mxu1 %vm4161_vm12, %v11074_v33  ;;  %v4122_v7 = vld [vmem:[%s13196_s5 + $0x18] sm:$0xff] }
 0x5dd   :  { %v3897_v34 = vsel %vm3891_vm15, %v3870_v20, %v11400_v51  ;;  %v3896_v35 = vsel %vm3891_vm15, %v11318_v26, %v3870_v20 }
 0x5de   :  { %3693 = vrot.lane.b32.xlu1 %v11095_v46, %s7582_s28 }
 0x5df   :  { %3695 = vrot.lane.b32.xlu0 %v11105_v6, %s7582_s28  ;;  %4281 = vmatpush1.bf16.msra.mxu1 %v3768_v54 }
 0x5e0   :  { %v3934_v53 = vpop.permute.xlu1 %3933  ;;  %4282 = vmatprep.subr.bf16.mxu1 %v3833_v19  ;;  %v11412_v55 = vpop.permute.xlu0 %3935 }
 0x5e1   :  { %v3961_v31 = vsel %vm121_vm1, %v3934_v53, %v11412_v55  ;;  %v3960_v5 = vsel %vm121_vm1, %v11328_v10, %v3934_v53 }
 0x5e2   :  { %3757 = vrot.lane.b32.xlu1 %v11095_v46, %s7591_s3 }
 0x5e3   :  { %3759 = vrot.lane.b32.xlu0 %v11105_v6, %s7591_s3  ;;  %4283 = vmatpush1.bf16.msra.mxu1 %v3832_v15 }
 0x5e4   :  { %v3998_v52 = vpop.permute.xlu1 %3997  ;;  %4284 = vmatprep.subr.bf16.mxu1 %v3897_v34  ;;  %v11422_v32 = vpop.permute.xlu0 %3999 }
 0x5e5   :  { %v4025_v49 = vsel %vm152_vm4, %v3998_v52, %v11422_v32  ;;  %v4024_v2 = vsel %vm152_vm4, %v11338_v59, %v3998_v52 }
 0x5e6   :  { %3821 = vrot.lane.b32.xlu1 %v11095_v46, %s7592_s20 }
 0x5e7   :  { %3823 = vrot.lane.b32.xlu0 %v11105_v6, %s7592_s20  ;;  %4285 = vmatpush1.bf16.msra.mxu1 %v3896_v35 }
 0x5e8   :  { %v4062_v18 = vpop.permute.xlu1 %4061  ;;  %4286 = vmatprep.subr.bf16.mxu1 %v3961_v31  ;;  %v11432_v16 = vpop.permute.xlu0 %4063 }
 0x5e9   :  { %v4089_v17 = vsel %vm183_vm3, %v4062_v18, %v11432_v16  ;;  %v4088_v63 = vsel %vm183_vm3, %v11348_v23, %v4062_v18 }
 0x5ea   :  { %3885 = vrot.lane.b32.xlu1 %v11095_v46, %s7593_s2 }
 0x5eb   :  { %3887 = vrot.lane.b32.xlu0 %v11105_v6, %s7593_s2  ;;  %4287 = vmatpush1.bf16.msra.mxu1 %v3960_v5 }
 0x5ec   :  { %4288 = vmatprep.subr.bf16.mxu1 %v4025_v49  ;;  %v3618_v60 = vpop.permute.xlu1 %3617  ;;  %v11442_v22 = vpop.permute.xlu0 %3619 }
 0x5ed   :  { %v3643_v62 = vsel %vm59_vm0, %v3618_v60, %v11442_v22 }
 0x5ee   :  { %3949 = vrot.lane.b32.xlu1 %v11095_v46, %s7584_s9 }
 0x5ef   :  { %3951 = vrot.lane.b32.xlu0 %v11105_v6, %s7584_s9  ;;  %4289 = vmatpush1.bf16.msra.mxu1 %v4024_v2 }
 0x5f0   :  { %4290 = vmatprep.subr.bf16.mxu1 %v4089_v17  ;;  %v3682_v26 = vpop.permute.xlu1 %3681  ;;  %v11452_v24 = vpop.permute.xlu0 %3683 }
 0x5f1   :  { %v3706_v4 = vsel %vm90_vm2, %v11367_v43, %v3682_v26 }
 0x5f2   :  { %4013 = vrot.lane.b32.xlu1 %v11095_v46, %s7586_s11 }
 0x5f3   :  { %4015 = vrot.lane.b32.xlu0 %v11105_v6, %s7586_s11  ;;  %4291 = vmatpush1.bf16.msra.mxu1 %v4088_v63 }
 0x5f4   :  { %v3746_v25 = vpop.permute.xlu1 %3745  ;;  %4327 = vmatprep.subr.bf16.mxu1 %v11055_v28  ;;  %v11461_v10 = vpop.permute.xlu0 %3747  ;;  %v3642_v28 = vsel %vm59_vm0, %v11358_v47, %v3618_v60 }
 0x5f5   :  { %v3771_v37 = vsel %vm3763_vm13, %v3746_v25, %v11461_v10  ;;  %v3770_v1 = vsel %vm3763_vm13, %v11377_v58, %v3746_v25  ;;  %v4120_v58 = vld [vmem:[%s13196_s5 + $0x8] sm:$0xff] }
 0x5f6   :  { %4307 = vmatmul.mubr.bf16.vlgmr.msra.gmra.mrb[96].mxu1 %v11258_v48  ;;  %4077 = vrot.lane.b32.xlu1 %v11095_v46, %s7585_s10 }
 0x5f7   :  { %4079 = vrot.lane.b32.xlu0 %v11105_v6, %s7585_s10  ;;  %4328 = vmatpush1.bf16.msra.mxu1 %v11053_v61  ;;  %v3707_v61 = vsel %vm90_vm2, %v3682_v26, %v11452_v24 }
 0x5f8   :  { %v3810_v41 = vpop.permute.xlu1 %3809  ;;  %4329 = vmatprep.subr.bf16.mxu1 %v3643_v62  ;;  %v11471_v30 = vpop.permute.xlu0 %3811  ;;  %6109 = vmatprep.mubr.msk.bf16.mxu1 %vm4161_vm12, %v11268_v13 }
 0x5f9   :  { %v3835_v40 = vsel %vm3827_vm14, %v3810_v41, %v11471_v30  ;;  %v3834_v14 = vsel %vm3827_vm14, %v11389_v38, %v3810_v41  ;;  %v4121_v38 = vld [vmem:[%s13196_s5 + $0x10] sm:$0xff] }
 0x5fa   :  { %3633 = vrot.lane.b32.xlu1 %v11107_v50, %s7583_s29 }
 0x5fb   :  { %3697 = vrot.lane.b32.xlu0 %v11107_v50, %s7582_s28  ;;  %4330 = vmatpush1.bf16.msra.mxu1 %v3642_v28 }
 0x5fc   :  { %v3874_v59 = vpop.permute.xlu1 %3873  ;;  %4331 = vmatprep.subr.bf16.mxu1 %v3707_v61 }
 0x5fd   :  { %v11483_v36 = vpop.permute.xlu0 %3875  ;;  %v3898_v9 = vsel %vm3891_vm15, %v11400_v51, %v3874_v59 }
 0x5fe   :  { %4317 = vmatmul.mubr.bf16.gmra.mrb[100].mxu1 %v11289_v57  ;;  %3761 = vrot.lane.b32.xlu1 %v11107_v50, %s7591_s3  ;;  %v3899_v43 = vsel %vm3891_vm15, %v3874_v59, %v11483_v36 }
 0x5ff   :  { %3825 = vrot.lane.b32.xlu0 %v11107_v50, %s7592_s20  ;;  %4332 = vmatpush1.bf16.msra.mxu1 %v3706_v4 }
 0x600   :  { %v3938_v23 = vpop.permute.xlu1 %3937  ;;  %4333 = vmatprep.subr.bf16.mxu1 %v3771_v37  ;;  %6110 = vmatprep.mubr.msk.bf16.mxu1 %vm4161_vm12, %v11074_v33 }
 0x601   :  { %v11496_v11 = vpop.permute.xlu0 %3939  ;;  %v3962_v51 = vsel %vm121_vm1, %v11412_v55, %v3938_v23 }
 0x602   :  { %3889 = vrot.lane.b32.xlu1 %v11107_v50, %s7593_s2  ;;  %v3963_v39 = vsel %vm121_vm1, %v3938_v23, %v11496_v11 }
 0x603   :  { %3953 = vrot.lane.b32.xlu0 %v11107_v50, %s7584_s9  ;;  %4334 = vmatpush1.bf16.msra.mxu1 %v3770_v1 }
 0x604   :  { %v4002_v47 = vpop.permute.xlu1 %4001  ;;  %4335 = vmatprep.subr.bf16.mxu1 %v3835_v40 }
 0x605   :  { %v11506_v42 = vpop.permute.xlu0 %4003  ;;  %v4026_v15 = vsel %vm152_vm4, %v11422_v32, %v4002_v47 }
 0x606   :  { %4017 = vrot.lane.b32.xlu1 %v11107_v50, %s7586_s11  ;;  %v4027_v54 = vsel %vm152_vm4, %v4002_v47, %v11506_v42 }
 0x607   :  { %4081 = vrot.lane.b32.xlu0 %v11107_v50, %s7585_s10  ;;  %4336 = vmatpush1.bf16.msra.mxu1 %v3834_v14 }
 0x608   :  { %v4066_v3 = vpop.permute.xlu1 %4065  ;;  %4337 = vmatprep.subr.bf16.mxu1 %v3899_v43 }
 0x609   :  { %v11522_v8 = vpop.permute.xlu0 %4067  ;;  %v4090_v55 = vsel %vm183_vm3, %v11432_v16, %v4066_v3 }
 0x60a   :  { %4125 = vperm.xlu1 %6511, %v4119_v27   ;;  %v4091_v34 = vsel %vm183_vm3, %v4066_v3, %v11522_v8 }
 0x60b   :  { %4130 = vperm.xlu0 %6510, %v4120_v58   ;;  %4338 = vmatpush1.bf16.msra.mxu1 %v3898_v9 }
 0x60c   :  { %4339 = vmatprep.subr.bf16.mxu1 %v3963_v39  ;;  %v3622_v56 = vpop.permute.xlu1 %3621 }
 0x60d   :  { %v11534_v20 = vpop.permute.xlu0 %3623  ;;  %v3644_v16 = vsel %vm59_vm0, %v11442_v22, %v3622_v56 }
 0x60e   :  { %4135 = vperm.xlu1 %6511, %v4121_v38   ;;  %v3645_v32 = vsel %vm59_vm0, %v3622_v56, %v11534_v20 }
 0x60f   :  { %4140 = vperm.xlu0 %6510, %v4122_v7   ;;  %4340 = vmatpush1.bf16.msra.mxu1 %v3962_v51 }
 0x610   :  { %4341 = vmatprep.subr.bf16.mxu1 %v4027_v54  ;;  %v3686_v19 = vpop.permute.xlu1 %3685 }
 0x611   :  { %v11540_v53 = vpop.permute.xlu0 %3687  ;;  %v3708_v2 = vsel %vm90_vm2, %v11452_v24, %v3686_v19 }
 0x613   :  { %4342 = vmatpush1.bf16.msra.mxu1 %v4026_v15 }
 0x614   :  { %4343 = vmatprep.subr.bf16.mxu1 %v4091_v34  ;;  %v3750_v52 = vpop.permute.xlu1 %3749 }
 0x615   :  { %v11546_v35 = vpop.permute.xlu0 %3751  ;;  %v3772_v63 = vsel %vm3763_vm13, %v11461_v10, %v3750_v52 }
 0x616   :  { %v3773_v17 = vsel %vm3763_vm13, %v3750_v52, %v11546_v35 }
 0x617   :  { %4344 = vmatpush1.bf16.msra.mxu1 %v4090_v55 }
 0x618   :  { %v3814_v31 = vpop.permute.xlu1 %3813  ;;  %4380 = vmatprep.subr.bf16.mxu1 %v11066_v0  ;;  %v3709_v0 = vsel %vm90_vm2, %v3686_v19, %v11540_v53 }
 0x619   :  { %v11551_v18 = vpop.permute.xlu0 %3815  ;;  %v3836_v41 = vsel %vm3827_vm14, %v11471_v30, %v3814_v31 }
 0x61a   :  { %4360 = vmatmul.mubr.bf16.vlgmr.msra.gmra.mrb[104].mxu1 %v11258_v48  ;;  %v3837_v25 = vsel %vm3827_vm14, %v3814_v31, %v11551_v18 }
 0x61b   :  { %4381 = vmatpush1.bf16.msra.mxu1 %v11064_v12  ;;  %6111 = vmatprep.mubr.msk.bf16.mxu1 %vm4161_vm12, %v11268_v13 }
 0x61c   :  { %v3878_v5 = vpop.permute.xlu1 %3877  ;;  %4382 = vmatprep.subr.bf16.mxu1 %v3645_v32 }
 0x61d   :  { %v11559_v49 = vpop.permute.xlu0 %3879  ;;  %v3900_v10 = vsel %vm3891_vm15, %v11483_v36, %v3878_v5 }
 0x61e   :  { %v3901_v28 = vsel %vm3891_vm15, %v3878_v5, %v11559_v49 }
 0x61f   :  { %4383 = vmatpush1.bf16.msra.mxu1 %v3644_v16 }
 0x620   :  { %v3942_v60 = vpop.permute.xlu1 %3941  ;;  %4384 = vmatprep.subr.bf16.mxu1 %v3709_v0 }
 0x621   :  { %v11565_v12 = vpop.permute.xlu0 %3943  ;;  %v3964_v30 = vsel %vm121_vm1, %v11496_v11, %v3942_v60 }
 0x622   :  { %4370 = vmatmul.mubr.bf16.gmra.mrb[108].mxu1 %v11289_v57  ;;  %v3965_v4 = vsel %vm121_vm1, %v3942_v60, %v11565_v12 }
 0x623   :  { %4385 = vmatpush1.bf16.msra.mxu1 %v3708_v2  ;;  %6112 = vmatprep.mubr.msk.bf16.mxu1 %vm4161_vm12, %v11074_v33 }
 0x624   :  { %v4006_v22 = vpop.permute.xlu1 %4005  ;;  %4386 = vmatprep.subr.bf16.mxu1 %v3773_v17 }
 0x625   :  { %v11574_v26 = vpop.permute.xlu0 %4007  ;;  %v4028_v36 = vsel %vm152_vm4, %v11506_v42, %v4006_v22 }
 0x626   :  { %v4029_v1 = vsel %vm152_vm4, %v4006_v22, %v11574_v26 }
 0x627   :  { %4387 = vmatpush1.bf16.msra.mxu1 %v3772_v63 }
 0x628   :  { %v4070_v62 = vpop.permute.xlu1 %4069  ;;  %4388 = vmatprep.subr.bf16.mxu1 %v3837_v25 }
 0x629   :  { %v11580_v24 = vpop.permute.xlu0 %4071  ;;  %v4092_v11 = vsel %vm183_vm3, %v11522_v8, %v4070_v62 }
 0x62a   :  { %v4093_v14 = vsel %vm183_vm3, %v4070_v62, %v11580_v24 }
 0x62b   :  { %4389 = vmatpush1.bf16.msra.mxu1 %v3836_v41 }
 0x62c   :  { %4390 = vmatprep.subr.bf16.mxu1 %v3901_v28  ;;  %v3626_v61 = vpop.permute.xlu1 %3625 }
 0x62d   :  { %v11586_v59 = vpop.permute.xlu0 %3627  ;;  %v3646_v8 = vsel %vm59_vm0, %v11534_v20, %v3626_v61 }
 0x62e   :  { %v3647_v42 = vsel %vm59_vm0, %v3626_v61, %v11586_v59 }
 0x62f   :  { %4391 = vmatpush1.bf16.msra.mxu1 %v3900_v10 }
 0x630   :  { %4392 = vmatprep.subr.bf16.mxu1 %v3965_v4  ;;  %v3690_v37 = vpop.permute.xlu1 %3689 }
 0x631   :  { %v11592_v23 = vpop.permute.xlu0 %3691  ;;  %v3710_v56 = vsel %vm90_vm2, %v11540_v53, %v3690_v37 }
 0x633   :  { %4393 = vmatpush1.bf16.msra.mxu1 %v3964_v30 }
 0x634   :  { %4394 = vmatprep.subr.bf16.mxu1 %v4029_v1  ;;  %v3754_v40 = vpop.permute.xlu1 %3753 }
 0x635   :  { %v11598_v47 = vpop.permute.xlu0 %3755  ;;  %v3774_v20 = vsel %vm3763_vm13, %v11546_v35, %v3754_v40 }
 0x636   :  { %v3775_v7 = vsel %vm3763_vm13, %v3754_v40, %v11598_v47 }
 0x637   :  { %4395 = vmatpush1.bf16.msra.mxu1 %v4028_v36 }
 0x638   :  { %4396 = vmatprep.subr.bf16.mxu1 %v4093_v14  ;;  %v3818_v43 = vpop.permute.xlu1 %3817 }
 0x639   :  { %v11604_v27 = vpop.permute.xlu0 %3819  ;;  %v3838_v53 = vsel %vm3827_vm14, %v11551_v18, %v3818_v43 }
 0x63a   :  { %v3839_v51 = vsel %vm3827_vm14, %v3818_v43, %v11604_v27 }
 0x63b   :  { %4397 = vmatpush1.bf16.msra.mxu1 %v4092_v11 }
 0x63c   :  { %v3882_v3 = vpop.permute.xlu1 %3881  ;;  %4433 = vmatprep.subr.bf16.mxu1 %v11084_v44  ;;  %v3711_v44 = vsel %vm90_vm2, %v3690_v37, %v11592_v23 }
 0x63d   :  { %v11609_v58 = vpop.permute.xlu0 %3883  ;;  %v3902_v35 = vsel %vm3891_vm15, %v11559_v49, %v3882_v3 }
 0x63e   :  { %4413 = vmatmul.mubr.bf16.vlgmr.msra.gmra.mrb[112].mxu1 %v11258_v48  ;;  %v3903_v15 = vsel %vm3891_vm15, %v3882_v3, %v11609_v58 }
 0x63f   :  { %4434 = vmatpush1.bf16.msra.mxu1 %v11082_v45  ;;  %6113 = vmatprep.mubr.msk.bf16.mxu1 %vm4161_vm12, %v11268_v13 }
 0x640   :  { %v3946_v9 = vpop.permute.xlu1 %3945  ;;  %4435 = vmatprep.subr.bf16.mxu1 %v3647_v42 }
 0x641   :  { %v11617_v39 = vpop.permute.xlu0 %3947  ;;  %v3966_v31 = vsel %vm121_vm1, %v11565_v12, %v3946_v9 }
 0x642   :  { %v3967_v55 = vsel %vm121_vm1, %v3946_v9, %v11617_v39 }
 0x643   :  { %4436 = vmatpush1.bf16.msra.mxu1 %v3646_v8 }
 0x644   :  { %4437 = vmatprep.subr.bf16.mxu1 %v3711_v44  ;;  %v4010_v38 = vpop.permute.xlu1 %4009 }
 0x645   :  { %v11623_v45 = vpop.permute.xlu0 %4011  ;;  %v4030_v16 = vsel %vm152_vm4, %v11574_v26, %v4010_v38 }
 0x646   :  { %4423 = vmatmul.mubr.bf16.gmra.mrb[116].mxu1 %v11289_v57  ;;  %v4031_v18 = vsel %vm152_vm4, %v4010_v38, %v11623_v45 }
 0x647   :  { %4438 = vmatpush1.bf16.msra.mxu1 %v3710_v56  ;;  %6114 = vmatprep.mubr.msk.bf16.mxu1 %vm4161_vm12, %v11074_v33  ;;  %v7581_v56 = vld [vmem:[%s13195_s4 + $0x4] ss:$8 sps:$4 sm:$0xff]  }
 0x648   :  { %4439 = vmatprep.subr.bf16.mxu1 %v3775_v7  ;;  %v4074_v54 = vpop.permute.xlu1 %4073 }
 0x649   :  { %v11636_v19 = vpop.permute.xlu0 %4075  ;;  %v4094_v0 = vsel %vm183_vm3, %v11580_v24, %v4074_v54 }
 0x64a   :  { %v4095_v49 = vsel %vm183_vm3, %v4074_v54, %v11636_v19 }
 0x64b   :  { %4440 = vmatpush1.bf16.msra.mxu1 %v3774_v20 }
 0x64c   :  { %4441 = vmatprep.subr.bf16.mxu1 %v3839_v51  ;;  %v3630_v34 = vpop.permute.xlu1 %3629 }
 0x64d   :  { %v11642_v52 = vpop.permute.xlu0 %3631  ;;  %v3648_v26 = vsel %vm59_vm0, %v11586_v59, %v3630_v34 }
 0x64e   :  { %v3649_v2 = vsel %vm59_vm0, %v3630_v34, %v11642_v52 }
 0x64f   :  { %4442 = vmatpush1.bf16.msra.mxu1 %v3838_v53 }
 0x650   :  { %4443 = vmatprep.subr.bf16.mxu1 %v3903_v15  ;;  %v3694_v32 = vpop.permute.xlu1 %3693 }
 0x651   :  { %v11652_v5 = vpop.permute.xlu0 %3695 }
 0x653   :  { %4444 = vmatpush1.bf16.msra.mxu1 %v3902_v35 }
 0x654   :  { %4445 = vmatprep.subr.bf16.mxu1 %v3967_v55  ;;  %v3758_v60 = vpop.permute.xlu1 %3757 }
 0x655   :  { %v11660_v12 = vpop.permute.xlu0 %3759  ;;  %v3776_v24 = vsel %vm3763_vm13, %v11598_v47, %v3758_v60 }
 0x656   :  { %v3777_v62 = vsel %vm3763_vm13, %v3758_v60, %v11660_v12 }
 0x657   :  { %4446 = vmatpush1.bf16.msra.mxu1 %v3966_v31 }
 0x658   :  { %4447 = vmatprep.subr.bf16.mxu1 %v4031_v18  ;;  %v3822_v17 = vpop.permute.xlu1 %3821 }
 0x659   :  { %v11669_v22 = vpop.permute.xlu0 %3823  ;;  %v3840_v59 = vsel %vm3827_vm14, %v11604_v27, %v3822_v17 }
 0x65a   :  { %v3841_v41 = vsel %vm3827_vm14, %v3822_v17, %v11669_v22 }
 0x65b   :  { %4448 = vmatpush1.bf16.msra.mxu1 %v4030_v16 }
 0x65c   :  { %4449 = vmatprep.subr.bf16.mxu1 %v4095_v49  ;;  %v3886_v63 = vpop.permute.xlu1 %3885 }
 0x65d   :  { %v11677_v25 = vpop.permute.xlu0 %3887 }
 0x65e   :  { %v3905_v10 = vsel %vm3891_vm15, %v3886_v63, %v11677_v25 }
 0x65f   :  { %4450 = vmatpush1.bf16.msra.mxu1 %v4094_v0 }
 0x660   :  { %4486 = vmatprep.subr.bf16.mxu1 %v11095_v46  ;;  %v3713_v46 = vsel %vm90_vm2, %v3694_v32, %v11652_v5  ;;  %v3950_v28 = vpop.permute.xlu1 %3949 }
 0x661   :  { %v11688_v61 = vpop.permute.xlu0 %3951  ;;  %v3968_v30 = vsel %vm121_vm1, %v11617_v39, %v3950_v28 }
 0x662   :  { %4466 = vmatmul.mubr.bf16.vlgmr.msra.gmra.mrb[120].mxu1 %v11258_v48 }
 0x663   :  { %4487 = vmatpush1.bf16.msra.mxu1 %v11093_v21  ;;  %6115 = vmatprep.mubr.msk.bf16.mxu1 %vm4161_vm12, %v11268_v13  ;;  %v3712_v21 = vsel %vm90_vm2, %v11592_v23, %v3694_v32  ;;  %v3969_v23 = vsel %vm121_vm1, %v3950_v28, %v11688_v61 }
 0x664   :  { %4488 = vmatprep.subr.bf16.mxu1 %v3649_v2  ;;  %v4014_v4 = vpop.permute.xlu1 %4013 }
 0x665   :  { %v4016_v37 = vpop.permute.xlu0 %4015  ;;  %v4032_v36 = vsel %vm152_vm4, %v11623_v45, %v4014_v4 }
 0x666   :  { %v4033_v1 = vsel %vm152_vm4, %v4014_v4, %v4016_v37 }
 0x667   :  { %4489 = vmatpush1.bf16.msra.mxu1 %v3648_v26 }
 0x668   :  { %4490 = vmatprep.subr.bf16.mxu1 %v3713_v46  ;;  %v4078_v40 = vpop.permute.xlu1 %4077 }
 0x669   :  { %v4080_v47 = vpop.permute.xlu0 %4079  ;;  %v4096_v27 = vsel %vm183_vm3, %v11636_v19, %v4078_v40 }
 0x66a   :  { %4476 = vmatmul.mubr.bf16.gmra.mrb[124].mxu1 %v11289_v57  ;;  %v4097_v14 = vsel %vm183_vm3, %v4078_v40, %v4080_v47 }
 0x66b   :  { %4491 = vmatpush1.bf16.msra.mxu1 %v3712_v21  ;;  %6116 = vmatprep.mubr.msk.bf16.mxu1 %vm4161_vm12, %v11074_v33  ;;  %v3904_v33 = vsel %vm3891_vm15, %v11609_v58, %v3886_v63 }
 0x66c   :  { %4492 = vmatprep.subr.bf16.mxu1 %v3777_v62  ;;  %v3634_v42 = vpop.permute.xlu1 %3633 }
 0x66d   :  { %v3650_v39 = vsel %vm59_vm0, %v11642_v52, %v3634_v42  ;;  %v3698_v44 = vpop.permute.xlu0 %3697 }
 0x66f   :  { %4493 = vmatpush1.bf16.msra.mxu1 %v3776_v24 }
 0x670   :  { %4494 = vmatprep.subr.bf16.mxu1 %v3841_v41  ;;  %v3762_v45 = vpop.permute.xlu1 %3761 }
 0x671   :  { %v3826_v7 = vpop.permute.xlu0 %3825  ;;  %v3778_v20 = vsel %vm3763_vm13, %v11660_v12, %v3762_v45 }
 0x672   :  { %v3842_v51 = vsel %vm3827_vm14, %v11669_v22, %v3826_v7 }
 0x673   :  { %4495 = vmatpush1.bf16.msra.mxu1 %v3840_v59 }
 0x674   :  { %4496 = vmatprep.subr.bf16.mxu1 %v3905_v10  ;;  %v3890_v54 = vpop.permute.xlu1 %3889 }
 0x675   :  { %v3954_v19 = vpop.permute.xlu0 %3953  ;;  %v3906_v53 = vsel %vm3891_vm15, %v11677_v25, %v3890_v54 }
 0x676   :  { %v3970_v34 = vsel %vm121_vm1, %v11688_v61, %v3954_v19  ;;  %vm5601_vm1 = vcmask 1046528  }
 0x677   :  { %4497 = vmatpush1.bf16.msra.mxu1 %v3904_v33 }
 0x678   :  { %4498 = vmatprep.subr.bf16.mxu1 %v3969_v23  ;;  %v4018_v15 = vpop.permute.xlu1 %4017 }
 0x679   :  { %v4082_v52 = vpop.permute.xlu0 %4081  ;;  %v4034_v55 = vsel %vm152_vm4, %v4016_v37, %v4018_v15 }
 0x67a   :  { %v4098_v16 = vsel %vm183_vm3, %v4080_v47, %v4082_v52 }
 0x67b   :  { %4499 = vmatpush1.bf16.msra.mxu1 %v3968_v30 }
 0x67c   :  { %4500 = vmatprep.subr.bf16.mxu1 %v4033_v1 }
 0x67f   :  { %4501 = vmatpush1.bf16.msra.mxu1 %v4032_v36 }
 0x680   :  { %4502 = vmatprep.subr.bf16.mxu1 %v4097_v14 }
 0x681   :  { %v4202_v43 = vpop.f32.mrb[80].mxu1 }
 0x682   :  { %v4204_v11 = vpop.f32.mrb[81].mxu1 }
 0x683   :  { %v4206_v3 = vpop.f32.mrb[82].mxu1  ;;  %4503 = vmatpush1.bf16.msra.mxu1 %v4096_v27 }
 0x684   :  { %v4208_v58 = vpop.f32.mrb[83].mxu1  ;;  %4539 = vmatprep.subr.bf16.mxu1 %v11107_v50 }
 0x686   :  { %4519 = vmatmul.mubr.bf16.vlgmr.msra.gmra.mrb[128].mxu1 %v11258_v48 }
 0x687   :  { %4540 = vmatpush1.bf16.msra.mxu1 %v11105_v6  ;;  %6117 = vmatprep.mubr.msk.bf16.mxu1 %vm4161_vm12, %v11268_v13  ;;  %v3714_v6 = vsel %vm90_vm2, %v11652_v5, %v3698_v44  ;;  %vm5552_vm2 = vcmask 629760  }
 0x688   :  { %4541 = vmatprep.subr.bf16.mxu1 %v3634_v42 }
 0x689   :  { %v11711_v9 = vpop.f32.mrb[84].mxu1  ;;  %v11736_v35 = vpop.permute.xlu1 %4125 }
 0x68a   :  { %v11715_v8 = vpop.f32.mrb[85].mxu1  ;;  %v11739_v31 = vpop.permute.xlu0 %4130  ;;  %v11742_v18 = vadd.f32 %v4204_v11, %v11736_v35  ;;  %v11755_v2 = vadd.f32 %v4202_v43, %v11736_v35 }
 0x68b   :  { %4542 = vmatpush1.bf16.msra.mxu1 %v3650_v39  ;;  %v11717_v38 = vpop.f32.mrb[86].mxu1  ;;  %v11745_v5 = vadd.f32 %v4208_v58, %v11739_v31  ;;  %v11758_v17 = vadd.f32 %v4206_v3, %v11739_v31 }
 0x68c   :  { %4543 = vmatprep.subr.bf16.mxu1 %v3698_v44  ;;  %v11719_v50 = vpop.f32.mrb[87].mxu1  ;;  %v13530_v22 = vmax.f32 %v11742_v18, 0.0  ;;  %v13535_v33 = vmax.f32 %v11755_v2, 0.0 }
 0x68d   :  { %v11765_v63 = vpop.permute.xlu1 %4135  ;;  %v4609_v62 = vmax.f32 %v11745_v5, 0.0  ;;  %v13536_v4 = vmax.f32 %v11758_v17, 0.0 }
 0x68e   :  { %4529 = vmatmul.mubr.bf16.gmra.mrb[132].mxu1 %v11289_v57  ;;  %v11772_v41 = vpop.permute.xlu0 %4140  ;;  %v11792_v37 = vadd.f32 %v11715_v8, %v11765_v63  ;;  %v11815_v14 = vadd.f32 %v11711_v9, %v11765_v63 }
 0x68f   :  { %4544 = vmatpush1.bf16.msra.mxu1 %v3714_v6  ;;  %6118 = vmatprep.mubr.msk.bf16.mxu1 %vm4161_vm12, %v7581_v56  ;;  %v11801_v30 = vadd.f32 %v11719_v50, %v11772_v41  ;;  %v7082_v36 = vpack.i.bf16 %v13536_v4, %v13535_v33  ;;  %v11819_v43 = vadd.f32 %v11717_v38, %v11772_v41 }
 0x690   :  { %4545 = vmatprep.subr.bf16.mxu1 %v3762_v45  ;;  %v13534_v27 = vmax.f32 %v11792_v37, 0.0  ;;  %v13527_v6 = vmax.f32 %v11815_v14, 0.0 }
 0x691   :  { %v13526_v39 = vmax.f32 %v11801_v30, 0.0  ;;  %v13528_v45 = vmax.f32 %v11819_v43, 0.0 }
 0x693   :  { %4546 = vmatpush1.bf16.msra.mxu1 %v3778_v20 }
 0x694   :  { %4547 = vmatprep.subr.bf16.mxu1 %v3826_v7 }
 0x697   :  { %4548 = vmatpush1.bf16.msra.mxu1 %v3842_v51 }
 0x698   :  { %4549 = vmatprep.subr.bf16.mxu1 %v3890_v54 }
 0x69b   :  { %4550 = vmatpush1.bf16.msra.mxu1 %v3906_v53 }
 0x69c   :  { %4551 = vmatprep.subr.bf16.mxu1 %v3954_v19 }
 0x69f   :  { %4552 = vmatpush1.bf16.msra.mxu1 %v3970_v34 }
 0x6a0   :  { %4553 = vmatprep.subr.bf16.mxu1 %v4018_v15 }
 0x6a3   :  { %4554 = vmatpush1.bf16.msra.mxu1 %v4034_v55 }
 0x6a4   :  { %4555 = vmatprep.subr.bf16.mxu1 %v4082_v52 }
 0x6a5   :  { %v4255_v32 = vpop.f32.mrb[88].mxu1 }
 0x6a6   :  { %v11749_v49 = vadd.f32 %v4255_v32, %v11736_v35  ;;  %v4257_v0 = vpop.f32.mrb[89].mxu1 }
 0x6a7   :  { %v11752_v60 = vadd.f32 %v4257_v0, %v11736_v35  ;;  %v4259_v12 = vpop.f32.mrb[90].mxu1  ;;  %4556 = vmatpush1.bf16.msra.mxu1 %v4098_v16 }
 0x6a8   :  { %v13529_v26 = vmax.f32 %v11749_v49, 0.0  ;;  %v11763_v46 = vadd.f32 %v4259_v12, %v11739_v31  ;;  %v4261_v21 = vpop.f32.mrb[91].mxu1 }
 0x6a9   :  { %v13520_v25 = vmax.f32 %v11752_v60, 0.0  ;;  %v11770_v24 = vadd.f32 %v4261_v21, %v11739_v31 }
 0x6aa   :  { %v7072_v28 = vpack.i.bf16 %v13529_v26, %v13530_v22  ;;  %v13537_v61 = vmax.f32 %v11763_v46, 0.0  ;;  %4572 = vmatmul.mubr.bf16.vlgmr.msra.gmra.mrb[136].mxu1 %v11258_v48 }
 0x6ab   :  { %v7077_v59 = vpack.i.bf16 %v4609_v62, %v13520_v25  ;;  %v13518_v10 = vmax.f32 %v11770_v24, 0.0  ;;  %6119 = vmatprep.mubr.msk.bf16.mxu1 %vm4161_vm12, %v11268_v13 }
 0x6ac   :  { %7073 = vrot.lane.b32.xlu1 %v7072_v28, %s7583_s29 }
 0x6ad   :  { %v7087_v48 = vpack.i.bf16 %v13518_v10, %v13537_v61  ;;  %v4265_v23 = vpop.f32.mrb[92].mxu1  ;;  %7078 = vrot.lane.b32.xlu0 %v7077_v59, %s7583_s29 }
 0x6ae   :  { %v11804_v13 = vadd.f32 %v4265_v23, %v11765_v63  ;;  %v4267_v1 = vpop.f32.mrb[93].mxu1 }
 0x6af   :  { %v11807_v40 = vadd.f32 %v4267_v1, %v11765_v63  ;;  %v4269_v47 = vpop.f32.mrb[94].mxu1 }
 0x6b0   :  { %v13533_v11 = vmax.f32 %v11804_v13, 0.0  ;;  %v11824_v3 = vadd.f32 %v4269_v47, %v11772_v41  ;;  %v4271_v58 = vpop.f32.mrb[95].mxu1  ;;  %7088 = vrot.lane.b32.xlu1 %v7087_v48, %s7583_s29 }
 0x6b1   :  { %v13516_v42 = vmax.f32 %v11807_v40, 0.0  ;;  %v11830_v9 = vadd.f32 %v4271_v58, %v11772_v41  ;;  %7083 = vrot.lane.b32.xlu0 %v7082_v36, %s7583_s29 }
 0x6b2   :  { %v7092_v8 = vpack.i.bf16 %v13533_v11, %v13534_v27  ;;  %v13525_v44 = vmax.f32 %v11824_v3, 0.0  ;;  %4582 = vmatmul.mubr.bf16.gmra.mrb[140].mxu1 %v11289_v57  ;;  %v7107_v57 = vpack.i.bf16 %v13528_v45, %v13527_v6 }
 0x6b3   :  { %v7097_v38 = vpack.i.bf16 %v13526_v39, %v13516_v42  ;;  %v13514_v50 = vmax.f32 %v11830_v9, 0.0 }
 0x6b4   :  { %7093 = vrot.lane.b32.xlu1 %v7092_v8, %s7583_s29 }
 0x6b5   :  { %v7102_v56 = vpack.i.bf16 %v13514_v50, %v13525_v44  ;;  %7098 = vrot.lane.b32.xlu0 %v7097_v38, %s7583_s29 }
 0x6b8   :  { %7103 = vrot.lane.b32.xlu1 %v7102_v56, %s7583_s29 }
 0x6b9   :  { %7108 = vrot.lane.b32.xlu0 %v7107_v57, %s7583_s29 }
 0x6c9   :  { %v4308_v7 = vpop.f32.mrb[96].mxu1 }
 0x6ca   :  { %v11859_v20 = vadd.f32 %v4308_v7, %v11736_v35  ;;  %v4310_v51 = vpop.f32.mrb[97].mxu1 }
 0x6cb   :  { %v11862_v54 = vadd.f32 %v4310_v51, %v11736_v35  ;;  %v4312_v19 = vpop.f32.mrb[98].mxu1 }
 0x6cc   :  { %v13519_v53 = vmax.f32 %v11859_v20, 0.0  ;;  %v11866_v15 = vadd.f32 %v4312_v19, %v11739_v31  ;;  %v4314_v34 = vpop.f32.mrb[99].mxu1 }
 0x6cd   :  { %v13506_v52 = vmax.f32 %v11862_v54, 0.0  ;;  %v11870_v55 = vadd.f32 %v4314_v34, %v11739_v31 }
 0x6ce   :  { %v13517_v32 = vmax.f32 %v11866_v15, 0.0 }
 0x6cf   :  { %v7112_v16 = vpack.i.bf16 %v13506_v52, %v13519_v53  ;;  %v13503_v0 = vmax.f32 %v11870_v55, 0.0 }
 0x6d1   :  { %v7117_v12 = vpack.i.bf16 %v13503_v0, %v13517_v32  ;;  %v4318_v21 = vpop.f32.mrb[100].mxu1  ;;  %7113 = vrot.lane.b32.xlu1 %v7112_v16, %s7583_s29  ;;  %v7568_v0 = vld [vmem:[%s13197_s6] sm:$0xff]  }
 0x6d2   :  { %v11884_v28 = vadd.f32 %v4318_v21, %v11765_v63  ;;  %v4320_v59 = vpop.f32.mrb[101].mxu1  ;;  %5608 = vmatpush1.bf16.msra.mxu0 %v7568_v0 }
 0x6d3   :  { %v11887_v48 = vadd.f32 %v4320_v59, %v11765_v63  ;;  %v4322_v23 = vpop.f32.mrb[102].mxu1  ;;  %7118 = vrot.lane.b32.xlu0 %v7117_v12, %s7583_s29  ;;  %5609 = vmatprep.subr.bf16.mxu0 %v14227_v29 }
 0x6d4   :  { %v13515_v1 = vmax.f32 %v11884_v28, 0.0  ;;  %v11892_v47 = vadd.f32 %v4322_v23, %v11772_v41  ;;  %v4324_v36 = vpop.f32.mrb[103].mxu1 }
 0x6d5   :  { %v13502_v58 = vmax.f32 %v11887_v48, 0.0  ;;  %v11896_v8 = vadd.f32 %v4324_v36, %v11772_v41 }
 0x6d6   :  { %v13509_v38 = vmax.f32 %v11892_v47, 0.0 }
 0x6d7   :  { %v7122_v56 = vpack.i.bf16 %v13502_v58, %v13515_v1  ;;  %v13501_v57 = vmax.f32 %v11896_v8, 0.0 }
 0x6d9   :  { %v7127_v7 = vpack.i.bf16 %v13501_v57, %v13509_v38  ;;  %7123 = vrot.lane.b32.xlu1 %v7122_v56, %s7583_s29 }
 0x6db   :  { %7128 = vrot.lane.b32.xlu0 %v7127_v7, %s7583_s29 }
 0x6ed   :  { %v4361_v51 = vpop.f32.mrb[104].mxu1 }
 0x6ee   :  { %v11911_v19 = vadd.f32 %v4361_v51, %v11736_v35  ;;  %v4363_v34 = vpop.f32.mrb[105].mxu1 }
 0x6ef   :  { %v11914_v16 = vadd.f32 %v4363_v34, %v11736_v35  ;;  %v4365_v12 = vpop.f32.mrb[106].mxu1 }
 0x6f0   :  { %v13505_v21 = vmax.f32 %v11911_v19, 0.0  ;;  %v11918_v59 = vadd.f32 %v4365_v12, %v11739_v31  ;;  %v4367_v23 = vpop.f32.mrb[107].mxu1 }
 0x6f1   :  { %v13504_v36 = vmax.f32 %v11914_v16, 0.0  ;;  %v11922_v56 = vadd.f32 %v4367_v23, %v11739_v31 }
 0x6f2   :  { %v13508_v7 = vmax.f32 %v11918_v59, 0.0 }
 0x6f3   :  { %v7132_v51 = vpack.i.bf16 %v13504_v36, %v13505_v21  ;;  %v13507_v34 = vmax.f32 %v11922_v56, 0.0 }
 0x6f5   :  { %v7137_v12 = vpack.i.bf16 %v13507_v34, %v13508_v7  ;;  %v4371_v57 = vpop.f32.mrb[108].mxu1  ;;  %7133 = vrot.lane.b32.xlu1 %v7132_v51, %s7583_s29 }
 0x6f6   :  { %v11936_v23 = vadd.f32 %v4371_v57, %v11765_v63  ;;  %v4373_v58 = vpop.f32.mrb[109].mxu1 }
 0x6f7   :  { %v11942_v36 = vadd.f32 %v4373_v58, %v11765_v63  ;;  %v4375_v21 = vpop.f32.mrb[110].mxu1  ;;  %7138 = vrot.lane.b32.xlu0 %v7137_v12, %s7583_s29 }
 0x6f8   :  { %v13513_v52 = vmax.f32 %v11936_v23, 0.0  ;;  %v11947_v34 = vadd.f32 %v4375_v21, %v11772_v41  ;;  %v4377_v51 = vpop.f32.mrb[111].mxu1  ;;  %v7569_v21 = vld [vmem:[%s13197_s6 + $0x8] sm:$0xff]  }
 0x6f9   :  { %v13510_v57 = vmax.f32 %v11942_v36, 0.0  ;;  %v11951_v7 = vadd.f32 %v4377_v51, %v11772_v41  ;;  %5610 = vmatpush1.bf16.msra.mxu0 %v7569_v21  ;;  %v7570_v51 = vld [vmem:[%s13197_s6 + $0x10] sm:$0xff]  }
 0x6fa   :  { %v13512_v58 = vmax.f32 %v11947_v34, 0.0  ;;  %5611 = vmatprep.subr.bf16.mxu0 %v14227_v29 }
 0x6fb   :  { %v7142_v12 = vpack.i.bf16 %v13510_v57, %v13513_v52  ;;  %v13511_v38 = vmax.f32 %v11951_v7, 0.0 }
 0x6fd   :  { %v7147_v0 = vpack.i.bf16 %v13511_v38, %v13512_v58  ;;  %7143 = vrot.lane.b32.xlu1 %v7142_v12, %s7583_s29  ;;  %5612 = vmatpush1.bf16.msra.mxu0 %v7570_v51  ;;  %v7571_v12 = vld [vmem:[%s13197_s6 + $0x18] sm:$0xff]   ;;  %v7573_v51 = vld [vmem:[%s13197_s6 + $0x28] sm:$0xff]  }
 0x6fe   :  { %5613 = vmatprep.subr.bf16.mxu0 %v14227_v29 }
 0x6ff   :  { %7148 = vrot.lane.b32.xlu0 %v7147_v0, %s7583_s29  ;;  %v7572_v0 = vld [vmem:[%s13197_s6 + $0x20] sm:$0xff]  }
 0x701   :  { %5614 = vmatpush1.bf16.msra.mxu0 %v7571_v12 }
 0x702   :  { %5615 = vmatprep.subr.bf16.mxu0 %v14227_v29 }
 0x705   :  { %5616 = vmatpush1.bf16.msra.mxu0 %v7572_v0  ;;  %v7574_v0 = vld [vmem:[%s13197_s6 + $0x30] sm:$0xff]  }
 0x706   :  { %5617 = vmatprep.subr.bf16.mxu0 %v14227_v29 }
 0x709   :  { %5618 = vmatpush1.bf16.msra.mxu0 %v7573_v51 }
 0x70a   :  { %5619 = vmatprep.subr.bf16.mxu0 %v14227_v29 }
 0x70d   :  { %5620 = vmatpush1.bf16.msra.mxu0 %v7574_v0  ;;  %v7576_v0 = vld [vmem:[%s13197_s6 + $0x40] sm:$0xff]  }
 0x70e   :  { %5621 = vmatprep.subr.bf16.mxu0 %v14227_v29 }
 0x711   :  { %v4414_v21 = vpop.f32.mrb[112].mxu1 }
 0x712   :  { %v11986_v57 = vadd.f32 %v4414_v21, %v11736_v35  ;;  %v4416_v38 = vpop.f32.mrb[113].mxu1 }
 0x713   :  { %v11989_v12 = vadd.f32 %v4416_v38, %v11736_v35  ;;  %v4418_v58 = vpop.f32.mrb[114].mxu1 }
 0x714   :  { %v13524_v52 = vmax.f32 %v11986_v57, 0.0  ;;  %v11996_v50 = vadd.f32 %v4418_v58, %v11739_v31  ;;  %v4420_v1 = vpop.f32.mrb[115].mxu1 }
 0x715   :  { %14244 = vst [vmem:[#allocation68_spill] sm:$0xff] %v11989_v12  ;;  %v13521_v21 = vmax.f32 %v11989_v12, 0.0  ;;  %v12001_v42 = vadd.f32 %v4420_v1, %v11739_v31  ;;  %v7575_v1 = vld [vmem:[%s13197_s6 + $0x38] sm:$0xff]  }
 0x716   :  { %v13523_v38 = vmax.f32 %v11996_v50, 0.0  ;;  %5622 = vmatpush1.bf16.msra.mxu0 %v7575_v1  ;;  %v7594_v1 = vmov 65535  }
 0x717   :  { %14245 = vst [vmem:[#allocation20_spill] sm:$0xff] %v12001_v42  ;;  %v7152_v51 = vpack.i.bf16 %v13521_v21, %v13524_v52  ;;  %v13522_v32 = vmax.f32 %v12001_v42, 0.0  ;;  %5623 = vmatprep.subr.bf16.mxu0 %v14227_v29  ;;  %v5602_v39 = vsel %vm3112_vm10, 4294967295, %v7594_v1  ;;  %v14249_v42 = vmax.f32 %v11758_v17, 0.0 }
 0x719   :  { %v7162_v58 = vpack.i.bf16 %v13522_v32, %v13523_v38  ;;  %v4424_v10 = vpop.f32.mrb[116].mxu1  ;;  %7153 = vrot.lane.b32.xlu1 %v7152_v51, %s7583_s29 }
 0x71a   :  { %v4426_v53 = vpop.f32.mrb[117].mxu1  ;;  %5624 = vmatpush1.bf16.msra.mxu0 %v7576_v0  ;;  %v12045_v45 = vadd.f32 %v4424_v10, %v11765_v63 }
 0x71b   :  { %v4428_v25 = vpop.f32.mrb[118].mxu1  ;;  %7163 = vrot.lane.b32.xlu0 %v7162_v58, %s7583_s29  ;;  %5625 = vmatprep.subr.bf16.mxu0 %v14227_v29 }
 0x71c   :  { %v12023_v21 = vadd.f32 %v4428_v25, %v11772_v41  ;;  %v4430_v32 = vpop.f32.mrb[119].mxu1 }
 0x71d   :  { %v12027_v51 = vadd.f32 %v4430_v32, %v11772_v41  ;;  %v7577_v32 = vld [vmem:[%s13197_s6 + $0x48] sm:$0xff]  }
 0x71e   :  { %v13532_v38 = vmax.f32 %v12023_v21, 0.0  ;;  %v7074_v52 = vpop.permute.xlu1 %7073  ;;  %5626 = vmatpush1.bf16.msra.mxu0 %v7577_v32 }
 0x71f   :  { %14246 = vst [vmem:[#allocation24_spill] sm:$0xff] %v12027_v51  ;;  %v13531_v44 = vmax.f32 %v12027_v51, 0.0  ;;  %v12031_v58 = vpop.permute.xlu0 %7078  ;;  %v7075_v11 = vunpack.i.l.bf16 %v7074_v52  ;;  %5627 = vmatprep.subr.bf16.mxu0 %v14227_v29  ;;  %v7076_v10 = vunpack.i.h.bf16 %v7074_v52 }
 0x720   :  { %v7081_v0 = vunpack.i.h.bf16 %v12031_v58 }
 0x721   :  { %v7172_v25 = vpack.i.bf16 %v13531_v44, %v13532_v38  ;;  %v12052_v38 = vadd.f32 %v4426_v53, %v11765_v63 }
 0x722   :  { %v12042_v6 = vpop.permute.xlu1 %7088 }
 0x723   :  { %v13540_v26 = vunpack.i.h.bf16 %v12042_v6  ;;  %v7090_v22 = vunpack.i.l.bf16 %v12042_v6  ;;  %v7084_v44 = vpop.permute.xlu0 %7083  ;;  %7173 = vrot.lane.b32.xlu0 %v7172_v25, %s7583_s29  ;;  %v7578_v25 = vld [vmem:[%s13197_s6 + $0x50] sm:$0xff]  }
 0x724   :  { %v7086_v1 = vunpack.i.h.bf16 %v7084_v44  ;;  %v7085_v27 = vunpack.i.l.bf16 %v7084_v44  ;;  %v14247_v44 = vmax.f32 %v11763_v46, 0.0  ;;  %5628 = vmatpush1.bf16.msra.mxu0 %v7578_v25  ;;  %v13542_v46 = vmax.f32 %v12045_v45, 0.0 }
 0x725   :  { %v4864_v4 = vsel %vm59_vm0, %v7081_v0, %v7090_v22  ;;  %v4865_v61 = vsel %vm59_vm0, %v7090_v22, %v13540_v26  ;;  %v14250_v26 = vmax.f32 %v11755_v2, 0.0  ;;  %5629 = vmatprep.subr.bf16.mxu0 %v14227_v29  ;;  %v5603_v2 = vsel %vm5601_vm1, %v5602_v39, 0 }
 0x726   :  { %v12065_v53 = vmax.f32 %v4609_v62, %v4864_v4  ;;  %v12069_v32 = vmax.f32 %v14247_v44, %v4865_v61  ;;  %v4863_v52 = vsel %vm59_vm0, %v7086_v1, %v7081_v0  ;;  %v4848_v33 = vsel %vm59_vm0, %v7085_v27, %v7075_v11  ;;  %v7094_v51 = vpop.permute.xlu1 %7093 }
 0x727   :  { %v12075_v22 = vmax.f32 %v14249_v42, %v4863_v52  ;;  %v12079_v12 = vmax.f32 %v14250_v26, %v4848_v33  ;;  %v7096_v5 = vunpack.i.h.bf16 %v7094_v51  ;;  %v7095_v62 = vunpack.i.l.bf16 %v7094_v51  ;;  %v12081_v4 = vpop.permute.xlu0 %7098  ;;  %v7579_v42 = vld [vmem:[%s13197_s6 + $0x58] sm:$0xff]  }
 0x728   :  { %14248 = vst [vmem:[#allocation111_spill] sm:$0xff] %v12069_v32  ;;  %v13543_v27 = vunpack.i.l.bf16 %v12081_v4  ;;  %v7182_v17 = vpack.i.bf16 %v12069_v32, %v12065_v53  ;;  %v4849_v51 = vsel %vm59_vm0, %v7075_v11, %v7076_v10  ;;  %v14251_v0 = vunpack.i.l.bf16 %v12031_v58  ;;  %5630 = vmatpush1.bf16.msra.mxu0 %v7579_v42  ;;  %v7580_v11 = vld [vmem:[%s13197_s6 + $0x60] sm:$0x7f]  }
 0x729   :  { %v4879_v26 = vsel %vm59_vm0, %v7095_v62, %v7096_v5  ;;  %v7157_v33 = vpack.i.bf16 %v12075_v22, %v12079_v12  ;;  %v14252_v25 = vmax.f32 %v11792_v37, 0.0  ;;  %v14253_v52 = vmax.f32 %v11804_v13, 0.0  ;;  %5631 = vmatprep.subr.bf16.mxu0 %v14227_v29 }
 0x72a   :  { %v4850_v1 = vsel %vm59_vm0, %v7076_v10, %v14251_v0  ;;  %v4880_v39 = vsel %vm59_vm0, %v7096_v5, %v13543_v27  ;;  %7183 = vrot.lane.b32.xlu0 %v7182_v17, %s7591_s3  ;;  %v14255_v37 = vmax.f32 %v12052_v38, 0.0  ;;  %v14256_v5 = vmax.f32 %v11742_v18, 0.0  ;;  %v12135_v18 = vpop.permute.xlu1 %7103 }
 0x72b   :  { %v12102_v44 = vmax.f32 %v14252_v25, %v4879_v26  ;;  %v12110_v61 = vmax.f32 %v14253_v52, %v4880_v39  ;;  %7158 = vrot.lane.b32.xlu1 %v7157_v33, %s7591_s3  ;;  %v14257_v13 = vmax.f32 %v11749_v49, 0.0  ;;  %v5605_v42 = vand.u32 %v7580_v11, %v5603_v2  ;;  %v7109_v0 = vpop.permute.xlu0 %7108 }
 0x72c   :  { %v7167_v10 = vpack.i.bf16 %v14255_v37, %v13542_v46  ;;  %v12123_v17 = vmax.f32 %v14256_v5, %v4849_v51  ;;  %v7111_v49 = vunpack.i.h.bf16 %v7109_v0  ;;  %v7110_v51 = vunpack.i.l.bf16 %v7109_v0 }
 0x72d   :  { %14254 = vst [vmem:[#allocation69_spill] sm:$0xff] %v12110_v61  ;;  %v12127_v26 = vmax.f32 %v14257_v13, %v4850_v1  ;;  %v7187_v33 = vpack.i.bf16 %v12110_v61, %v12102_v44  ;;  %5632 = vmatpush1.bf16.msra.mxu0 %v5605_v42  ;;  %v7101_v25 = vunpack.i.h.bf16 %v12081_v4  ;;  %v13545_v2 = vunpack.i.h.bf16 %v12135_v18 }
 0x72e   :  { %v7105_v39 = vunpack.i.l.bf16 %v12135_v18  ;;  %v4878_v13 = vsel %vm59_vm0, %v7110_v51, %v7095_v62  ;;  %v14260_v62 = vmax.f32 %v11819_v43, 0.0  ;;  %v14262_v61 = vmax.f32 %v11801_v30, 0.0 }
 0x72f   :  { %7188 = vrot.lane.b32.xlu0 %v7187_v33, %s7591_s3  ;;  %7168 = vrot.lane.b32.xlu1 %v7167_v10, %s7583_s29  ;;  %v7177_v29 = vpack.i.bf16 %v12127_v26, %v12123_v17  ;;  %v4893_v5 = vsel %vm59_vm0, %v7111_v49, %v7101_v25  ;;  %v14283_v32 = vmax.f32 %v11830_v9, 0.0 }
 0x730   :  { %v4894_v46 = vsel %vm59_vm0, %v7101_v25, %v7105_v39  ;;  %v12164_v51 = vmax.f32 %v14260_v62, %v4893_v5 }
 0x733   :  { %7178 = vrot.lane.b32.xlu1 %v7177_v29, %s7591_s3 }
 0x735   :  { %v4467_v1 = vpop.f32.mrb[120].mxu1 }
 0x736   :  { %v12142_v52 = vadd.f32 %v4467_v1, %v11736_v35  ;;  %v4469_v11 = vpop.f32.mrb[121].mxu1 }
 0x737   :  { %v12145_v37 = vadd.f32 %v4469_v11, %v11736_v35  ;;  %v4471_v10 = vpop.f32.mrb[122].mxu1  ;;  %v4895_v11 = vsel %vm59_vm0, %v7105_v39, %v13545_v2  ;;  %v12177_v39 = vmax.f32 %v14262_v61, %v4894_v46  ;;  %v14263_v2 = vmax.f32 %v11824_v3, 0.0 }
 0x738   :  { %v13549_v33 = vmax.f32 %v12142_v52, 0.0  ;;  %v12151_v42 = vadd.f32 %v4471_v10, %v11739_v31  ;;  %v4473_v0 = vpop.f32.mrb[123].mxu1  ;;  %v14261_v10 = vmax.f32 %v11815_v14, 0.0 }
 0x739   :  { %14258 = vst [vmem:[#allocation29_spill] sm:$0xff] %v12145_v37  ;;  %v13547_v29 = vmax.f32 %v12145_v37, 0.0  ;;  %v12155_v1 = vadd.f32 %v4473_v0, %v11739_v31  ;;  %v12181_v43 = vmax.f32 %v14263_v2, %v4895_v11 }
 0x73a   :  { %v13548_v49 = vmax.f32 %v12151_v42, 0.0  ;;  %v12168_v27 = vmax.f32 %v14261_v10, %v4878_v13 }
 0x73b   :  { %14259 = vst [vmem:[#allocation88_spill] sm:$0xff] %v12155_v1  ;;  %v7192_v0 = vpack.i.bf16 %v13547_v29, %v13549_v33  ;;  %v13546_v25 = vmax.f32 %v12155_v1, 0.0  ;;  %14264 = vst [vmem:[#allocation25_spill] sm:$0xff] %v12181_v43  ;;  %v14267_v33 = vunpack.i.l.bf16 %v12031_v58  ;;  %v14271_v58 = vunpack.i.h.bf16 %v12042_v6 }
 0x73c   :  { %v7207_v3 = vpack.i.bf16 %v12164_v51, %v12168_v27 }
 0x73d   :  { %v7197_v14 = vpack.i.bf16 %v13546_v25, %v13548_v49  ;;  %v4477_v5 = vpop.f32.mrb[124].mxu1  ;;  %7193 = vrot.lane.b32.xlu0 %v7192_v0, %s7583_s29 }
 0x73e   :  { %v12189_v13 = vadd.f32 %v4477_v5, %v11765_v63  ;;  %v4479_v62 = vpop.f32.mrb[125].mxu1  ;;  %v7202_v5 = vpack.i.bf16 %v12181_v43, %v12177_v39 }
 0x73f   :  { %v12192_v30 = vadd.f32 %v4479_v62, %v11765_v63  ;;  %v4481_v46 = vpop.f32.mrb[126].mxu1  ;;  %7198 = vrot.lane.b32.xlu1 %v7197_v14, %s7583_s29 }
 0x740   :  { %v12198_v61 = vadd.f32 %v4481_v46, %v11772_v41  ;;  %v4483_v2 = vpop.f32.mrb[127].mxu1  ;;  %v13554_v11 = vmax.f32 %v12189_v13, 0.0 }
 0x741   :  { %14265 = vst [vmem:[#allocation90_spill] sm:$0xff] %v12192_v30  ;;  %v13553_v10 = vmax.f32 %v12192_v30, 0.0  ;;  %v12203_v0 = vadd.f32 %v4483_v2, %v11772_v41  ;;  %7208 = vrot.lane.b32.xlu0 %v7207_v3, %s7591_s3 }
 0x742   :  { %v13556_v14 = vmax.f32 %v12198_v61, 0.0 }
 0x743   :  { %14266 = vst [vmem:[#allocation16_spill] sm:$0xff] %v12203_v0  ;;  %v13555_v62 = vmax.f32 %v12203_v0, 0.0  ;;  %v12210_v25 = vpop.permute.xlu1 %7113  ;;  %7203 = vrot.lane.b32.xlu1 %v7202_v5, %s7591_s3  ;;  %v7212_v3 = vpack.i.bf16 %v13553_v10, %v13554_v11  ;;  %v14268_v10 = vmax.f32 %v11752_v60, 0.0  ;;  %v14272_v60 = vmax.f32 %v11770_v24, 0.0 }
 0x744   :  { %v13558_v46 = vunpack.i.h.bf16 %v12210_v25  ;;  %v7115_v29 = vunpack.i.l.bf16 %v12210_v25 }
 0x745   :  { %v7217_v2 = vpack.i.bf16 %v13555_v62, %v13556_v14  ;;  %v12223_v49 = vpop.permute.xlu0 %7118  ;;  %v14269_v62 = vmax.f32 %v11859_v20, 0.0  ;;  %v14273_v20 = vmax.f32 %v11866_v15, 0.0 }
 0x746   :  { %v4851_v5 = vsel %vm59_vm0, %v14267_v33, %v7115_v29  ;;  %v4852_v43 = vsel %vm59_vm0, %v7115_v29, %v13558_v46  ;;  %v13557_v1 = vunpack.i.h.bf16 %v12223_v49  ;;  %v7120_v30 = vunpack.i.l.bf16 %v12223_v49 }
 0x747   :  { %v12235_v11 = vmax.f32 %v14268_v10, %v4851_v5  ;;  %v12239_v14 = vmax.f32 %v14269_v62, %v4852_v43  ;;  %7218 = vrot.lane.b32.xlu0 %v7217_v2, %s7583_s29  ;;  %7213 = vrot.lane.b32.xlu1 %v7212_v3, %s7583_s29  ;;  %v14279_v46 = vmax.f32 %v11884_v28, 0.0 }
 0x748   :  { %v4866_v33 = vsel %vm59_vm0, %v14271_v58, %v7120_v30  ;;  %v4867_v29 = vsel %vm59_vm0, %v7120_v30, %v13557_v1 }
 0x749   :  { %14270 = vst [vmem:[#allocation17_spill] sm:$0xff] %v12239_v14  ;;  %v12251_v10 = vmax.f32 %v14272_v60, %v4866_v33  ;;  %v12255_v43 = vmax.f32 %v14273_v20, %v4867_v29  ;;  %v7222_v62 = vpack.i.bf16 %v12239_v14, %v12235_v11  ;;  %v14276_v14 = vunpack.i.h.bf16 %v12135_v18 }
 0x74b   :  { %14274 = vst [vmem:[#allocation73_spill] sm:$0xff] %v12255_v43  ;;  %7223 = vrot.lane.b32.xlu1 %v7222_v62, %s7591_s3  ;;  %v7227_v6 = vpack.i.bf16 %v12255_v43, %v12251_v10  ;;  %v12263_v3 = vpop.permute.xlu1 %7123  ;;  %v14275_v62 = vunpack.i.l.bf16 %v12081_v4 }
 0x74c   :  { %v13562_v24 = vunpack.i.h.bf16 %v12263_v3  ;;  %v7125_v15 = vunpack.i.l.bf16 %v12263_v3 }
 0x74d   :  { %7228 = vrot.lane.b32.xlu0 %v7227_v6, %s7591_s3  ;;  %v12265_v30 = vpop.permute.xlu0 %7128 }
 0x74e   :  { %v7130_v58 = vunpack.i.l.bf16 %v12265_v30  ;;  %v4881_v6 = vsel %vm59_vm0, %v14275_v62, %v7125_v15  ;;  %v4882_v1 = vsel %vm59_vm0, %v7125_v15, %v13562_v24  ;;  %v14277_v62 = vunpack.i.h.bf16 %v12265_v30 }
 0x74f   :  { %v14278_v24 = vmax.f32 %v11807_v40, 0.0  ;;  %v12304_v43 = vmax.f32 %v14279_v46, %v4882_v1 }
 0x750   :  { %v4896_v4 = vsel %vm59_vm0, %v14276_v14, %v7130_v58  ;;  %v4897_v0 = vsel %vm59_vm0, %v7130_v58, %v14277_v62  ;;  %v14284_v62 = vmax.f32 %v11892_v47, 0.0 }
 0x751   :  { %14280 = vst [vmem:[#allocation72_spill] sm:$0xff] %v12304_v43  ;;  %v12313_v58 = vmax.f32 %v14283_v32, %v4896_v4 }
 0x752   :  { %v12317_v40 = vmax.f32 %v14284_v62, %v4897_v0 }
 0x754   :  { %14285 = vst [vmem:[#allocation95_spill] sm:$0xff] %v12317_v40 }
 0x759   :  { %v4520_v2 = vpop.f32.mrb[128].mxu1 }
 0x75a   :  { %v12272_v33 = vadd.f32 %v4520_v2, %v11736_v35  ;;  %v4522_v29 = vpop.f32.mrb[129].mxu1 }
 0x75b   :  { %v12275_v60 = vadd.f32 %v4522_v29, %v11736_v35  ;;  %v4524_v20 = vpop.f32.mrb[130].mxu1 }
 0x75c   :  { %v12285_v5 = vadd.f32 %v4524_v20, %v11739_v31  ;;  %v4526_v2 = vpop.f32.mrb[131].mxu1  ;;  %v12300_v20 = vmax.f32 %v14278_v24, %v4881_v6 }
 0x75d   :  { %v12289_v29 = vadd.f32 %v4526_v2, %v11739_v31  ;;  %v14281_v2 = vmax.f32 %v12272_v33, 0.0  ;;  %v14282_v18 = vmax.f32 %v12275_v60, 0.0 }
 0x75e   :  { %v13568_v15 = vmax.f32 %v12285_v5, 0.0  ;;  %v7237_v47 = vpack.i.bf16 %v12304_v43, %v12300_v20 }
 0x75f   :  { %v7232_v37 = vpack.i.bf16 %v14282_v18, %v14281_v2  ;;  %v13565_v14 = vmax.f32 %v12289_v29, 0.0  ;;  %v7247_v18 = vpack.i.bf16 %v12317_v40, %v12313_v58  ;;  %v14289_v40 = vmax.f32 %v11862_v54, 0.0 }
 0x760   :  { %v14294_v54 = vmax.f32 %v11918_v59, 0.0 }
 0x761   :  { %v7242_v28 = vpack.i.bf16 %v13565_v14, %v13568_v15  ;;  %v4530_v1 = vpop.f32.mrb[132].mxu1  ;;  %7233 = vrot.lane.b32.xlu1 %v7232_v37, %s7583_s29 }
 0x762   :  { %v12325_v46 = vadd.f32 %v4530_v1, %v11765_v63  ;;  %v4532_v24 = vpop.f32.mrb[133].mxu1 }
 0x763   :  { %v12328_v9 = vadd.f32 %v4532_v24, %v11765_v63  ;;  %v4534_v32 = vpop.f32.mrb[134].mxu1  ;;  %7243 = vrot.lane.b32.xlu0 %v7242_v28, %s7583_s29 }
 0x764   :  { %v13567_v0 = vmax.f32 %v12325_v46, 0.0  ;;  %v12335_v6 = vadd.f32 %v4534_v32, %v11772_v41  ;;  %v4536_v4 = vpop.f32.mrb[135].mxu1 }
 0x765   :  { %14286 = vst [vmem:[#allocation93_spill] sm:$0xff] %v12328_v9  ;;  %v13566_v37 = vmax.f32 %v12328_v9, 0.0  ;;  %v12339_v2 = vadd.f32 %v4536_v4, %v11772_v41  ;;  %7238 = vrot.lane.b32.xlu1 %v7237_v47, %s7591_s3  ;;  %v14303_v9 = vmax.f32 %v11896_v8, 0.0 }
 0x766   :  { %v13573_v62 = vmax.f32 %v12335_v6, 0.0 }
 0x767   :  { %14287 = vst [vmem:[#allocation74_spill] sm:$0xff] %v12339_v2  ;;  %v7252_v28 = vpack.i.bf16 %v13566_v37, %v13567_v0  ;;  %v13572_v1 = vmax.f32 %v12339_v2, 0.0  ;;  %v12350_v24 = vpop.permute.xlu1 %7133  ;;  %7248 = vrot.lane.b32.xlu0 %v7247_v18, %s7591_s3  ;;  %v14288_v37 = vunpack.i.h.bf16 %v12210_v25  ;;  %v14292_v25 = vunpack.i.h.bf16 %v12223_v49 }
 0x768   :  { %v13574_v32 = vunpack.i.h.bf16 %v12350_v24  ;;  %v7135_v47 = vunpack.i.l.bf16 %v12350_v24 }
 0x769   :  { %v7257_v4 = vpack.i.bf16 %v13572_v1, %v13573_v62  ;;  %v12359_v14 = vpop.permute.xlu0 %7138  ;;  %7253 = vrot.lane.b32.xlu1 %v7252_v28, %s7583_s29  ;;  %v14290_v1 = vmax.f32 %v11911_v19, 0.0 }
 0x76a   :  { %v4853_v0 = vsel %vm59_vm0, %v14288_v37, %v7135_v47  ;;  %v4854_v18 = vsel %vm59_vm0, %v7135_v47, %v13574_v32  ;;  %v13575_v15 = vunpack.i.h.bf16 %v12359_v14  ;;  %v7140_v43 = vunpack.i.l.bf16 %v12359_v14 }
 0x76b   :  { %v12372_v2 = vmax.f32 %v14289_v40, %v4853_v0  ;;  %v12376_v62 = vmax.f32 %v14290_v1, %v4854_v18  ;;  %7258 = vrot.lane.b32.xlu0 %v7257_v4, %s7583_s29  ;;  %v14293_v47 = vmax.f32 %v11870_v55, 0.0 }
 0x76c   :  { %v4868_v37 = vsel %vm59_vm0, %v14292_v25, %v7140_v43  ;;  %v4869_v28 = vsel %vm59_vm0, %v7140_v43, %v13575_v15  ;;  %v14300_v15 = vmax.f32 %v11936_v23, 0.0 }
 0x76d   :  { %14291 = vst [vmem:[#allocation76_spill] sm:$0xff] %v12376_v62  ;;  %v12387_v32 = vmax.f32 %v14293_v47, %v4868_v37  ;;  %v12391_v40 = vmax.f32 %v14294_v54, %v4869_v28  ;;  %v7262_v19 = vpack.i.bf16 %v12376_v62, %v12372_v2  ;;  %v14296_v54 = vunpack.i.h.bf16 %v12263_v3 }
 0x76f   :  { %14295 = vst [vmem:[#allocation98_spill] sm:$0xff] %v12391_v40  ;;  %7263 = vrot.lane.b32.xlu1 %v7262_v19, %s7591_s3  ;;  %v7267_v49 = vpack.i.bf16 %v12391_v40, %v12387_v32  ;;  %v12399_v0 = vpop.permute.xlu1 %7143 }
 0x770   :  { %v13578_v55 = vunpack.i.h.bf16 %v12399_v0  ;;  %v7145_v59 = vunpack.i.l.bf16 %v12399_v0 }
 0x771   :  { %7268 = vrot.lane.b32.xlu0 %v7267_v49, %s7591_s3  ;;  %v12401_v43 = vpop.permute.xlu0 %7148 }
 0x772   :  { %v7150_v18 = vunpack.i.l.bf16 %v12401_v43  ;;  %v4883_v19 = vsel %vm59_vm0, %v14296_v54, %v7145_v59  ;;  %v4884_v49 = vsel %vm59_vm0, %v7145_v59, %v13578_v55  ;;  %v14298_v54 = vunpack.i.h.bf16 %v12401_v43 }
 0x773   :  { %v14299_v55 = vmax.f32 %v11887_v48, 0.0  ;;  %v12440_v40 = vmax.f32 %v14300_v15, %v4884_v49 }
 0x774   :  { %v4899_v62 = vsel %vm59_vm0, %v7150_v18, %v14298_v54  ;;  %v14304_v54 = vmax.f32 %v11947_v34, 0.0 }
 0x776   :  { %v12453_v48 = vmax.f32 %v14304_v54, %v4899_v62 }
 0x778   :  { %14305 = vst [vmem:[#allocation46_spill] sm:$0xff] %v12453_v48 }
 0x77d   :  { %v4573_v1 = vpop.f32.mrb[136].mxu1 }
 0x77e   :  { %v12408_v25 = vadd.f32 %v4573_v1, %v11736_v35  ;;  %v4575_v37 = vpop.f32.mrb[137].mxu1 }
 0x77f   :  { %v12411_v28 = vadd.f32 %v4575_v37, %v11736_v35  ;;  %v4577_v47 = vpop.f32.mrb[138].mxu1  ;;  %v14297_v37 = vunpack.i.h.bf16 %v12265_v30 }
 0x780   :  { %v12421_v4 = vadd.f32 %v4577_v47, %v11739_v31  ;;  %v4579_v1 = vpop.f32.mrb[139].mxu1  ;;  %v12436_v47 = vmax.f32 %v14299_v55, %v4883_v19 }
 0x781   :  { %v12425_v35 = vadd.f32 %v4579_v1, %v11739_v31  ;;  %v4898_v3 = vsel %vm59_vm0, %v14297_v37, %v7150_v18  ;;  %v14301_v31 = vmax.f32 %v12408_v25, 0.0  ;;  %v14302_v30 = vmax.f32 %v12411_v28, 0.0 }
 0x782   :  { %v13583_v59 = vmax.f32 %v12421_v4, 0.0  ;;  %v12449_v18 = vmax.f32 %v14303_v9, %v4898_v3  ;;  %v7277_v34 = vpack.i.bf16 %v12440_v40, %v12436_v47 }
 0x783   :  { %v7272_v1 = vpack.i.bf16 %v14302_v30, %v14301_v31  ;;  %v13581_v37 = vmax.f32 %v12425_v35, 0.0 }
 0x785   :  { %v7282_v23 = vpack.i.bf16 %v13581_v37, %v13583_v59  ;;  %v4583_v15 = vpop.f32.mrb[140].mxu1  ;;  %7273 = vrot.lane.b32.xlu1 %v7272_v1, %s7583_s29  ;;  %v14307_v59 = vmax.f32 %v11914_v16, 0.0  ;;  %v14312_v16 = vmax.f32 %v11996_v50, 0.0  ;;  %v14314_v50 = vunpack.i.h.bf16 %v12401_v43 }
 0x786   :  { %v12461_v55 = vadd.f32 %v4583_v15, %v11765_v63  ;;  %v4585_v19 = vpop.f32.mrb[141].mxu1 }
 0x787   :  { %v12464_v8 = vadd.f32 %v4585_v19, %v11765_v63  ;;  %v4587_v9 = vpop.f32.mrb[142].mxu1  ;;  %7283 = vrot.lane.b32.xlu0 %v7282_v23, %s7583_s29  ;;  %v7287_v63 = vpack.i.bf16 %v12453_v48, %v12449_v18 }
 0x788   :  { %v13582_v62 = vmax.f32 %v12461_v55, 0.0  ;;  %v12471_v49 = vadd.f32 %v4587_v9, %v11772_v41  ;;  %v4589_v3 = vpop.f32.mrb[143].mxu1 }
 0x789   :  { %v13580_v31 = vmax.f32 %v12464_v8, 0.0  ;;  %v12475_v30 = vadd.f32 %v4589_v3, %v11772_v41  ;;  %7278 = vrot.lane.b32.xlu1 %v7277_v34, %s7591_s3  ;;  %v14306_v3 = vunpack.i.h.bf16 %v12350_v24  ;;  %v14310_v24 = vunpack.i.h.bf16 %v12359_v14 }
 0x78a   :  { %v13586_v1 = vmax.f32 %v12471_v49, 0.0 }
 0x78b   :  { %v7292_v54 = vpack.i.bf16 %v13580_v31, %v13582_v62  ;;  %v13585_v23 = vmax.f32 %v12475_v30, 0.0  ;;  %v12486_v15 = vpop.permute.xlu1 %7153  ;;  %7288 = vrot.lane.b32.xlu0 %v7287_v63, %s7591_s3 }
 0x78c   :  { %v13587_v41 = vunpack.i.h.bf16 %v12486_v15  ;;  %v7155_v19 = vunpack.i.l.bf16 %v12486_v15 }
 0x78d   :  { %v7297_v9 = vpack.i.bf16 %v13585_v23, %v13586_v1  ;;  %v12495_v34 = vpop.permute.xlu0 %7163  ;;  %7293 = vrot.lane.b32.xlu1 %v7292_v54, %s7583_s29  ;;  %v14308_v23 = vmax.f32 %v11986_v57, 0.0 }
 0x78e   :  { %v4855_v31 = vsel %vm59_vm0, %v14306_v3, %v7155_v19  ;;  %v4856_v63 = vsel %vm59_vm0, %v7155_v19, %v13587_v41  ;;  %v13589_v37 = vunpack.i.h.bf16 %v12495_v34  ;;  %v7165_v62 = vunpack.i.l.bf16 %v12495_v34 }
 0x78f   :  { %v12508_v48 = vmax.f32 %v14307_v59, %v4855_v31  ;;  %v12512_v1 = vmax.f32 %v14308_v23, %v4856_v63  ;;  %7298 = vrot.lane.b32.xlu0 %v7297_v9, %s7583_s29  ;;  %v14311_v3 = vmax.f32 %v11922_v56, 0.0  ;;  %v14315_v63 = vmax.f32 %v11951_v7, 0.0 }
 0x790   :  { %v4870_v54 = vsel %vm59_vm0, %v14310_v24, %v7165_v62  ;;  %v4871_v19 = vsel %vm59_vm0, %v7165_v62, %v13589_v37  ;;  %v14320_v37 = vmax.f32 %v12045_v45, 0.0 }
 0x791   :  { %14309 = vst [vmem:[#allocation94_spill] sm:$0xff] %v12512_v1  ;;  %v12523_v41 = vmax.f32 %v14311_v3, %v4870_v54  ;;  %v12527_v59 = vmax.f32 %v14312_v16, %v4871_v19  ;;  %v7302_v57 = vpack.i.bf16 %v12512_v1, %v12508_v48  ;;  %v14316_v54 = vmax.f32 %v12023_v21, 0.0 }
 0x793   :  { %14313 = vst [vmem:[#allocation64_spill] sm:$0xff] %v12527_v59  ;;  %7303 = vrot.lane.b32.xlu1 %v7302_v57, %s7591_s3  ;;  %v7307_v14 = vpack.i.bf16 %v12527_v59, %v12523_v41 }
 0x795   :  { %v12534_v31 = vpop.permute.xlu0 %7173  ;;  %7308 = vrot.lane.b32.xlu0 %v7307_v14, %s7591_s3 }
 0x796   :  { %v13588_v56 = vunpack.i.h.bf16 %v12534_v31  ;;  %v7175_v62 = vunpack.i.l.bf16 %v12534_v31 }
 0x798   :  { %v4900_v23 = vsel %vm59_vm0, %v14314_v50, %v7175_v62  ;;  %v4901_v9 = vsel %vm59_vm0, %v7175_v62, %v13588_v56 }
 0x799   :  { %v12547_v24 = vmax.f32 %v14315_v63, %v4900_v23  ;;  %v12551_v19 = vmax.f32 %v14316_v54, %v4901_v9  ;;  %v14318_v23 = vunpack.i.h.bf16 %v12399_v0 }
 0x79b   :  { %14317 = vst [vmem:[#allocation50_spill] sm:$0xff] %v12551_v19  ;;  %v7317_v3 = vpack.i.bf16 %v12551_v19, %v12547_v24 }
 0x79c   :  { %v12556_v43 = vpop.permute.xlu0 %7183 }
 0x79d   :  { %v7159_v16 = vpop.permute.xlu1 %7158  ;;  %7318 = vrot.lane.b32.xlu0 %v7317_v3, %s7591_s3  ;;  %v7185_v7 = vunpack.i.l.bf16 %v12556_v43  ;;  %v14319_v3 = vmax.f32 %v11942_v36, 0.0  ;;  %v14321_v59 = vunpack.i.h.bf16 %v12556_v43 }
 0x79e   :  { %v7161_v62 = vunpack.i.h.bf16 %v7159_v16  ;;  %v7160_v54 = vunpack.i.l.bf16 %v7159_v16 }
 0x79f   :  { %v5245_v0 = vsel %vm3763_vm13, %v7185_v7, %v14321_v59 }
 0x7a1   :  { %v12559_v14 = vpop.permute.xlu1 %7168 }
 0x7a2   :  { %v7171_v50 = vunpack.i.h.bf16 %v12559_v14  ;;  %v7170_v21 = vunpack.i.l.bf16 %v12559_v14  ;;  %v14335_v14 = vmax.f32 %v12189_v13, 0.0 }
 0x7a4   :  { %v4885_v9 = vsel %vm59_vm0, %v14318_v23, %v7170_v21  ;;  %v4886_v63 = vsel %vm59_vm0, %v7170_v21, %v7171_v50  ;;  %v5244_v23 = vsel %vm3763_vm13, %v7161_v62, %v7185_v7  ;;  %v12597_v62 = vpop.permute.xlu0 %7188 }
 0x7a5   :  { %v12572_v56 = vmax.f32 %v14319_v3, %v4885_v9  ;;  %v12576_v57 = vmax.f32 %v14320_v37, %v4886_v63  ;;  %v12578_v19 = vpop.permute.xlu1 %7178  ;;  %v5370_v37 = vmax.f32 %v12065_v53, %v5245_v0  ;;  %v5369_v9 = vmax.f32 %v12075_v22, %v5244_v23 }
 0x7a6   :  { %v13594_v1 = vunpack.i.h.bf16 %v12578_v19  ;;  %v7180_v16 = vunpack.i.l.bf16 %v12578_v19  ;;  %v14322_v23 = vunpack.i.h.bf16 %v12486_v15  ;;  %v14326_v15 = vunpack.i.h.bf16 %v12495_v34 }
 0x7a7   :  { %v7312_v36 = vpack.i.bf16 %v12576_v57, %v12572_v56  ;;  %v14336_v13 = vunpack.i.h.bf16 %v12578_v19 }
 0x7a8   :  { %v5229_v21 = vsel %vm3763_vm13, %v7160_v54, %v7180_v16  ;;  %v5230_v45 = vsel %vm3763_vm13, %v7180_v16, %v13594_v1 }
 0x7a9   :  { %v5353_v59 = vmax.f32 %v12079_v12, %v5229_v21  ;;  %v5354_v7 = vmax.f32 %v12123_v17, %v5230_v45  ;;  %7313 = vrot.lane.b32.xlu1 %v7312_v36, %s7591_s3  ;;  %v13596_v12 = vunpack.i.h.bf16 %v12597_v62  ;;  %v7190_v17 = vunpack.i.l.bf16 %v12597_v62 }
 0x7ab   :  { %v5417_v63 = vpack.c.bf16 %v5369_v9, %v5353_v59  ;;  %v5418_v3 = vpack.c.bf16 %v5370_v37, %v5354_v7  ;;  %v14323_v37 = vld [vmem:[#allocation68_spill] sm:$0xff]  ;;  %v14325_v7 = vmax.f32 %v12142_v52, 0.0  ;;  %v14329_v52 = vmax.f32 %v12151_v42, 0.0 }
 0x7ac   :  { %v14324_v9 = vmax.f32 %v14323_v37, 0.0  ;;  %v5260_v37 = vsel %vm3763_vm13, %v7190_v17, %v13596_v12 }
 0x7ad   :  { %6133 = vmatprep.mubr.msk.bf16.mxu0 %vm5552_vm2, %v5418_v3 }
 0x7ae   :  { %5640 = vmatmul.mubr.bf16.vlgmr.msra.gmra.mrb[64].mxu0 %v5417_v63 }
 0x7af   :  { %v12600_v54 = vpop.permute.xlu0 %7193 }
 0x7b0   :  { %v13593_v53 = vunpack.i.h.bf16 %v12600_v54  ;;  %v7195_v22 = vunpack.i.l.bf16 %v12600_v54 }
 0x7b1   :  { %v12606_v0 = vpop.permute.xlu1 %7198 }
 0x7b2   :  { %v4857_v16 = vsel %vm59_vm0, %v14322_v23, %v7195_v22  ;;  %v4858_v36 = vsel %vm59_vm0, %v7195_v22, %v13593_v53  ;;  %v13595_v21 = vunpack.i.h.bf16 %v12606_v0  ;;  %v7200_v45 = vunpack.i.l.bf16 %v12606_v0 }
 0x7b3   :  { %v12618_v59 = vmax.f32 %v14324_v9, %v4857_v16  ;;  %v12622_v63 = vmax.f32 %v14325_v7, %v4858_v36  ;;  %v7209_v3 = vpop.permute.xlu0 %7208  ;;  %v14327_v16 = vld [vmem:[#allocation20_spill] sm:$0xff] }
 0x7b4   :  { %v4872_v23 = vsel %vm59_vm0, %v14326_v15, %v7200_v45  ;;  %v4873_v22 = vsel %vm59_vm0, %v7200_v45, %v13595_v21  ;;  %v7210_v53 = vunpack.i.l.bf16 %v7209_v3  ;;  %v14328_v9 = vmax.f32 %v14327_v16, 0.0 }
 0x7b5   :  { %v12639_v36 = vmax.f32 %v14329_v52, %v4873_v22  ;;  %v12641_v34 = vpop.permute.xlu1 %7203  ;;  %v7322_v7 = vpack.i.bf16 %v12622_v63, %v12618_v59  ;;  %v7211_v15 = vunpack.i.h.bf16 %v7209_v3  ;;  %v5386_v16 = vmax.f32 %v12102_v44, %v5260_v37 }
 0x7b6   :  { %v12635_v1 = vmax.f32 %v14328_v9, %v4872_v23  ;;  %v5259_v45 = vsel %vm3763_vm13, %v7210_v53, %v7190_v17  ;;  %v13597_v21 = vunpack.i.h.bf16 %v12641_v34  ;;  %v7205_v12 = vunpack.i.l.bf16 %v12641_v34 }
 0x7b7   :  { %7323 = vrot.lane.b32.xlu1 %v7322_v7, %s7591_s3  ;;  %v5385_v9 = vmax.f32 %v12168_v27, %v5259_v45 }
 0x7b8   :  { %v7327_v23 = vpack.i.bf16 %v12639_v36, %v12635_v1  ;;  %v5274_v42 = vsel %vm3763_vm13, %v7211_v15, %v7205_v12  ;;  %v5275_v22 = vsel %vm3763_vm13, %v7205_v12, %v13597_v21 }
 0x7b9   :  { %v5402_v3 = vmax.f32 %v12177_v39, %v5275_v22  ;;  %v12657_v53 = vpop.permute.xlu0 %7218  ;;  %v12659_v17 = vpop.permute.xlu1 %7213  ;;  %v5401_v52 = vmax.f32 %v12164_v51, %v5274_v42  ;;  %v14330_v22 = vunpack.i.h.bf16 %v12534_v31  ;;  %v14333_v31 = vmax.f32 %v12198_v61, 0.0 }
 0x7ba   :  { %7328 = vrot.lane.b32.xlu0 %v7327_v23, %s7591_s3  ;;  %v7221_v7 = vunpack.i.h.bf16 %v12657_v53  ;;  %v7220_v15 = vunpack.i.l.bf16 %v12657_v53  ;;  %v7216_v12 = vunpack.i.h.bf16 %v12659_v17  ;;  %v7215_v44 = vunpack.i.l.bf16 %v12659_v17  ;;  %v14331_v23 = vld [vmem:[#allocation24_spill] sm:$0xff] }
 0x7bb   :  { %v5434_v37 = vpack.c.bf16 %v5402_v3, %v5386_v16  ;;  %v5433_v39 = vpack.c.bf16 %v5401_v52, %v5385_v9  ;;  %v14332_v42 = vmax.f32 %v14331_v23, 0.0  ;;  %v14334_v9 = vmax.f32 %v12052_v38, 0.0 }
 0x7bc   :  { %v4902_v21 = vsel %vm59_vm0, %v14330_v22, %v7220_v15  ;;  %v4903_v27 = vsel %vm59_vm0, %v7220_v15, %v7221_v7  ;;  %v4887_v51 = vsel %vm59_vm0, %v7171_v50, %v7215_v44  ;;  %v4888_v45 = vsel %vm59_vm0, %v7215_v44, %v7216_v12 }
 0x7bd   :  { %v12682_v16 = vmax.f32 %v14332_v42, %v4902_v21  ;;  %v12686_v3 = vmax.f32 %v14333_v31, %v4903_v27  ;;  %v12690_v52 = vmax.f32 %v14334_v9, %v4887_v51  ;;  %v12694_v15 = vmax.f32 %v14335_v14, %v4888_v45  ;;  %v12696_v50 = vpop.permute.xlu1 %7223  ;;  %6134 = vmatprep.mubr.msk.bf16.mxu0 %vm5552_vm2, %v5434_v37  ;;  %v14338_v14 = vld [vmem:[#allocation111_spill] sm:$0xff] }
 0x7be   :  { %v13603_v44 = vunpack.i.h.bf16 %v12696_v50  ;;  %v7225_v21 = vunpack.i.l.bf16 %v12696_v50  ;;  %5648 = vmatmul.mubr.bf16.gmra.mrb[68].mxu0 %v5433_v39  ;;  %v14337_v45 = vunpack.i.h.bf16 %v12556_v43 }
 0x7bf   :  { %v12701_v61 = vpop.permute.xlu0 %7228  ;;  %v7337_v38 = vpack.i.bf16 %v12686_v3, %v12682_v16  ;;  %v7332_v22 = vpack.i.bf16 %v12694_v15, %v12690_v52 }
 0x7c0   :  { %v5231_v27 = vsel %vm3763_vm13, %v14336_v13, %v7225_v21  ;;  %v5232_v37 = vsel %vm3763_vm13, %v7225_v21, %v13603_v44  ;;  %v13601_v51 = vunpack.i.h.bf16 %v12701_v61  ;;  %v7230_v39 = vunpack.i.l.bf16 %v12701_v61 }
 0x7c1   :  { %7338 = vrot.lane.b32.xlu0 %v7337_v38, %s7591_s3  ;;  %7333 = vrot.lane.b32.xlu1 %v7332_v22, %s7591_s3  ;;  %v5356_v42 = vmax.f32 %v12235_v11, %v5232_v37  ;;  %v5355_v9 = vmax.f32 %v12127_v26, %v5231_v27  ;;  %v14339_v11 = vunpack.i.h.bf16 %v12600_v54  ;;  %v14343_v54 = vunpack.i.h.bf16 %v12606_v0 }
 0x7c2   :  { %v5246_v23 = vsel %vm3763_vm13, %v14337_v45, %v7230_v39  ;;  %v5247_v19 = vsel %vm3763_vm13, %v7230_v39, %v13601_v51  ;;  %v14350_v51 = vld [vmem:[#allocation25_spill] sm:$0xff] }
 0x7c3   :  { %v5372_v31 = vmax.f32 %v12251_v10, %v5247_v19  ;;  %v5371_v21 = vmax.f32 %v14338_v14, %v5246_v23  ;;  %v14340_v23 = vld [vmem:[#allocation29_spill] sm:$0xff] }
 0x7c4   :  { %v14341_v19 = vmax.f32 %v14340_v23, 0.0 }
 0x7c5   :  { %v5420_v13 = vpack.c.bf16 %v5372_v31, %v5356_v42  ;;  %v5419_v38 = vpack.c.bf16 %v5371_v21, %v5355_v9  ;;  %v14342_v31 = vmax.f32 %v12272_v33, 0.0  ;;  %v14346_v33 = vmax.f32 %v12285_v5, 0.0 }
 0x7c7   :  { %6135 = vmatprep.mubr.msk.bf16.mxu0 %vm5552_vm2, %v5420_v13 }
 0x7c8   :  { %5656 = vmatmul.mubr.bf16.gmra.mrb[72].mxu0 %v5419_v38 }
 0x7d3   :  { %v12728_v43 = vpop.permute.xlu1 %7233 }
 0x7d4   :  { %v13600_v22 = vunpack.i.h.bf16 %v12728_v43  ;;  %v7235_v45 = vunpack.i.l.bf16 %v12728_v43 }
 0x7d5   :  { %v12732_v39 = vpop.permute.xlu0 %7243 }
 0x7d6   :  { %v4859_v10 = vsel %vm59_vm0, %v14339_v11, %v7235_v45  ;;  %v4860_v26 = vsel %vm59_vm0, %v7235_v45, %v13600_v22  ;;  %v13599_v27 = vunpack.i.h.bf16 %v12732_v39  ;;  %v7245_v37 = vunpack.i.l.bf16 %v12732_v39  ;;  %v14344_v11 = vld [vmem:[#allocation88_spill] sm:$0xff]  ;;  %v14349_v22 = vld [vmem:[#allocation69_spill] sm:$0xff] }
 0x7d7   :  { %v12744_v42 = vmax.f32 %v14341_v19, %v4859_v10  ;;  %v12748_v9 = vmax.f32 %v14342_v31, %v4860_v26  ;;  %v12750_v14 = vpop.permute.xlu1 %7238  ;;  %v14345_v10 = vmax.f32 %v14344_v11, 0.0  ;;  %v14347_v31 = vunpack.i.h.bf16 %v12597_v62 }
 0x7d8   :  { %v4874_v21 = vsel %vm59_vm0, %v14343_v54, %v7245_v37  ;;  %v4875_v13 = vsel %vm59_vm0, %v7245_v37, %v13599_v27  ;;  %v13598_v38 = vunpack.i.h.bf16 %v12750_v14  ;;  %v7240_v45 = vunpack.i.l.bf16 %v12750_v14 }
 0x7d9   :  { %v12762_v23 = vmax.f32 %v14345_v10, %v4874_v21  ;;  %v12766_v26 = vmax.f32 %v14346_v33, %v4875_v13  ;;  %v12768_v19 = vpop.permute.xlu0 %7248  ;;  %v7342_v0 = vpack.i.bf16 %v12748_v9, %v12744_v42  ;;  %v14348_v10 = vunpack.i.h.bf16 %v12641_v34 }
 0x7da   :  { %v5261_v37 = vsel %vm3763_vm13, %v14347_v31, %v7240_v45  ;;  %v5262_v54 = vsel %vm3763_vm13, %v7240_v45, %v13598_v38  ;;  %v13602_v21 = vunpack.i.h.bf16 %v12768_v19  ;;  %v7250_v11 = vunpack.i.l.bf16 %v12768_v19 }
 0x7db   :  { %v12780_v5 = vpop.permute.xlu1 %7253  ;;  %7343 = vrot.lane.b32.xlu1 %v7342_v0, %s7591_s3  ;;  %v7347_v13 = vpack.i.bf16 %v12766_v26, %v12762_v23  ;;  %v5388_v38 = vmax.f32 %v12300_v20, %v5262_v54  ;;  %v5387_v34 = vmax.f32 %v14349_v22, %v5261_v37  ;;  %v14351_v54 = vld [vmem:[#allocation90_spill] sm:$0xff]  ;;  %v14353_v22 = vmax.f32 %v12325_v46, 0.0 }
 0x7dc   :  { %v5276_v62 = vsel %vm3763_vm13, %v14348_v10, %v7250_v11  ;;  %v5277_v33 = vsel %vm3763_vm13, %v7250_v11, %v13602_v21  ;;  %v13604_v45 = vunpack.i.h.bf16 %v12780_v5  ;;  %v7255_v31 = vunpack.i.l.bf16 %v12780_v5 }
 0x7dd   :  { %v5404_v27 = vmax.f32 %v12313_v58, %v5277_v33  ;;  %v12795_v0 = vpop.permute.xlu0 %7258  ;;  %7348 = vrot.lane.b32.xlu0 %v7347_v13, %s7591_s3  ;;  %v5403_v10 = vmax.f32 %v14350_v51, %v5276_v62  ;;  %v14352_v33 = vmax.f32 %v14351_v54, 0.0  ;;  %v14354_v62 = vld [vmem:[#allocation16_spill] sm:$0xff] }
 0x7de   :  { %v4889_v11 = vsel %vm59_vm0, %v7216_v12, %v7255_v31  ;;  %v4890_v21 = vsel %vm59_vm0, %v7255_v31, %v13604_v45  ;;  %v7261_v20 = vunpack.i.h.bf16 %v12795_v0  ;;  %v7260_v58 = vunpack.i.l.bf16 %v12795_v0 }
 0x7df   :  { %v12810_v44 = vmax.f32 %v14352_v33, %v4889_v11  ;;  %v12814_v37 = vmax.f32 %v14353_v22, %v4890_v21  ;;  %v5436_v51 = vpack.c.bf16 %v5404_v27, %v5388_v38  ;;  %v5435_v17 = vpack.c.bf16 %v5403_v10, %v5387_v34 }
 0x7e0   :  { %v4904_v12 = vsel %vm59_vm0, %v7221_v7, %v7260_v58  ;;  %v4905_v13 = vsel %vm59_vm0, %v7260_v58, %v7261_v20  ;;  %v14355_v31 = vmax.f32 %v14354_v62, 0.0  ;;  %v14356_v11 = vmax.f32 %v12335_v6, 0.0 }
 0x7e1   :  { %v12830_v46 = vpop.permute.xlu1 %7263  ;;  %6136 = vmatprep.mubr.msk.bf16.mxu0 %vm5552_vm2, %v5436_v51  ;;  %v7352_v53 = vpack.i.bf16 %v12814_v37, %v12810_v44  ;;  %v14357_v21 = vunpack.i.h.bf16 %v12696_v50  ;;  %v14358_v22 = vunpack.i.h.bf16 %v12701_v61 }
 0x7e2   :  { %v12824_v45 = vmax.f32 %v14355_v31, %v4904_v12  ;;  %v12828_v54 = vmax.f32 %v14356_v11, %v4905_v13  ;;  %v13605_v7 = vunpack.i.h.bf16 %v12830_v46  ;;  %v7265_v27 = vunpack.i.l.bf16 %v12830_v46  ;;  %5664 = vmatmul.mubr.bf16.gmra.mrb[76].mxu0 %v5435_v17  ;;  %v14359_v13 = vld [vmem:[#allocation17_spill] sm:$0xff] }
 0x7e3   :  { %v12837_v38 = vpop.permute.xlu0 %7268  ;;  %7353 = vrot.lane.b32.xlu1 %v7352_v53, %s7591_s3  ;;  %v14360_v31 = vld [vmem:[#allocation73_spill] sm:$0xff] }
 0x7e4   :  { %v7357_v6 = vpack.i.bf16 %v12828_v54, %v12824_v45  ;;  %v5233_v34 = vsel %vm3763_vm13, %v14357_v21, %v7265_v27  ;;  %v5234_v10 = vsel %vm3763_vm13, %v7265_v27, %v13605_v7  ;;  %v7271_v58 = vunpack.i.h.bf16 %v12837_v38 }
 0x7e5   :  { %v7270_v33 = vunpack.i.l.bf16 %v12837_v38  ;;  %v5358_v17 = vmax.f32 %v12372_v2, %v5234_v10  ;;  %v5357_v62 = vmax.f32 %v14359_v13, %v5233_v34  ;;  %v14361_v7 = vunpack.i.h.bf16 %v12728_v43 }
 0x7e6   :  { %7358 = vrot.lane.b32.xlu0 %v7357_v6, %s7591_s3  ;;  %v14362_v34 = vmax.f32 %v12275_v60, 0.0 }
 0x7e7   :  { %v5248_v51 = vsel %vm3763_vm13, %v14358_v22, %v7270_v33  ;;  %v5249_v50 = vsel %vm3763_vm13, %v7270_v33, %v7271_v58 }
 0x7e8   :  { %v5374_v12 = vmax.f32 %v12387_v32, %v5249_v50  ;;  %v5373_v11 = vmax.f32 %v14360_v31, %v5248_v51  ;;  %v14363_v51 = vmax.f32 %v12408_v25, 0.0 }
 0x7ea   :  { %v5422_v53 = vpack.c.bf16 %v5374_v12, %v5358_v17  ;;  %v5421_v27 = vpack.c.bf16 %v5373_v11, %v5357_v62  ;;  %v14365_v11 = vmax.f32 %v12289_v29, 0.0 }
 0x7ec   :  { %6137 = vmatprep.mubr.msk.bf16.mxu0 %vm5552_vm2, %v5422_v53 }
 0x7ed   :  { %5672 = vmatmul.mubr.bf16.gmra.mrb[80].mxu0 %v5421_v27  ;;  %v14366_v27 = vmax.f32 %v12421_v4, 0.0  ;;  %v14367_v4 = vunpack.i.h.bf16 %v12750_v14 }
 0x7f7   :  { %v7274_v61 = vpop.permute.xlu1 %7273 }
 0x7f8   :  { %v7276_v6 = vunpack.i.h.bf16 %v7274_v61  ;;  %v7275_v21 = vunpack.i.l.bf16 %v7274_v61 }
 0x7f9   :  { %v7284_v22 = vpop.permute.xlu0 %7283 }
 0x7fa   :  { %v4861_v33 = vsel %vm59_vm0, %v14361_v7, %v7275_v21  ;;  %v4862_v2 = vsel %vm59_vm0, %v7275_v21, %v7276_v6  ;;  %v7286_v32 = vunpack.i.h.bf16 %v7284_v22  ;;  %v7285_v17 = vunpack.i.l.bf16 %v7284_v22 }
 0x7fb   :  { %v12868_v10 = vmax.f32 %v14362_v34, %v4861_v33  ;;  %v12872_v50 = vmax.f32 %v14363_v51, %v4862_v2  ;;  %v12874_v12 = vpop.permute.xlu1 %7278  ;;  %v14364_v7 = vunpack.i.h.bf16 %v12732_v39 }
 0x7fc   :  { %v13606_v13 = vunpack.i.h.bf16 %v12874_v12  ;;  %v7280_v43 = vunpack.i.l.bf16 %v12874_v12  ;;  %v4877_v31 = vsel %vm59_vm0, %v7285_v17, %v7286_v32 }
 0x7fd   :  { %v4876_v62 = vsel %vm59_vm0, %v14364_v7, %v7285_v17  ;;  %v12882_v60 = vpop.permute.xlu0 %7288  ;;  %v7362_v25 = vpack.i.bf16 %v12872_v50, %v12868_v10  ;;  %v12892_v61 = vmax.f32 %v14366_v27, %v4877_v31  ;;  %v14368_v17 = vunpack.i.h.bf16 %v12768_v19  ;;  %v14370_v19 = vld [vmem:[#allocation93_spill] sm:$0xff] }
 0x7fe   :  { %v12888_v53 = vmax.f32 %v14365_v11, %v4876_v62  ;;  %v5264_v39 = vsel %vm3763_vm13, %v7280_v43, %v13606_v13  ;;  %v7291_v21 = vunpack.i.h.bf16 %v12882_v60  ;;  %v7290_v22 = vunpack.i.l.bf16 %v12882_v60 }
 0x7ff   :  { %v7294_v33 = vpop.permute.xlu1 %7293  ;;  %7363 = vrot.lane.b32.xlu1 %v7362_v25, %s7591_s3  ;;  %v5263_v51 = vsel %vm3763_vm13, %v14367_v4, %v7280_v43  ;;  %v5390_v25 = vmax.f32 %v12436_v47, %v5264_v39  ;;  %v14369_v27 = vunpack.i.h.bf16 %v12780_v5  ;;  %v14371_v43 = vmax.f32 %v14370_v19, 0.0  ;;  %v14375_v19 = vld [vmem:[#allocation72_spill] sm:$0xff] }
 0x800   :  { %v7296_v2 = vunpack.i.h.bf16 %v7294_v33  ;;  %v7295_v34 = vunpack.i.l.bf16 %v7294_v33  ;;  %v7367_v29 = vpack.i.bf16 %v12892_v61, %v12888_v53  ;;  %v5278_v7 = vsel %vm3763_vm13, %v14368_v17, %v7290_v22 }
 0x801   :  { %v5279_v62 = vsel %vm3763_vm13, %v7290_v22, %v7291_v21  ;;  %v7299_v31 = vpop.permute.xlu0 %7298  ;;  %v14372_v17 = vmax.f32 %v12461_v55, 0.0  ;;  %v5389_v55 = vmax.f32 %v14375_v19, %v5263_v51 }
 0x802   :  { %v5406_v11 = vmax.f32 %v12449_v18, %v5279_v62  ;;  %v4891_v33 = vsel %vm59_vm0, %v14369_v27, %v7295_v34  ;;  %v4892_v14 = vsel %vm59_vm0, %v7295_v34, %v7296_v2  ;;  %7368 = vrot.lane.b32.xlu0 %v7367_v29, %s7591_s3  ;;  %v7301_v13 = vunpack.i.h.bf16 %v7299_v31  ;;  %v14374_v62 = vld [vmem:[#allocation95_spill] sm:$0xff] }
 0x803   :  { %v12920_v4 = vmax.f32 %v14371_v43, %v4891_v33  ;;  %v12924_v22 = vmax.f32 %v14372_v17, %v4892_v14  ;;  %v7300_v47 = vunpack.i.l.bf16 %v7299_v31  ;;  %v14373_v18 = vmax.f32 %v12425_v35, 0.0  ;;  %v14376_v31 = vld [vmem:[#allocation74_spill] sm:$0xff] }
 0x804   :  { %v5438_v5 = vpack.c.bf16 %v5406_v11, %v5390_v25  ;;  %v5405_v27 = vmax.f32 %v14374_v62, %v5278_v7  ;;  %v14377_v43 = vmax.f32 %v14376_v31, 0.0  ;;  %v14384_v31 = vld [vmem:[#allocation98_spill] sm:$0xff] }
 0x805   :  { %v12928_v39 = vmax.f32 %v14373_v18, %v7286_v32  ;;  %v4906_v34 = vsel %vm59_vm0, %v7261_v20, %v7300_v47  ;;  %v4907_v29 = vsel %vm59_vm0, %v7300_v47, %v7301_v13  ;;  %v7304_v33 = vpop.permute.xlu1 %7303  ;;  %v7372_v14 = vpack.i.bf16 %v12924_v22, %v12920_v4 }
 0x806   :  { %v12940_v35 = vmax.f32 %v14377_v43, %v4906_v34  ;;  %v14378_v32 = vmax.f32 %v12471_v49, 0.0  ;;  %v7306_v7 = vunpack.i.h.bf16 %v7304_v33  ;;  %v7305_v0 = vunpack.i.l.bf16 %v7304_v33  ;;  %6138 = vmatprep.mubr.msk.bf16.mxu0 %vm5552_vm2, %v5438_v5 }
 0x807   :  { %v14379_v20 = vmax.f32 %v12411_v28, 0.0  ;;  %v5437_v51 = vpack.c.bf16 %v5405_v27, %v5389_v55  ;;  %v7309_v17 = vpop.permute.xlu0 %7308  ;;  %7373 = vrot.lane.b32.xlu1 %v7372_v14, %s7591_s3  ;;  %v14380_v47 = vunpack.i.h.bf16 %v12830_v46  ;;  %v14381_v5 = vmax.f32 %v12475_v30, 0.0 }
 0x808   :  { %v12944_v25 = vmax.f32 %v14378_v32, %v4907_v29  ;;  %v5236_v49 = vsel %vm3763_vm13, %v7305_v0, %v7306_v7  ;;  %v7311_v62 = vunpack.i.h.bf16 %v7309_v17  ;;  %v7310_v34 = vunpack.i.l.bf16 %v7309_v17 }
 0x809   :  { %v12949_v11 = vmax.f32 %v14379_v20, %v7276_v6  ;;  %v5235_v18 = vsel %vm3763_vm13, %v14380_v47, %v7305_v0  ;;  %v12960_v28 = vmax.f32 %v14381_v5, %v7301_v13  ;;  %5680 = vmatmul.mubr.bf16.gmra.mrb[84].mxu0 %v5437_v51  ;;  %v14382_v27 = vmax.f32 %v12464_v8, 0.0  ;;  %v14383_v13 = vld [vmem:[#allocation76_spill] sm:$0xff] }
 0x80a   :  { %v7377_v6 = vpack.i.bf16 %v12944_v25, %v12940_v35  ;;  %v5360_v33 = vmax.f32 %v12508_v48, %v5236_v49  ;;  %v5250_v19 = vsel %vm3763_vm13, %v7271_v58, %v7310_v34  ;;  %v5251_v55 = vsel %vm3763_vm13, %v7310_v34, %v7311_v62 }
 0x80b   :  { %v7382_v29 = vpack.i.bf16 %v12928_v39, %v12949_v11  ;;  %v12966_v46 = vmax.f32 %v14382_v27, %v7296_v2  ;;  %v5376_v30 = vmax.f32 %v12523_v41, %v5251_v55  ;;  %v5359_v14 = vmax.f32 %v14383_v13, %v5235_v18 }
 0x80c   :  { %7378 = vrot.lane.b32.xlu0 %v7377_v6, %s7591_s3  ;;  %v5375_v8 = vmax.f32 %v14384_v31, %v5250_v19  ;;  %v14385_v47 = vunpack.i.h.bf16 %v12874_v12  ;;  %v14386_v6 = vld [vmem:[#allocation46_spill] sm:$0xff]  ;;  %vm5798_vm0 = vcmask 519168  }
 0x80d   :  { %7383 = vrot.lane.b32.xlu1 %v7382_v29, %s7591_s3  ;;  %v7387_v2 = vpack.i.bf16 %v12960_v28, %v12966_v46  ;;  %v5424_v48 = vpack.c.bf16 %v5376_v30, %v5360_v33 }
 0x80e   :  { %v5423_v43 = vpack.c.bf16 %v5375_v8, %v5359_v14 }
 0x80f   :  { %6139 = vmatprep.mubr.msk.bf16.mxu0 %vm5552_vm2, %v5424_v48  ;;  %v7319_v38 = vpop.permute.xlu0 %7318 }
 0x810   :  { %7388 = vrot.lane.b32.xlu0 %v7387_v2, %s7591_s3  ;;  %v7321_v41 = vunpack.i.h.bf16 %v7319_v38  ;;  %v7320_v58 = vunpack.i.l.bf16 %v7319_v38  ;;  %v14387_v2 = vld [vmem:[#allocation94_spill] sm:$0xff] }
 0x811   :  { %5688 = vmatmul.mubr.bf16.gmra.mrb[88].mxu0 %v5423_v43  ;;  %v14388_v43 = vld [vmem:[#allocation64_spill] sm:$0xff] }
 0x812   :  { %v5280_v0 = vsel %vm3763_vm13, %v7291_v21, %v7320_v58  ;;  %v5281_v20 = vsel %vm3763_vm13, %v7320_v58, %v7321_v41 }
 0x813   :  { %v5408_v34 = vmax.f32 %v12547_v24, %v5281_v20  ;;  %v5407_v60 = vmax.f32 %v14386_v6, %v5280_v0  ;;  %v14389_v6 = vld [vmem:[#allocation50_spill] sm:$0xff] }
 0x81b   :  { %v7314_v32 = vpop.permute.xlu1 %7313 }
 0x81c   :  { %v7316_v51 = vunpack.i.h.bf16 %v7314_v32  ;;  %v7315_v17 = vunpack.i.l.bf16 %v7314_v32 }
 0x81e   :  { %v5265_v18 = vsel %vm3763_vm13, %v14385_v47, %v7315_v17  ;;  %v5266_v49 = vsel %vm3763_vm13, %v7315_v17, %v7316_v51 }
 0x81f   :  { %v5392_v29 = vmax.f32 %v12572_v56, %v5266_v49  ;;  %v5391_v5 = vmax.f32 %v12440_v40, %v5265_v18 }
 0x821   :  { %v5440_v27 = vpack.c.bf16 %v5408_v34, %v5392_v29  ;;  %v5439_v21 = vpack.c.bf16 %v5407_v60, %v5391_v5 }
 0x823   :  { %6140 = vmatprep.mubr.msk.bf16.mxu0 %vm5552_vm2, %v5440_v27 }
 0x824   :  { %5696 = vmatmul.mubr.bf16.gmra.mrb[92].mxu0 %v5439_v21 }
 0x829   :  { %v7324_v33 = vpop.permute.xlu1 %7323 }
 0x82a   :  { %v7326_v19 = vunpack.i.h.bf16 %v7324_v33  ;;  %v7325_v12 = vunpack.i.l.bf16 %v7324_v33 }
 0x82c   :  { %v7329_v55 = vpop.permute.xlu0 %7328  ;;  %v5237_v30 = vsel %vm3763_vm13, %v7306_v7, %v7325_v12  ;;  %v5238_v13 = vsel %vm3763_vm13, %v7325_v12, %v7326_v19 }
 0x82d   :  { %v7331_v24 = vunpack.i.h.bf16 %v7329_v55  ;;  %v7330_v14 = vunpack.i.l.bf16 %v7329_v55  ;;  %v5362_v31 = vmax.f32 %v12618_v59, %v5238_v13  ;;  %v5361_v48 = vmax.f32 %v14387_v2, %v5237_v30 }
 0x82f   :  { %v5252_v56 = vsel %vm3763_vm13, %v7311_v62, %v7330_v14  ;;  %v5253_v40 = vsel %vm3763_vm13, %v7330_v14, %v7331_v24 }
 0x830   :  { %v5378_v8 = vmax.f32 %v12635_v1, %v5253_v40  ;;  %v5377_v38 = vmax.f32 %v14388_v43, %v5252_v56 }
 0x832   :  { %v5426_v58 = vpack.c.bf16 %v5378_v8, %v5362_v31  ;;  %v5425_v32 = vpack.c.bf16 %v5377_v38, %v5361_v48 }
 0x833   :  { %v7339_v0 = vpop.permute.xlu0 %7338  ;;  %v7334_v7 = vpop.permute.xlu1 %7333 }
 0x834   :  { %6141 = vmatprep.mubr.msk.bf16.mxu0 %vm5552_vm2, %v5426_v58  ;;  %v7341_v20 = vunpack.i.h.bf16 %v7339_v0  ;;  %v7340_v17 = vunpack.i.l.bf16 %v7339_v0  ;;  %v7336_v47 = vunpack.i.h.bf16 %v7334_v7  ;;  %v7335_v62 = vunpack.i.l.bf16 %v7334_v7 }
 0x835   :  { %5704 = vmatmul.mubr.bf16.gmra.mrb[96].mxu0 %v5425_v32 }
 0x836   :  { %v5282_v18 = vsel %vm3763_vm13, %v7321_v41, %v7340_v17  ;;  %v5283_v59 = vsel %vm3763_vm13, %v7340_v17, %v7341_v20  ;;  %v5267_v1 = vsel %vm3763_vm13, %v7316_v51, %v7335_v62  ;;  %v5268_v49 = vsel %vm3763_vm13, %v7335_v62, %v7336_v47 }
 0x837   :  { %v5410_v34 = vmax.f32 %v12682_v16, %v5283_v59  ;;  %v5394_v29 = vmax.f32 %v12690_v52, %v5268_v49  ;;  %v5393_v5 = vmax.f32 %v12576_v57, %v5267_v1  ;;  %v5409_v60 = vmax.f32 %v14389_v6, %v5282_v18 }
 0x839   :  { %v5442_v27 = vpack.c.bf16 %v5410_v34, %v5394_v29  ;;  %v5441_v21 = vpack.c.bf16 %v5409_v60, %v5393_v5 }
 0x83b   :  { %6142 = vmatprep.mubr.msk.bf16.mxu0 %vm5552_vm2, %v5442_v27 }
 0x83d   :  { %5712 = vmatmul.mubr.bf16.gmra.mrb[100].mxu0 %v5441_v21 }
 0x84d   :  { %v7344_v41 = vpop.permute.xlu1 %7343 }
 0x84e   :  { %v7346_v33 = vunpack.i.h.bf16 %v7344_v41  ;;  %v7345_v12 = vunpack.i.l.bf16 %v7344_v41 }
 0x84f   :  { %v7349_v55 = vpop.permute.xlu0 %7348 }
 0x850   :  { %v5239_v51 = vsel %vm3763_vm13, %v7326_v19, %v7345_v12  ;;  %v5240_v30 = vsel %vm3763_vm13, %v7345_v12, %v7346_v33  ;;  %v7351_v16 = vunpack.i.h.bf16 %v7349_v55  ;;  %v7350_v13 = vunpack.i.l.bf16 %v7349_v55 }
 0x851   :  { %v5364_v14 = vmax.f32 %v12744_v42, %v5240_v30  ;;  %v5363_v40 = vmax.f32 %v12622_v63, %v5239_v51 }
 0x852   :  { %v5254_v52 = vsel %vm3763_vm13, %v7331_v24, %v7350_v13  ;;  %v5255_v57 = vsel %vm3763_vm13, %v7350_v13, %v7351_v16 }
 0x853   :  { %v5380_v56 = vmax.f32 %v12762_v23, %v5255_v57  ;;  %v5379_v31 = vmax.f32 %v12639_v36, %v5254_v52 }
 0x855   :  { %v7354_v8 = vpop.permute.xlu1 %7353  ;;  %v5428_v2 = vpack.c.bf16 %v5380_v56, %v5364_v14  ;;  %v5427_v48 = vpack.c.bf16 %v5379_v31, %v5363_v40 }
 0x856   :  { %v7356_v19 = vunpack.i.h.bf16 %v7354_v8  ;;  %v7355_v43 = vunpack.i.l.bf16 %v7354_v8 }
 0x857   :  { %6143 = vmatprep.mubr.msk.bf16.mxu0 %vm5552_vm2, %v5428_v2 }
 0x858   :  { %v7359_v38 = vpop.permute.xlu0 %7358  ;;  %v5269_v24 = vsel %vm3763_vm13, %v7336_v47, %v7355_v43  ;;  %v5270_v58 = vsel %vm3763_vm13, %v7355_v43, %v7356_v19  ;;  %5720 = vmatmul.mubr.bf16.gmra.mrb[104].mxu0 %v5427_v48 }
 0x859   :  { %v7361_v32 = vunpack.i.h.bf16 %v7359_v38  ;;  %v7360_v42 = vunpack.i.l.bf16 %v7359_v38  ;;  %v5396_v36 = vmax.f32 %v12810_v44, %v5270_v58  ;;  %v5395_v7 = vmax.f32 %v12694_v15, %v5269_v24 }
 0x85b   :  { %v5284_v23 = vsel %vm3763_vm13, %v7341_v20, %v7360_v42  ;;  %v5285_v63 = vsel %vm3763_vm13, %v7360_v42, %v7361_v32 }
 0x85c   :  { %v5412_v0 = vmax.f32 %v12824_v45, %v5285_v63  ;;  %v5411_v17 = vmax.f32 %v12686_v3, %v5284_v23 }
 0x85e   :  { %v5444_v62 = vpack.c.bf16 %v5412_v0, %v5396_v36  ;;  %v5443_v18 = vpack.c.bf16 %v5411_v17, %v5395_v7 }
 0x860   :  { %6144 = vmatprep.mubr.msk.bf16.mxu0 %vm5552_vm2, %v5444_v62 }
 0x861   :  { %5728 = vmatmul.mubr.bf16.gmra.mrb[108].mxu0 %v5443_v18 }
 0x871   :  { %v7364_v47 = vpop.permute.xlu1 %7363 }
 0x872   :  { %v7366_v59 = vunpack.i.h.bf16 %v7364_v47  ;;  %v7365_v1 = vunpack.i.l.bf16 %v7364_v47 }
 0x874   :  { %v7369_v49 = vpop.permute.xlu0 %7368  ;;  %v5241_v20 = vsel %vm3763_vm13, %v7346_v33, %v7365_v1  ;;  %v5242_v34 = vsel %vm3763_vm13, %v7365_v1, %v7366_v59 }
 0x875   :  { %v7371_v44 = vunpack.i.h.bf16 %v7369_v49  ;;  %v7370_v29 = vunpack.i.l.bf16 %v7369_v49  ;;  %v5366_v3 = vmax.f32 %v12868_v10, %v5242_v34  ;;  %v5365_v6 = vmax.f32 %v12748_v9, %v5241_v20 }
 0x877   :  { %v5256_v45 = vsel %vm3763_vm13, %v7351_v16, %v7370_v29  ;;  %v5257_v15 = vsel %vm3763_vm13, %v7370_v29, %v7371_v44 }
 0x878   :  { %v5382_v5 = vmax.f32 %v12888_v53, %v5257_v15  ;;  %v5381_v60 = vmax.f32 %v12766_v26, %v5256_v45 }
 0x879   :  { %v7374_v27 = vpop.permute.xlu1 %7373 }
 0x87a   :  { %v7376_v21 = vunpack.i.h.bf16 %v7374_v27  ;;  %v7375_v41 = vunpack.i.l.bf16 %v7374_v27  ;;  %v5430_v33 = vpack.c.bf16 %v5382_v5, %v5366_v3  ;;  %v5429_v12 = vpack.c.bf16 %v5381_v60, %v5365_v6 }
 0x87c   :  { %6145 = vmatprep.mubr.msk.bf16.mxu0 %vm5552_vm2, %v5430_v33  ;;  %v5271_v55 = vsel %vm3763_vm13, %v7356_v19, %v7375_v41  ;;  %v5272_v51 = vsel %vm3763_vm13, %v7375_v41, %v7376_v21 }
 0x87d   :  { %5736 = vmatmul.mubr.bf16.gmra.mrb[112].mxu0 %v5429_v12  ;;  %v5398_v26 = vmax.f32 %v12920_v4, %v5272_v51  ;;  %v5397_v8 = vmax.f32 %v12814_v37, %v5271_v55 }
 0x87e   :  { %v7379_v30 = vpop.permute.xlu0 %7378 }
 0x87f   :  { %v7384_v10 = vpop.permute.xlu1 %7383  ;;  %v7381_v16 = vunpack.i.h.bf16 %v7379_v30  ;;  %v7380_v53 = vunpack.i.l.bf16 %v7379_v30 }
 0x880   :  { %v7386_v13 = vunpack.i.h.bf16 %v7384_v10  ;;  %v7385_v9 = vunpack.i.l.bf16 %v7384_v10 }
 0x881   :  { %v5286_v52 = vsel %vm3763_vm13, %v7361_v32, %v7380_v53  ;;  %v5287_v57 = vsel %vm3763_vm13, %v7380_v53, %v7381_v16  ;;  %v5641_v31 = vpop.f32.mrb[64].mxu0 }
 0x882   :  { %v5384_v14 = vmax.f32 %v12928_v39, %v7386_v13  ;;  %v5414_v56 = vmax.f32 %v12940_v35, %v5287_v57  ;;  %v5368_v40 = vmax.f32 %v12949_v11, %v7385_v9  ;;  %v5413_v2 = vmax.f32 %v12828_v54, %v5286_v52  ;;  %v7389_v48 = vpop.permute.xlu0 %7388  ;;  %v5643_v43 = vpop.f32.mrb[65].mxu0 }
 0x883   :  { %v6209_v19 = vpack.c.bf16 %v5641_v31, %v5641_v31  ;;  %v5644_v4 = vpop.f32.mrb[66].mxu0  ;;  %v5258_v32 = vsel %vm3763_vm13, %v7371_v44, %v7386_v13  ;;  %v5243_v35 = vsel %vm3763_vm13, %v7366_v59, %v7385_v9  ;;  %v7391_v37 = vunpack.i.h.bf16 %v7389_v48 }
 0x884   :  { %v5432_v38 = vpack.c.bf16 %v5384_v14, %v5368_v40  ;;  %v5446_v24 = vpack.c.bf16 %v5414_v56, %v5398_v26  ;;  %v5445_v58 = vpack.c.bf16 %v5413_v2, %v5397_v8  ;;  %v5646_v39 = vpop.f32.mrb[67].mxu0  ;;  %v7390_v11 = vunpack.i.l.bf16 %v7389_v48 }
 0x885   :  { %5799 = vst.msk [vmem:[%s13198_s7] sm:$0xf] %vm5798_vm0, %v6209_v19  ;;  %v6210_v54 = vpack.c.bf16 %v5644_v4, %v5644_v4  ;;  %v5367_v42 = vmax.f32 %v12872_v50, %v5243_v35  ;;  %v5383_v23 = vmax.f32 %v12892_v61, %v5258_v32  ;;  %v5416_v63 = vmax.f32 %v12960_v28, %v7391_v37 }
 0x886   :  { %6146 = vmatprep.mubr.msk.bf16.mxu0 %vm5552_vm2, %v5446_v24  ;;  %v5400_v36 = vmax.f32 %v12966_v46, %v7390_v11  ;;  %v5288_v7 = vsel %vm3763_vm13, %v7381_v16, %v7391_v37  ;;  %v5273_v17 = vsel %vm3763_vm13, %v7376_v21, %v7390_v11 }
 0x887   :  { %5744 = vmatmul.mubr.bf16.gmra.mrb[116].mxu0 %v5445_v58  ;;  %5800 = vst.msk [vmem:[%s13198_s7 + $0x4] sm:$0xf] %vm5798_vm0, %v6210_v54  ;;  %v5431_v0 = vpack.c.bf16 %v5383_v23, %v5367_v42  ;;  %v5399_v18 = vmax.f32 %v12924_v22, %v5273_v17  ;;  %v5415_v47 = vmax.f32 %v12944_v25, %v5288_v7 }
 0x888   :  { %6147 = vmatprep.mubr.msk.bf16.mxu0 %vm5552_vm2, %v5432_v38  ;;  %v5448_v62 = vpack.c.bf16 %v5416_v63, %v5400_v36 }
 0x889   :  { %v5447_v49 = vpack.c.bf16 %v5415_v47, %v5399_v18 }
 0x88f   :  { %5752 = vmatmul.mubr.bf16.gmra.mrb[120].mxu0 %v5431_v0 }
 0x890   :  { %6148 = vmatprep.mubr.msk.bf16.mxu0 %vm5552_vm2, %v5448_v62 }
 0x891   :  { %v5649_v50 = vpop.f32.mrb[68].mxu0 }
 0x892   :  { %v6211_v59 = vpack.c.bf16 %v5649_v50, %v5649_v50  ;;  %v5651_v61 = vpop.f32.mrb[69].mxu0 }
 0x893   :  { %v5652_v1 = vpop.f32.mrb[70].mxu0 }
 0x894   :  { %5801 = vst.msk [vmem:[%s13198_s7 + $0x8] sm:$0xf] %vm5798_vm0, %v6211_v59  ;;  %v6212_v28 = vpack.c.bf16 %v5652_v1, %v5652_v1  ;;  %v5654_v46 = vpop.f32.mrb[71].mxu0 }
 0x896   :  { %5802 = vst.msk [vmem:[%s13198_s7 + $0xc] sm:$0xf] %vm5798_vm0, %v6212_v28 }
 0x897   :  { %5760 = vmatmul.mubr.bf16.gmra.mrb[124].mxu0 %v5447_v49 }
 0x89b   :  { %v5657_v22 = vpop.f32.mrb[72].mxu0 }
 0x89c   :  { %v6213_v25 = vpack.c.bf16 %v5657_v22, %v5657_v22  ;;  %v5659_v20 = vpop.f32.mrb[73].mxu0 }
 0x89d   :  { %v5660_v34 = vpop.f32.mrb[74].mxu0 }
 0x89e   :  { %6157 = vst.msk [vmem:[%s13198_s7 + $0x10] sm:$0xf] %vm5798_vm0, %v6213_v25  ;;  %v6214_v44 = vpack.c.bf16 %v5660_v34, %v5660_v34  ;;  %v5662_v29 = vpop.f32.mrb[75].mxu0 }
 0x8a0   :  { %6158 = vst.msk [vmem:[%s13198_s7 + $0x14] sm:$0xf] %vm5798_vm0, %v6214_v44 }
 0x8b5   :  { %v5665_v45 = vpop.f32.mrb[76].mxu0 }
 0x8b6   :  { %v6215_v15 = vpack.c.bf16 %v5665_v45, %v5665_v45  ;;  %v5667_v3 = vpop.f32.mrb[77].mxu0 }
 0x8b7   :  { %v5668_v5 = vpop.f32.mrb[78].mxu0 }
 0x8b8   :  { %6159 = vst.msk [vmem:[%s13198_s7 + $0x18] sm:$0xf] %vm5798_vm0, %v6215_v15  ;;  %v6216_v6 = vpack.c.bf16 %v5668_v5, %v5668_v5  ;;  %v5670_v60 = vpop.f32.mrb[79].mxu0 }
 0x8ba   :  { %6160 = vst.msk [vmem:[%s13198_s7 + $0x1c] sm:$0xf] %vm5798_vm0, %v6216_v6 }
 0x8c0   :  { %v5673_v27 = vpop.f32.mrb[80].mxu0 }
 0x8c1   :  { %v6217_v21 = vpack.c.bf16 %v5673_v27, %v5673_v27  ;;  %v5675_v41 = vpop.f32.mrb[81].mxu0 }
 0x8c2   :  { %v5676_v33 = vpop.f32.mrb[82].mxu0 }
 0x8c3   :  { %6165 = vst.msk [vmem:[%s13198_s7 + $0x20] sm:$0xf] %vm5798_vm0, %v6217_v21  ;;  %v6218_v12 = vpack.c.bf16 %v5676_v33, %v5676_v33  ;;  %v5678_v55 = vpop.f32.mrb[83].mxu0 }
 0x8c5   :  { %6166 = vst.msk [vmem:[%s13198_s7 + $0x24] sm:$0xf] %vm5798_vm0, %v6218_v12 }
 0x8dc   :  { %v5681_v51 = vpop.f32.mrb[84].mxu0 }
 0x8dd   :  { %v6219_v30 = vpack.c.bf16 %v5681_v51, %v5681_v51  ;;  %v5683_v10 = vpop.f32.mrb[85].mxu0 }
 0x8de   :  { %v5684_v16 = vpop.f32.mrb[86].mxu0 }
 0x8df   :  { %6167 = vst.msk [vmem:[%s13198_s7 + $0x28] sm:$0xf] %vm5798_vm0, %v6219_v30  ;;  %v6220_v53 = vpack.c.bf16 %v5684_v16, %v5684_v16  ;;  %v5686_v13 = vpop.f32.mrb[87].mxu0 }
 0x8e1   :  { %6168 = vst.msk [vmem:[%s13198_s7 + $0x2c] sm:$0xf] %vm5798_vm0, %v6220_v53 }
 0x8e4   :  { %v5689_v9 = vpop.f32.mrb[88].mxu0 }
 0x8e5   :  { %v6221_v26 = vpack.c.bf16 %v5689_v9, %v5689_v9  ;;  %v5691_v52 = vpop.f32.mrb[89].mxu0 }
 0x8e6   :  { %v5692_v57 = vpop.f32.mrb[90].mxu0 }
 0x8e7   :  { %6173 = vst.msk [vmem:[%s13198_s7 + $0x30] sm:$0xf] %vm5798_vm0, %v6221_v26  ;;  %v6222_v14 = vpack.c.bf16 %v5692_v57, %v5692_v57  ;;  %v5694_v56 = vpop.f32.mrb[91].mxu0 }
 0x8e9   :  { %6174 = vst.msk [vmem:[%s13198_s7 + $0x34] sm:$0xf] %vm5798_vm0, %v6222_v14 }
 0x8f7   :  { %v5697_v40 = vpop.f32.mrb[92].mxu0 }
 0x8f8   :  { %v6223_v31 = vpack.c.bf16 %v5697_v40, %v5697_v40  ;;  %v5699_v8 = vpop.f32.mrb[93].mxu0 }
 0x8f9   :  { %v5700_v2 = vpop.f32.mrb[94].mxu0 }
 0x8fa   :  { %6175 = vst.msk [vmem:[%s13198_s7 + $0x38] sm:$0xf] %vm5798_vm0, %v6223_v31  ;;  %v6224_v48 = vpack.c.bf16 %v5700_v2, %v5700_v2  ;;  %v5702_v19 = vpop.f32.mrb[95].mxu0 }
 0x8fc   :  { %6176 = vst.msk [vmem:[%s13198_s7 + $0x3c] sm:$0xf] %vm5798_vm0, %v6224_v48 }
 0x908   :  { %v5705_v43 = vpop.f32.mrb[96].mxu0 }
 0x909   :  { %v6225_v38 = vpack.c.bf16 %v5705_v43, %v5705_v43  ;;  %v5707_v4 = vpop.f32.mrb[97].mxu0 }
 0x90a   :  { %v5708_v24 = vpop.f32.mrb[98].mxu0 }
 0x90b   :  { %6181 = vst.msk [vmem:[%s13198_s7 + $0x40] sm:$0xf] %vm5798_vm0, %v6225_v38  ;;  %v6226_v58 = vpack.c.bf16 %v5708_v24, %v5708_v24  ;;  %v5710_v32 = vpop.f32.mrb[99].mxu0 }
 0x90d   :  { %6182 = vst.msk [vmem:[%s13198_s7 + $0x44] sm:$0xf] %vm5798_vm0, %v6226_v58 }
 0x910   :  { %v5713_v39 = vpop.f32.mrb[100].mxu0 }
 0x911   :  { %v6227_v35 = vpack.c.bf16 %v5713_v39, %v5713_v39  ;;  %v5715_v37 = vpop.f32.mrb[101].mxu0 }
 0x912   :  { %v5716_v11 = vpop.f32.mrb[102].mxu0 }
 0x913   :  { %6183 = vst.msk [vmem:[%s13198_s7 + $0x48] sm:$0xf] %vm5798_vm0, %v6227_v35  ;;  %v6228_v54 = vpack.c.bf16 %v5716_v11, %v5716_v11  ;;  %v5718_v42 = vpop.f32.mrb[103].mxu0 }
 0x915   :  { %6184 = vst.msk [vmem:[%s13198_s7 + $0x4c] sm:$0xf] %vm5798_vm0, %v6228_v54 }
 0x92b   :  { %v5721_v23 = vpop.f32.mrb[104].mxu0 }
 0x92c   :  { %v6229_v63 = vpack.c.bf16 %v5721_v23, %v5721_v23  ;;  %v5723_v36 = vpop.f32.mrb[105].mxu0 }
 0x92d   :  { %v5724_v0 = vpop.f32.mrb[106].mxu0 }
 0x92e   :  { %6189 = vst.msk [vmem:[%s13198_s7 + $0x50] sm:$0xf] %vm5798_vm0, %v6229_v63  ;;  %v6230_v7 = vpack.c.bf16 %v5724_v0, %v5724_v0  ;;  %v5726_v17 = vpop.f32.mrb[107].mxu0 }
 0x930   :  { %6190 = vst.msk [vmem:[%s13198_s7 + $0x54] sm:$0xf] %vm5798_vm0, %v6230_v7 }
 0x934   :  { %v5729_v62 = vpop.f32.mrb[108].mxu0 }
 0x935   :  { %v6231_v18 = vpack.c.bf16 %v5729_v62, %v5729_v62  ;;  %v5731_v47 = vpop.f32.mrb[109].mxu0 }
 0x936   :  { %v5732_v50 = vpop.f32.mrb[110].mxu0 }
 0x937   :  { %6191 = vst.msk [vmem:[%s13198_s7 + $0x58] sm:$0xf] %vm5798_vm0, %v6231_v18  ;;  %v6232_v59 = vpack.c.bf16 %v5732_v50, %v5732_v50  ;;  %v5734_v61 = vpop.f32.mrb[111].mxu0 }
 0x939   :  { %6192 = vst.msk [vmem:[%s13198_s7 + $0x5c] sm:$0xf] %vm5798_vm0, %v6232_v59 }
 0x950   :  { %v5737_v1 = vpop.f32.mrb[112].mxu0 }
 0x951   :  { %v6233_v28 = vpack.c.bf16 %v5737_v1, %v5737_v1  ;;  %v5739_v46 = vpop.f32.mrb[113].mxu0 }
 0x952   :  { %v5740_v49 = vpop.f32.mrb[114].mxu0 }
 0x953   :  { %6197 = vst.msk [vmem:[%s13198_s7 + $0x60] sm:$0xf] %vm5798_vm0, %v6233_v28  ;;  %v6234_v22 = vpack.c.bf16 %v5740_v49, %v5740_v49  ;;  %v5742_v25 = vpop.f32.mrb[115].mxu0 }
 0x955   :  { %6198 = vst.msk [vmem:[%s13198_s7 + $0x64] sm:$0xf] %vm5798_vm0, %v6234_v22 }
 0x95a   :  { %v5745_v20 = vpop.f32.mrb[116].mxu0 }
 0x95b   :  { %v6235_v34 = vpack.c.bf16 %v5745_v20, %v5745_v20  ;;  %v5747_v44 = vpop.f32.mrb[117].mxu0 }
 0x95c   :  { %v5748_v29 = vpop.f32.mrb[118].mxu0 }
 0x95d   :  { %6199 = vst.msk [vmem:[%s13198_s7 + $0x68] sm:$0xf] %vm5798_vm0, %v6235_v34  ;;  %v6236_v45 = vpack.c.bf16 %v5748_v29, %v5748_v29  ;;  %v5750_v15 = vpop.f32.mrb[119].mxu0 }
 0x95f   :  { %6200 = vst.msk [vmem:[%s13198_s7 + $0x6c] sm:$0xf] %vm5798_vm0, %v6236_v45 }
 0x962   :  { %v5753_v3 = vpop.f32.mrb[120].mxu0 }
 0x963   :  { %v6237_v5 = vpack.c.bf16 %v5753_v3, %v5753_v3  ;;  %v5755_v6 = vpop.f32.mrb[121].mxu0 }
 0x964   :  { %v5756_v60 = vpop.f32.mrb[122].mxu0 }
 0x965   :  { %6205 = vst.msk [vmem:[%s13198_s7 + $0x70] sm:$0xf] %vm5798_vm0, %v6237_v5  ;;  %v6238_v27 = vpack.c.bf16 %v5756_v60, %v5756_v60  ;;  %v5758_v21 = vpop.f32.mrb[123].mxu0 }
 0x967   :  { %6206 = vst.msk [vmem:[%s13198_s7 + $0x74] sm:$0xf] %vm5798_vm0, %v6238_v27 }
 0x96a   :  { %v5761_v41 = vpop.f32.mrb[124].mxu0 }
 0x96b   :  { %v6239_v33 = vpack.c.bf16 %v5761_v41, %v5761_v41  ;;  %v5763_v12 = vpop.f32.mrb[125].mxu0 }
 0x96c   :  { %v5764_v55 = vpop.f32.mrb[126].mxu0 }
 0x96d   :  { %6207 = vst.msk [vmem:[%s13198_s7 + $0x78] sm:$0xf] %vm5798_vm0, %v6239_v33  ;;  %v6240_v51 = vpack.c.bf16 %v5764_v55, %v5764_v55  ;;  %v5766_v30 = vpop.f32.mrb[127].mxu0 }
 0x96f   :  { %6208 = vst.msk [vmem:[%s13198_s7 + $0x7c] sm:$0xf] %vm5798_vm0, %v6240_v51 }

</bundles_post_ra>
